<compile_context>
chip_gen: v7x
topology: tpu7x:2x2x1
jax: 0.10.0
libtpu: 0.0.40
codegen_flags: <defaults>
</compile_context>

<pallas_src>
import jax
import jax.numpy as jnp
from jax.experimental import pallas as pl
from jax.experimental.pallas import tpu as pltpu

# Logical layer dims (torch): 1000 -> 2000 -> 1000 -> 500
D_IN, D_H1, D_H2, D_OUT = 1000, 2000, 1000, 500


def _round_up(v, m):
    return ((v + m - 1) // m) * m


# Lane-aligned (multiple-of-128) padded feature dims.
D_IN_P = _round_up(D_IN, 128)    # 1024
D_H1_P = _round_up(D_H1, 128)    # 2048
D_H2_P = _round_up(D_H2, 128)    # 1024
D_OUT_P = _round_up(D_OUT, 128)  # 512


def _toy_mlp_kernel(x_ref, w1_ref, s1_ref, b1_ref,        # auto-pipelined (VMEM)
                    w2_hbm, s2_ref, b2_ref,                # w2 stays in HBM (pl.ANY)
                    w3_hbm, b3_ref,                        # w3 stays in HBM (pl.ANY)
                    o_ref,
                    w2_vm, w3_vm, dma_sems):               # scratch
    first = pl.program_id(0) == 0

    w2_cp = pltpu.make_async_copy(w2_hbm, w2_vm, dma_sems.at[0])
    w3_cp = pltpu.make_async_copy(w3_hbm, w3_vm, dma_sems.at[1])

    # Kick off W2/W3 HBM->VMEM DMA before any compute so their transfer time hides
    # under layer-1 dequant + MXU work.  Scratch persists across grid steps, so the
    # copies are only issued/waited on the first M tile.
    @pl.when(first)
    def _():
        w2_cp.start()
        w3_cp.start()

    # ---- Layer 1: Linear(1000, 2000) + ReLU ----
    # int8 -> bf16 cast is exact; the per-output-column scale is applied to the small
    # (TM, 2048) activation after the matmul instead of to the 1024x2048 weight.
    h = jnp.dot(x_ref[...], w1_ref[...].astype(jnp.bfloat16),
                preferred_element_type=jnp.float32)
    h = jnp.maximum(h * s1_ref[...] + b1_ref[...], 0.0).astype(jnp.bfloat16)

    @pl.when(first)
    def _():
        w2_cp.wait()

    # ---- Layer 2: Linear(2000, 1000) + ReLU ----
    h = jnp.dot(h, w2_vm[...].astype(jnp.bfloat16),
                preferred_element_type=jnp.float32)
    h = jnp.maximum(h * s2_ref[...] + b2_ref[...], 0.0).astype(jnp.bfloat16)

    @pl.when(first)
    def _():
        w3_cp.wait()

    # ---- Layer 3: Linear(1000, 500), no activation ----
    y = jnp.dot(h, w3_vm[...], preferred_element_type=jnp.float32) + b3_ref[...]
    o_ref[...] = y.astype(o_ref.dtype)


def _quantize_int8_per_col(w):
    """Symmetric per-output-column int8 quantization of a (K, N) f32 matrix."""
    amax = jnp.max(jnp.abs(w), axis=0, keepdims=True)          # (1, N)
    scale = jnp.maximum(amax, 1e-8) / 127.0
    w_i8 = jnp.clip(jnp.round(w / scale), -127, 127).astype(jnp.int8)
    return w_i8, scale.astype(jnp.float32)


def init_toy_model_params(key):
    """Deterministic init mirroring nn.Linear defaults (uniform +/- 1/sqrt(fan_in)).

    Layers 1 & 2: (in,out)-layout weights, zero-padded to lane-aligned shapes,
    quantized to int8 with per-output-column f32 scales.  Layer 3: bf16 weights.
    Biases are f32, shape (1, N_pad).
    """
    dims = [(D_IN, D_H1, D_IN_P, D_H1_P),
            (D_H1, D_H2, D_H1_P, D_H2_P),
            (D_H2, D_OUT, D_H2_P, D_OUT_P)]
    layers = []
    for i, (fan_in, fan_out, fan_in_p, fan_out_p) in enumerate(dims):
        kw, kb = jax.random.split(jax.random.fold_in(key, i))
        bound = 1.0 / (fan_in ** 0.5)
        w = jax.random.uniform(kw, (fan_in, fan_out), jnp.float32, -bound, bound)
        b = jax.random.uniform(kb, (fan_out,), jnp.float32, -bound, bound)
        w_p = jnp.pad(w, ((0, fan_in_p - fan_in), (0, fan_out_p - fan_out)))
        b_p = jnp.pad(b, (0, fan_out_p - fan_out)).reshape(1, fan_out_p)
        if i < 2:
            w_i8, s = _quantize_int8_per_col(w_p)
            layers.append((w_i8, s, b_p))
        else:
            layers.append((w_p.astype(jnp.bfloat16), b_p))
    return tuple(layers)


@jax.jit
def toy_model_forward(x, params):
    (w1, s1, b1), (w2, s2, b2), (w3, b3) = params
    M, K = x.shape
    # M tile: up to 256 rows per grid step (weights are revisited, not re-fetched,
    # across M tiles, so larger batches amortize the weight stream).
    TM = min(256, _round_up(M, 8))
    M_pad = _round_up(M, TM)
    x_p = jnp.pad(x, ((0, M_pad - M), (0, D_IN_P - K))).astype(jnp.bfloat16)

    out = pl.pallas_call(
        _toy_mlp_kernel,
        out_shape=jax.ShapeDtypeStruct((M_pad, D_OUT_P), jnp.float32),
        grid=(M_pad // TM,),
        in_specs=[
            pl.BlockSpec((TM, D_IN_P), lambda i: (i, 0)),        # x (tiled over M)
            pl.BlockSpec((D_IN_P, D_H1_P), lambda i: (0, 0)),    # W1 int8 (resident)
            pl.BlockSpec((1, D_H1_P), lambda i: (0, 0)),         # s1
            pl.BlockSpec((1, D_H1_P), lambda i: (0, 0)),         # b1
            pl.BlockSpec(memory_space=pl.ANY),                   # W2 int8 (manual DMA)
            pl.BlockSpec((1, D_H2_P), lambda i: (0, 0)),         # s2
            pl.BlockSpec((1, D_H2_P), lambda i: (0, 0)),         # b2
            pl.BlockSpec(memory_space=pl.ANY),                   # W3 bf16 (manual DMA)
            pl.BlockSpec((1, D_OUT_P), lambda i: (0, 0)),        # b3
        ],
        out_specs=pl.BlockSpec((TM, D_OUT_P), lambda i: (i, 0)),
        scratch_shapes=[
            pltpu.VMEM((D_H1_P, D_H2_P), jnp.int8),              # W2 landing buffer
            pltpu.VMEM((D_H2_P, D_OUT_P), jnp.bfloat16),         # W3 landing buffer
            pltpu.SemaphoreType.DMA((2,)),
        ],
        compiler_params=pltpu.CompilerParams(
            # "arbitrary": the W2/W3 DMAs are issued/waited only on program_id==0,
            # which requires sequential grid execution on a single core.
            dimension_semantics=("arbitrary",),
            vmem_limit_bytes=40 * 1024 * 1024,
        ),
    )(x_p, w1, s1, b1, w2, s2, b2, w3, b3)

    return out[:M, :D_OUT]


if __name__ == "__main__":
    key = jax.random.PRNGKey(0)
    k_x, k_p = jax.random.split(key)

    batch = 8
    x = jax.random.normal(k_x, (batch, D_IN), dtype=jnp.float32)
    params = init_toy_model_params(k_p)

    y = toy_model_forward(x, params)
    jax.block_until_ready(y)

    # Reference on the same precision path (int8/bf16 weights, bf16 matmul inputs,
    # f32 accumulation) using the stored padded parameters.  Self-consistent check;
    # not a torch-float32 bit-parity check (quantization is intentional).
    (w1, s1, b1), (w2, s2, b2), (w3, b3) = params
    xb = jnp.pad(x, ((0, 0), (0, D_IN_P - D_IN))).astype(jnp.bfloat16)
    h = jnp.dot(xb, w1.astype(jnp.bfloat16), preferred_element_type=jnp.float32)
    h = jnp.maximum(h * s1 + b1, 0.0).astype(jnp.bfloat16)
    h = jnp.dot(h, w2.astype(jnp.bfloat16), preferred_element_type=jnp.float32)
    h = jnp.maximum(h * s2 + b2, 0.0).astype(jnp.bfloat16)
    ref = jnp.dot(h, w3, preferred_element_type=jnp.float32) + b3
    ref = ref[:, :D_OUT]

    assert y.shape == (batch, D_OUT)
    err = float(jnp.max(jnp.abs(y - ref)))
    assert jnp.allclose(y, ref, atol=2e-2, rtol=2e-2), err

    print("KERNEL_OK")
</pallas_src>

<mosaic_0001>
module attributes {stable_mosaic.version = 11 : i64} {
  func.func @_toy_mlp_kernel(%arg0: i32, %arg1: memref<8x1024xbf16, #tpu.memory_space<vmem>>, %arg2: memref<1024x2048xi8, #tpu.memory_space<vmem>>, %arg3: memref<1x2048xf32, #tpu.memory_space<vmem>>, %arg4: memref<1x2048xf32, #tpu.memory_space<vmem>>, %arg5: memref<2048x1024xi8, #tpu.memory_space<any>>, %arg6: memref<1x1024xf32, #tpu.memory_space<vmem>>, %arg7: memref<1x1024xf32, #tpu.memory_space<vmem>>, %arg8: memref<1024x512xbf16, #tpu.memory_space<any>>, %arg9: memref<1x512xf32, #tpu.memory_space<vmem>>, %arg10: memref<8x512xf32, #tpu.memory_space<vmem>>, %arg11: memref<2048x1024xi8, #tpu.memory_space<vmem>>, %arg12: memref<1024x512xbf16, #tpu.memory_space<vmem>>, %arg13: memref<2x!tpu.dma_semaphore, #tpu.memory_space<semaphore_mem>>) attributes {dimension_semantics = [#tpu.dimension_semantics<arbitrary>], iteration_bounds = array<i64: 1>, scalar_prefetch = 0 : i64, scratch_operands = 3 : i64, tpu.core_type = #tpu.core_type<tc>, window_params = [{transform_indices = @transform_0, window_bounds = array<i64: 8, 1024>}, {pipeline_mode = #tpu.pipeline_mode<synchronous>, transform_indices = @transform_1, window_bounds = array<i64: 1024, 2048>}, {pipeline_mode = #tpu.pipeline_mode<synchronous>, transform_indices = @transform_2, window_bounds = array<i64: 1, 2048>}, {pipeline_mode = #tpu.pipeline_mode<synchronous>, transform_indices = @transform_3, window_bounds = array<i64: 1, 2048>}, {}, {pipeline_mode = #tpu.pipeline_mode<synchronous>, transform_indices = @transform_5, window_bounds = array<i64: 1, 1024>}, {pipeline_mode = #tpu.pipeline_mode<synchronous>, transform_indices = @transform_6, window_bounds = array<i64: 1, 1024>}, {}, {pipeline_mode = #tpu.pipeline_mode<synchronous>, transform_indices = @transform_8, window_bounds = array<i64: 1, 512>}, {transform_indices = @transform_9, window_bounds = array<i64: 8, 512>}]} {
    %c0_i32 = arith.constant 0 : i32
    %0 = arith.cmpi eq, %arg0, %c0_i32 : i32
    %1 = arith.extui %0 : i1 to i32
    %c0_i32_0 = arith.constant 0 : i32
    %c1_i32 = arith.constant 1 : i32
    %c0_i32_1 = arith.constant 0 : i32
    %2 = arith.cmpi ne, %1, %c0_i32_1 : i32
    scf.if %2 {
      %38 = tpu.memref_slice %arg13[%c0_i32_0] : memref<2x!tpu.dma_semaphore, #tpu.memory_space<semaphore_mem>> -> memref<1x!tpu.dma_semaphore, #tpu.memory_space<semaphore_mem>>
      %39 = tpu.memref_squeeze %38 : memref<1x!tpu.dma_semaphore, #tpu.memory_space<semaphore_mem>> -> memref<!tpu.dma_semaphore, #tpu.memory_space<semaphore_mem>>
      tpu.enqueue_dma source(%arg5 : memref<2048x1024xi8, #tpu.memory_space<any>>) target(%arg11 : memref<2048x1024xi8, #tpu.memory_space<vmem>>) target_semaphore(%39 : memref<!tpu.dma_semaphore, #tpu.memory_space<semaphore_mem>>)
      %40 = tpu.memref_slice %arg13[%c1_i32] : memref<2x!tpu.dma_semaphore, #tpu.memory_space<semaphore_mem>> -> memref<1x!tpu.dma_semaphore, #tpu.memory_space<semaphore_mem>>
      %41 = tpu.memref_squeeze %40 : memref<1x!tpu.dma_semaphore, #tpu.memory_space<semaphore_mem>> -> memref<!tpu.dma_semaphore, #tpu.memory_space<semaphore_mem>>
      tpu.enqueue_dma source(%arg8 : memref<1024x512xbf16, #tpu.memory_space<any>>) target(%arg12 : memref<1024x512xbf16, #tpu.memory_space<vmem>>) target_semaphore(%41 : memref<!tpu.dma_semaphore, #tpu.memory_space<semaphore_mem>>)
    } else {
    }
    %c0 = arith.constant 0 : index
    %c0_2 = arith.constant 0 : index
    %3 = vector.load %arg1[%c0, %c0_2] : memref<8x1024xbf16, #tpu.memory_space<vmem>>, vector<8x1024xbf16>
    %c0_3 = arith.constant 0 : index
    %c0_4 = arith.constant 0 : index
    %4 = vector.load %arg2[%c0_3, %c0_4] : memref<1024x2048xi8, #tpu.memory_space<vmem>>, vector<1024x2048xi8>
    %5 = arith.sitofp %4 : vector<1024x2048xi8> to vector<1024x2048xbf16>
    %cst = arith.constant dense<0.000000e+00> : vector<8x2048xf32>
    %6 = tpu.matmul %3, %5, %cst {dimension_numbers = #tpu.dot_dimension_numbers<[1], [0], [0], [1], [0, 0, 1, 1], [], []>} : vector<8x1024xbf16>, vector<1024x2048xbf16>, vector<8x2048xf32> -> vector<8x2048xf32>
    %c0_5 = arith.constant 0 : index
    %c0_6 = arith.constant 0 : index
    %7 = vector.load %arg3[%c0_5, %c0_6] : memref<1x2048xf32, #tpu.memory_space<vmem>>, vector<1x2048xf32>
    %8 = vector.broadcast %7 : vector<1x2048xf32> to vector<8x2048xf32>
    %9 = arith.mulf %6, %8 : vector<8x2048xf32>
    %c0_7 = arith.constant 0 : index
    %c0_8 = arith.constant 0 : index
    %10 = vector.load %arg4[%c0_7, %c0_8] : memref<1x2048xf32, #tpu.memory_space<vmem>>, vector<1x2048xf32>
    %11 = vector.broadcast %10 : vector<1x2048xf32> to vector<8x2048xf32>
    %12 = arith.addf %9, %11 : vector<8x2048xf32>
    %cst_9 = arith.constant 0.000000e+00 : f32
    %13 = vector.broadcast %cst_9 : f32 to vector<8x2048xf32>
    %14 = arith.maximumf %12, %13 : vector<8x2048xf32>
    %15 = arith.truncf %14 : vector<8x2048xf32> to vector<8x2048xbf16>
    %16 = arith.extui %0 : i1 to i32
    %c0_i32_10 = arith.constant 0 : i32
    %c0_i32_11 = arith.constant 0 : i32
    %17 = arith.cmpi ne, %16, %c0_i32_11 : i32
    scf.if %17 {
      %38 = tpu.memref_slice %arg13[%c0_i32_10] : memref<2x!tpu.dma_semaphore, #tpu.memory_space<semaphore_mem>> -> memref<1x!tpu.dma_semaphore, #tpu.memory_space<semaphore_mem>>
      %39 = tpu.memref_squeeze %38 : memref<1x!tpu.dma_semaphore, #tpu.memory_space<semaphore_mem>> -> memref<!tpu.dma_semaphore, #tpu.memory_space<semaphore_mem>>
      tpu.wait_dma2 semaphore(%39 : memref<!tpu.dma_semaphore, #tpu.memory_space<semaphore_mem>>) src(%arg5 : memref<2048x1024xi8, #tpu.memory_space<any>>) dst(%arg11 : memref<2048x1024xi8, #tpu.memory_space<vmem>>)
    } else {
    }
    %c0_12 = arith.constant 0 : index
    %c0_13 = arith.constant 0 : index
    %18 = vector.load %arg11[%c0_12, %c0_13] : memref<2048x1024xi8, #tpu.memory_space<vmem>>, vector<2048x1024xi8>
    %19 = arith.sitofp %18 : vector<2048x1024xi8> to vector<2048x1024xbf16>
    %cst_14 = arith.constant dense<0.000000e+00> : vector<8x1024xf32>
    %20 = tpu.matmul %15, %19, %cst_14 {dimension_numbers = #tpu.dot_dimension_numbers<[1], [0], [0], [1], [0, 0, 1, 1], [], []>} : vector<8x2048xbf16>, vector<2048x1024xbf16>, vector<8x1024xf32> -> vector<8x1024xf32>
    %c0_15 = arith.constant 0 : index
    %c0_16 = arith.constant 0 : index
    %21 = vector.load %arg6[%c0_15, %c0_16] : memref<1x1024xf32, #tpu.memory_space<vmem>>, vector<1x1024xf32>
    %22 = vector.broadcast %21 : vector<1x1024xf32> to vector<8x1024xf32>
    %23 = arith.mulf %20, %22 : vector<8x1024xf32>
    %c0_17 = arith.constant 0 : index
    %c0_18 = arith.constant 0 : index
    %24 = vector.load %arg7[%c0_17, %c0_18] : memref<1x1024xf32, #tpu.memory_space<vmem>>, vector<1x1024xf32>
    %25 = vector.broadcast %24 : vector<1x1024xf32> to vector<8x1024xf32>
    %26 = arith.addf %23, %25 : vector<8x1024xf32>
    %cst_19 = arith.constant 0.000000e+00 : f32
    %27 = vector.broadcast %cst_19 : f32 to vector<8x1024xf32>
    %28 = arith.maximumf %26, %27 : vector<8x1024xf32>
    %29 = arith.truncf %28 : vector<8x1024xf32> to vector<8x1024xbf16>
    %30 = arith.extui %0 : i1 to i32
    %c1_i32_20 = arith.constant 1 : i32
    %c0_i32_21 = arith.constant 0 : i32
    %31 = arith.cmpi ne, %30, %c0_i32_21 : i32
    scf.if %31 {
      %38 = tpu.memref_slice %arg13[%c1_i32_20] : memref<2x!tpu.dma_semaphore, #tpu.memory_space<semaphore_mem>> -> memref<1x!tpu.dma_semaphore, #tpu.memory_space<semaphore_mem>>
      %39 = tpu.memref_squeeze %38 : memref<1x!tpu.dma_semaphore, #tpu.memory_space<semaphore_mem>> -> memref<!tpu.dma_semaphore, #tpu.memory_space<semaphore_mem>>
      tpu.wait_dma2 semaphore(%39 : memref<!tpu.dma_semaphore, #tpu.memory_space<semaphore_mem>>) src(%arg8 : memref<1024x512xbf16, #tpu.memory_space<any>>) dst(%arg12 : memref<1024x512xbf16, #tpu.memory_space<vmem>>)
    } else {
    }
    %c0_22 = arith.constant 0 : index
    %c0_23 = arith.constant 0 : index
    %32 = vector.load %arg12[%c0_22, %c0_23] : memref<1024x512xbf16, #tpu.memory_space<vmem>>, vector<1024x512xbf16>
    %cst_24 = arith.constant dense<0.000000e+00> : vector<8x512xf32>
    %33 = tpu.matmul %29, %32, %cst_24 {dimension_numbers = #tpu.dot_dimension_numbers<[1], [0], [0], [1], [0, 0, 1, 1], [], []>} : vector<8x1024xbf16>, vector<1024x512xbf16>, vector<8x512xf32> -> vector<8x512xf32>
    %c0_25 = arith.constant 0 : index
    %c0_26 = arith.constant 0 : index
    %34 = vector.load %arg9[%c0_25, %c0_26] : memref<1x512xf32, #tpu.memory_space<vmem>>, vector<1x512xf32>
    %35 = vector.broadcast %34 : vector<1x512xf32> to vector<8x512xf32>
    %36 = arith.addf %33, %35 : vector<8x512xf32>
    %c0_27 = arith.constant 0 : index
    %c0_28 = arith.constant 0 : index
    %37 = vector.load %arg10[%c0_27, %c0_28] : memref<8x512xf32, #tpu.memory_space<vmem>>, vector<8x512xf32>
    tpu.vector_store %arg10[%c0_27, %c0_28], %36 {strides = array<i32>} : memref<8x512xf32, #tpu.memory_space<vmem>>, vector<8x512xf32>,
    return
  }
  func.func @transform_0(%arg0: i32) -> (i32, i32) {
    %c0_i32 = arith.constant 0 : i32
    %c0_i32_0 = arith.constant 0 : i32
    return %arg0, %c0_i32 : i32, i32
  }
  func.func @transform_1(%arg0: i32) -> (i32, i32) {
    %c0_i32 = arith.constant 0 : i32
    %c0_i32_0 = arith.constant 0 : i32
    %c0_i32_1 = arith.constant 0 : i32
    return %c0_i32, %c0_i32_0 : i32, i32
  }
  func.func @transform_2(%arg0: i32) -> (i32, i32) {
    %c0_i32 = arith.constant 0 : i32
    %c0_i32_0 = arith.constant 0 : i32
    %c0_i32_1 = arith.constant 0 : i32
    return %c0_i32, %c0_i32_0 : i32, i32
  }
  func.func @transform_3(%arg0: i32) -> (i32, i32) {
    %c0_i32 = arith.constant 0 : i32
    %c0_i32_0 = arith.constant 0 : i32
    %c0_i32_1 = arith.constant 0 : i32
    return %c0_i32, %c0_i32_0 : i32, i32
  }
  func.func @transform_5(%arg0: i32) -> (i32, i32) {
    %c0_i32 = arith.constant 0 : i32
    %c0_i32_0 = arith.constant 0 : i32
    %c0_i32_1 = arith.constant 0 : i32
    return %c0_i32, %c0_i32_0 : i32, i32
  }
  func.func @transform_6(%arg0: i32) -> (i32, i32) {
    %c0_i32 = arith.constant 0 : i32
    %c0_i32_0 = arith.constant 0 : i32
    %c0_i32_1 = arith.constant 0 : i32
    return %c0_i32, %c0_i32_0 : i32, i32
  }
  func.func @transform_8(%arg0: i32) -> (i32, i32) {
    %c0_i32 = arith.constant 0 : i32
    %c0_i32_0 = arith.constant 0 : i32
    %c0_i32_1 = arith.constant 0 : i32
    return %c0_i32, %c0_i32_0 : i32, i32
  }
  func.func @transform_9(%arg0: i32) -> (i32, i32) {
    %c0_i32 = arith.constant 0 : i32
    %c0_i32_0 = arith.constant 0 : i32
    return %arg0, %c0_i32 : i32, i32
  }
}

</mosaic_0001>

<bundles_post_ra>
// kernel: toy_model_forward.1
= control target key start
LH: loop header
LB: loop body
LE: loop exit
PB: predicated region body
PF: predicated region fallthrough
CT: control target
= control target key end

     0   :  { %14 = vsyncpa [#allocation6], 0  ;;  %s7866_s0 = inlined_call_operand.vmem [shape: bf16[8,1024], index: 0, kind: input, shape index: {}]   ;;  %s7867_s1 = inlined_call_operand.hbm [shape: s8[1024,2048], index: 1, kind: input, shape index: {}]   ;;  %s7868_s2 = inlined_call_operand.hbm [shape: f32[1,2048], index: 2, kind: input, shape index: {}]   ;;  %s7869_s3 = inlined_call_operand.hbm [shape: f32[1,2048], index: 3, kind: input, shape index: {}]   ;;  %s7870_s4 = inlined_call_operand.hbm [shape: s8[2048,1024], index: 4, kind: input, shape index: {}]   ;;  %s7871_s5 = inlined_call_operand.hbm [shape: f32[1,1024], index: 5, kind: input, shape index: {}]   ;;  %s7872_s6 = inlined_call_operand.hbm [shape: f32[1,1024], index: 6, kind: input, shape index: {}]   ;;  %s7873_s7 = inlined_call_operand.hbm [shape: bf16[1024,512], index: 7, kind: input, shape index: {}]   ;;  %s7874_s8 = inlined_call_operand.hbm [shape: f32[1,512], index: 8, kind: input, shape index: {}]   ;;  %s7875_s9 = inlined_call_operand.hbm [shape: f32[8,512], index: 9, kind: output, shape index: {}]  }
   0x1   :  { %15 = vsyncpa [#allocation9], 0 }
   0x2   :  { %16 = vsyncpa [#allocation12], 0 }
   0x3   :  { %17 = vsyncpa [#allocation15], 0 }
   0x4   :  { %18 = vsyncpa [#allocation7], 0  ;;  %s7353_s30 = smov [#allocation8]   ;;  %s7354_s11 = smov [#allocation11]  }
   0x5   :  { %s39_s10 = sshll.u32 %s7353_s30, 4  ;;  %s59_s12 = sshll.u32 %s7354_s11, 4  ;;  %s40_s10 = int_to_ptr.vmem [resolvable:$true] %s39_s10  ;;  %s60_s12 = int_to_ptr.vmem [resolvable:$true] %s59_s12 }
   0x6   :  { %s7163_s15 = scalar_lea.hbm %s7868_s2, 256 }
   0x7   :  { %p7164_p0 = scmp.ne.s32.totalorder %s7868_s2, %s7163_s15  ;;  %p7167_p1 = scmp.lt.u32.totalorder %s7163_s15, %s7868_s2 }
   0x9   :  { %p7169_p2 = pnand %p7167_p1, %p7164_p0 }
   0xb   :  { %7172 = shalt.err (!%p7169_p2)
}
   0xc   :  { %s7173_s20 = scalar_lea.vmem %s40_s10, 256  ;;  %p7178_p4 = scmp.lt.s32.totalorder %s40_s10, %s40_s10 }
   0xd   :  { %p7174_p3 = scmp.ne.s32.totalorder %s40_s10, %s7173_s20  ;;  %p7179_p5 = scmp.lt.s32.totalorder %s7173_s20, %s7173_s20 }
   0xf   :  { %p7180_p6 = por %p7179_p5, %p7178_p4 }
  0x11   :  { %p7181_p7 = pnand %p7180_p6, %p7174_p3 }
  0x13   :  { %7184 = shalt.err (!%p7181_p7)
}
  0x14   :  { %42 = dma.hbm_to_vmem [thread:$0]  %s7868_s2, 256, %s40_s10, [#allocation9]  }
  0x15   :  { %s7185_s25 = scalar_lea.hbm %s7871_s5, 128 }
  0x16   :  { %p7186_p8 = scmp.ne.s32.totalorder %s7871_s5, %s7185_s25  ;;  %p7189_p9 = scmp.lt.u32.totalorder %s7185_s25, %s7871_s5 }
  0x18   :  { %p7191_p10 = pnand %p7189_p9, %p7186_p8 }
  0x1a   :  { %7194 = shalt.err (!%p7191_p10)
}
  0x1b   :  { %s7195_s30 = scalar_lea.vmem %s60_s12, 128  ;;  %p7200_p12 = scmp.lt.s32.totalorder %s60_s12, %s60_s12 }
  0x1c   :  { %p7196_p11 = scmp.ne.s32.totalorder %s60_s12, %s7195_s30  ;;  %p7201_p13 = scmp.lt.s32.totalorder %s7195_s30, %s7195_s30 }
  0x1e   :  { %p7202_p0 = por %p7201_p13, %p7200_p12 }
  0x20   :  { %p7203_p1 = pnand %p7202_p0, %p7196_p11 }
  0x22   :  { %7206 = shalt.err (!%p7203_p1)
}
  0x23   :  { %62 = dma.hbm_to_vmem [thread:$0]  %s7871_s5, 128, %s60_s12, [#allocation12]  }
  0x24   :  { %s7355_s11 = smov [#allocation5]   ;;  %s7207_s16 = scalar_lea.hbm %s7867_s1, 65536 }
  0x25   :  { %s26_s13 = sshll.u32 %s7355_s11, 4  ;;  %p7208_p2 = scmp.ne.s32.totalorder %s7867_s1, %s7207_s16  ;;  %s27_s13 = int_to_ptr.vmem [resolvable:$true] %s26_s13 }
  0x26   :  { %p7211_p3 = scmp.lt.u32.totalorder %s7207_s16, %s7867_s1 }
  0x28   :  { %p7213_p4 = pnand %p7211_p3, %p7208_p2 }
  0x2a   :  { %7216 = shalt.err (!%p7213_p4)
}
  0x2b   :  { %s7217_s21 = scalar_lea.vmem %s27_s13, 65536  ;;  %p7222_p6 = scmp.lt.s32.totalorder %s27_s13, %s27_s13 }
  0x2c   :  { %p7218_p5 = scmp.ne.s32.totalorder %s27_s13, %s7217_s21  ;;  %p7223_p7 = scmp.lt.s32.totalorder %s7217_s21, %s7217_s21 }
  0x2e   :  { %p7224_p8 = por %p7223_p7, %p7222_p6 }
  0x30   :  { %p7225_p9 = pnand %p7224_p8, %p7218_p5 }
  0x32   :  { %7228 = shalt.err (!%p7225_p9)
}
  0x33   :  { %s7356_s5 = smov 2048   ;;  %s7357_s12 = smov 128  }
  0x34   :  { %32 = dma.hbm_to_vmem [thread:$0]  %s7867_s1, 65536, %s27_s13, [#allocation6], %s7356_s5, %s7356_s5, %s7357_s12  }
  0x35   :  { %s7358_s24 = smov [#allocation10]   ;;  %s7359_s26 = smov [#allocation13]  }
  0x36   :  { %s49_s25 = sshll.u32 %s7358_s24, 4  ;;  %s69_s27 = sshll.u32 %s7359_s26, 4  ;;  %s50_s25 = int_to_ptr.vmem [resolvable:$true] %s49_s25  ;;  %s70_s27 = int_to_ptr.vmem [resolvable:$true] %s69_s27 }
  0x37   :  { %s7229_s30 = scalar_lea.hbm %s7869_s3, 256 }
  0x38   :  { %p7230_p10 = scmp.ne.s32.totalorder %s7869_s3, %s7229_s30  ;;  %p7233_p11 = scmp.lt.u32.totalorder %s7229_s30, %s7869_s3 }
  0x3a   :  { %p7235_p12 = pnand %p7233_p11, %p7230_p10 }
  0x3c   :  { %7238 = shalt.err (!%p7235_p12)
}
  0x3d   :  { %s7239_s1 = scalar_lea.vmem %s50_s25, 256  ;;  %p7244_p0 = scmp.lt.s32.totalorder %s50_s25, %s50_s25 }
  0x3e   :  { %p7240_p13 = scmp.ne.s32.totalorder %s50_s25, %s7239_s1  ;;  %p7245_p1 = scmp.lt.s32.totalorder %s7239_s1, %s7239_s1 }
  0x40   :  { %p7246_p2 = por %p7245_p1, %p7244_p0 }
  0x42   :  { %p7247_p3 = pnand %p7246_p2, %p7240_p13 }
  0x44   :  { %7250 = shalt.err (!%p7247_p3)
}
  0x45   :  { %52 = dma.hbm_to_vmem [thread:$0]  %s7869_s3, 256, %s50_s25, [#allocation9]  }
  0x46   :  { %s7251_s18 = scalar_lea.hbm %s7872_s6, 128 }
  0x47   :  { %p7252_p4 = scmp.ne.s32.totalorder %s7872_s6, %s7251_s18  ;;  %p7255_p5 = scmp.lt.u32.totalorder %s7251_s18, %s7872_s6 }
  0x49   :  { %p7257_p6 = pnand %p7255_p5, %p7252_p4 }
  0x4b   :  { %7260 = shalt.err (!%p7257_p6)
}
  0x4c   :  { %s7261_s12 = scalar_lea.vmem %s70_s27, 128  ;;  %p7266_p8 = scmp.lt.s32.totalorder %s70_s27, %s70_s27 }
  0x4d   :  { %p7262_p7 = scmp.ne.s32.totalorder %s70_s27, %s7261_s12  ;;  %p7267_p9 = scmp.lt.s32.totalorder %s7261_s12, %s7261_s12 }
  0x4f   :  { %p7268_p10 = por %p7267_p9, %p7266_p8 }
  0x51   :  { %p7269_p11 = pnand %p7268_p10, %p7262_p7 }
  0x53   :  { %7272 = shalt.err (!%p7269_p11)
}
  0x54   :  { %72 = dma.hbm_to_vmem [thread:$0]  %s7872_s6, 128, %s70_s27, [#allocation12]  }
  0x55   :  { %s7360_s23 = smov [#allocation14]   ;;  %s7273_s28 = scalar_lea.hbm %s7874_s8, 64 }
  0x56   :  { %s79_s24 = sshll.u32 %s7360_s23, 4  ;;  %p7274_p12 = scmp.ne.s32.totalorder %s7874_s8, %s7273_s28  ;;  %s80_s24 = int_to_ptr.vmem [resolvable:$true] %s79_s24 }
  0x57   :  { %p7277_p13 = scmp.lt.u32.totalorder %s7273_s28, %s7874_s8 }
  0x59   :  { %p7279_p0 = pnand %p7277_p13, %p7274_p12 }
  0x5b   :  { %7282 = shalt.err (!%p7279_p0)
}
  0x5c   :  { %s7283_s11 = scalar_lea.vmem %s80_s24, 64  ;;  %p7288_p2 = scmp.lt.s32.totalorder %s80_s24, %s80_s24 }
  0x5d   :  { %p7284_p1 = scmp.ne.s32.totalorder %s80_s24, %s7283_s11  ;;  %p7289_p3 = scmp.lt.s32.totalorder %s7283_s11, %s7283_s11 }
  0x5f   :  { %p7290_p4 = por %p7289_p3, %p7288_p2 }
  0x61   :  { %p7291_p5 = pnand %p7290_p4, %p7284_p1 }
  0x63   :  { %7294 = shalt.err (!%p7291_p5)
}
  0x64   :  { %82 = dma.hbm_to_vmem [thread:$0]  %s7874_s8, 64, %s80_s24, [#allocation15]  }
  0x65   :  { %7339 = dma.done.wait [#allocation6], 65536  }
  0x66   :  { %7340 = vsyncadd [#allocation6], 4294901760 }
  0x67   :  { %7341 = dma.done.wait [#allocation9], 512  }
  0x68   :  { %7342 = vsyncadd [#allocation9], 4294966784 }
  0x69   :  { %7343 = dma.done.wait [#allocation12], 256  }
  0x6a   :  { %7344 = vsyncadd [#allocation12], 4294967040 }
  0x6b   :  { %7345 = dma.done.wait [#allocation15], 64  }
  0x6c   :  { %7346 = vsyncadd [#allocation15], 4294967232 }
  0x6d   :  { %s121_s14 = sld [smem:[#allocation0]]   ;;  %s7361_s1 = smov [#allocation2]  }
  0x6e   :  { %s112_s13 = sshll.u32 %s7361_s1, 4  ;;  %s7362_s15 = smov [#allocation3]   ;;  %s113_s13 = int_to_ptr.vmem [resolvable:$true] %s112_s13 }
  0x6f   :  { %s7494_s16 = sshll.u32 %s7362_s15, 4  ;;  %s7295_s19 = scalar_lea.hbm %s7870_s4, 65536  ;;  %s130_s16 = int_to_ptr.vmem [resolvable:$true] %s7494_s16 }
  0x70   :  { %p7296_p6 = scmp.ne.s32.totalorder %s7870_s4, %s7295_s19  ;;  %p7299_p7 = scmp.lt.u32.totalorder %s7295_s19, %s7870_s4 }
  0x72   :  { %p7301_p8 = pnand %p7299_p7, %p7296_p6 }
  0x74   :  { %7304 = shalt.err (!%p7301_p8)  }
  0x75   :  { %s7305_s12 = scalar_lea.vmem %s113_s13, 65536  ;;  %p7310_p10 = scmp.lt.s32.totalorder %s113_s13, %s113_s13 }
  0x76   :  { %p7306_p9 = scmp.ne.s32.totalorder %s113_s13, %s7305_s12  ;;  %p7311_p11 = scmp.lt.s32.totalorder %s7305_s12, %s7305_s12 }
  0x78   :  { %p7312_p12 = por %p7311_p11, %p7310_p10 }
  0x7a   :  { %p7313_p13 = pnand %p7312_p12, %p7306_p9 }
  0x7c   :  { %7316 = shalt.err (!%p7313_p13)  }
  0x7d   :  { %115 = dma.hbm_to_vmem [thread:$0]  %s7870_s4, 65536, %s113_s13, [#allocation4] }
  0x7e   :  { %s7363_s23 = smov 512   ;;  %s6884_s24 = sshll.u32 %s121_s14, 26 }
  0x7f   :  { %133 = sst [smem:[#allocation22]] %s7363_s23  ;;  %s6885_s25 = sadd.s32 134217728, %s6884_s24 }
  0x80   :  { %135 = sst [smem:[#allocation22 + $0x1]] %s7363_s23  ;;  %s7364_s26 = smov 4  }
  0x81   :  { %137 = sst [smem:[#allocation22 + $0x2]] %s7364_s26  ;;  %s7365_s28 = smov 64  }
  0x82   :  { %139 = sst [smem:[#allocation22 + $0x3]] %s7365_s28  ;;  %s7366_s29 = smov 128  }
  0x83   :  { %141 = sst [smem:[#allocation22 + $0x4]] %s7366_s29  ;;  %s7367_s30 = smov 2  }
  0x84   :  { %143 = sst [smem:[#allocation22 + $0x5]] %s7367_s30  ;;  %s7368_s2 = smov 256  }
  0x85   :  { %145 = sst [smem:[#allocation22 + $0x6]] %s7368_s2  ;;  %s7369_s10 = smov [#allocation4 + $0x1]  }
  0x86   :  { %147 = sst [smem:[#allocation22 + $0x7]] %s7365_s28  ;;  %s7370_s4 = smov [#allocation21]  }
  0x87   :  { %149 = sst [smem:[#allocation22 + $0x8]] %s7364_s26 }
  0x88   :  { %151 = dma.general %s7873_s7, 32768, %s130_s16, %s7369_s10, %s7370_s4, [#allocation22], %s6885_s25, 0  }
  0x89   :  { %v157_v0 = vld [vmem:[#allocation5 + $0x8] sm:$0xff]  ;;  %v159_v1 = vld [vmem:[#allocation5 + $0x18] sm:$0xff]  ;;  %v156_v2 = vld [vmem:[#allocation5] sm:$0xff] }
  0x8a   :  { %v669_v3 = vunpack.c.l.s8.bf16 %v157_v0  ;;  %v685_v4 = vunpack.c.h.s8.bf16 %v157_v0  ;;  %v671_v5 = vunpack.c.l.s8.bf16 %v159_v1  ;;  %v687_v6 = vunpack.c.h.s8.bf16 %v159_v1  ;;  %v158_v7 = vld [vmem:[#allocation5 + $0x10] sm:$0xff]  ;;  %v173_v10 = vld [vmem:[#allocation5 + $0x88] sm:$0xff]  ;;  %v175_v11 = vld [vmem:[#allocation5 + $0x98] sm:$0xff] }
  0x8b   :  { %v668_v8 = vunpack.c.l.s8.bf16 %v156_v2  ;;  %v670_v9 = vunpack.c.l.s8.bf16 %v158_v7  ;;  %v684_v12 = vunpack.c.h.s8.bf16 %v156_v2  ;;  %v686_v13 = vunpack.c.h.s8.bf16 %v158_v7  ;;  %v172_v16 = vld [vmem:[#allocation5 + $0x80] sm:$0xff]  ;;  %v174_v17 = vld [vmem:[#allocation5 + $0x90] sm:$0xff]  ;;  %v189_v22 = vld [vmem:[#allocation5 + $0x108] sm:$0xff] }
  0x8c   :  { %1720 = vmatprep.subr.bf16.mxu0 %v669_v3  ;;  %1884 = vmatprep.subr.bf16.mxu1 %v671_v5  ;;  %v701_v14 = vunpack.c.l.s8.bf16 %v173_v10  ;;  %v703_v15 = vunpack.c.l.s8.bf16 %v175_v11  ;;  %v700_v18 = vunpack.c.l.s8.bf16 %v172_v16  ;;  %v702_v19 = vunpack.c.l.s8.bf16 %v174_v17  ;;  %v191_v23 = vld [vmem:[#allocation5 + $0x118] sm:$0xff]  ;;  %v188_v28 = vld [vmem:[#allocation5 + $0x100] sm:$0xff]  ;;  %v190_v29 = vld [vmem:[#allocation5 + $0x110] sm:$0xff] }
  0x8d   :  { %1721 = vmatpush1.bf16.msra.mxu0 %v668_v8  ;;  %1885 = vmatpush1.bf16.msra.mxu1 %v670_v9  ;;  %v717_v20 = vunpack.c.h.s8.bf16 %v173_v10  ;;  %v719_v21 = vunpack.c.h.s8.bf16 %v175_v11  ;;  %v716_v24 = vunpack.c.h.s8.bf16 %v172_v16  ;;  %v718_v25 = vunpack.c.h.s8.bf16 %v174_v17  ;;  %v7515_v30 = vld [vmem:[%s7866_s0] sm:$0xff]  ;;  %v205_v36 = vld [vmem:[#allocation5 + $0x188] sm:$0xff]  ;;  %v207_v37 = vld [vmem:[#allocation5 + $0x198] sm:$0xff] }
  0x8e   :  { %1722 = vmatprep.subr.bf16.mxu0 %v685_v4  ;;  %1886 = vmatprep.subr.bf16.mxu1 %v687_v6  ;;  %v733_v26 = vunpack.c.l.s8.bf16 %v189_v22  ;;  %v735_v27 = vunpack.c.l.s8.bf16 %v191_v23  ;;  %v732_v31 = vunpack.c.l.s8.bf16 %v188_v28  ;;  %v734_v32 = vunpack.c.l.s8.bf16 %v190_v29  ;;  %v204_v42 = vld [vmem:[#allocation5 + $0x180] sm:$0xff]  ;;  %v206_v43 = vld [vmem:[#allocation5 + $0x190] sm:$0xff]  ;;  %v221_v48 = vld [vmem:[#allocation5 + $0x208] sm:$0xff] }
  0x8f   :  { %v749_v33 = vunpack.c.h.s8.bf16 %v189_v22  ;;  %v751_v34 = vunpack.c.h.s8.bf16 %v191_v23  ;;  %v7519_v35 = vcombine.high %v7515_v30, %v7515_v30  ;;  %v748_v38 = vunpack.c.h.s8.bf16 %v188_v28  ;;  %v223_v49 = vld [vmem:[#allocation5 + $0x218] sm:$0xff]  ;;  %v220_v54 = vld [vmem:[#allocation5 + $0x200] sm:$0xff]  ;;  %v222_v55 = vld [vmem:[#allocation5 + $0x210] sm:$0xff] }
  0x90   :  { %v750_v39 = vunpack.c.h.s8.bf16 %v190_v29  ;;  %v765_v40 = vunpack.c.l.s8.bf16 %v205_v36  ;;  %v767_v41 = vunpack.c.l.s8.bf16 %v207_v37  ;;  %v764_v44 = vunpack.c.l.s8.bf16 %v204_v42  ;;  %v237_v60 = vld [vmem:[#allocation5 + $0x288] sm:$0xff]  ;;  %v239_v61 = vld [vmem:[#allocation5 + $0x298] sm:$0xff]  ;;  %v236_v2 = vld [vmem:[#allocation5 + $0x280] sm:$0xff] }
  0x91   :  { %1723 = vmatpush1.bf16.msra.mxu0 %v684_v12  ;;  %1887 = vmatpush1.bf16.msra.mxu1 %v686_v13  ;;  %v766_v45 = vunpack.c.l.s8.bf16 %v206_v43  ;;  %v781_v46 = vunpack.c.h.s8.bf16 %v205_v36  ;;  %v783_v47 = vunpack.c.h.s8.bf16 %v207_v37  ;;  %v780_v50 = vunpack.c.h.s8.bf16 %v204_v42  ;;  %v238_v3 = vld [vmem:[#allocation5 + $0x290] sm:$0xff]  ;;  %v253_v8 = vld [vmem:[#allocation5 + $0x308] sm:$0xff]  ;;  %v255_v9 = vld [vmem:[#allocation5 + $0x318] sm:$0xff] }
  0x92   :  { %1724 = vmatprep.subr.bf16.mxu0 %v701_v14  ;;  %1888 = vmatprep.subr.bf16.mxu1 %v703_v15  ;;  %v782_v51 = vunpack.c.h.s8.bf16 %v206_v43  ;;  %v797_v52 = vunpack.c.l.s8.bf16 %v221_v48  ;;  %v799_v53 = vunpack.c.l.s8.bf16 %v223_v49  ;;  %v796_v56 = vunpack.c.l.s8.bf16 %v220_v54  ;;  %v252_v14 = vld [vmem:[#allocation5 + $0x300] sm:$0xff]  ;;  %v254_v15 = vld [vmem:[#allocation5 + $0x310] sm:$0xff]  ;;  %v7530_v43 = vld [vmem:[%s7866_s0 + $0x8] sm:$0xff] }
  0x93   :  { %1752 = vmatprep.mubr.bf16.mxu0 %v7519_v35  ;;  %1916 = vmatprep.mubr.bf16.mxu1 %v7519_v35  ;;  %v798_v57 = vunpack.c.l.s8.bf16 %v222_v55  ;;  %v813_v58 = vunpack.c.h.s8.bf16 %v221_v48  ;;  %v815_v59 = vunpack.c.h.s8.bf16 %v223_v49  ;;  %v812_v62 = vunpack.c.h.s8.bf16 %v220_v54  ;;  %v301_v48 = vld [vmem:[#allocation5 + $0x488] sm:$0xff]  ;;  %v303_v49 = vld [vmem:[#allocation5 + $0x498] sm:$0xff]  ;;  %v300_v54 = vld [vmem:[#allocation5 + $0x480] sm:$0xff] }
  0x94   :  { %v814_v63 = vunpack.c.h.s8.bf16 %v222_v55  ;;  %v829_v0 = vunpack.c.l.s8.bf16 %v237_v60  ;;  %v831_v1 = vunpack.c.l.s8.bf16 %v239_v61  ;;  %v828_v4 = vunpack.c.l.s8.bf16 %v236_v2  ;;  %v302_v55 = vld [vmem:[#allocation5 + $0x490] sm:$0xff] }
  0x95   :  { %1725 = vmatpush1.bf16.msra.mxu0 %v700_v18  ;;  %1889 = vmatpush1.bf16.msra.mxu1 %v702_v19  ;;  %v830_v5 = vunpack.c.l.s8.bf16 %v238_v3  ;;  %v845_v6 = vunpack.c.h.s8.bf16 %v237_v60  ;;  %v847_v7 = vunpack.c.h.s8.bf16 %v239_v61  ;;  %v844_v10 = vunpack.c.h.s8.bf16 %v236_v2  ;;  %v317_v60 = vld [vmem:[#allocation5 + $0x508] sm:$0xff]  ;;  %v319_v61 = vld [vmem:[#allocation5 + $0x518] sm:$0xff]  ;;  %v316_v2 = vld [vmem:[#allocation5 + $0x500] sm:$0xff] }
  0x96   :  { %1726 = vmatprep.subr.bf16.mxu0 %v717_v20  ;;  %1890 = vmatprep.subr.bf16.mxu1 %v719_v21  ;;  %v846_v11 = vunpack.c.h.s8.bf16 %v238_v3  ;;  %v861_v12 = vunpack.c.l.s8.bf16 %v253_v8  ;;  %v863_v13 = vunpack.c.l.s8.bf16 %v255_v9  ;;  %v860_v16 = vunpack.c.l.s8.bf16 %v252_v14  ;;  %v269_v20 = vld [vmem:[#allocation5 + $0x388] sm:$0xff]  ;;  %v271_v21 = vld [vmem:[#allocation5 + $0x398] sm:$0xff]  ;;  %v318_v3 = vld [vmem:[#allocation5 + $0x510] sm:$0xff] }
  0x97   :  { %v862_v17 = vunpack.c.l.s8.bf16 %v254_v15  ;;  %v877_v18 = vunpack.c.h.s8.bf16 %v253_v8  ;;  %v879_v19 = vunpack.c.h.s8.bf16 %v255_v9  ;;  %v876_v22 = vunpack.c.h.s8.bf16 %v252_v14  ;;  %v333_v8 = vld [vmem:[#allocation5 + $0x588] sm:$0xff]  ;;  %v335_v9 = vld [vmem:[#allocation5 + $0x598] sm:$0xff]  ;;  %v332_v14 = vld [vmem:[#allocation5 + $0x580] sm:$0xff] }
  0x98   :  { %v878_v23 = vunpack.c.h.s8.bf16 %v254_v15  ;;  %v7525_v42 = vcombine.low %v7515_v30, %v7515_v30  ;;  %v334_v15 = vld [vmem:[#allocation5 + $0x590] sm:$0xff] }
  0x99   :  { %1727 = vmatpush1.bf16.msra.mxu0 %v716_v24  ;;  %1891 = vmatpush1.bf16.msra.mxu1 %v718_v25  ;;  %v893_v24 = vunpack.c.l.s8.bf16 %v269_v20  ;;  %v895_v25 = vunpack.c.l.s8.bf16 %v271_v21 }
  0x9a   :  { %1728 = vmatprep.subr.bf16.mxu0 %v733_v26  ;;  %1892 = vmatprep.subr.bf16.mxu1 %v735_v27  ;;  %v268_v26 = vld [vmem:[#allocation5 + $0x380] sm:$0xff]  ;;  %v270_v27 = vld [vmem:[#allocation5 + $0x390] sm:$0xff] }
  0x9b   :  { %v892_v28 = vunpack.c.l.s8.bf16 %v268_v26  ;;  %v894_v29 = vunpack.c.l.s8.bf16 %v270_v27  ;;  %v908_v36 = vunpack.c.h.s8.bf16 %v268_v26  ;;  %v910_v37 = vunpack.c.h.s8.bf16 %v270_v27  ;;  %v348_v26 = vld [vmem:[#allocation5 + $0x600] sm:$0xff]  ;;  %v350_v27 = vld [vmem:[#allocation5 + $0x610] sm:$0xff] }
  0x9d   :  { %1729 = vmatpush1.bf16.msra.mxu0 %v732_v31  ;;  %1893 = vmatpush1.bf16.msra.mxu1 %v734_v32  ;;  %v909_v31 = vunpack.c.h.s8.bf16 %v269_v20  ;;  %v911_v32 = vunpack.c.h.s8.bf16 %v271_v21  ;;  %v349_v20 = vld [vmem:[#allocation5 + $0x608] sm:$0xff]  ;;  %v351_v21 = vld [vmem:[#allocation5 + $0x618] sm:$0xff] }
  0x9e   :  { %1730 = vmatprep.subr.bf16.mxu0 %v749_v33  ;;  %1894 = vmatprep.subr.bf16.mxu1 %v751_v34  ;;  %v285_v33 = vld [vmem:[#allocation5 + $0x408] sm:$0xff]  ;;  %v287_v34 = vld [vmem:[#allocation5 + $0x418] sm:$0xff] }
  0xa1   :  { %1731 = vmatpush1.bf16.msra.mxu0 %v748_v38  ;;  %1895 = vmatpush1.bf16.msra.mxu1 %v750_v39  ;;  %v925_v38 = vunpack.c.l.s8.bf16 %v285_v33  ;;  %v927_v39 = vunpack.c.l.s8.bf16 %v287_v34 }
  0xa2   :  { %1732 = vmatprep.subr.bf16.mxu0 %v765_v40  ;;  %1896 = vmatprep.subr.bf16.mxu1 %v767_v41  ;;  %v284_v40 = vld [vmem:[#allocation5 + $0x400] sm:$0xff]  ;;  %v286_v41 = vld [vmem:[#allocation5 + $0x410] sm:$0xff] }
  0xa3   :  { %v940_v30 = vunpack.c.h.s8.bf16 %v284_v40 }
  0xa5   :  { %1733 = vmatpush1.bf16.msra.mxu0 %v764_v44  ;;  %1897 = vmatpush1.bf16.msra.mxu1 %v766_v45  ;;  %v924_v44 = vunpack.c.l.s8.bf16 %v284_v40  ;;  %v926_v45 = vunpack.c.l.s8.bf16 %v286_v41  ;;  %v364_v40 = vld [vmem:[#allocation5 + $0x680] sm:$0xff] }
  0xa6   :  { %1734 = vmatprep.subr.bf16.mxu0 %v781_v46  ;;  %1898 = vmatprep.subr.bf16.mxu1 %v783_v47  ;;  %v941_v46 = vunpack.c.h.s8.bf16 %v285_v33  ;;  %v943_v47 = vunpack.c.h.s8.bf16 %v287_v34  ;;  %v365_v33 = vld [vmem:[#allocation5 + $0x688] sm:$0xff]  ;;  %v367_v34 = vld [vmem:[#allocation5 + $0x698] sm:$0xff] }
  0xa9   :  { %1735 = vmatpush1.bf16.msra.mxu0 %v780_v50  ;;  %1899 = vmatpush1.bf16.msra.mxu1 %v782_v51  ;;  %v7534_v50 = vcombine.high %v7530_v43, %v7530_v43  ;;  %v942_v51 = vunpack.c.h.s8.bf16 %v286_v41  ;;  %v366_v41 = vld [vmem:[#allocation5 + $0x690] sm:$0xff] }
  0xaa   :  { %1736 = vmatprep.subr.bf16.mxu0 %v797_v52  ;;  %1900 = vmatprep.subr.bf16.mxu1 %v799_v53  ;;  %v957_v52 = vunpack.c.l.s8.bf16 %v301_v48  ;;  %v959_v53 = vunpack.c.l.s8.bf16 %v303_v49 }
  0xad   :  { %1737 = vmatpush1.bf16.msra.mxu0 %v796_v56  ;;  %1901 = vmatpush1.bf16.msra.mxu1 %v798_v57  ;;  %v956_v56 = vunpack.c.l.s8.bf16 %v300_v54  ;;  %v958_v57 = vunpack.c.l.s8.bf16 %v302_v55 }
  0xae   :  { %1738 = vmatprep.subr.bf16.mxu0 %v813_v58  ;;  %1902 = vmatprep.subr.bf16.mxu1 %v815_v59  ;;  %v973_v58 = vunpack.c.h.s8.bf16 %v301_v48  ;;  %v975_v59 = vunpack.c.h.s8.bf16 %v303_v49  ;;  %v381_v48 = vld [vmem:[#allocation5 + $0x708] sm:$0xff]  ;;  %v383_v49 = vld [vmem:[#allocation5 + $0x718] sm:$0xff] }
  0xb1   :  { %1739 = vmatpush1.bf16.msra.mxu0 %v812_v62  ;;  %1903 = vmatpush1.bf16.msra.mxu1 %v814_v63  ;;  %v972_v62 = vunpack.c.h.s8.bf16 %v300_v54  ;;  %v974_v63 = vunpack.c.h.s8.bf16 %v302_v55  ;;  %v380_v54 = vld [vmem:[#allocation5 + $0x700] sm:$0xff]  ;;  %v382_v55 = vld [vmem:[#allocation5 + $0x710] sm:$0xff] }
  0xb2   :  { %1740 = vmatprep.subr.bf16.mxu0 %v829_v0  ;;  %1904 = vmatprep.subr.bf16.mxu1 %v831_v1  ;;  %v989_v0 = vunpack.c.l.s8.bf16 %v317_v60  ;;  %v991_v1 = vunpack.c.l.s8.bf16 %v319_v61 }
  0xb5   :  { %1741 = vmatpush1.bf16.msra.mxu0 %v828_v4  ;;  %1905 = vmatpush1.bf16.msra.mxu1 %v830_v5  ;;  %v988_v4 = vunpack.c.l.s8.bf16 %v316_v2  ;;  %v990_v5 = vunpack.c.l.s8.bf16 %v318_v3 }
  0xb6   :  { %1742 = vmatprep.subr.bf16.mxu0 %v845_v6  ;;  %1906 = vmatprep.subr.bf16.mxu1 %v847_v7  ;;  %v1005_v6 = vunpack.c.h.s8.bf16 %v317_v60  ;;  %v1007_v7 = vunpack.c.h.s8.bf16 %v319_v61  ;;  %v397_v60 = vld [vmem:[#allocation5 + $0x788] sm:$0xff]  ;;  %v399_v61 = vld [vmem:[#allocation5 + $0x798] sm:$0xff] }
  0xb9   :  { %1743 = vmatpush1.bf16.msra.mxu0 %v844_v10  ;;  %1907 = vmatpush1.bf16.msra.mxu1 %v846_v11  ;;  %v1004_v10 = vunpack.c.h.s8.bf16 %v316_v2  ;;  %v1006_v11 = vunpack.c.h.s8.bf16 %v318_v3  ;;  %v396_v2 = vld [vmem:[#allocation5 + $0x780] sm:$0xff]  ;;  %v398_v3 = vld [vmem:[#allocation5 + $0x790] sm:$0xff] }
  0xba   :  { %1744 = vmatprep.subr.bf16.mxu0 %v861_v12  ;;  %1908 = vmatprep.subr.bf16.mxu1 %v863_v13  ;;  %v1021_v12 = vunpack.c.l.s8.bf16 %v333_v8  ;;  %v1023_v13 = vunpack.c.l.s8.bf16 %v335_v9 }
  0xbd   :  { %1745 = vmatpush1.bf16.msra.mxu0 %v860_v16  ;;  %1909 = vmatpush1.bf16.msra.mxu1 %v862_v17  ;;  %v1020_v16 = vunpack.c.l.s8.bf16 %v332_v14  ;;  %v1022_v17 = vunpack.c.l.s8.bf16 %v334_v15 }
  0xbe   :  { %1746 = vmatprep.subr.bf16.mxu0 %v877_v18  ;;  %1910 = vmatprep.subr.bf16.mxu1 %v879_v19  ;;  %v1037_v18 = vunpack.c.h.s8.bf16 %v333_v8  ;;  %v1039_v19 = vunpack.c.h.s8.bf16 %v335_v9  ;;  %v413_v8 = vld [vmem:[#allocation5 + $0x808] sm:$0xff]  ;;  %v415_v9 = vld [vmem:[#allocation5 + $0x818] sm:$0xff] }
  0xc1   :  { %1747 = vmatpush1.bf16.msra.mxu0 %v876_v22  ;;  %1911 = vmatpush1.bf16.msra.mxu1 %v878_v23  ;;  %v1036_v22 = vunpack.c.h.s8.bf16 %v332_v14  ;;  %v1038_v23 = vunpack.c.h.s8.bf16 %v334_v15  ;;  %v412_v14 = vld [vmem:[#allocation5 + $0x800] sm:$0xff]  ;;  %v414_v15 = vld [vmem:[#allocation5 + $0x810] sm:$0xff] }
  0xc2   :  { %1748 = vmatprep.subr.bf16.mxu0 %v893_v24  ;;  %1912 = vmatprep.subr.bf16.mxu1 %v895_v25  ;;  %v1053_v24 = vunpack.c.l.s8.bf16 %v349_v20  ;;  %v1055_v25 = vunpack.c.l.s8.bf16 %v351_v21 }
  0xc5   :  { %1749 = vmatpush1.bf16.msra.mxu0 %v892_v28  ;;  %1913 = vmatpush1.bf16.msra.mxu1 %v894_v29  ;;  %v1052_v28 = vunpack.c.l.s8.bf16 %v348_v26  ;;  %v1054_v29 = vunpack.c.l.s8.bf16 %v350_v27 }
  0xc6   :  { %1750 = vmatprep.subr.bf16.mxu0 %v909_v31  ;;  %1914 = vmatprep.subr.bf16.mxu1 %v911_v32  ;;  %v1069_v31 = vunpack.c.h.s8.bf16 %v349_v20  ;;  %v1071_v32 = vunpack.c.h.s8.bf16 %v351_v21  ;;  %v1197_v20 = vunpack.c.h.s8.bf16 %v413_v8  ;;  %v1199_v21 = vunpack.c.h.s8.bf16 %v415_v9 }
  0xc9   :  { %1751 = vmatpush1.bf16.msra.mxu0 %v908_v36  ;;  %1915 = vmatpush1.bf16.msra.mxu1 %v910_v37  ;;  %v1068_v36 = vunpack.c.h.s8.bf16 %v348_v26  ;;  %v1070_v37 = vunpack.c.h.s8.bf16 %v350_v27 }
  0xca   :  { %1761 = vmatprep.subr.bf16.mxu0 %v925_v38  ;;  %1925 = vmatprep.subr.bf16.mxu1 %v927_v39  ;;  %v1085_v38 = vunpack.c.l.s8.bf16 %v365_v33  ;;  %v1087_v39 = vunpack.c.l.s8.bf16 %v367_v34 }
  0xcc   :  { %1753 = vmatmul.mubr.bf16.vlgmr.msra.gmra.mrb[0].mxu0 %v7525_v42  ;;  %1917 = vmatmul.mubr.bf16.vlgmr.msra.gmra.mrb[0].mxu1 %v7525_v42 }
  0xcd   :  { %1762 = vmatpush1.bf16.msra.mxu0 %v924_v44  ;;  %1926 = vmatpush1.bf16.msra.mxu1 %v926_v45  ;;  %v1084_v44 = vunpack.c.l.s8.bf16 %v364_v40  ;;  %v1086_v45 = vunpack.c.l.s8.bf16 %v366_v41 }
  0xce   :  { %1763 = vmatprep.subr.bf16.mxu0 %v941_v46  ;;  %1927 = vmatprep.subr.bf16.mxu1 %v943_v47  ;;  %v1101_v46 = vunpack.c.h.s8.bf16 %v365_v33  ;;  %v1103_v47 = vunpack.c.h.s8.bf16 %v367_v34 }
  0xcf   :  { %1793 = vmatprep.mubr.bf16.mxu0 %v7534_v50  ;;  %1957 = vmatprep.mubr.bf16.mxu1 %v7534_v50 }
  0xd1   :  { %1764 = vmatpush1.bf16.msra.mxu0 %v940_v30  ;;  %1928 = vmatpush1.bf16.msra.mxu1 %v942_v51  ;;  %v1100_v30 = vunpack.c.h.s8.bf16 %v364_v40  ;;  %v1102_v51 = vunpack.c.h.s8.bf16 %v366_v41 }
  0xd2   :  { %1765 = vmatprep.subr.bf16.mxu0 %v957_v52  ;;  %1929 = vmatprep.subr.bf16.mxu1 %v959_v53  ;;  %v1117_v52 = vunpack.c.l.s8.bf16 %v381_v48  ;;  %v1119_v53 = vunpack.c.l.s8.bf16 %v383_v49 }
  0xd5   :  { %1766 = vmatpush1.bf16.msra.mxu0 %v956_v56  ;;  %1930 = vmatpush1.bf16.msra.mxu1 %v958_v57  ;;  %v1116_v56 = vunpack.c.l.s8.bf16 %v380_v54  ;;  %v1118_v57 = vunpack.c.l.s8.bf16 %v382_v55 }
  0xd6   :  { %1767 = vmatprep.subr.bf16.mxu0 %v973_v58  ;;  %1931 = vmatprep.subr.bf16.mxu1 %v975_v59  ;;  %v1133_v58 = vunpack.c.h.s8.bf16 %v381_v48  ;;  %v1135_v59 = vunpack.c.h.s8.bf16 %v383_v49 }
  0xd9   :  { %1768 = vmatpush1.bf16.msra.mxu0 %v972_v62  ;;  %1932 = vmatpush1.bf16.msra.mxu1 %v974_v63  ;;  %v1132_v62 = vunpack.c.h.s8.bf16 %v380_v54  ;;  %v1134_v63 = vunpack.c.h.s8.bf16 %v382_v55 }
  0xda   :  { %1769 = vmatprep.subr.bf16.mxu0 %v989_v0  ;;  %1933 = vmatprep.subr.bf16.mxu1 %v991_v1  ;;  %v1149_v0 = vunpack.c.l.s8.bf16 %v397_v60  ;;  %v1151_v1 = vunpack.c.l.s8.bf16 %v399_v61 }
  0xdd   :  { %1770 = vmatpush1.bf16.msra.mxu0 %v988_v4  ;;  %1934 = vmatpush1.bf16.msra.mxu1 %v990_v5  ;;  %v1148_v4 = vunpack.c.l.s8.bf16 %v396_v2  ;;  %v1150_v5 = vunpack.c.l.s8.bf16 %v398_v3 }
  0xde   :  { %1771 = vmatprep.subr.bf16.mxu0 %v1005_v6  ;;  %1935 = vmatprep.subr.bf16.mxu1 %v1007_v7  ;;  %v1165_v6 = vunpack.c.h.s8.bf16 %v397_v60  ;;  %v1167_v7 = vunpack.c.h.s8.bf16 %v399_v61 }
  0xe1   :  { %1772 = vmatpush1.bf16.msra.mxu0 %v1004_v10  ;;  %1936 = vmatpush1.bf16.msra.mxu1 %v1006_v11  ;;  %v1164_v10 = vunpack.c.h.s8.bf16 %v396_v2  ;;  %v1166_v11 = vunpack.c.h.s8.bf16 %v398_v3 }
  0xe2   :  { %1773 = vmatprep.subr.bf16.mxu0 %v1021_v12  ;;  %1937 = vmatprep.subr.bf16.mxu1 %v1023_v13  ;;  %v1181_v12 = vunpack.c.l.s8.bf16 %v413_v8  ;;  %v1183_v13 = vunpack.c.l.s8.bf16 %v415_v9 }
  0xe5   :  { %1774 = vmatpush1.bf16.msra.mxu0 %v1020_v16  ;;  %1938 = vmatpush1.bf16.msra.mxu1 %v1022_v17  ;;  %v7542_v16 = vcombine.low %v7530_v43, %v7530_v43  ;;  %v7547_v17 = vld [vmem:[%s7866_s0 + $0x10] sm:$0xff]  ;;  %v1196_v43 = vunpack.c.h.s8.bf16 %v412_v14 }
  0xe6   :  { %1775 = vmatprep.subr.bf16.mxu0 %v1037_v18  ;;  %1939 = vmatprep.subr.bf16.mxu1 %v1039_v19  ;;  %v1180_v18 = vunpack.c.l.s8.bf16 %v412_v14  ;;  %v1182_v19 = vunpack.c.l.s8.bf16 %v414_v15 }
  0xe9   :  { %1776 = vmatpush1.bf16.msra.mxu0 %v1036_v22  ;;  %1940 = vmatpush1.bf16.msra.mxu1 %v1038_v23  ;;  %v429_v22 = vld [vmem:[#allocation5 + $0x888] sm:$0xff]  ;;  %v431_v23 = vld [vmem:[#allocation5 + $0x898] sm:$0xff] }
  0xea   :  { %1777 = vmatprep.subr.bf16.mxu0 %v1053_v24  ;;  %1941 = vmatprep.subr.bf16.mxu1 %v1055_v25  ;;  %v7551_v24 = vcombine.high %v7547_v17, %v7547_v17  ;;  %v1198_v25 = vunpack.c.h.s8.bf16 %v414_v15  ;;  %v1213_v26 = vunpack.c.l.s8.bf16 %v429_v22  ;;  %v1215_v27 = vunpack.c.l.s8.bf16 %v431_v23 }
  0xeb   :  { %v1229_v33 = vunpack.c.h.s8.bf16 %v429_v22  ;;  %v1231_v34 = vunpack.c.h.s8.bf16 %v431_v23 }
  0xed   :  { %1778 = vmatpush1.bf16.msra.mxu0 %v1052_v28  ;;  %1942 = vmatpush1.bf16.msra.mxu1 %v1054_v29  ;;  %v428_v28 = vld [vmem:[#allocation5 + $0x880] sm:$0xff]  ;;  %v430_v29 = vld [vmem:[#allocation5 + $0x890] sm:$0xff] }
  0xee   :  { %1779 = vmatprep.subr.bf16.mxu0 %v1069_v31  ;;  %1943 = vmatprep.subr.bf16.mxu1 %v1071_v32  ;;  %v1212_v31 = vunpack.c.l.s8.bf16 %v428_v28  ;;  %v1214_v32 = vunpack.c.l.s8.bf16 %v430_v29 }
  0xf1   :  { %1780 = vmatpush1.bf16.msra.mxu0 %v1068_v36  ;;  %1944 = vmatpush1.bf16.msra.mxu1 %v1070_v37  ;;  %v445_v36 = vld [vmem:[#allocation5 + $0x908] sm:$0xff]  ;;  %v447_v37 = vld [vmem:[#allocation5 + $0x918] sm:$0xff] }
  0xf2   :  { %1781 = vmatprep.subr.bf16.mxu0 %v1085_v38  ;;  %1945 = vmatprep.subr.bf16.mxu1 %v1087_v39  ;;  %v1228_v38 = vunpack.c.h.s8.bf16 %v428_v28  ;;  %v1230_v39 = vunpack.c.h.s8.bf16 %v430_v29  ;;  %v1245_v40 = vunpack.c.l.s8.bf16 %v445_v36  ;;  %v1247_v41 = vunpack.c.l.s8.bf16 %v447_v37 }
  0xf3   :  { %v1261_v48 = vunpack.c.h.s8.bf16 %v445_v36  ;;  %v1263_v49 = vunpack.c.h.s8.bf16 %v447_v37 }
  0xf5   :  { %1782 = vmatpush1.bf16.msra.mxu0 %v1084_v44  ;;  %1946 = vmatpush1.bf16.msra.mxu1 %v1086_v45  ;;  %v444_v44 = vld [vmem:[#allocation5 + $0x900] sm:$0xff]  ;;  %v446_v45 = vld [vmem:[#allocation5 + $0x910] sm:$0xff] }
  0xf6   :  { %1783 = vmatprep.subr.bf16.mxu0 %v1101_v46  ;;  %1947 = vmatprep.subr.bf16.mxu1 %v1103_v47  ;;  %v1244_v46 = vunpack.c.l.s8.bf16 %v444_v44  ;;  %v1246_v47 = vunpack.c.l.s8.bf16 %v446_v45 }
  0xf9   :  { %1784 = vmatpush1.bf16.msra.mxu0 %v1100_v30  ;;  %1948 = vmatpush1.bf16.msra.mxu1 %v1102_v51  ;;  %v461_v30 = vld [vmem:[#allocation5 + $0x988] sm:$0xff]  ;;  %v463_v51 = vld [vmem:[#allocation5 + $0x998] sm:$0xff] }
  0xfa   :  { %1785 = vmatprep.subr.bf16.mxu0 %v1117_v52  ;;  %1949 = vmatprep.subr.bf16.mxu1 %v1119_v53  ;;  %v1260_v52 = vunpack.c.h.s8.bf16 %v444_v44  ;;  %v1262_v53 = vunpack.c.h.s8.bf16 %v446_v45  ;;  %v1277_v54 = vunpack.c.l.s8.bf16 %v461_v30  ;;  %v1279_v55 = vunpack.c.l.s8.bf16 %v463_v51 }
  0xfb   :  { %v1293_v60 = vunpack.c.h.s8.bf16 %v461_v30  ;;  %v1295_v61 = vunpack.c.h.s8.bf16 %v463_v51 }
  0xfd   :  { %1786 = vmatpush1.bf16.msra.mxu0 %v1116_v56  ;;  %1950 = vmatpush1.bf16.msra.mxu1 %v1118_v57  ;;  %v460_v56 = vld [vmem:[#allocation5 + $0x980] sm:$0xff]  ;;  %v462_v57 = vld [vmem:[#allocation5 + $0x990] sm:$0xff] }
  0xfe   :  { %1787 = vmatprep.subr.bf16.mxu0 %v1133_v58  ;;  %1951 = vmatprep.subr.bf16.mxu1 %v1135_v59  ;;  %v1276_v58 = vunpack.c.l.s8.bf16 %v460_v56  ;;  %v1278_v59 = vunpack.c.l.s8.bf16 %v462_v57 }
 0x101   :  { %1788 = vmatpush1.bf16.msra.mxu0 %v1132_v62  ;;  %1952 = vmatpush1.bf16.msra.mxu1 %v1134_v63  ;;  %v477_v62 = vld [vmem:[#allocation5 + $0xa08] sm:$0xff]  ;;  %v479_v63 = vld [vmem:[#allocation5 + $0xa18] sm:$0xff] }
 0x102   :  { %1789 = vmatprep.subr.bf16.mxu0 %v1149_v0  ;;  %1953 = vmatprep.subr.bf16.mxu1 %v1151_v1  ;;  %v1292_v0 = vunpack.c.h.s8.bf16 %v460_v56  ;;  %v1294_v1 = vunpack.c.h.s8.bf16 %v462_v57  ;;  %v1309_v2 = vunpack.c.l.s8.bf16 %v477_v62  ;;  %v1311_v3 = vunpack.c.l.s8.bf16 %v479_v63 }
 0x103   :  { %v1325_v8 = vunpack.c.h.s8.bf16 %v477_v62  ;;  %v1327_v9 = vunpack.c.h.s8.bf16 %v479_v63 }
 0x105   :  { %1790 = vmatpush1.bf16.msra.mxu0 %v1148_v4  ;;  %1954 = vmatpush1.bf16.msra.mxu1 %v1150_v5  ;;  %v476_v4 = vld [vmem:[#allocation5 + $0xa00] sm:$0xff]  ;;  %v478_v5 = vld [vmem:[#allocation5 + $0xa10] sm:$0xff] }
 0x106   :  { %1791 = vmatprep.subr.bf16.mxu0 %v1165_v6  ;;  %1955 = vmatprep.subr.bf16.mxu1 %v1167_v7  ;;  %v1308_v6 = vunpack.c.l.s8.bf16 %v476_v4  ;;  %v1310_v7 = vunpack.c.l.s8.bf16 %v478_v5 }
 0x109   :  { %1792 = vmatpush1.bf16.msra.mxu0 %v1164_v10  ;;  %1956 = vmatpush1.bf16.msra.mxu1 %v1166_v11  ;;  %v493_v10 = vld [vmem:[#allocation5 + $0xa88] sm:$0xff]  ;;  %v495_v11 = vld [vmem:[#allocation5 + $0xa98] sm:$0xff] }
 0x10a   :  { %1802 = vmatprep.subr.bf16.mxu0 %v1181_v12  ;;  %1966 = vmatprep.subr.bf16.mxu1 %v1183_v13  ;;  %v1324_v12 = vunpack.c.h.s8.bf16 %v476_v4  ;;  %v1326_v13 = vunpack.c.h.s8.bf16 %v478_v5  ;;  %v1341_v14 = vunpack.c.l.s8.bf16 %v493_v10  ;;  %v1343_v15 = vunpack.c.l.s8.bf16 %v495_v11 }
 0x10b   :  { %v1357_v22 = vunpack.c.h.s8.bf16 %v493_v10  ;;  %v1359_v23 = vunpack.c.h.s8.bf16 %v495_v11 }
 0x10c   :  { %1794 = vmatmul.mubr.bf16.vlgmr.msra.gmra.mrb[0].mxu0 %v7542_v16  ;;  %1958 = vmatmul.mubr.bf16.vlgmr.msra.gmra.mrb[0].mxu1 %v7542_v16 }
 0x10d   :  { %1803 = vmatpush1.bf16.msra.mxu0 %v1180_v18  ;;  %1967 = vmatpush1.bf16.msra.mxu1 %v1182_v19  ;;  %v492_v18 = vld [vmem:[#allocation5 + $0xa80] sm:$0xff]  ;;  %v494_v19 = vld [vmem:[#allocation5 + $0xa90] sm:$0xff] }
 0x10e   :  { %1804 = vmatprep.subr.bf16.mxu0 %v1197_v20  ;;  %1968 = vmatprep.subr.bf16.mxu1 %v1199_v21  ;;  %v1340_v20 = vunpack.c.l.s8.bf16 %v492_v18  ;;  %v1342_v21 = vunpack.c.l.s8.bf16 %v494_v19 }
 0x10f   :  { %1834 = vmatprep.mubr.bf16.mxu0 %v7551_v24  ;;  %1998 = vmatprep.mubr.bf16.mxu1 %v7551_v24 }
 0x111   :  { %1805 = vmatpush1.bf16.msra.mxu0 %v1196_v43  ;;  %1969 = vmatpush1.bf16.msra.mxu1 %v1198_v25  ;;  %v509_v43 = vld [vmem:[#allocation5 + $0xb08] sm:$0xff]  ;;  %v511_v25 = vld [vmem:[#allocation5 + $0xb18] sm:$0xff] }
 0x112   :  { %1806 = vmatprep.subr.bf16.mxu0 %v1213_v26  ;;  %1970 = vmatprep.subr.bf16.mxu1 %v1215_v27  ;;  %v1356_v26 = vunpack.c.h.s8.bf16 %v492_v18  ;;  %v1358_v27 = vunpack.c.h.s8.bf16 %v494_v19  ;;  %v1373_v28 = vunpack.c.l.s8.bf16 %v509_v43  ;;  %v1375_v29 = vunpack.c.l.s8.bf16 %v511_v25 }
 0x113   :  { %v1389_v36 = vunpack.c.h.s8.bf16 %v509_v43  ;;  %v1391_v37 = vunpack.c.h.s8.bf16 %v511_v25 }
 0x115   :  { %1807 = vmatpush1.bf16.msra.mxu0 %v1212_v31  ;;  %1971 = vmatpush1.bf16.msra.mxu1 %v1214_v32  ;;  %v508_v31 = vld [vmem:[#allocation5 + $0xb00] sm:$0xff]  ;;  %v510_v32 = vld [vmem:[#allocation5 + $0xb10] sm:$0xff] }
 0x116   :  { %1808 = vmatprep.subr.bf16.mxu0 %v1229_v33  ;;  %1972 = vmatprep.subr.bf16.mxu1 %v1231_v34  ;;  %v1372_v33 = vunpack.c.l.s8.bf16 %v508_v31  ;;  %v1374_v34 = vunpack.c.l.s8.bf16 %v510_v32 }
 0x119   :  { %1809 = vmatpush1.bf16.msra.mxu0 %v1228_v38  ;;  %1973 = vmatpush1.bf16.msra.mxu1 %v1230_v39  ;;  %v525_v38 = vld [vmem:[#allocation5 + $0xb88] sm:$0xff]  ;;  %v527_v39 = vld [vmem:[#allocation5 + $0xb98] sm:$0xff] }
 0x11a   :  { %1810 = vmatprep.subr.bf16.mxu0 %v1245_v40  ;;  %1974 = vmatprep.subr.bf16.mxu1 %v1247_v41  ;;  %v1388_v40 = vunpack.c.h.s8.bf16 %v508_v31  ;;  %v1390_v41 = vunpack.c.h.s8.bf16 %v510_v32  ;;  %v1405_v44 = vunpack.c.l.s8.bf16 %v525_v38  ;;  %v1407_v45 = vunpack.c.l.s8.bf16 %v527_v39 }
 0x11b   :  { %v1421_v30 = vunpack.c.h.s8.bf16 %v525_v38  ;;  %v1423_v51 = vunpack.c.h.s8.bf16 %v527_v39 }
 0x11d   :  { %1811 = vmatpush1.bf16.msra.mxu0 %v1244_v46  ;;  %1975 = vmatpush1.bf16.msra.mxu1 %v1246_v47  ;;  %v524_v46 = vld [vmem:[#allocation5 + $0xb80] sm:$0xff]  ;;  %v526_v47 = vld [vmem:[#allocation5 + $0xb90] sm:$0xff] }
 0x11e   :  { %1812 = vmatprep.subr.bf16.mxu0 %v1261_v48  ;;  %1976 = vmatprep.subr.bf16.mxu1 %v1263_v49  ;;  %v1404_v48 = vunpack.c.l.s8.bf16 %v524_v46  ;;  %v1406_v49 = vunpack.c.l.s8.bf16 %v526_v47 }
 0x121   :  { %1813 = vmatpush1.bf16.msra.mxu0 %v1260_v52  ;;  %1977 = vmatpush1.bf16.msra.mxu1 %v1262_v53  ;;  %v541_v52 = vld [vmem:[#allocation5 + $0xc08] sm:$0xff]  ;;  %v543_v53 = vld [vmem:[#allocation5 + $0xc18] sm:$0xff] }
 0x122   :  { %1814 = vmatprep.subr.bf16.mxu0 %v1277_v54  ;;  %1978 = vmatprep.subr.bf16.mxu1 %v1279_v55  ;;  %v1420_v54 = vunpack.c.h.s8.bf16 %v524_v46  ;;  %v1422_v55 = vunpack.c.h.s8.bf16 %v526_v47  ;;  %v1437_v56 = vunpack.c.l.s8.bf16 %v541_v52  ;;  %v1439_v57 = vunpack.c.l.s8.bf16 %v543_v53 }
 0x125   :  { %1815 = vmatpush1.bf16.msra.mxu0 %v1276_v58  ;;  %1979 = vmatpush1.bf16.msra.mxu1 %v1278_v59  ;;  %v540_v58 = vld [vmem:[#allocation5 + $0xc00] sm:$0xff]  ;;  %v542_v59 = vld [vmem:[#allocation5 + $0xc10] sm:$0xff] }
 0x126   :  { %1816 = vmatprep.subr.bf16.mxu0 %v1293_v60  ;;  %1980 = vmatprep.subr.bf16.mxu1 %v1295_v61  ;;  %v7559_v60 = vcombine.low %v7547_v17, %v7547_v17  ;;  %v7564_v61 = vld [vmem:[%s7866_s0 + $0x18] sm:$0xff]  ;;  %v1436_v62 = vunpack.c.l.s8.bf16 %v540_v58  ;;  %v1438_v63 = vunpack.c.l.s8.bf16 %v542_v59  ;;  %v1452_v17 = vunpack.c.h.s8.bf16 %v540_v58 }
 0x127   :  { %v7568_v4 = vcombine.high %v7564_v61, %v7564_v61  ;;  %v1454_v5 = vunpack.c.h.s8.bf16 %v542_v59 }
 0x129   :  { %1817 = vmatpush1.bf16.msra.mxu0 %v1292_v0  ;;  %1981 = vmatpush1.bf16.msra.mxu1 %v1294_v1  ;;  %v1453_v0 = vunpack.c.h.s8.bf16 %v541_v52  ;;  %v1455_v1 = vunpack.c.h.s8.bf16 %v543_v53 }
 0x12a   :  { %1818 = vmatprep.subr.bf16.mxu0 %v1309_v2  ;;  %1982 = vmatprep.subr.bf16.mxu1 %v1311_v3  ;;  %v557_v2 = vld [vmem:[#allocation5 + $0xc88] sm:$0xff]  ;;  %v559_v3 = vld [vmem:[#allocation5 + $0xc98] sm:$0xff] }
 0x12d   :  { %1819 = vmatpush1.bf16.msra.mxu0 %v1308_v6  ;;  %1983 = vmatpush1.bf16.msra.mxu1 %v1310_v7  ;;  %v1469_v6 = vunpack.c.l.s8.bf16 %v557_v2  ;;  %v1471_v7 = vunpack.c.l.s8.bf16 %v559_v3 }
 0x12e   :  { %1820 = vmatprep.subr.bf16.mxu0 %v1325_v8  ;;  %1984 = vmatprep.subr.bf16.mxu1 %v1327_v9  ;;  %v556_v8 = vld [vmem:[#allocation5 + $0xc80] sm:$0xff]  ;;  %v558_v9 = vld [vmem:[#allocation5 + $0xc90] sm:$0xff] }
 0x12f   :  { %v1468_v10 = vunpack.c.l.s8.bf16 %v556_v8  ;;  %v1470_v11 = vunpack.c.l.s8.bf16 %v558_v9  ;;  %v1484_v18 = vunpack.c.h.s8.bf16 %v556_v8  ;;  %v1486_v19 = vunpack.c.h.s8.bf16 %v558_v9 }
 0x131   :  { %1821 = vmatpush1.bf16.msra.mxu0 %v1324_v12  ;;  %1985 = vmatpush1.bf16.msra.mxu1 %v1326_v13  ;;  %v1485_v12 = vunpack.c.h.s8.bf16 %v557_v2  ;;  %v1487_v13 = vunpack.c.h.s8.bf16 %v559_v3 }
 0x132   :  { %1822 = vmatprep.subr.bf16.mxu0 %v1341_v14  ;;  %1986 = vmatprep.subr.bf16.mxu1 %v1343_v15  ;;  %v573_v14 = vld [vmem:[#allocation5 + $0xd08] sm:$0xff]  ;;  %v575_v15 = vld [vmem:[#allocation5 + $0xd18] sm:$0xff] }
 0x135   :  { %1823 = vmatpush1.bf16.msra.mxu0 %v1340_v20  ;;  %1987 = vmatpush1.bf16.msra.mxu1 %v1342_v21  ;;  %v1501_v20 = vunpack.c.l.s8.bf16 %v573_v14  ;;  %v1503_v21 = vunpack.c.l.s8.bf16 %v575_v15 }
 0x136   :  { %1824 = vmatprep.subr.bf16.mxu0 %v1357_v22  ;;  %1988 = vmatprep.subr.bf16.mxu1 %v1359_v23  ;;  %v572_v22 = vld [vmem:[#allocation5 + $0xd00] sm:$0xff]  ;;  %v574_v23 = vld [vmem:[#allocation5 + $0xd10] sm:$0xff] }
 0x137   :  { %v1500_v43 = vunpack.c.l.s8.bf16 %v572_v22  ;;  %v1502_v25 = vunpack.c.l.s8.bf16 %v574_v23  ;;  %v1516_v31 = vunpack.c.h.s8.bf16 %v572_v22  ;;  %v1518_v32 = vunpack.c.h.s8.bf16 %v574_v23 }
 0x139   :  { %1825 = vmatpush1.bf16.msra.mxu0 %v1356_v26  ;;  %1989 = vmatpush1.bf16.msra.mxu1 %v1358_v27  ;;  %v1517_v26 = vunpack.c.h.s8.bf16 %v573_v14  ;;  %v1519_v27 = vunpack.c.h.s8.bf16 %v575_v15 }
 0x13a   :  { %1826 = vmatprep.subr.bf16.mxu0 %v1373_v28  ;;  %1990 = vmatprep.subr.bf16.mxu1 %v1375_v29  ;;  %v589_v28 = vld [vmem:[#allocation5 + $0xd88] sm:$0xff]  ;;  %v591_v29 = vld [vmem:[#allocation5 + $0xd98] sm:$0xff] }
 0x13d   :  { %1827 = vmatpush1.bf16.msra.mxu0 %v1372_v33  ;;  %1991 = vmatpush1.bf16.msra.mxu1 %v1374_v34  ;;  %v1533_v33 = vunpack.c.l.s8.bf16 %v589_v28  ;;  %v1535_v34 = vunpack.c.l.s8.bf16 %v591_v29 }
 0x13e   :  { %1828 = vmatprep.subr.bf16.mxu0 %v1389_v36  ;;  %1992 = vmatprep.subr.bf16.mxu1 %v1391_v37  ;;  %v588_v36 = vld [vmem:[#allocation5 + $0xd80] sm:$0xff]  ;;  %v590_v37 = vld [vmem:[#allocation5 + $0xd90] sm:$0xff] }
 0x13f   :  { %v1532_v38 = vunpack.c.l.s8.bf16 %v588_v36  ;;  %v1534_v39 = vunpack.c.l.s8.bf16 %v590_v37  ;;  %v1548_v46 = vunpack.c.h.s8.bf16 %v588_v36  ;;  %v1550_v47 = vunpack.c.h.s8.bf16 %v590_v37 }
 0x141   :  { %1829 = vmatpush1.bf16.msra.mxu0 %v1388_v40  ;;  %1993 = vmatpush1.bf16.msra.mxu1 %v1390_v41  ;;  %v1549_v40 = vunpack.c.h.s8.bf16 %v589_v28  ;;  %v1551_v41 = vunpack.c.h.s8.bf16 %v591_v29 }
 0x142   :  { %1830 = vmatprep.subr.bf16.mxu0 %v1405_v44  ;;  %1994 = vmatprep.subr.bf16.mxu1 %v1407_v45  ;;  %v605_v44 = vld [vmem:[#allocation5 + $0xe08] sm:$0xff]  ;;  %v607_v45 = vld [vmem:[#allocation5 + $0xe18] sm:$0xff] }
 0x145   :  { %1831 = vmatpush1.bf16.msra.mxu0 %v1404_v48  ;;  %1995 = vmatpush1.bf16.msra.mxu1 %v1406_v49  ;;  %v1565_v48 = vunpack.c.l.s8.bf16 %v605_v44  ;;  %v1567_v49 = vunpack.c.l.s8.bf16 %v607_v45 }
 0x146   :  { %1832 = vmatprep.subr.bf16.mxu0 %v1421_v30  ;;  %1996 = vmatprep.subr.bf16.mxu1 %v1423_v51  ;;  %v604_v30 = vld [vmem:[#allocation5 + $0xe00] sm:$0xff]  ;;  %v606_v51 = vld [vmem:[#allocation5 + $0xe10] sm:$0xff] }
 0x147   :  { %v1564_v52 = vunpack.c.l.s8.bf16 %v604_v30  ;;  %v1566_v53 = vunpack.c.l.s8.bf16 %v606_v51  ;;  %v1580_v58 = vunpack.c.h.s8.bf16 %v604_v30  ;;  %v1582_v59 = vunpack.c.h.s8.bf16 %v606_v51  ;;  %v179_v30 = vld [vmem:[#allocation5 + $0xb8] sm:$0xff] }
 0x149   :  { %1833 = vmatpush1.bf16.msra.mxu0 %v1420_v54  ;;  %1997 = vmatpush1.bf16.msra.mxu1 %v1422_v55  ;;  %v1581_v54 = vunpack.c.h.s8.bf16 %v605_v44  ;;  %v1583_v55 = vunpack.c.h.s8.bf16 %v607_v45  ;;  %v7576_v44 = vcombine.low %v7564_v61, %v7564_v61 }
 0x14a   :  { %1843 = vmatprep.subr.bf16.mxu0 %v1437_v56  ;;  %2007 = vmatprep.subr.bf16.mxu1 %v1439_v57  ;;  %v621_v56 = vld [vmem:[#allocation5 + $0xe88] sm:$0xff]  ;;  %v623_v57 = vld [vmem:[#allocation5 + $0xe98] sm:$0xff] }
 0x14c   :  { %1835 = vmatmul.mubr.bf16.vlgmr.msra.gmra.mrb[0].mxu0 %v7559_v60  ;;  %1999 = vmatmul.mubr.bf16.vlgmr.msra.gmra.mrb[0].mxu1 %v7559_v60 }
 0x14d   :  { %1844 = vmatpush1.bf16.msra.mxu0 %v1436_v62  ;;  %2008 = vmatpush1.bf16.msra.mxu1 %v1438_v63  ;;  %v1597_v62 = vunpack.c.l.s8.bf16 %v621_v56  ;;  %v1599_v63 = vunpack.c.l.s8.bf16 %v623_v57 }
 0x14e   :  { %1845 = vmatprep.subr.bf16.mxu0 %v1453_v0  ;;  %2009 = vmatprep.subr.bf16.mxu1 %v1455_v1  ;;  %v620_v0 = vld [vmem:[#allocation5 + $0xe80] sm:$0xff]  ;;  %v622_v1 = vld [vmem:[#allocation5 + $0xe90] sm:$0xff] }
 0x14f   :  { %1875 = vmatprep.mubr.bf16.mxu0 %v7568_v4  ;;  %2039 = vmatprep.mubr.bf16.mxu1 %v7568_v4  ;;  %v1596_v2 = vunpack.c.l.s8.bf16 %v620_v0  ;;  %v1598_v3 = vunpack.c.l.s8.bf16 %v622_v1  ;;  %v1612_v8 = vunpack.c.h.s8.bf16 %v620_v0  ;;  %v1614_v9 = vunpack.c.h.s8.bf16 %v622_v1 }
 0x151   :  { %1846 = vmatpush1.bf16.msra.mxu0 %v1452_v17  ;;  %2010 = vmatpush1.bf16.msra.mxu1 %v1454_v5  ;;  %v1613_v17 = vunpack.c.h.s8.bf16 %v621_v56  ;;  %v1615_v5 = vunpack.c.h.s8.bf16 %v623_v57 }
 0x152   :  { %1847 = vmatprep.subr.bf16.mxu0 %v1469_v6  ;;  %2011 = vmatprep.subr.bf16.mxu1 %v1471_v7  ;;  %v637_v6 = vld [vmem:[#allocation5 + $0xf08] sm:$0xff]  ;;  %v639_v7 = vld [vmem:[#allocation5 + $0xf18] sm:$0xff] }
 0x155   :  { %1848 = vmatpush1.bf16.msra.mxu0 %v1468_v10  ;;  %2012 = vmatpush1.bf16.msra.mxu1 %v1470_v11  ;;  %v1629_v10 = vunpack.c.l.s8.bf16 %v637_v6  ;;  %v1631_v11 = vunpack.c.l.s8.bf16 %v639_v7 }
 0x156   :  { %1849 = vmatprep.subr.bf16.mxu0 %v1485_v12  ;;  %2013 = vmatprep.subr.bf16.mxu1 %v1487_v13  ;;  %v636_v12 = vld [vmem:[#allocation5 + $0xf00] sm:$0xff]  ;;  %v638_v13 = vld [vmem:[#allocation5 + $0xf10] sm:$0xff] }
 0x157   :  { %v1628_v14 = vunpack.c.l.s8.bf16 %v636_v12  ;;  %v1630_v15 = vunpack.c.l.s8.bf16 %v638_v13  ;;  %v1644_v22 = vunpack.c.h.s8.bf16 %v636_v12  ;;  %v1646_v23 = vunpack.c.h.s8.bf16 %v638_v13 }
 0x159   :  { %1850 = vmatpush1.bf16.msra.mxu0 %v1484_v18  ;;  %2014 = vmatpush1.bf16.msra.mxu1 %v1486_v19  ;;  %v1645_v18 = vunpack.c.h.s8.bf16 %v637_v6  ;;  %v1647_v19 = vunpack.c.h.s8.bf16 %v639_v7 }
 0x15a   :  { %1851 = vmatprep.subr.bf16.mxu0 %v1501_v20  ;;  %2015 = vmatprep.subr.bf16.mxu1 %v1503_v21  ;;  %v653_v20 = vld [vmem:[#allocation5 + $0xf88] sm:$0xff]  ;;  %v655_v21 = vld [vmem:[#allocation5 + $0xf98] sm:$0xff] }
 0x15d   :  { %1852 = vmatpush1.bf16.msra.mxu0 %v1500_v43  ;;  %2016 = vmatpush1.bf16.msra.mxu1 %v1502_v25  ;;  %v1661_v43 = vunpack.c.l.s8.bf16 %v653_v20  ;;  %v1663_v25 = vunpack.c.l.s8.bf16 %v655_v21 }
 0x15e   :  { %1853 = vmatprep.subr.bf16.mxu0 %v1517_v26  ;;  %2017 = vmatprep.subr.bf16.mxu1 %v1519_v27  ;;  %v652_v26 = vld [vmem:[#allocation5 + $0xf80] sm:$0xff]  ;;  %v654_v27 = vld [vmem:[#allocation5 + $0xf90] sm:$0xff] }
 0x15f   :  { %v1660_v28 = vunpack.c.l.s8.bf16 %v652_v26  ;;  %v1662_v29 = vunpack.c.l.s8.bf16 %v654_v27  ;;  %v1676_v36 = vunpack.c.h.s8.bf16 %v652_v26  ;;  %v1678_v37 = vunpack.c.h.s8.bf16 %v654_v27 }
 0x161   :  { %1854 = vmatpush1.bf16.msra.mxu0 %v1516_v31  ;;  %2018 = vmatpush1.bf16.msra.mxu1 %v1518_v32  ;;  %v1677_v31 = vunpack.c.h.s8.bf16 %v653_v20  ;;  %v1679_v32 = vunpack.c.h.s8.bf16 %v655_v21 }
 0x162   :  { %1855 = vmatprep.subr.bf16.mxu0 %v1533_v33  ;;  %2019 = vmatprep.subr.bf16.mxu1 %v1535_v34  ;;  %v161_v33 = vld [vmem:[#allocation5 + $0x28] sm:$0xff]  ;;  %v163_v34 = vld [vmem:[#allocation5 + $0x38] sm:$0xff] }
 0x165   :  { %1856 = vmatpush1.bf16.msra.mxu0 %v1532_v38  ;;  %2020 = vmatpush1.bf16.msra.mxu1 %v1534_v39  ;;  %v673_v38 = vunpack.c.l.s8.bf16 %v161_v33  ;;  %v675_v39 = vunpack.c.l.s8.bf16 %v163_v34 }
 0x166   :  { %1857 = vmatprep.subr.bf16.mxu0 %v1549_v40  ;;  %2021 = vmatprep.subr.bf16.mxu1 %v1551_v41  ;;  %v160_v40 = vld [vmem:[#allocation5 + $0x20] sm:$0xff]  ;;  %v162_v41 = vld [vmem:[#allocation5 + $0x30] sm:$0xff] }
 0x167   :  { %v672_v45 = vunpack.c.l.s8.bf16 %v160_v40  ;;  %v688_v51 = vunpack.c.h.s8.bf16 %v160_v40 }
 0x169   :  { %1858 = vmatpush1.bf16.msra.mxu0 %v1548_v46  ;;  %2022 = vmatpush1.bf16.msra.mxu1 %v1550_v47  ;;  %v674_v46 = vunpack.c.l.s8.bf16 %v162_v41  ;;  %v689_v47 = vunpack.c.h.s8.bf16 %v161_v33 }
 0x16a   :  { %1859 = vmatprep.subr.bf16.mxu0 %v1565_v48  ;;  %2023 = vmatprep.subr.bf16.mxu1 %v1567_v49  ;;  %v691_v48 = vunpack.c.h.s8.bf16 %v163_v34  ;;  %v177_v49 = vld [vmem:[#allocation5 + $0xa8] sm:$0xff] }
 0x16b   :  { %v705_v61 = vunpack.c.l.s8.bf16 %v177_v49 }
 0x16d   :  { %1860 = vmatpush1.bf16.msra.mxu0 %v1564_v52  ;;  %2024 = vmatpush1.bf16.msra.mxu1 %v1566_v53  ;;  %v690_v52 = vunpack.c.h.s8.bf16 %v162_v41  ;;  %v707_v53 = vunpack.c.l.s8.bf16 %v179_v30 }
 0x16e   :  { %1861 = vmatprep.subr.bf16.mxu0 %v1581_v54  ;;  %2025 = vmatprep.subr.bf16.mxu1 %v1583_v55  ;;  %v176_v54 = vld [vmem:[#allocation5 + $0xa0] sm:$0xff]  ;;  %v178_v55 = vld [vmem:[#allocation5 + $0xb0] sm:$0xff] }
 0x16f   :  { %v704_v56 = vunpack.c.l.s8.bf16 %v176_v54  ;;  %v706_v57 = vunpack.c.l.s8.bf16 %v178_v55  ;;  %v720_v0 = vunpack.c.h.s8.bf16 %v176_v54  ;;  %v722_v1 = vunpack.c.h.s8.bf16 %v178_v55 }
 0x171   :  { %1862 = vmatpush1.bf16.msra.mxu0 %v1580_v58  ;;  %2026 = vmatpush1.bf16.msra.mxu1 %v1582_v59  ;;  %v721_v58 = vunpack.c.h.s8.bf16 %v177_v49  ;;  %v723_v59 = vunpack.c.h.s8.bf16 %v179_v30 }
 0x172   :  { %1863 = vmatprep.subr.bf16.mxu0 %v1597_v62  ;;  %2027 = vmatprep.subr.bf16.mxu1 %v1599_v63  ;;  %v193_v62 = vld [vmem:[#allocation5 + $0x128] sm:$0xff]  ;;  %v195_v63 = vld [vmem:[#allocation5 + $0x138] sm:$0xff] }
 0x175   :  { %1864 = vmatpush1.bf16.msra.mxu0 %v1596_v2  ;;  %2028 = vmatpush1.bf16.msra.mxu1 %v1598_v3  ;;  %v737_v2 = vunpack.c.l.s8.bf16 %v193_v62  ;;  %v739_v3 = vunpack.c.l.s8.bf16 %v195_v63 }
 0x176   :  { %1865 = vmatprep.subr.bf16.mxu0 %v1613_v17  ;;  %2029 = vmatprep.subr.bf16.mxu1 %v1615_v5  ;;  %v192_v17 = vld [vmem:[#allocation5 + $0x120] sm:$0xff]  ;;  %v194_v5 = vld [vmem:[#allocation5 + $0x130] sm:$0xff] }
 0x177   :  { %v736_v6 = vunpack.c.l.s8.bf16 %v192_v17  ;;  %v738_v7 = vunpack.c.l.s8.bf16 %v194_v5  ;;  %v752_v12 = vunpack.c.h.s8.bf16 %v192_v17  ;;  %v754_v13 = vunpack.c.h.s8.bf16 %v194_v5 }
 0x179   :  { %1866 = vmatpush1.bf16.msra.mxu0 %v1612_v8  ;;  %2030 = vmatpush1.bf16.msra.mxu1 %v1614_v9  ;;  %v753_v8 = vunpack.c.h.s8.bf16 %v193_v62  ;;  %v755_v9 = vunpack.c.h.s8.bf16 %v195_v63 }
 0x17a   :  { %1867 = vmatprep.subr.bf16.mxu0 %v1629_v10  ;;  %2031 = vmatprep.subr.bf16.mxu1 %v1631_v11  ;;  %v209_v10 = vld [vmem:[#allocation5 + $0x1a8] sm:$0xff]  ;;  %v211_v11 = vld [vmem:[#allocation5 + $0x1b8] sm:$0xff] }
 0x17d   :  { %1868 = vmatpush1.bf16.msra.mxu0 %v1628_v14  ;;  %2032 = vmatpush1.bf16.msra.mxu1 %v1630_v15  ;;  %v769_v14 = vunpack.c.l.s8.bf16 %v209_v10  ;;  %v771_v15 = vunpack.c.l.s8.bf16 %v211_v11 }
 0x17e   :  { %1869 = vmatprep.subr.bf16.mxu0 %v1645_v18  ;;  %2033 = vmatprep.subr.bf16.mxu1 %v1647_v19  ;;  %v208_v18 = vld [vmem:[#allocation5 + $0x1a0] sm:$0xff]  ;;  %v210_v19 = vld [vmem:[#allocation5 + $0x1b0] sm:$0xff] }
 0x17f   :  { %v768_v20 = vunpack.c.l.s8.bf16 %v208_v18  ;;  %v770_v21 = vunpack.c.l.s8.bf16 %v210_v19  ;;  %v784_v26 = vunpack.c.h.s8.bf16 %v208_v18  ;;  %v786_v27 = vunpack.c.h.s8.bf16 %v210_v19 }
 0x181   :  { %1870 = vmatpush1.bf16.msra.mxu0 %v1644_v22  ;;  %2034 = vmatpush1.bf16.msra.mxu1 %v1646_v23  ;;  %v785_v22 = vunpack.c.h.s8.bf16 %v209_v10  ;;  %v787_v23 = vunpack.c.h.s8.bf16 %v211_v11 }
 0x182   :  { %1871 = vmatprep.subr.bf16.mxu0 %v1661_v43  ;;  %2035 = vmatprep.subr.bf16.mxu1 %v1663_v25  ;;  %v225_v43 = vld [vmem:[#allocation5 + $0x228] sm:$0xff]  ;;  %v227_v25 = vld [vmem:[#allocation5 + $0x238] sm:$0xff] }
 0x185   :  { %1872 = vmatpush1.bf16.msra.mxu0 %v1660_v28  ;;  %2036 = vmatpush1.bf16.msra.mxu1 %v1662_v29  ;;  %v801_v28 = vunpack.c.l.s8.bf16 %v225_v43  ;;  %v803_v29 = vunpack.c.l.s8.bf16 %v227_v25 }
 0x186   :  { %1873 = vmatprep.subr.bf16.mxu0 %v1677_v31  ;;  %2037 = vmatprep.subr.bf16.mxu1 %v1679_v32  ;;  %v224_v31 = vld [vmem:[#allocation5 + $0x220] sm:$0xff]  ;;  %v226_v32 = vld [vmem:[#allocation5 + $0x230] sm:$0xff] }
 0x187   :  { %v800_v33 = vunpack.c.l.s8.bf16 %v224_v31  ;;  %v802_v34 = vunpack.c.l.s8.bf16 %v226_v32  ;;  %v816_v40 = vunpack.c.h.s8.bf16 %v224_v31  ;;  %v818_v41 = vunpack.c.h.s8.bf16 %v226_v32 }
 0x189   :  { %1874 = vmatpush1.bf16.msra.mxu0 %v1676_v36  ;;  %2038 = vmatpush1.bf16.msra.mxu1 %v1678_v37  ;;  %v817_v36 = vunpack.c.h.s8.bf16 %v225_v43  ;;  %v819_v37 = vunpack.c.h.s8.bf16 %v227_v25 }
 0x18a   :  { %2048 = vmatprep.subr.bf16.mxu0 %v673_v38  ;;  %2212 = vmatprep.subr.bf16.mxu1 %v675_v39  ;;  %v241_v38 = vld [vmem:[#allocation5 + $0x2a8] sm:$0xff]  ;;  %v243_v39 = vld [vmem:[#allocation5 + $0x2b8] sm:$0xff] }
 0x18c   :  { %1876 = vmatmul.mubr.bf16.vlgmr.msra.gmra.mrb[0].mxu0 %v7576_v44  ;;  %2040 = vmatmul.mubr.bf16.vlgmr.msra.gmra.mrb[0].mxu1 %v7576_v44 }
 0x18d   :  { %2049 = vmatpush1.bf16.msra.mxu0 %v672_v45  ;;  %2213 = vmatpush1.bf16.msra.mxu1 %v674_v46  ;;  %v833_v45 = vunpack.c.l.s8.bf16 %v241_v38  ;;  %v835_v46 = vunpack.c.l.s8.bf16 %v243_v39 }
 0x18e   :  { %2050 = vmatprep.subr.bf16.mxu0 %v689_v47  ;;  %2214 = vmatprep.subr.bf16.mxu1 %v691_v48  ;;  %v240_v47 = vld [vmem:[#allocation5 + $0x2a0] sm:$0xff]  ;;  %v242_v48 = vld [vmem:[#allocation5 + $0x2b0] sm:$0xff] }
 0x18f   :  { %2080 = vmatprep.mubr.bf16.mxu0 %v7519_v35  ;;  %2244 = vmatprep.mubr.bf16.mxu1 %v7519_v35  ;;  %v832_v49 = vunpack.c.l.s8.bf16 %v240_v47  ;;  %v834_v30 = vunpack.c.l.s8.bf16 %v242_v48  ;;  %v848_v54 = vunpack.c.h.s8.bf16 %v240_v47  ;;  %v850_v55 = vunpack.c.h.s8.bf16 %v242_v48 }
 0x191   :  { %2051 = vmatpush1.bf16.msra.mxu0 %v688_v51  ;;  %2215 = vmatpush1.bf16.msra.mxu1 %v690_v52  ;;  %v849_v51 = vunpack.c.h.s8.bf16 %v241_v38  ;;  %v851_v52 = vunpack.c.h.s8.bf16 %v243_v39 }
 0x192   :  { %2052 = vmatprep.subr.bf16.mxu0 %v705_v61  ;;  %2216 = vmatprep.subr.bf16.mxu1 %v707_v53  ;;  %v257_v61 = vld [vmem:[#allocation5 + $0x328] sm:$0xff]  ;;  %v259_v53 = vld [vmem:[#allocation5 + $0x338] sm:$0xff] }
 0x195   :  { %2053 = vmatpush1.bf16.msra.mxu0 %v704_v56  ;;  %2217 = vmatpush1.bf16.msra.mxu1 %v706_v57  ;;  %v865_v56 = vunpack.c.l.s8.bf16 %v257_v61  ;;  %v867_v57 = vunpack.c.l.s8.bf16 %v259_v53 }
 0x196   :  { %2054 = vmatprep.subr.bf16.mxu0 %v721_v58  ;;  %2218 = vmatprep.subr.bf16.mxu1 %v723_v59  ;;  %v256_v58 = vld [vmem:[#allocation5 + $0x320] sm:$0xff]  ;;  %v258_v59 = vld [vmem:[#allocation5 + $0x330] sm:$0xff] }
 0x197   :  { %v864_v62 = vunpack.c.l.s8.bf16 %v256_v58  ;;  %v866_v63 = vunpack.c.l.s8.bf16 %v258_v59  ;;  %v880_v17 = vunpack.c.h.s8.bf16 %v256_v58  ;;  %v882_v5 = vunpack.c.h.s8.bf16 %v258_v59 }
 0x199   :  { %2055 = vmatpush1.bf16.msra.mxu0 %v720_v0  ;;  %2219 = vmatpush1.bf16.msra.mxu1 %v722_v1  ;;  %v881_v0 = vunpack.c.h.s8.bf16 %v257_v61  ;;  %v883_v1 = vunpack.c.h.s8.bf16 %v259_v53 }
 0x19a   :  { %2056 = vmatprep.subr.bf16.mxu0 %v737_v2  ;;  %2220 = vmatprep.subr.bf16.mxu1 %v739_v3  ;;  %v273_v2 = vld [vmem:[#allocation5 + $0x3a8] sm:$0xff]  ;;  %v275_v3 = vld [vmem:[#allocation5 + $0x3b8] sm:$0xff] }
 0x19d   :  { %2057 = vmatpush1.bf16.msra.mxu0 %v736_v6  ;;  %2221 = vmatpush1.bf16.msra.mxu1 %v738_v7  ;;  %v897_v6 = vunpack.c.l.s8.bf16 %v273_v2  ;;  %v899_v7 = vunpack.c.l.s8.bf16 %v275_v3 }
 0x19e   :  { %2058 = vmatprep.subr.bf16.mxu0 %v753_v8  ;;  %2222 = vmatprep.subr.bf16.mxu1 %v755_v9  ;;  %v272_v8 = vld [vmem:[#allocation5 + $0x3a0] sm:$0xff]  ;;  %v274_v9 = vld [vmem:[#allocation5 + $0x3b0] sm:$0xff] }
 0x19f   :  { %v896_v10 = vunpack.c.l.s8.bf16 %v272_v8  ;;  %v898_v11 = vunpack.c.l.s8.bf16 %v274_v9  ;;  %v912_v18 = vunpack.c.h.s8.bf16 %v272_v8  ;;  %v914_v19 = vunpack.c.h.s8.bf16 %v274_v9 }
 0x1a1   :  { %2059 = vmatpush1.bf16.msra.mxu0 %v752_v12  ;;  %2223 = vmatpush1.bf16.msra.mxu1 %v754_v13  ;;  %v913_v12 = vunpack.c.h.s8.bf16 %v273_v2  ;;  %v915_v13 = vunpack.c.h.s8.bf16 %v275_v3 }
 0x1a2   :  { %2060 = vmatprep.subr.bf16.mxu0 %v769_v14  ;;  %2224 = vmatprep.subr.bf16.mxu1 %v771_v15  ;;  %v289_v14 = vld [vmem:[#allocation5 + $0x428] sm:$0xff]  ;;  %v291_v15 = vld [vmem:[#allocation5 + $0x438] sm:$0xff] }
 0x1a5   :  { %2061 = vmatpush1.bf16.msra.mxu0 %v768_v20  ;;  %2225 = vmatpush1.bf16.msra.mxu1 %v770_v21  ;;  %v929_v20 = vunpack.c.l.s8.bf16 %v289_v14  ;;  %v931_v21 = vunpack.c.l.s8.bf16 %v291_v15 }
 0x1a6   :  { %2062 = vmatprep.subr.bf16.mxu0 %v785_v22  ;;  %2226 = vmatprep.subr.bf16.mxu1 %v787_v23  ;;  %v288_v22 = vld [vmem:[#allocation5 + $0x420] sm:$0xff]  ;;  %v290_v23 = vld [vmem:[#allocation5 + $0x430] sm:$0xff] }
 0x1a7   :  { %v928_v43 = vunpack.c.l.s8.bf16 %v288_v22  ;;  %v930_v25 = vunpack.c.l.s8.bf16 %v290_v23  ;;  %v944_v31 = vunpack.c.h.s8.bf16 %v288_v22  ;;  %v946_v32 = vunpack.c.h.s8.bf16 %v290_v23 }
 0x1a9   :  { %2063 = vmatpush1.bf16.msra.mxu0 %v784_v26  ;;  %2227 = vmatpush1.bf16.msra.mxu1 %v786_v27  ;;  %v945_v26 = vunpack.c.h.s8.bf16 %v289_v14  ;;  %v947_v27 = vunpack.c.h.s8.bf16 %v291_v15 }
 0x1aa   :  { %2064 = vmatprep.subr.bf16.mxu0 %v801_v28  ;;  %2228 = vmatprep.subr.bf16.mxu1 %v803_v29  ;;  %v305_v28 = vld [vmem:[#allocation5 + $0x4a8] sm:$0xff]  ;;  %v307_v29 = vld [vmem:[#allocation5 + $0x4b8] sm:$0xff] }
 0x1ad   :  { %2065 = vmatpush1.bf16.msra.mxu0 %v800_v33  ;;  %2229 = vmatpush1.bf16.msra.mxu1 %v802_v34  ;;  %v961_v33 = vunpack.c.l.s8.bf16 %v305_v28  ;;  %v963_v34 = vunpack.c.l.s8.bf16 %v307_v29 }
 0x1ae   :  { %2066 = vmatprep.subr.bf16.mxu0 %v817_v36  ;;  %2230 = vmatprep.subr.bf16.mxu1 %v819_v37  ;;  %v304_v36 = vld [vmem:[#allocation5 + $0x4a0] sm:$0xff]  ;;  %v306_v37 = vld [vmem:[#allocation5 + $0x4b0] sm:$0xff] }
 0x1af   :  { %v960_v38 = vunpack.c.l.s8.bf16 %v304_v36  ;;  %v962_v39 = vunpack.c.l.s8.bf16 %v306_v37  ;;  %v976_v47 = vunpack.c.h.s8.bf16 %v304_v36  ;;  %v978_v48 = vunpack.c.h.s8.bf16 %v306_v37 }
 0x1b1   :  { %2067 = vmatpush1.bf16.msra.mxu0 %v816_v40  ;;  %2231 = vmatpush1.bf16.msra.mxu1 %v818_v41  ;;  %v977_v40 = vunpack.c.h.s8.bf16 %v305_v28  ;;  %v979_v41 = vunpack.c.h.s8.bf16 %v307_v29 }
 0x1b2   :  { %2068 = vmatprep.subr.bf16.mxu0 %v833_v45  ;;  %2232 = vmatprep.subr.bf16.mxu1 %v835_v46  ;;  %v321_v45 = vld [vmem:[#allocation5 + $0x528] sm:$0xff]  ;;  %v323_v46 = vld [vmem:[#allocation5 + $0x538] sm:$0xff] }
 0x1b5   :  { %2069 = vmatpush1.bf16.msra.mxu0 %v832_v49  ;;  %2233 = vmatpush1.bf16.msra.mxu1 %v834_v30  ;;  %v993_v49 = vunpack.c.l.s8.bf16 %v321_v45  ;;  %v995_v30 = vunpack.c.l.s8.bf16 %v323_v46 }
 0x1b6   :  { %2070 = vmatprep.subr.bf16.mxu0 %v849_v51  ;;  %2234 = vmatprep.subr.bf16.mxu1 %v851_v52  ;;  %v320_v51 = vld [vmem:[#allocation5 + $0x520] sm:$0xff]  ;;  %v322_v52 = vld [vmem:[#allocation5 + $0x530] sm:$0xff] }
 0x1b7   :  { %v992_v61 = vunpack.c.l.s8.bf16 %v320_v51  ;;  %v994_v53 = vunpack.c.l.s8.bf16 %v322_v52  ;;  %v1008_v58 = vunpack.c.h.s8.bf16 %v320_v51  ;;  %v1010_v59 = vunpack.c.h.s8.bf16 %v322_v52 }
 0x1b9   :  { %2071 = vmatpush1.bf16.msra.mxu0 %v848_v54  ;;  %2235 = vmatpush1.bf16.msra.mxu1 %v850_v55  ;;  %v1009_v54 = vunpack.c.h.s8.bf16 %v321_v45  ;;  %v1011_v55 = vunpack.c.h.s8.bf16 %v323_v46 }
 0x1ba   :  { %2072 = vmatprep.subr.bf16.mxu0 %v865_v56  ;;  %2236 = vmatprep.subr.bf16.mxu1 %v867_v57  ;;  %v337_v56 = vld [vmem:[#allocation5 + $0x5a8] sm:$0xff]  ;;  %v339_v57 = vld [vmem:[#allocation5 + $0x5b8] sm:$0xff] }
 0x1bd   :  { %2073 = vmatpush1.bf16.msra.mxu0 %v864_v62  ;;  %2237 = vmatpush1.bf16.msra.mxu1 %v866_v63  ;;  %v1025_v62 = vunpack.c.l.s8.bf16 %v337_v56  ;;  %v1027_v63 = vunpack.c.l.s8.bf16 %v339_v57 }
 0x1be   :  { %2074 = vmatprep.subr.bf16.mxu0 %v881_v0  ;;  %2238 = vmatprep.subr.bf16.mxu1 %v883_v1  ;;  %v336_v0 = vld [vmem:[#allocation5 + $0x5a0] sm:$0xff]  ;;  %v338_v1 = vld [vmem:[#allocation5 + $0x5b0] sm:$0xff] }
 0x1bf   :  { %v1024_v2 = vunpack.c.l.s8.bf16 %v336_v0  ;;  %v1026_v3 = vunpack.c.l.s8.bf16 %v338_v1  ;;  %v1040_v8 = vunpack.c.h.s8.bf16 %v336_v0  ;;  %v1042_v9 = vunpack.c.h.s8.bf16 %v338_v1 }
 0x1c1   :  { %2075 = vmatpush1.bf16.msra.mxu0 %v880_v17  ;;  %2239 = vmatpush1.bf16.msra.mxu1 %v882_v5  ;;  %v1041_v17 = vunpack.c.h.s8.bf16 %v337_v56  ;;  %v1043_v5 = vunpack.c.h.s8.bf16 %v339_v57 }
 0x1c2   :  { %2076 = vmatprep.subr.bf16.mxu0 %v897_v6  ;;  %2240 = vmatprep.subr.bf16.mxu1 %v899_v7  ;;  %v353_v6 = vld [vmem:[#allocation5 + $0x628] sm:$0xff]  ;;  %v355_v7 = vld [vmem:[#allocation5 + $0x638] sm:$0xff] }
 0x1c5   :  { %2077 = vmatpush1.bf16.msra.mxu0 %v896_v10  ;;  %2241 = vmatpush1.bf16.msra.mxu1 %v898_v11  ;;  %v1057_v10 = vunpack.c.l.s8.bf16 %v353_v6  ;;  %v1059_v11 = vunpack.c.l.s8.bf16 %v355_v7 }
 0x1c6   :  { %2078 = vmatprep.subr.bf16.mxu0 %v913_v12  ;;  %2242 = vmatprep.subr.bf16.mxu1 %v915_v13  ;;  %v352_v12 = vld [vmem:[#allocation5 + $0x620] sm:$0xff]  ;;  %v354_v13 = vld [vmem:[#allocation5 + $0x630] sm:$0xff] }
 0x1c7   :  { %v1056_v14 = vunpack.c.l.s8.bf16 %v352_v12  ;;  %v1058_v15 = vunpack.c.l.s8.bf16 %v354_v13  ;;  %v1072_v22 = vunpack.c.h.s8.bf16 %v352_v12  ;;  %v1074_v23 = vunpack.c.h.s8.bf16 %v354_v13 }
 0x1c9   :  { %2079 = vmatpush1.bf16.msra.mxu0 %v912_v18  ;;  %2243 = vmatpush1.bf16.msra.mxu1 %v914_v19  ;;  %v1073_v18 = vunpack.c.h.s8.bf16 %v353_v6  ;;  %v1075_v19 = vunpack.c.h.s8.bf16 %v355_v7 }
 0x1ca   :  { %2089 = vmatprep.subr.bf16.mxu0 %v929_v20  ;;  %2253 = vmatprep.subr.bf16.mxu1 %v931_v21  ;;  %v369_v20 = vld [vmem:[#allocation5 + $0x6a8] sm:$0xff]  ;;  %v371_v21 = vld [vmem:[#allocation5 + $0x6b8] sm:$0xff] }
 0x1cc   :  { %2081 = vmatmul.mubr.bf16.vlgmr.msra.gmra.mrb[4].mxu0 %v7525_v42  ;;  %2245 = vmatmul.mubr.bf16.vlgmr.msra.gmra.mrb[4].mxu1 %v7525_v42 }
 0x1cd   :  { %2090 = vmatpush1.bf16.msra.mxu0 %v928_v43  ;;  %2254 = vmatpush1.bf16.msra.mxu1 %v930_v25  ;;  %v1089_v43 = vunpack.c.l.s8.bf16 %v369_v20  ;;  %v1091_v25 = vunpack.c.l.s8.bf16 %v371_v21 }
 0x1ce   :  { %2091 = vmatprep.subr.bf16.mxu0 %v945_v26  ;;  %2255 = vmatprep.subr.bf16.mxu1 %v947_v27  ;;  %v368_v26 = vld [vmem:[#allocation5 + $0x6a0] sm:$0xff]  ;;  %v370_v27 = vld [vmem:[#allocation5 + $0x6b0] sm:$0xff] }
 0x1cf   :  { %2121 = vmatprep.mubr.bf16.mxu0 %v7534_v50  ;;  %2285 = vmatprep.mubr.bf16.mxu1 %v7534_v50  ;;  %v1088_v28 = vunpack.c.l.s8.bf16 %v368_v26  ;;  %v1090_v29 = vunpack.c.l.s8.bf16 %v370_v27  ;;  %v1104_v36 = vunpack.c.h.s8.bf16 %v368_v26  ;;  %v1106_v37 = vunpack.c.h.s8.bf16 %v370_v27 }
 0x1d1   :  { %2092 = vmatpush1.bf16.msra.mxu0 %v944_v31  ;;  %2256 = vmatpush1.bf16.msra.mxu1 %v946_v32  ;;  %v1105_v31 = vunpack.c.h.s8.bf16 %v369_v20  ;;  %v1107_v32 = vunpack.c.h.s8.bf16 %v371_v21 }
 0x1d2   :  { %2093 = vmatprep.subr.bf16.mxu0 %v961_v33  ;;  %2257 = vmatprep.subr.bf16.mxu1 %v963_v34  ;;  %v385_v33 = vld [vmem:[#allocation5 + $0x728] sm:$0xff]  ;;  %v387_v34 = vld [vmem:[#allocation5 + $0x738] sm:$0xff] }
 0x1d5   :  { %2094 = vmatpush1.bf16.msra.mxu0 %v960_v38  ;;  %2258 = vmatpush1.bf16.msra.mxu1 %v962_v39  ;;  %v1121_v38 = vunpack.c.l.s8.bf16 %v385_v33  ;;  %v1123_v39 = vunpack.c.l.s8.bf16 %v387_v34 }
 0x1d6   :  { %2095 = vmatprep.subr.bf16.mxu0 %v977_v40  ;;  %2259 = vmatprep.subr.bf16.mxu1 %v979_v41  ;;  %v384_v40 = vld [vmem:[#allocation5 + $0x720] sm:$0xff]  ;;  %v386_v41 = vld [vmem:[#allocation5 + $0x730] sm:$0xff] }
 0x1d7   :  { %v1120_v45 = vunpack.c.l.s8.bf16 %v384_v40  ;;  %v1122_v46 = vunpack.c.l.s8.bf16 %v386_v41  ;;  %v1136_v51 = vunpack.c.h.s8.bf16 %v384_v40  ;;  %v1138_v52 = vunpack.c.h.s8.bf16 %v386_v41 }
 0x1d9   :  { %2096 = vmatpush1.bf16.msra.mxu0 %v976_v47  ;;  %2260 = vmatpush1.bf16.msra.mxu1 %v978_v48  ;;  %v1137_v47 = vunpack.c.h.s8.bf16 %v385_v33  ;;  %v1139_v48 = vunpack.c.h.s8.bf16 %v387_v34 }
 0x1da   :  { %2097 = vmatprep.subr.bf16.mxu0 %v993_v49  ;;  %2261 = vmatprep.subr.bf16.mxu1 %v995_v30  ;;  %v401_v49 = vld [vmem:[#allocation5 + $0x7a8] sm:$0xff]  ;;  %v403_v30 = vld [vmem:[#allocation5 + $0x7b8] sm:$0xff] }
 0x1dd   :  { %2098 = vmatpush1.bf16.msra.mxu0 %v992_v61  ;;  %2262 = vmatpush1.bf16.msra.mxu1 %v994_v53  ;;  %v1153_v61 = vunpack.c.l.s8.bf16 %v401_v49  ;;  %v1155_v53 = vunpack.c.l.s8.bf16 %v403_v30 }
 0x1de   :  { %2099 = vmatprep.subr.bf16.mxu0 %v1009_v54  ;;  %2263 = vmatprep.subr.bf16.mxu1 %v1011_v55  ;;  %v400_v54 = vld [vmem:[#allocation5 + $0x7a0] sm:$0xff]  ;;  %v402_v55 = vld [vmem:[#allocation5 + $0x7b0] sm:$0xff] }
 0x1df   :  { %v1152_v56 = vunpack.c.l.s8.bf16 %v400_v54  ;;  %v1154_v57 = vunpack.c.l.s8.bf16 %v402_v55  ;;  %v1168_v0 = vunpack.c.h.s8.bf16 %v400_v54  ;;  %v1170_v1 = vunpack.c.h.s8.bf16 %v402_v55 }
 0x1e1   :  { %2100 = vmatpush1.bf16.msra.mxu0 %v1008_v58  ;;  %2264 = vmatpush1.bf16.msra.mxu1 %v1010_v59  ;;  %v1169_v58 = vunpack.c.h.s8.bf16 %v401_v49  ;;  %v1171_v59 = vunpack.c.h.s8.bf16 %v403_v30 }
 0x1e2   :  { %2101 = vmatprep.subr.bf16.mxu0 %v1025_v62  ;;  %2265 = vmatprep.subr.bf16.mxu1 %v1027_v63  ;;  %v417_v62 = vld [vmem:[#allocation5 + $0x828] sm:$0xff]  ;;  %v419_v63 = vld [vmem:[#allocation5 + $0x838] sm:$0xff] }
 0x1e5   :  { %2102 = vmatpush1.bf16.msra.mxu0 %v1024_v2  ;;  %2266 = vmatpush1.bf16.msra.mxu1 %v1026_v3  ;;  %v1185_v2 = vunpack.c.l.s8.bf16 %v417_v62  ;;  %v1187_v3 = vunpack.c.l.s8.bf16 %v419_v63 }
 0x1e6   :  { %2103 = vmatprep.subr.bf16.mxu0 %v1041_v17  ;;  %2267 = vmatprep.subr.bf16.mxu1 %v1043_v5  ;;  %v416_v17 = vld [vmem:[#allocation5 + $0x820] sm:$0xff]  ;;  %v418_v5 = vld [vmem:[#allocation5 + $0x830] sm:$0xff] }
 0x1e7   :  { %v1184_v6 = vunpack.c.l.s8.bf16 %v416_v17  ;;  %v1186_v7 = vunpack.c.l.s8.bf16 %v418_v5  ;;  %v1200_v12 = vunpack.c.h.s8.bf16 %v416_v17  ;;  %v1202_v13 = vunpack.c.h.s8.bf16 %v418_v5 }
 0x1e9   :  { %2104 = vmatpush1.bf16.msra.mxu0 %v1040_v8  ;;  %2268 = vmatpush1.bf16.msra.mxu1 %v1042_v9  ;;  %v1201_v8 = vunpack.c.h.s8.bf16 %v417_v62  ;;  %v1203_v9 = vunpack.c.h.s8.bf16 %v419_v63 }
 0x1ea   :  { %2105 = vmatprep.subr.bf16.mxu0 %v1057_v10  ;;  %2269 = vmatprep.subr.bf16.mxu1 %v1059_v11  ;;  %v433_v10 = vld [vmem:[#allocation5 + $0x8a8] sm:$0xff]  ;;  %v435_v11 = vld [vmem:[#allocation5 + $0x8b8] sm:$0xff] }
 0x1ed   :  { %2106 = vmatpush1.bf16.msra.mxu0 %v1056_v14  ;;  %2270 = vmatpush1.bf16.msra.mxu1 %v1058_v15  ;;  %v1217_v14 = vunpack.c.l.s8.bf16 %v433_v10  ;;  %v1219_v15 = vunpack.c.l.s8.bf16 %v435_v11 }
 0x1ee   :  { %2107 = vmatprep.subr.bf16.mxu0 %v1073_v18  ;;  %2271 = vmatprep.subr.bf16.mxu1 %v1075_v19  ;;  %v432_v18 = vld [vmem:[#allocation5 + $0x8a0] sm:$0xff]  ;;  %v434_v19 = vld [vmem:[#allocation5 + $0x8b0] sm:$0xff] }
 0x1ef   :  { %v1216_v20 = vunpack.c.l.s8.bf16 %v432_v18  ;;  %v1218_v21 = vunpack.c.l.s8.bf16 %v434_v19  ;;  %v1232_v26 = vunpack.c.h.s8.bf16 %v432_v18  ;;  %v1234_v27 = vunpack.c.h.s8.bf16 %v434_v19 }
 0x1f1   :  { %2108 = vmatpush1.bf16.msra.mxu0 %v1072_v22  ;;  %2272 = vmatpush1.bf16.msra.mxu1 %v1074_v23  ;;  %v1233_v22 = vunpack.c.h.s8.bf16 %v433_v10  ;;  %v1235_v23 = vunpack.c.h.s8.bf16 %v435_v11 }
 0x1f2   :  { %2109 = vmatprep.subr.bf16.mxu0 %v1089_v43  ;;  %2273 = vmatprep.subr.bf16.mxu1 %v1091_v25  ;;  %v449_v43 = vld [vmem:[#allocation5 + $0x928] sm:$0xff]  ;;  %v451_v25 = vld [vmem:[#allocation5 + $0x938] sm:$0xff] }
 0x1f5   :  { %2110 = vmatpush1.bf16.msra.mxu0 %v1088_v28  ;;  %2274 = vmatpush1.bf16.msra.mxu1 %v1090_v29  ;;  %v1249_v28 = vunpack.c.l.s8.bf16 %v449_v43  ;;  %v1251_v29 = vunpack.c.l.s8.bf16 %v451_v25 }
 0x1f6   :  { %2111 = vmatprep.subr.bf16.mxu0 %v1105_v31  ;;  %2275 = vmatprep.subr.bf16.mxu1 %v1107_v32  ;;  %v448_v31 = vld [vmem:[#allocation5 + $0x920] sm:$0xff]  ;;  %v450_v32 = vld [vmem:[#allocation5 + $0x930] sm:$0xff] }
 0x1f7   :  { %v1248_v33 = vunpack.c.l.s8.bf16 %v448_v31  ;;  %v1250_v34 = vunpack.c.l.s8.bf16 %v450_v32  ;;  %v1264_v40 = vunpack.c.h.s8.bf16 %v448_v31  ;;  %v1266_v41 = vunpack.c.h.s8.bf16 %v450_v32 }
 0x1f9   :  { %2112 = vmatpush1.bf16.msra.mxu0 %v1104_v36  ;;  %2276 = vmatpush1.bf16.msra.mxu1 %v1106_v37  ;;  %v1265_v36 = vunpack.c.h.s8.bf16 %v449_v43  ;;  %v1267_v37 = vunpack.c.h.s8.bf16 %v451_v25 }
 0x1fa   :  { %2113 = vmatprep.subr.bf16.mxu0 %v1121_v38  ;;  %2277 = vmatprep.subr.bf16.mxu1 %v1123_v39  ;;  %v465_v38 = vld [vmem:[#allocation5 + $0x9a8] sm:$0xff]  ;;  %v467_v39 = vld [vmem:[#allocation5 + $0x9b8] sm:$0xff] }
 0x1fd   :  { %2114 = vmatpush1.bf16.msra.mxu0 %v1120_v45  ;;  %2278 = vmatpush1.bf16.msra.mxu1 %v1122_v46  ;;  %v1281_v45 = vunpack.c.l.s8.bf16 %v465_v38  ;;  %v1283_v46 = vunpack.c.l.s8.bf16 %v467_v39 }
 0x1fe   :  { %2115 = vmatprep.subr.bf16.mxu0 %v1137_v47  ;;  %2279 = vmatprep.subr.bf16.mxu1 %v1139_v48  ;;  %v464_v47 = vld [vmem:[#allocation5 + $0x9a0] sm:$0xff]  ;;  %v466_v48 = vld [vmem:[#allocation5 + $0x9b0] sm:$0xff] }
 0x1ff   :  { %v1280_v49 = vunpack.c.l.s8.bf16 %v464_v47  ;;  %v1282_v30 = vunpack.c.l.s8.bf16 %v466_v48  ;;  %v1296_v54 = vunpack.c.h.s8.bf16 %v464_v47  ;;  %v1298_v55 = vunpack.c.h.s8.bf16 %v466_v48 }
 0x201   :  { %2116 = vmatpush1.bf16.msra.mxu0 %v1136_v51  ;;  %2280 = vmatpush1.bf16.msra.mxu1 %v1138_v52  ;;  %v1297_v51 = vunpack.c.h.s8.bf16 %v465_v38  ;;  %v1299_v52 = vunpack.c.h.s8.bf16 %v467_v39 }
 0x202   :  { %2117 = vmatprep.subr.bf16.mxu0 %v1153_v61  ;;  %2281 = vmatprep.subr.bf16.mxu1 %v1155_v53  ;;  %v481_v61 = vld [vmem:[#allocation5 + $0xa28] sm:$0xff]  ;;  %v483_v53 = vld [vmem:[#allocation5 + $0xa38] sm:$0xff] }
 0x205   :  { %2118 = vmatpush1.bf16.msra.mxu0 %v1152_v56  ;;  %2282 = vmatpush1.bf16.msra.mxu1 %v1154_v57  ;;  %v1313_v56 = vunpack.c.l.s8.bf16 %v481_v61  ;;  %v1315_v57 = vunpack.c.l.s8.bf16 %v483_v53 }
 0x206   :  { %2119 = vmatprep.subr.bf16.mxu0 %v1169_v58  ;;  %2283 = vmatprep.subr.bf16.mxu1 %v1171_v59  ;;  %v480_v58 = vld [vmem:[#allocation5 + $0xa20] sm:$0xff]  ;;  %v482_v59 = vld [vmem:[#allocation5 + $0xa30] sm:$0xff] }
 0x207   :  { %v1312_v62 = vunpack.c.l.s8.bf16 %v480_v58  ;;  %v1314_v63 = vunpack.c.l.s8.bf16 %v482_v59  ;;  %v1328_v17 = vunpack.c.h.s8.bf16 %v480_v58  ;;  %v1330_v5 = vunpack.c.h.s8.bf16 %v482_v59 }
 0x209   :  { %2120 = vmatpush1.bf16.msra.mxu0 %v1168_v0  ;;  %2284 = vmatpush1.bf16.msra.mxu1 %v1170_v1  ;;  %v1329_v0 = vunpack.c.h.s8.bf16 %v481_v61  ;;  %v1331_v1 = vunpack.c.h.s8.bf16 %v483_v53 }
 0x20a   :  { %2130 = vmatprep.subr.bf16.mxu0 %v1185_v2  ;;  %2294 = vmatprep.subr.bf16.mxu1 %v1187_v3  ;;  %v497_v2 = vld [vmem:[#allocation5 + $0xaa8] sm:$0xff]  ;;  %v499_v3 = vld [vmem:[#allocation5 + $0xab8] sm:$0xff] }
 0x20c   :  { %2122 = vmatmul.mubr.bf16.vlgmr.msra.gmra.mrb[4].mxu0 %v7542_v16  ;;  %2286 = vmatmul.mubr.bf16.vlgmr.msra.gmra.mrb[4].mxu1 %v7542_v16 }
 0x20d   :  { %2131 = vmatpush1.bf16.msra.mxu0 %v1184_v6  ;;  %2295 = vmatpush1.bf16.msra.mxu1 %v1186_v7  ;;  %v1345_v6 = vunpack.c.l.s8.bf16 %v497_v2  ;;  %v1347_v7 = vunpack.c.l.s8.bf16 %v499_v3 }
 0x20e   :  { %2132 = vmatprep.subr.bf16.mxu0 %v1201_v8  ;;  %2296 = vmatprep.subr.bf16.mxu1 %v1203_v9  ;;  %v496_v8 = vld [vmem:[#allocation5 + $0xaa0] sm:$0xff]  ;;  %v498_v9 = vld [vmem:[#allocation5 + $0xab0] sm:$0xff] }
 0x20f   :  { %2162 = vmatprep.mubr.bf16.mxu0 %v7551_v24  ;;  %2326 = vmatprep.mubr.bf16.mxu1 %v7551_v24  ;;  %v1344_v10 = vunpack.c.l.s8.bf16 %v496_v8  ;;  %v1346_v11 = vunpack.c.l.s8.bf16 %v498_v9  ;;  %v1360_v18 = vunpack.c.h.s8.bf16 %v496_v8  ;;  %v1362_v19 = vunpack.c.h.s8.bf16 %v498_v9  ;;  %v579_v8 = vld [vmem:[#allocation5 + $0xd38] sm:$0xff] }
 0x211   :  { %2133 = vmatpush1.bf16.msra.mxu0 %v1200_v12  ;;  %2297 = vmatpush1.bf16.msra.mxu1 %v1202_v13  ;;  %v1361_v12 = vunpack.c.h.s8.bf16 %v497_v2  ;;  %v1363_v13 = vunpack.c.h.s8.bf16 %v499_v3  ;;  %v3036_v2 = vlaneseq }
 0x212   :  { %2134 = vmatprep.subr.bf16.mxu0 %v1217_v14  ;;  %2298 = vmatprep.subr.bf16.mxu1 %v1219_v15  ;;  %v513_v14 = vld [vmem:[#allocation5 + $0xb28] sm:$0xff]  ;;  %v515_v15 = vld [vmem:[#allocation5 + $0xb38] sm:$0xff] }
 0x213   :  { %v7594_v9 = vshrl.u32 %v3036_v2, 7 }
 0x215   :  { %2135 = vmatpush1.bf16.msra.mxu0 %v1216_v20  ;;  %2299 = vmatpush1.bf16.msra.mxu1 %v1218_v21  ;;  %v1377_v20 = vunpack.c.l.s8.bf16 %v513_v14  ;;  %v1379_v21 = vunpack.c.l.s8.bf16 %v515_v15 }
 0x216   :  { %2136 = vmatprep.subr.bf16.mxu0 %v1233_v22  ;;  %2300 = vmatprep.subr.bf16.mxu1 %v1235_v23  ;;  %v512_v22 = vld [vmem:[#allocation5 + $0xb20] sm:$0xff]  ;;  %v514_v23 = vld [vmem:[#allocation5 + $0xb30] sm:$0xff] }
 0x217   :  { %v1376_v43 = vunpack.c.l.s8.bf16 %v512_v22  ;;  %v1378_v25 = vunpack.c.l.s8.bf16 %v514_v23  ;;  %v1392_v31 = vunpack.c.h.s8.bf16 %v512_v22  ;;  %v1394_v32 = vunpack.c.h.s8.bf16 %v514_v23  ;;  %v3032_v22 = vld [vmem:[#allocation8] sm:$0xff] }
 0x218   :  { %v7603_v23 = vsub.s32 1, %v7594_v9 }
 0x219   :  { %2137 = vmatpush1.bf16.msra.mxu0 %v1232_v26  ;;  %2301 = vmatpush1.bf16.msra.mxu1 %v1234_v27  ;;  %v1393_v26 = vunpack.c.h.s8.bf16 %v513_v14  ;;  %v1395_v27 = vunpack.c.h.s8.bf16 %v515_v15  ;;  %v576_v14 = vld [vmem:[#allocation5 + $0xd20] sm:$0xff]  ;;  %v578_v15 = vld [vmem:[#allocation5 + $0xd30] sm:$0xff] }
 0x21a   :  { %2138 = vmatprep.subr.bf16.mxu0 %v1249_v28  ;;  %2302 = vmatprep.subr.bf16.mxu1 %v1251_v29  ;;  %v529_v28 = vld [vmem:[#allocation5 + $0xba8] sm:$0xff]  ;;  %v531_v29 = vld [vmem:[#allocation5 + $0xbb8] sm:$0xff] }
 0x21d   :  { %2139 = vmatpush1.bf16.msra.mxu0 %v1248_v33  ;;  %2303 = vmatpush1.bf16.msra.mxu1 %v1250_v34  ;;  %v1409_v33 = vunpack.c.l.s8.bf16 %v529_v28  ;;  %v1411_v34 = vunpack.c.l.s8.bf16 %v531_v29 }
 0x21e   :  { %2140 = vmatprep.subr.bf16.mxu0 %v1265_v36  ;;  %2304 = vmatprep.subr.bf16.mxu1 %v1267_v37  ;;  %v528_v36 = vld [vmem:[#allocation5 + $0xba0] sm:$0xff]  ;;  %v530_v37 = vld [vmem:[#allocation5 + $0xbb0] sm:$0xff] }
 0x21f   :  { %v1408_v38 = vunpack.c.l.s8.bf16 %v528_v36  ;;  %v1410_v39 = vunpack.c.l.s8.bf16 %v530_v37  ;;  %v1424_v47 = vunpack.c.h.s8.bf16 %v528_v36  ;;  %v1426_v48 = vunpack.c.h.s8.bf16 %v530_v37 }
 0x220   :  { %v1520_v36 = vunpack.c.h.s8.bf16 %v576_v14  ;;  %v1522_v37 = vunpack.c.h.s8.bf16 %v578_v15 }
 0x221   :  { %2141 = vmatpush1.bf16.msra.mxu0 %v1264_v40  ;;  %2305 = vmatpush1.bf16.msra.mxu1 %v1266_v41  ;;  %v1425_v40 = vunpack.c.h.s8.bf16 %v529_v28  ;;  %v1427_v41 = vunpack.c.h.s8.bf16 %v531_v29  ;;  %v593_v28 = vld [vmem:[#allocation5 + $0xda8] sm:$0xff]  ;;  %v595_v29 = vld [vmem:[#allocation5 + $0xdb8] sm:$0xff] }
 0x222   :  { %2142 = vmatprep.subr.bf16.mxu0 %v1281_v45  ;;  %2306 = vmatprep.subr.bf16.mxu1 %v1283_v46  ;;  %v545_v45 = vld [vmem:[#allocation5 + $0xc28] sm:$0xff]  ;;  %v547_v46 = vld [vmem:[#allocation5 + $0xc38] sm:$0xff]  ;;  %v1553_v2 = vunpack.c.h.s8.bf16 %v593_v28 }
 0x225   :  { %2143 = vmatpush1.bf16.msra.mxu0 %v1280_v49  ;;  %2307 = vmatpush1.bf16.msra.mxu1 %v1282_v30  ;;  %v1441_v49 = vunpack.c.l.s8.bf16 %v545_v45  ;;  %v1443_v30 = vunpack.c.l.s8.bf16 %v547_v46 }
 0x226   :  { %2144 = vmatprep.subr.bf16.mxu0 %v1297_v51  ;;  %2308 = vmatprep.subr.bf16.mxu1 %v1299_v52  ;;  %v544_v51 = vld [vmem:[#allocation5 + $0xc20] sm:$0xff]  ;;  %v546_v52 = vld [vmem:[#allocation5 + $0xc30] sm:$0xff] }
 0x227   :  { %v1440_v61 = vunpack.c.l.s8.bf16 %v544_v51  ;;  %v1442_v53 = vunpack.c.l.s8.bf16 %v546_v52  ;;  %v1456_v58 = vunpack.c.h.s8.bf16 %v544_v51  ;;  %v1458_v59 = vunpack.c.h.s8.bf16 %v546_v52 }
 0x229   :  { %2145 = vmatpush1.bf16.msra.mxu0 %v1296_v54  ;;  %2309 = vmatpush1.bf16.msra.mxu1 %v1298_v55  ;;  %v1457_v54 = vunpack.c.h.s8.bf16 %v545_v45  ;;  %v1459_v55 = vunpack.c.h.s8.bf16 %v547_v46  ;;  %v592_v45 = vld [vmem:[#allocation5 + $0xda0] sm:$0xff]  ;;  %v594_v46 = vld [vmem:[#allocation5 + $0xdb0] sm:$0xff] }
 0x22a   :  { %2146 = vmatprep.subr.bf16.mxu0 %v1313_v56  ;;  %2310 = vmatprep.subr.bf16.mxu1 %v1315_v57  ;;  %v561_v56 = vld [vmem:[#allocation5 + $0xca8] sm:$0xff]  ;;  %v563_v57 = vld [vmem:[#allocation5 + $0xcb8] sm:$0xff] }
 0x22d   :  { %2147 = vmatpush1.bf16.msra.mxu0 %v1312_v62  ;;  %2311 = vmatpush1.bf16.msra.mxu1 %v1314_v63  ;;  %v1473_v62 = vunpack.c.l.s8.bf16 %v561_v56  ;;  %v1475_v63 = vunpack.c.l.s8.bf16 %v563_v57 }
 0x22e   :  { %2148 = vmatprep.subr.bf16.mxu0 %v1329_v0  ;;  %2312 = vmatprep.subr.bf16.mxu1 %v1331_v1  ;;  %v560_v0 = vld [vmem:[#allocation5 + $0xca0] sm:$0xff]  ;;  %v562_v1 = vld [vmem:[#allocation5 + $0xcb0] sm:$0xff] }
 0x22f   :  { %v1472_v3 = vunpack.c.l.s8.bf16 %v560_v0 }
 0x231   :  { %2149 = vmatpush1.bf16.msra.mxu0 %v1328_v17  ;;  %2313 = vmatpush1.bf16.msra.mxu1 %v1330_v5  ;;  %v1474_v17 = vunpack.c.l.s8.bf16 %v562_v1  ;;  %v1489_v5 = vunpack.c.h.s8.bf16 %v561_v56 }
 0x232   :  { %2150 = vmatprep.subr.bf16.mxu0 %v1345_v6  ;;  %2314 = vmatprep.subr.bf16.mxu1 %v1347_v7  ;;  %v1491_v6 = vunpack.c.h.s8.bf16 %v563_v57  ;;  %v577_v7 = vld [vmem:[#allocation5 + $0xd28] sm:$0xff] }
 0x235   :  { %2151 = vmatpush1.bf16.msra.mxu0 %v1344_v10  ;;  %2315 = vmatpush1.bf16.msra.mxu1 %v1346_v11  ;;  %v1488_v10 = vunpack.c.h.s8.bf16 %v560_v0  ;;  %v1490_v11 = vunpack.c.h.s8.bf16 %v562_v1 }
 0x236   :  { %2152 = vmatprep.subr.bf16.mxu0 %v1361_v12  ;;  %2316 = vmatprep.subr.bf16.mxu1 %v1363_v13  ;;  %v1505_v12 = vunpack.c.l.s8.bf16 %v577_v7  ;;  %v1507_v13 = vunpack.c.l.s8.bf16 %v579_v8 }
 0x239   :  { %2153 = vmatpush1.bf16.msra.mxu0 %v1360_v18  ;;  %2317 = vmatpush1.bf16.msra.mxu1 %v1362_v19  ;;  %v7597_v18 = vsub.s32 0, %v7594_v9  ;;  %v7600_v19 = vsub.s32 2, %v7594_v9 }
 0x23a   :  { %2154 = vmatprep.subr.bf16.mxu0 %v1377_v20  ;;  %2318 = vmatprep.subr.bf16.mxu1 %v1379_v21  ;;  %v1504_v20 = vunpack.c.l.s8.bf16 %v576_v14  ;;  %v1506_v21 = vunpack.c.l.s8.bf16 %v578_v15  ;;  %v1554_v14 = vunpack.c.h.s8.bf16 %v594_v46 }
 0x23d   :  { %2155 = vmatpush1.bf16.msra.mxu0 %v1376_v43  ;;  %2319 = vmatpush1.bf16.msra.mxu1 %v1378_v25  ;;  %v7606_v43 = vsub.s32 3, %v7594_v9  ;;  %v1521_v25 = vunpack.c.h.s8.bf16 %v577_v7  ;;  %v611_v7 = vld [vmem:[#allocation5 + $0xe38] sm:$0xff] }
 0x23e   :  { %2156 = vmatprep.subr.bf16.mxu0 %v1393_v26  ;;  %2320 = vmatprep.subr.bf16.mxu1 %v1395_v27  ;;  %v1523_v26 = vunpack.c.h.s8.bf16 %v579_v8  ;;  %v3132_v27 = vld [vmem:[#allocation10] sm:$0xff] }
 0x241   :  { %2157 = vmatpush1.bf16.msra.mxu0 %v1392_v31  ;;  %2321 = vmatpush1.bf16.msra.mxu1 %v1394_v32  ;;  %v3039_v31 = vrot.slane %v3032_v22, %v7597_v18  ;;  %v3047_v32 = vrot.slane %v3032_v22, %v7600_v19 }
 0x242   :  { %2158 = vmatprep.subr.bf16.mxu0 %v1409_v33  ;;  %2322 = vmatprep.subr.bf16.mxu1 %v1411_v34  ;;  %v3043_v33 = vrot.slane %v3032_v22, %v7603_v23  ;;  %v3051_v34 = vrot.slane %v3032_v22, %v7606_v43  ;;  %v1571_v22 = vunpack.c.l.s8.bf16 %v611_v7 }
 0x245   :  { %2159 = vmatpush1.bf16.msra.mxu0 %v1408_v38  ;;  %2323 = vmatpush1.bf16.msra.mxu1 %v1410_v39  ;;  %v3139_v38 = vrot.slane %v3132_v27, %v7597_v18  ;;  %v3147_v39 = vrot.slane %v3132_v27, %v7600_v19 }
 0x246   :  { %2160 = vmatprep.subr.bf16.mxu0 %v1425_v40  ;;  %2324 = vmatprep.subr.bf16.mxu1 %v1427_v41  ;;  %v1537_v40 = vunpack.c.l.s8.bf16 %v593_v28  ;;  %v1539_v41 = vunpack.c.l.s8.bf16 %v595_v29 }
 0x249   :  { %2161 = vmatpush1.bf16.msra.mxu0 %v1424_v47  ;;  %2325 = vmatpush1.bf16.msra.mxu1 %v1426_v48 }
 0x24a   :  { %2171 = vmatprep.subr.bf16.mxu0 %v1441_v49  ;;  %2335 = vmatprep.subr.bf16.mxu1 %v1443_v30  ;;  %v3143_v49 = vrot.slane %v3132_v27, %v7603_v23  ;;  %v3151_v30 = vrot.slane %v3132_v27, %v7606_v43 }
 0x24c   :  { %2163 = vmatmul.mubr.bf16.vlgmr.msra.gmra.mrb[4].mxu0 %v7559_v60  ;;  %2327 = vmatmul.mubr.bf16.vlgmr.msra.gmra.mrb[4].mxu1 %v7559_v60 }
 0x24d   :  { %2172 = vmatpush1.bf16.msra.mxu0 %v1440_v61  ;;  %2336 = vmatpush1.bf16.msra.mxu1 %v1442_v53 }
 0x24e   :  { %2173 = vmatprep.subr.bf16.mxu0 %v1457_v54  ;;  %2337 = vmatprep.subr.bf16.mxu1 %v1459_v55 }
 0x24f   :  { %2203 = vmatprep.mubr.bf16.mxu0 %v7568_v4  ;;  %2367 = vmatprep.mubr.bf16.mxu1 %v7568_v4 }
 0x251   :  { %2174 = vmatpush1.bf16.msra.mxu0 %v1456_v58  ;;  %2338 = vmatpush1.bf16.msra.mxu1 %v1458_v59  ;;  %v1536_v58 = vunpack.c.l.s8.bf16 %v592_v45  ;;  %v1538_v59 = vunpack.c.l.s8.bf16 %v594_v46 }
 0x252   :  { %2175 = vmatprep.subr.bf16.mxu0 %v1473_v62  ;;  %2339 = vmatprep.subr.bf16.mxu1 %v1475_v63 }
 0x255   :  { %2176 = vmatpush1.bf16.msra.mxu0 %v1472_v3  ;;  %2340 = vmatpush1.bf16.msra.mxu1 %v1474_v17  ;;  %v1555_v3 = vunpack.c.h.s8.bf16 %v595_v29 }
 0x256   :  { %2177 = vmatprep.subr.bf16.mxu0 %v1489_v5  ;;  %2341 = vmatprep.subr.bf16.mxu1 %v1491_v6  ;;  %v609_v6 = vld [vmem:[#allocation5 + $0xe28] sm:$0xff] }
 0x259   :  { %2178 = vmatpush1.bf16.msra.mxu0 %v1488_v10  ;;  %2342 = vmatpush1.bf16.msra.mxu1 %v1490_v11 }
 0x25a   :  { %2179 = vmatprep.subr.bf16.mxu0 %v1505_v12  ;;  %2343 = vmatprep.subr.bf16.mxu1 %v1507_v13  ;;  %v1552_v13 = vunpack.c.h.s8.bf16 %v592_v45  ;;  %v626_v45 = vld [vmem:[#allocation5 + $0xeb0] sm:$0xff] }
 0x25d   :  { %2180 = vmatpush1.bf16.msra.mxu0 %v1504_v20  ;;  %2344 = vmatpush1.bf16.msra.mxu1 %v1506_v21  ;;  %v1569_v21 = vunpack.c.l.s8.bf16 %v609_v6 }
 0x25e   :  { %2181 = vmatprep.subr.bf16.mxu0 %v1521_v25  ;;  %2345 = vmatprep.subr.bf16.mxu1 %v1523_v26  ;;  %v608_v25 = vld [vmem:[#allocation5 + $0xe20] sm:$0xff]  ;;  %v610_v26 = vld [vmem:[#allocation5 + $0xe30] sm:$0xff] }
 0x25f   :  { %v1877_v47 = vpop.f32.mrb[0].mxu0  ;;  %v2041_v48 = vpop.f32.mrb[0].mxu1  ;;  %v1568_v29 = vunpack.c.l.s8.bf16 %v608_v25 }
 0x260   :  { %v3116_v51 = vmul.f32 %v3039_v31, %v1877_v47  ;;  %v3118_v52 = vmul.f32 %v3047_v32, %v2041_v48  ;;  %v1879_v61 = vpop.f32.mrb[1].mxu0  ;;  %v2043_v53 = vpop.f32.mrb[1].mxu1  ;;  %v1570_v31 = vunpack.c.l.s8.bf16 %v610_v26  ;;  %v1585_v32 = vunpack.c.h.s8.bf16 %v609_v6  ;;  %v658_v6 = vld [vmem:[#allocation5 + $0xfb0] sm:$0xff] }
 0x261   :  { %v3117_v54 = vmul.f32 %v3043_v33, %v1879_v61  ;;  %v3119_v55 = vmul.f32 %v3051_v34, %v2043_v53  ;;  %v1881_v56 = vpop.f32.mrb[2].mxu0  ;;  %v2045_v57 = vpop.f32.mrb[2].mxu1  ;;  %2182 = vmatpush1.bf16.msra.mxu0 %v1520_v36  ;;  %2346 = vmatpush1.bf16.msra.mxu1 %v1522_v37  ;;  %v1587_v33 = vunpack.c.h.s8.bf16 %v611_v7  ;;  %v625_v34 = vld [vmem:[#allocation5 + $0xea8] sm:$0xff]  ;;  %v627_v36 = vld [vmem:[#allocation5 + $0xeb8] sm:$0xff]  ;;  %v1584_v37 = vunpack.c.h.s8.bf16 %v608_v25 }
 0x262   :  { %v3216_v62 = vadd.f32 %v3139_v38, %v3116_v51  ;;  %v3218_v63 = vadd.f32 %v3147_v39, %v3118_v52  ;;  %v1882_v0 = vpop.f32.mrb[3].mxu0  ;;  %v2046_v1 = vpop.f32.mrb[3].mxu1  ;;  %2183 = vmatprep.subr.bf16.mxu0 %v1537_v40  ;;  %2347 = vmatprep.subr.bf16.mxu1 %v1539_v41  ;;  %v1586_v38 = vunpack.c.h.s8.bf16 %v610_v26  ;;  %v1601_v39 = vunpack.c.l.s8.bf16 %v625_v34  ;;  %v624_v41 = vld [vmem:[#allocation5 + $0xea0] sm:$0xff]  ;;  %v643_v51 = vld [vmem:[#allocation5 + $0xf38] sm:$0xff]  ;;  %v642_v56 = vld [vmem:[#allocation5 + $0xf30] sm:$0xff] }
 0x263   :  { %v3217_v17 = vadd.f32 %v3143_v49, %v3117_v54  ;;  %v3219_v5 = vadd.f32 %v3151_v30, %v3119_v55  ;;  %v1603_v40 = vunpack.c.l.s8.bf16 %v627_v36  ;;  %v1600_v46 = vunpack.c.l.s8.bf16 %v624_v41  ;;  %v641_v30 = vld [vmem:[#allocation5 + $0xf28] sm:$0xff]  ;;  %v640_v55 = vld [vmem:[#allocation5 + $0xf20] sm:$0xff]  ;;  %v659_v0 = vld [vmem:[#allocation5 + $0xfb8] sm:$0xff] }
 0x264   :  { %v3232_v8 = vmax.f32 %v3216_v62, 0.0  ;;  %v3234_v10 = vmax.f32 %v3218_v63, 0.0  ;;  %v1602_v47 = vunpack.c.l.s8.bf16 %v626_v45  ;;  %v1617_v48 = vunpack.c.h.s8.bf16 %v625_v34  ;;  %v657_v63 = vld [vmem:[#allocation5 + $0xfa8] sm:$0xff]  ;;  %v164_v26 = vld [vmem:[#allocation5 + $0x40] sm:$0xff] }
 0x265   :  { %v3233_v11 = vmax.f32 %v3217_v17, 0.0  ;;  %v3235_v12 = vmax.f32 %v3219_v5, 0.0  ;;  %2184 = vmatpush1.bf16.msra.mxu0 %v1536_v58  ;;  %2348 = vmatpush1.bf16.msra.mxu1 %v1538_v59  ;;  %v1619_v49 = vunpack.c.h.s8.bf16 %v627_v36  ;;  %v1616_v52 = vunpack.c.h.s8.bf16 %v624_v41  ;;  %v656_v5 = vld [vmem:[#allocation5 + $0xfa0] sm:$0xff]  ;;  %v181_v36 = vld [vmem:[#allocation5 + $0xc8] sm:$0xff] }
 0x266   :  { %v7616_v15 = vpack.c.bf16 %v3232_v8, %v3232_v8  ;;  %v7618_v20 = vpack.c.bf16 %v3234_v10, %v3234_v10  ;;  %2185 = vmatprep.subr.bf16.mxu0 %v1553_v2  ;;  %2349 = vmatprep.subr.bf16.mxu1 %v1555_v3  ;;  %v1618_v61 = vunpack.c.h.s8.bf16 %v626_v45  ;;  %v1633_v53 = vunpack.c.l.s8.bf16 %v641_v30  ;;  %v180_v45 = vld [vmem:[#allocation5 + $0xc0] sm:$0xff] }
 0x267   :  { %v7620_v27 = vpack.c.bf16 %v3233_v11, %v3233_v11  ;;  %v7622_v28 = vpack.c.bf16 %v3235_v12, %v3235_v12  ;;  %v1635_v54 = vunpack.c.l.s8.bf16 %v643_v51  ;;  %v1632_v57 = vunpack.c.l.s8.bf16 %v640_v55  ;;  %v165_v12 = vld [vmem:[#allocation5 + $0x48] sm:$0xff] }
 0x268   :  { %v1634_v58 = vunpack.c.l.s8.bf16 %v642_v56  ;;  %v1649_v59 = vunpack.c.h.s8.bf16 %v641_v30  ;;  %v1651_v62 = vunpack.c.h.s8.bf16 %v643_v51  ;;  %v1648_v1 = vunpack.c.h.s8.bf16 %v640_v55  ;;  %v197_v51 = vld [vmem:[#allocation5 + $0x148] sm:$0xff] }
 0x269   :  { %2186 = vmatpush1.bf16.msra.mxu0 %v1552_v13  ;;  %2350 = vmatpush1.bf16.msra.mxu1 %v1554_v14  ;;  %v1650_v2 = vunpack.c.h.s8.bf16 %v642_v56  ;;  %v1665_v3 = vunpack.c.l.s8.bf16 %v657_v63  ;;  %v1667_v17 = vunpack.c.l.s8.bf16 %v659_v0  ;;  %v1664_v7 = vunpack.c.l.s8.bf16 %v656_v5  ;;  %v167_v13 = vld [vmem:[#allocation5 + $0x58] sm:$0xff]  ;;  %v196_v56 = vld [vmem:[#allocation5 + $0x140] sm:$0xff] }
 0x26a   :  { %2187 = vmatprep.subr.bf16.mxu0 %v1569_v21  ;;  %2351 = vmatprep.subr.bf16.mxu1 %v1571_v22  ;;  %v1666_v8 = vunpack.c.l.s8.bf16 %v658_v6  ;;  %v1681_v10 = vunpack.c.h.s8.bf16 %v657_v63  ;;  %v1683_v11 = vunpack.c.h.s8.bf16 %v659_v0  ;;  %v1680_v14 = vunpack.c.h.s8.bf16 %v656_v5  ;;  %v213_v0 = vld [vmem:[#allocation5 + $0x1c8] sm:$0xff] }
 0x26b   :  { %v1682_v21 = vunpack.c.h.s8.bf16 %v658_v6  ;;  %v677_v22 = vunpack.c.l.s8.bf16 %v165_v12  ;;  %v679_v25 = vunpack.c.l.s8.bf16 %v167_v13  ;;  %v695_v34 = vunpack.c.h.s8.bf16 %v167_v13  ;;  %v212_v6 = vld [vmem:[#allocation5 + $0x1c0] sm:$0xff]  ;;  %v229_v13 = vld [vmem:[#allocation5 + $0x248] sm:$0xff] }
 0x26d   :  { %2188 = vmatpush1.bf16.msra.mxu0 %v1568_v29  ;;  %2352 = vmatpush1.bf16.msra.mxu1 %v1570_v31  ;;  %v166_v29 = vld [vmem:[#allocation5 + $0x50] sm:$0xff]  ;;  %v676_v31 = vunpack.c.l.s8.bf16 %v164_v26 }
 0x26e   :  { %2189 = vmatprep.subr.bf16.mxu0 %v1585_v32  ;;  %2353 = vmatprep.subr.bf16.mxu1 %v1587_v33  ;;  %v678_v32 = vunpack.c.l.s8.bf16 %v166_v29  ;;  %v693_v33 = vunpack.c.h.s8.bf16 %v165_v12 }
 0x271   :  { %2190 = vmatpush1.bf16.msra.mxu0 %v1584_v37  ;;  %2354 = vmatpush1.bf16.msra.mxu1 %v1586_v38  ;;  %v183_v37 = vld [vmem:[#allocation5 + $0xd8] sm:$0xff]  ;;  %v692_v38 = vunpack.c.h.s8.bf16 %v164_v26 }
 0x272   :  { %2191 = vmatprep.subr.bf16.mxu0 %v1601_v39  ;;  %2355 = vmatprep.subr.bf16.mxu1 %v1603_v40  ;;  %v694_v39 = vunpack.c.h.s8.bf16 %v166_v29  ;;  %v709_v40 = vunpack.c.l.s8.bf16 %v181_v36  ;;  %v711_v41 = vunpack.c.l.s8.bf16 %v183_v37  ;;  %v727_v30 = vunpack.c.h.s8.bf16 %v183_v37  ;;  %v228_v29 = vld [vmem:[#allocation5 + $0x240] sm:$0xff]  ;;  %v245_v37 = vld [vmem:[#allocation5 + $0x2c8] sm:$0xff] }
 0x275   :  { %2192 = vmatpush1.bf16.msra.mxu0 %v1600_v46  ;;  %2356 = vmatpush1.bf16.msra.mxu1 %v1602_v47  ;;  %v182_v46 = vld [vmem:[#allocation5 + $0xd0] sm:$0xff]  ;;  %v708_v47 = vunpack.c.l.s8.bf16 %v180_v45 }
 0x276   :  { %2193 = vmatprep.subr.bf16.mxu0 %v1617_v48  ;;  %2357 = vmatprep.subr.bf16.mxu1 %v1619_v49  ;;  %v710_v48 = vunpack.c.l.s8.bf16 %v182_v46  ;;  %v725_v49 = vunpack.c.h.s8.bf16 %v181_v36 }
 0x279   :  { %2194 = vmatpush1.bf16.msra.mxu0 %v1616_v52  ;;  %2358 = vmatpush1.bf16.msra.mxu1 %v1618_v61  ;;  %v199_v52 = vld [vmem:[#allocation5 + $0x158] sm:$0xff]  ;;  %v724_v61 = vunpack.c.h.s8.bf16 %v180_v45 }
 0x27a   :  { %2195 = vmatprep.subr.bf16.mxu0 %v1633_v53  ;;  %2359 = vmatprep.subr.bf16.mxu1 %v1635_v54  ;;  %v726_v53 = vunpack.c.h.s8.bf16 %v182_v46  ;;  %v741_v54 = vunpack.c.l.s8.bf16 %v197_v51  ;;  %v743_v55 = vunpack.c.l.s8.bf16 %v199_v52  ;;  %v759_v63 = vunpack.c.h.s8.bf16 %v199_v52  ;;  %v244_v46 = vld [vmem:[#allocation5 + $0x2c0] sm:$0xff]  ;;  %v261_v52 = vld [vmem:[#allocation5 + $0x348] sm:$0xff] }
 0x27d   :  { %2196 = vmatpush1.bf16.msra.mxu0 %v1632_v57  ;;  %2360 = vmatpush1.bf16.msra.mxu1 %v1634_v58  ;;  %v198_v57 = vld [vmem:[#allocation5 + $0x150] sm:$0xff]  ;;  %v740_v58 = vunpack.c.l.s8.bf16 %v196_v56 }
 0x27e   :  { %2197 = vmatprep.subr.bf16.mxu0 %v1649_v59  ;;  %2361 = vmatprep.subr.bf16.mxu1 %v1651_v62  ;;  %v742_v59 = vunpack.c.l.s8.bf16 %v198_v57  ;;  %v757_v62 = vunpack.c.h.s8.bf16 %v197_v51 }
 0x281   :  { %2198 = vmatpush1.bf16.msra.mxu0 %v1648_v1  ;;  %2362 = vmatpush1.bf16.msra.mxu1 %v1650_v2  ;;  %v215_v1 = vld [vmem:[#allocation5 + $0x1d8] sm:$0xff]  ;;  %v756_v2 = vunpack.c.h.s8.bf16 %v196_v56 }
 0x282   :  { %2199 = vmatprep.subr.bf16.mxu0 %v1665_v3  ;;  %2363 = vmatprep.subr.bf16.mxu1 %v1667_v17  ;;  %v758_v3 = vunpack.c.h.s8.bf16 %v198_v57  ;;  %v773_v17 = vunpack.c.l.s8.bf16 %v213_v0  ;;  %v775_v5 = vunpack.c.l.s8.bf16 %v215_v1  ;;  %v791_v12 = vunpack.c.h.s8.bf16 %v215_v1  ;;  %v260_v57 = vld [vmem:[#allocation5 + $0x340] sm:$0xff]  ;;  %v277_v1 = vld [vmem:[#allocation5 + $0x3c8] sm:$0xff] }
 0x285   :  { %2200 = vmatpush1.bf16.msra.mxu0 %v1664_v7  ;;  %2364 = vmatpush1.bf16.msra.mxu1 %v1666_v8  ;;  %v214_v7 = vld [vmem:[#allocation5 + $0x1d0] sm:$0xff]  ;;  %v772_v8 = vunpack.c.l.s8.bf16 %v212_v6 }
 0x286   :  { %2201 = vmatprep.subr.bf16.mxu0 %v1681_v10  ;;  %2365 = vmatprep.subr.bf16.mxu1 %v1683_v11  ;;  %v774_v10 = vunpack.c.l.s8.bf16 %v214_v7  ;;  %v789_v11 = vunpack.c.h.s8.bf16 %v213_v0 }
 0x289   :  { %2202 = vmatpush1.bf16.msra.mxu0 %v1680_v14  ;;  %2366 = vmatpush1.bf16.msra.mxu1 %v1682_v21  ;;  %v231_v14 = vld [vmem:[#allocation5 + $0x258] sm:$0xff]  ;;  %v788_v21 = vunpack.c.h.s8.bf16 %v212_v6 }
 0x28a   :  { %2376 = vmatprep.subr.bf16.mxu0 %v677_v22  ;;  %2540 = vmatprep.subr.bf16.mxu1 %v679_v25  ;;  %v790_v22 = vunpack.c.h.s8.bf16 %v214_v7  ;;  %v805_v25 = vunpack.c.l.s8.bf16 %v229_v13  ;;  %v807_v26 = vunpack.c.l.s8.bf16 %v231_v14  ;;  %v823_v36 = vunpack.c.h.s8.bf16 %v231_v14  ;;  %v276_v7 = vld [vmem:[#allocation5 + $0x3c0] sm:$0xff]  ;;  %v293_v14 = vld [vmem:[#allocation5 + $0x448] sm:$0xff] }
 0x28c   :  { %2204 = vmatmul.mubr.bf16.vlgmr.msra.gmra.mrb[4].mxu0 %v7576_v44  ;;  %2368 = vmatmul.mubr.bf16.vlgmr.msra.gmra.mrb[4].mxu1 %v7576_v44 }
 0x28d   :  { %2377 = vmatpush1.bf16.msra.mxu0 %v676_v31  ;;  %2541 = vmatpush1.bf16.msra.mxu1 %v678_v32  ;;  %v230_v31 = vld [vmem:[#allocation5 + $0x250] sm:$0xff]  ;;  %v804_v32 = vunpack.c.l.s8.bf16 %v228_v29 }
 0x28e   :  { %2378 = vmatprep.subr.bf16.mxu0 %v693_v33  ;;  %2542 = vmatprep.subr.bf16.mxu1 %v695_v34  ;;  %v806_v33 = vunpack.c.l.s8.bf16 %v230_v31  ;;  %v821_v34 = vunpack.c.h.s8.bf16 %v229_v13 }
 0x28f   :  { %2408 = vmatprep.mubr.bf16.mxu0 %v7519_v35  ;;  %2572 = vmatprep.mubr.bf16.mxu1 %v7519_v35 }
 0x291   :  { %2379 = vmatpush1.bf16.msra.mxu0 %v692_v38  ;;  %2543 = vmatpush1.bf16.msra.mxu1 %v694_v39  ;;  %v247_v38 = vld [vmem:[#allocation5 + $0x2d8] sm:$0xff]  ;;  %v820_v39 = vunpack.c.h.s8.bf16 %v228_v29 }
 0x292   :  { %2380 = vmatprep.subr.bf16.mxu0 %v709_v40  ;;  %2544 = vmatprep.subr.bf16.mxu1 %v711_v41  ;;  %v822_v40 = vunpack.c.h.s8.bf16 %v230_v31  ;;  %v837_v41 = vunpack.c.l.s8.bf16 %v245_v37  ;;  %v839_v45 = vunpack.c.l.s8.bf16 %v247_v38  ;;  %v855_v51 = vunpack.c.h.s8.bf16 %v247_v38  ;;  %v292_v31 = vld [vmem:[#allocation5 + $0x440] sm:$0xff]  ;;  %v309_v38 = vld [vmem:[#allocation5 + $0x4c8] sm:$0xff] }
 0x295   :  { %2381 = vmatpush1.bf16.msra.mxu0 %v708_v47  ;;  %2545 = vmatpush1.bf16.msra.mxu1 %v710_v48  ;;  %v246_v47 = vld [vmem:[#allocation5 + $0x2d0] sm:$0xff]  ;;  %v836_v48 = vunpack.c.l.s8.bf16 %v244_v46 }
 0x296   :  { %2382 = vmatprep.subr.bf16.mxu0 %v725_v49  ;;  %2546 = vmatprep.subr.bf16.mxu1 %v727_v30  ;;  %v838_v49 = vunpack.c.l.s8.bf16 %v246_v47  ;;  %v853_v30 = vunpack.c.h.s8.bf16 %v245_v37 }
 0x299   :  { %2383 = vmatpush1.bf16.msra.mxu0 %v724_v61  ;;  %2547 = vmatpush1.bf16.msra.mxu1 %v726_v53  ;;  %v263_v61 = vld [vmem:[#allocation5 + $0x358] sm:$0xff]  ;;  %v852_v53 = vunpack.c.h.s8.bf16 %v244_v46 }
 0x29a   :  { %2384 = vmatprep.subr.bf16.mxu0 %v741_v54  ;;  %2548 = vmatprep.subr.bf16.mxu1 %v743_v55  ;;  %v854_v54 = vunpack.c.h.s8.bf16 %v246_v47  ;;  %v869_v55 = vunpack.c.l.s8.bf16 %v261_v52  ;;  %v871_v56 = vunpack.c.l.s8.bf16 %v263_v61  ;;  %v887_v0 = vunpack.c.h.s8.bf16 %v263_v61  ;;  %v308_v47 = vld [vmem:[#allocation5 + $0x4c0] sm:$0xff]  ;;  %v325_v61 = vld [vmem:[#allocation5 + $0x548] sm:$0xff] }
 0x29d   :  { %2385 = vmatpush1.bf16.msra.mxu0 %v740_v58  ;;  %2549 = vmatpush1.bf16.msra.mxu1 %v742_v59  ;;  %v262_v58 = vld [vmem:[#allocation5 + $0x350] sm:$0xff]  ;;  %v868_v59 = vunpack.c.l.s8.bf16 %v260_v57 }
 0x29e   :  { %2386 = vmatprep.subr.bf16.mxu0 %v757_v62  ;;  %2550 = vmatprep.subr.bf16.mxu1 %v759_v63  ;;  %v870_v62 = vunpack.c.l.s8.bf16 %v262_v58  ;;  %v885_v63 = vunpack.c.h.s8.bf16 %v261_v52 }
 0x2a1   :  { %2387 = vmatpush1.bf16.msra.mxu0 %v756_v2  ;;  %2551 = vmatpush1.bf16.msra.mxu1 %v758_v3  ;;  %v279_v2 = vld [vmem:[#allocation5 + $0x3d8] sm:$0xff]  ;;  %v884_v3 = vunpack.c.h.s8.bf16 %v260_v57 }
 0x2a2   :  { %2388 = vmatprep.subr.bf16.mxu0 %v773_v17  ;;  %2552 = vmatprep.subr.bf16.mxu1 %v775_v5  ;;  %v886_v17 = vunpack.c.h.s8.bf16 %v262_v58  ;;  %v901_v5 = vunpack.c.l.s8.bf16 %v277_v1  ;;  %v903_v6 = vunpack.c.l.s8.bf16 %v279_v2  ;;  %v919_v13 = vunpack.c.h.s8.bf16 %v279_v2  ;;  %v324_v58 = vld [vmem:[#allocation5 + $0x540] sm:$0xff]  ;;  %v341_v2 = vld [vmem:[#allocation5 + $0x5c8] sm:$0xff] }
 0x2a5   :  { %2389 = vmatpush1.bf16.msra.mxu0 %v772_v8  ;;  %2553 = vmatpush1.bf16.msra.mxu1 %v774_v10  ;;  %v278_v8 = vld [vmem:[#allocation5 + $0x3d0] sm:$0xff]  ;;  %v900_v10 = vunpack.c.l.s8.bf16 %v276_v7 }
 0x2a6   :  { %2390 = vmatprep.subr.bf16.mxu0 %v789_v11  ;;  %2554 = vmatprep.subr.bf16.mxu1 %v791_v12  ;;  %v902_v11 = vunpack.c.l.s8.bf16 %v278_v8  ;;  %v917_v12 = vunpack.c.h.s8.bf16 %v277_v1 }
 0x2a9   :  { %2391 = vmatpush1.bf16.msra.mxu0 %v788_v21  ;;  %2555 = vmatpush1.bf16.msra.mxu1 %v790_v22  ;;  %v295_v21 = vld [vmem:[#allocation5 + $0x458] sm:$0xff]  ;;  %v916_v22 = vunpack.c.h.s8.bf16 %v276_v7 }
 0x2aa   :  { %2392 = vmatprep.subr.bf16.mxu0 %v805_v25  ;;  %2556 = vmatprep.subr.bf16.mxu1 %v807_v26  ;;  %v918_v25 = vunpack.c.h.s8.bf16 %v278_v8  ;;  %v933_v26 = vunpack.c.l.s8.bf16 %v293_v14  ;;  %v935_v29 = vunpack.c.l.s8.bf16 %v295_v21  ;;  %v951_v37 = vunpack.c.h.s8.bf16 %v295_v21  ;;  %v340_v8 = vld [vmem:[#allocation5 + $0x5c0] sm:$0xff]  ;;  %v357_v21 = vld [vmem:[#allocation5 + $0x648] sm:$0xff] }
 0x2ad   :  { %2393 = vmatpush1.bf16.msra.mxu0 %v804_v32  ;;  %2557 = vmatpush1.bf16.msra.mxu1 %v806_v33  ;;  %v294_v32 = vld [vmem:[#allocation5 + $0x450] sm:$0xff]  ;;  %v932_v33 = vunpack.c.l.s8.bf16 %v292_v31 }
 0x2ae   :  { %2394 = vmatprep.subr.bf16.mxu0 %v821_v34  ;;  %2558 = vmatprep.subr.bf16.mxu1 %v823_v36  ;;  %v934_v34 = vunpack.c.l.s8.bf16 %v294_v32  ;;  %v949_v36 = vunpack.c.h.s8.bf16 %v293_v14 }
 0x2b1   :  { %2395 = vmatpush1.bf16.msra.mxu0 %v820_v39  ;;  %2559 = vmatpush1.bf16.msra.mxu1 %v822_v40  ;;  %v311_v39 = vld [vmem:[#allocation5 + $0x4d8] sm:$0xff]  ;;  %v948_v40 = vunpack.c.h.s8.bf16 %v292_v31 }
 0x2b2   :  { %2396 = vmatprep.subr.bf16.mxu0 %v837_v41  ;;  %2560 = vmatprep.subr.bf16.mxu1 %v839_v45  ;;  %v950_v41 = vunpack.c.h.s8.bf16 %v294_v32  ;;  %v965_v45 = vunpack.c.l.s8.bf16 %v309_v38  ;;  %v967_v46 = vunpack.c.l.s8.bf16 %v311_v39  ;;  %v983_v52 = vunpack.c.h.s8.bf16 %v311_v39  ;;  %v356_v32 = vld [vmem:[#allocation5 + $0x640] sm:$0xff]  ;;  %v373_v39 = vld [vmem:[#allocation5 + $0x6c8] sm:$0xff] }
 0x2b5   :  { %2397 = vmatpush1.bf16.msra.mxu0 %v836_v48  ;;  %2561 = vmatpush1.bf16.msra.mxu1 %v838_v49  ;;  %v310_v48 = vld [vmem:[#allocation5 + $0x4d0] sm:$0xff]  ;;  %v964_v49 = vunpack.c.l.s8.bf16 %v308_v47 }
 0x2b6   :  { %2398 = vmatprep.subr.bf16.mxu0 %v853_v30  ;;  %2562 = vmatprep.subr.bf16.mxu1 %v855_v51  ;;  %v966_v30 = vunpack.c.l.s8.bf16 %v310_v48  ;;  %v981_v51 = vunpack.c.h.s8.bf16 %v309_v38 }
 0x2b9   :  { %2399 = vmatpush1.bf16.msra.mxu0 %v852_v53  ;;  %2563 = vmatpush1.bf16.msra.mxu1 %v854_v54  ;;  %v327_v53 = vld [vmem:[#allocation5 + $0x558] sm:$0xff]  ;;  %v980_v54 = vunpack.c.h.s8.bf16 %v308_v47 }
 0x2ba   :  { %2400 = vmatprep.subr.bf16.mxu0 %v869_v55  ;;  %2564 = vmatprep.subr.bf16.mxu1 %v871_v56  ;;  %v982_v55 = vunpack.c.h.s8.bf16 %v310_v48  ;;  %v997_v56 = vunpack.c.l.s8.bf16 %v325_v61  ;;  %v999_v57 = vunpack.c.l.s8.bf16 %v327_v53  ;;  %v1015_v1 = vunpack.c.h.s8.bf16 %v327_v53  ;;  %v372_v48 = vld [vmem:[#allocation5 + $0x6c0] sm:$0xff]  ;;  %v389_v53 = vld [vmem:[#allocation5 + $0x748] sm:$0xff] }
 0x2bd   :  { %2401 = vmatpush1.bf16.msra.mxu0 %v868_v59  ;;  %2565 = vmatpush1.bf16.msra.mxu1 %v870_v62  ;;  %v326_v59 = vld [vmem:[#allocation5 + $0x550] sm:$0xff]  ;;  %v996_v62 = vunpack.c.l.s8.bf16 %v324_v58 }
 0x2be   :  { %2402 = vmatprep.subr.bf16.mxu0 %v885_v63  ;;  %2566 = vmatprep.subr.bf16.mxu1 %v887_v0  ;;  %v998_v63 = vunpack.c.l.s8.bf16 %v326_v59  ;;  %v1013_v0 = vunpack.c.h.s8.bf16 %v325_v61 }
 0x2c1   :  { %2403 = vmatpush1.bf16.msra.mxu0 %v884_v3  ;;  %2567 = vmatpush1.bf16.msra.mxu1 %v886_v17  ;;  %v343_v3 = vld [vmem:[#allocation5 + $0x5d8] sm:$0xff]  ;;  %v1012_v17 = vunpack.c.h.s8.bf16 %v324_v58 }
 0x2c2   :  { %2404 = vmatprep.subr.bf16.mxu0 %v901_v5  ;;  %2568 = vmatprep.subr.bf16.mxu1 %v903_v6  ;;  %v1014_v5 = vunpack.c.h.s8.bf16 %v326_v59  ;;  %v1029_v6 = vunpack.c.l.s8.bf16 %v341_v2  ;;  %v1031_v7 = vunpack.c.l.s8.bf16 %v343_v3  ;;  %v1047_v14 = vunpack.c.h.s8.bf16 %v343_v3  ;;  %v388_v59 = vld [vmem:[#allocation5 + $0x740] sm:$0xff]  ;;  %v405_v3 = vld [vmem:[#allocation5 + $0x7c8] sm:$0xff] }
 0x2c5   :  { %2405 = vmatpush1.bf16.msra.mxu0 %v900_v10  ;;  %2569 = vmatpush1.bf16.msra.mxu1 %v902_v11  ;;  %v342_v10 = vld [vmem:[#allocation5 + $0x5d0] sm:$0xff]  ;;  %v1028_v11 = vunpack.c.l.s8.bf16 %v340_v8 }
 0x2c6   :  { %2406 = vmatprep.subr.bf16.mxu0 %v917_v12  ;;  %2570 = vmatprep.subr.bf16.mxu1 %v919_v13  ;;  %v1030_v12 = vunpack.c.l.s8.bf16 %v342_v10  ;;  %v1045_v13 = vunpack.c.h.s8.bf16 %v341_v2 }
 0x2c9   :  { %2407 = vmatpush1.bf16.msra.mxu0 %v916_v22  ;;  %2571 = vmatpush1.bf16.msra.mxu1 %v918_v25  ;;  %v359_v22 = vld [vmem:[#allocation5 + $0x658] sm:$0xff]  ;;  %v1044_v25 = vunpack.c.h.s8.bf16 %v340_v8 }
 0x2ca   :  { %2417 = vmatprep.subr.bf16.mxu0 %v933_v26  ;;  %2581 = vmatprep.subr.bf16.mxu1 %v935_v29  ;;  %v1046_v26 = vunpack.c.h.s8.bf16 %v342_v10  ;;  %v1061_v29 = vunpack.c.l.s8.bf16 %v357_v21  ;;  %v1063_v31 = vunpack.c.l.s8.bf16 %v359_v22  ;;  %v1079_v38 = vunpack.c.h.s8.bf16 %v359_v22  ;;  %v404_v10 = vld [vmem:[#allocation5 + $0x7c0] sm:$0xff]  ;;  %v421_v22 = vld [vmem:[#allocation5 + $0x848] sm:$0xff] }
 0x2cc   :  { %2409 = vmatmul.mubr.bf16.vlgmr.msra.gmra.mrb[8].mxu0 %v7525_v42  ;;  %2573 = vmatmul.mubr.bf16.vlgmr.msra.gmra.mrb[8].mxu1 %v7525_v42 }
 0x2cd   :  { %2418 = vmatpush1.bf16.msra.mxu0 %v932_v33  ;;  %2582 = vmatpush1.bf16.msra.mxu1 %v934_v34  ;;  %v358_v33 = vld [vmem:[#allocation5 + $0x650] sm:$0xff]  ;;  %v1060_v34 = vunpack.c.l.s8.bf16 %v356_v32 }
 0x2ce   :  { %2419 = vmatprep.subr.bf16.mxu0 %v949_v36  ;;  %2583 = vmatprep.subr.bf16.mxu1 %v951_v37  ;;  %v1062_v36 = vunpack.c.l.s8.bf16 %v358_v33  ;;  %v1077_v37 = vunpack.c.h.s8.bf16 %v357_v21 }
 0x2cf   :  { %2449 = vmatprep.mubr.bf16.mxu0 %v7534_v50  ;;  %2613 = vmatprep.mubr.bf16.mxu1 %v7534_v50 }
 0x2d1   :  { %2420 = vmatpush1.bf16.msra.mxu0 %v948_v40  ;;  %2584 = vmatpush1.bf16.msra.mxu1 %v950_v41  ;;  %v375_v40 = vld [vmem:[#allocation5 + $0x6d8] sm:$0xff]  ;;  %v1076_v41 = vunpack.c.h.s8.bf16 %v356_v32 }
 0x2d2   :  { %2421 = vmatprep.subr.bf16.mxu0 %v965_v45  ;;  %2585 = vmatprep.subr.bf16.mxu1 %v967_v46  ;;  %v1078_v45 = vunpack.c.h.s8.bf16 %v358_v33  ;;  %v1093_v46 = vunpack.c.l.s8.bf16 %v373_v39  ;;  %v1095_v47 = vunpack.c.l.s8.bf16 %v375_v40  ;;  %v1111_v61 = vunpack.c.h.s8.bf16 %v375_v40  ;;  %v420_v33 = vld [vmem:[#allocation5 + $0x840] sm:$0xff]  ;;  %v437_v40 = vld [vmem:[#allocation5 + $0x8c8] sm:$0xff] }
 0x2d5   :  { %2422 = vmatpush1.bf16.msra.mxu0 %v964_v49  ;;  %2586 = vmatpush1.bf16.msra.mxu1 %v966_v30  ;;  %v374_v49 = vld [vmem:[#allocation5 + $0x6d0] sm:$0xff]  ;;  %v1092_v30 = vunpack.c.l.s8.bf16 %v372_v48 }
 0x2d6   :  { %2423 = vmatprep.subr.bf16.mxu0 %v981_v51  ;;  %2587 = vmatprep.subr.bf16.mxu1 %v983_v52  ;;  %v1094_v51 = vunpack.c.l.s8.bf16 %v374_v49  ;;  %v1109_v52 = vunpack.c.h.s8.bf16 %v373_v39 }
 0x2d9   :  { %2424 = vmatpush1.bf16.msra.mxu0 %v980_v54  ;;  %2588 = vmatpush1.bf16.msra.mxu1 %v982_v55  ;;  %v391_v54 = vld [vmem:[#allocation5 + $0x758] sm:$0xff]  ;;  %v1108_v55 = vunpack.c.h.s8.bf16 %v372_v48 }
 0x2da   :  { %2425 = vmatprep.subr.bf16.mxu0 %v997_v56  ;;  %2589 = vmatprep.subr.bf16.mxu1 %v999_v57  ;;  %v1110_v56 = vunpack.c.h.s8.bf16 %v374_v49  ;;  %v1125_v57 = vunpack.c.l.s8.bf16 %v389_v53  ;;  %v1127_v58 = vunpack.c.l.s8.bf16 %v391_v54  ;;  %v1143_v2 = vunpack.c.h.s8.bf16 %v391_v54  ;;  %v436_v49 = vld [vmem:[#allocation5 + $0x8c0] sm:$0xff]  ;;  %v453_v54 = vld [vmem:[#allocation5 + $0x948] sm:$0xff] }
 0x2dd   :  { %2426 = vmatpush1.bf16.msra.mxu0 %v996_v62  ;;  %2590 = vmatpush1.bf16.msra.mxu1 %v998_v63  ;;  %v390_v62 = vld [vmem:[#allocation5 + $0x750] sm:$0xff]  ;;  %v1124_v63 = vunpack.c.l.s8.bf16 %v388_v59 }
 0x2de   :  { %2427 = vmatprep.subr.bf16.mxu0 %v1013_v0  ;;  %2591 = vmatprep.subr.bf16.mxu1 %v1015_v1  ;;  %v1126_v0 = vunpack.c.l.s8.bf16 %v390_v62  ;;  %v1141_v1 = vunpack.c.h.s8.bf16 %v389_v53 }
 0x2e1   :  { %2428 = vmatpush1.bf16.msra.mxu0 %v1012_v17  ;;  %2592 = vmatpush1.bf16.msra.mxu1 %v1014_v5  ;;  %v407_v17 = vld [vmem:[#allocation5 + $0x7d8] sm:$0xff]  ;;  %v1140_v5 = vunpack.c.h.s8.bf16 %v388_v59 }
 0x2e2   :  { %2429 = vmatprep.subr.bf16.mxu0 %v1029_v6  ;;  %2593 = vmatprep.subr.bf16.mxu1 %v1031_v7  ;;  %v1142_v6 = vunpack.c.h.s8.bf16 %v390_v62  ;;  %v1157_v7 = vunpack.c.l.s8.bf16 %v405_v3  ;;  %v1159_v8 = vunpack.c.l.s8.bf16 %v407_v17  ;;  %v1175_v21 = vunpack.c.h.s8.bf16 %v407_v17  ;;  %v452_v62 = vld [vmem:[#allocation5 + $0x940] sm:$0xff]  ;;  %v469_v17 = vld [vmem:[#allocation5 + $0x9c8] sm:$0xff] }
 0x2e5   :  { %2430 = vmatpush1.bf16.msra.mxu0 %v1028_v11  ;;  %2594 = vmatpush1.bf16.msra.mxu1 %v1030_v12  ;;  %v406_v11 = vld [vmem:[#allocation5 + $0x7d0] sm:$0xff]  ;;  %v1156_v12 = vunpack.c.l.s8.bf16 %v404_v10 }
 0x2e6   :  { %2431 = vmatprep.subr.bf16.mxu0 %v1045_v13  ;;  %2595 = vmatprep.subr.bf16.mxu1 %v1047_v14  ;;  %v1158_v13 = vunpack.c.l.s8.bf16 %v406_v11  ;;  %v1173_v14 = vunpack.c.h.s8.bf16 %v405_v3 }
 0x2e9   :  { %2432 = vmatpush1.bf16.msra.mxu0 %v1044_v25  ;;  %2596 = vmatpush1.bf16.msra.mxu1 %v1046_v26  ;;  %v423_v25 = vld [vmem:[#allocation5 + $0x858] sm:$0xff]  ;;  %v1172_v26 = vunpack.c.h.s8.bf16 %v404_v10 }
 0x2ea   :  { %2433 = vmatprep.subr.bf16.mxu0 %v1061_v29  ;;  %2597 = vmatprep.subr.bf16.mxu1 %v1063_v31  ;;  %v1174_v29 = vunpack.c.h.s8.bf16 %v406_v11  ;;  %v1189_v31 = vunpack.c.l.s8.bf16 %v421_v22  ;;  %v1191_v32 = vunpack.c.l.s8.bf16 %v423_v25  ;;  %v1207_v39 = vunpack.c.h.s8.bf16 %v423_v25  ;;  %v468_v11 = vld [vmem:[#allocation5 + $0x9c0] sm:$0xff]  ;;  %v485_v25 = vld [vmem:[#allocation5 + $0xa48] sm:$0xff] }
 0x2ed   :  { %2434 = vmatpush1.bf16.msra.mxu0 %v1060_v34  ;;  %2598 = vmatpush1.bf16.msra.mxu1 %v1062_v36  ;;  %v422_v34 = vld [vmem:[#allocation5 + $0x850] sm:$0xff]  ;;  %v1188_v36 = vunpack.c.l.s8.bf16 %v420_v33 }
 0x2ee   :  { %2435 = vmatprep.subr.bf16.mxu0 %v1077_v37  ;;  %2599 = vmatprep.subr.bf16.mxu1 %v1079_v38  ;;  %v1190_v37 = vunpack.c.l.s8.bf16 %v422_v34  ;;  %v1205_v38 = vunpack.c.h.s8.bf16 %v421_v22 }
 0x2f1   :  { %2436 = vmatpush1.bf16.msra.mxu0 %v1076_v41  ;;  %2600 = vmatpush1.bf16.msra.mxu1 %v1078_v45  ;;  %v439_v41 = vld [vmem:[#allocation5 + $0x8d8] sm:$0xff]  ;;  %v1204_v45 = vunpack.c.h.s8.bf16 %v420_v33 }
 0x2f2   :  { %2437 = vmatprep.subr.bf16.mxu0 %v1093_v46  ;;  %2601 = vmatprep.subr.bf16.mxu1 %v1095_v47  ;;  %v1206_v46 = vunpack.c.h.s8.bf16 %v422_v34  ;;  %v1221_v47 = vunpack.c.l.s8.bf16 %v437_v40  ;;  %v1223_v48 = vunpack.c.l.s8.bf16 %v439_v41  ;;  %v1239_v53 = vunpack.c.h.s8.bf16 %v439_v41  ;;  %v484_v34 = vld [vmem:[#allocation5 + $0xa40] sm:$0xff]  ;;  %v501_v41 = vld [vmem:[#allocation5 + $0xac8] sm:$0xff] }
 0x2f5   :  { %2438 = vmatpush1.bf16.msra.mxu0 %v1092_v30  ;;  %2602 = vmatpush1.bf16.msra.mxu1 %v1094_v51  ;;  %v438_v30 = vld [vmem:[#allocation5 + $0x8d0] sm:$0xff]  ;;  %v1220_v51 = vunpack.c.l.s8.bf16 %v436_v49 }
 0x2f6   :  { %2439 = vmatprep.subr.bf16.mxu0 %v1109_v52  ;;  %2603 = vmatprep.subr.bf16.mxu1 %v1111_v61  ;;  %v1222_v52 = vunpack.c.l.s8.bf16 %v438_v30  ;;  %v1237_v61 = vunpack.c.h.s8.bf16 %v437_v40 }
 0x2f9   :  { %2440 = vmatpush1.bf16.msra.mxu0 %v1108_v55  ;;  %2604 = vmatpush1.bf16.msra.mxu1 %v1110_v56  ;;  %v455_v55 = vld [vmem:[#allocation5 + $0x958] sm:$0xff]  ;;  %v1236_v56 = vunpack.c.h.s8.bf16 %v436_v49 }
 0x2fa   :  { %2441 = vmatprep.subr.bf16.mxu0 %v1125_v57  ;;  %2605 = vmatprep.subr.bf16.mxu1 %v1127_v58  ;;  %v1238_v57 = vunpack.c.h.s8.bf16 %v438_v30  ;;  %v1253_v58 = vunpack.c.l.s8.bf16 %v453_v54  ;;  %v1255_v59 = vunpack.c.l.s8.bf16 %v455_v55  ;;  %v1271_v3 = vunpack.c.h.s8.bf16 %v455_v55  ;;  %v500_v30 = vld [vmem:[#allocation5 + $0xac0] sm:$0xff]  ;;  %v517_v55 = vld [vmem:[#allocation5 + $0xb48] sm:$0xff] }
 0x2fd   :  { %2442 = vmatpush1.bf16.msra.mxu0 %v1124_v63  ;;  %2606 = vmatpush1.bf16.msra.mxu1 %v1126_v0  ;;  %v454_v63 = vld [vmem:[#allocation5 + $0x950] sm:$0xff]  ;;  %v1252_v0 = vunpack.c.l.s8.bf16 %v452_v62 }
 0x2fe   :  { %2443 = vmatprep.subr.bf16.mxu0 %v1141_v1  ;;  %2607 = vmatprep.subr.bf16.mxu1 %v1143_v2  ;;  %v1254_v1 = vunpack.c.l.s8.bf16 %v454_v63  ;;  %v1269_v2 = vunpack.c.h.s8.bf16 %v453_v54 }
 0x301   :  { %2444 = vmatpush1.bf16.msra.mxu0 %v1140_v5  ;;  %2608 = vmatpush1.bf16.msra.mxu1 %v1142_v6  ;;  %v471_v5 = vld [vmem:[#allocation5 + $0x9d8] sm:$0xff]  ;;  %v1268_v6 = vunpack.c.h.s8.bf16 %v452_v62 }
 0x302   :  { %2445 = vmatprep.subr.bf16.mxu0 %v1157_v7  ;;  %2609 = vmatprep.subr.bf16.mxu1 %v1159_v8  ;;  %v1270_v7 = vunpack.c.h.s8.bf16 %v454_v63  ;;  %v1285_v8 = vunpack.c.l.s8.bf16 %v469_v17  ;;  %v1287_v10 = vunpack.c.l.s8.bf16 %v471_v5  ;;  %v1303_v22 = vunpack.c.h.s8.bf16 %v471_v5  ;;  %v516_v63 = vld [vmem:[#allocation5 + $0xb40] sm:$0xff]  ;;  %v533_v5 = vld [vmem:[#allocation5 + $0xbc8] sm:$0xff] }
 0x305   :  { %2446 = vmatpush1.bf16.msra.mxu0 %v1156_v12  ;;  %2610 = vmatpush1.bf16.msra.mxu1 %v1158_v13  ;;  %v470_v12 = vld [vmem:[#allocation5 + $0x9d0] sm:$0xff]  ;;  %v1284_v13 = vunpack.c.l.s8.bf16 %v468_v11 }
 0x306   :  { %2447 = vmatprep.subr.bf16.mxu0 %v1173_v14  ;;  %2611 = vmatprep.subr.bf16.mxu1 %v1175_v21  ;;  %v1286_v14 = vunpack.c.l.s8.bf16 %v470_v12  ;;  %v1301_v21 = vunpack.c.h.s8.bf16 %v469_v17 }
 0x309   :  { %2448 = vmatpush1.bf16.msra.mxu0 %v1172_v26  ;;  %2612 = vmatpush1.bf16.msra.mxu1 %v1174_v29  ;;  %v487_v26 = vld [vmem:[#allocation5 + $0xa58] sm:$0xff]  ;;  %v1300_v29 = vunpack.c.h.s8.bf16 %v468_v11 }
 0x30a   :  { %2458 = vmatprep.subr.bf16.mxu0 %v1189_v31  ;;  %2622 = vmatprep.subr.bf16.mxu1 %v1191_v32  ;;  %v1302_v31 = vunpack.c.h.s8.bf16 %v470_v12  ;;  %v1317_v32 = vunpack.c.l.s8.bf16 %v485_v25  ;;  %v1319_v33 = vunpack.c.l.s8.bf16 %v487_v26  ;;  %v1335_v40 = vunpack.c.h.s8.bf16 %v487_v26  ;;  %v532_v12 = vld [vmem:[#allocation5 + $0xbc0] sm:$0xff]  ;;  %v549_v26 = vld [vmem:[#allocation5 + $0xc48] sm:$0xff] }
 0x30c   :  { %2450 = vmatmul.mubr.bf16.vlgmr.msra.gmra.mrb[8].mxu0 %v7542_v16  ;;  %2614 = vmatmul.mubr.bf16.vlgmr.msra.gmra.mrb[8].mxu1 %v7542_v16 }
 0x30d   :  { %2459 = vmatpush1.bf16.msra.mxu0 %v1188_v36  ;;  %2623 = vmatpush1.bf16.msra.mxu1 %v1190_v37  ;;  %v486_v36 = vld [vmem:[#allocation5 + $0xa50] sm:$0xff]  ;;  %v1316_v37 = vunpack.c.l.s8.bf16 %v484_v34 }
 0x30e   :  { %2460 = vmatprep.subr.bf16.mxu0 %v1205_v38  ;;  %2624 = vmatprep.subr.bf16.mxu1 %v1207_v39  ;;  %v1318_v38 = vunpack.c.l.s8.bf16 %v486_v36  ;;  %v1333_v39 = vunpack.c.h.s8.bf16 %v485_v25 }
 0x30f   :  { %2490 = vmatprep.mubr.bf16.mxu0 %v7551_v24  ;;  %2654 = vmatprep.mubr.bf16.mxu1 %v7551_v24 }
 0x311   :  { %2461 = vmatpush1.bf16.msra.mxu0 %v1204_v45  ;;  %2625 = vmatpush1.bf16.msra.mxu1 %v1206_v46  ;;  %v503_v45 = vld [vmem:[#allocation5 + $0xad8] sm:$0xff]  ;;  %v1332_v46 = vunpack.c.h.s8.bf16 %v484_v34 }
 0x312   :  { %2462 = vmatprep.subr.bf16.mxu0 %v1221_v47  ;;  %2626 = vmatprep.subr.bf16.mxu1 %v1223_v48  ;;  %v1334_v47 = vunpack.c.h.s8.bf16 %v486_v36  ;;  %v1349_v48 = vunpack.c.l.s8.bf16 %v501_v41  ;;  %v1351_v49 = vunpack.c.l.s8.bf16 %v503_v45  ;;  %v1367_v54 = vunpack.c.h.s8.bf16 %v503_v45  ;;  %v548_v36 = vld [vmem:[#allocation5 + $0xc40] sm:$0xff]  ;;  %v565_v45 = vld [vmem:[#allocation5 + $0xcc8] sm:$0xff] }
 0x315   :  { %2463 = vmatpush1.bf16.msra.mxu0 %v1220_v51  ;;  %2627 = vmatpush1.bf16.msra.mxu1 %v1222_v52  ;;  %v502_v51 = vld [vmem:[#allocation5 + $0xad0] sm:$0xff]  ;;  %v1348_v52 = vunpack.c.l.s8.bf16 %v500_v30 }
 0x316   :  { %2464 = vmatprep.subr.bf16.mxu0 %v1237_v61  ;;  %2628 = vmatprep.subr.bf16.mxu1 %v1239_v53  ;;  %v1350_v61 = vunpack.c.l.s8.bf16 %v502_v51  ;;  %v1365_v53 = vunpack.c.h.s8.bf16 %v501_v41 }
 0x319   :  { %2465 = vmatpush1.bf16.msra.mxu0 %v1236_v56  ;;  %2629 = vmatpush1.bf16.msra.mxu1 %v1238_v57  ;;  %v519_v56 = vld [vmem:[#allocation5 + $0xb58] sm:$0xff]  ;;  %v1364_v57 = vunpack.c.h.s8.bf16 %v500_v30 }
 0x31a   :  { %2466 = vmatprep.subr.bf16.mxu0 %v1253_v58  ;;  %2630 = vmatprep.subr.bf16.mxu1 %v1255_v59  ;;  %v1366_v58 = vunpack.c.h.s8.bf16 %v502_v51  ;;  %v1381_v59 = vunpack.c.l.s8.bf16 %v517_v55  ;;  %v1383_v62 = vunpack.c.l.s8.bf16 %v519_v56  ;;  %v1399_v17 = vunpack.c.h.s8.bf16 %v519_v56  ;;  %v564_v51 = vld [vmem:[#allocation5 + $0xcc0] sm:$0xff]  ;;  %v581_v56 = vld [vmem:[#allocation5 + $0xd48] sm:$0xff] }
 0x31d   :  { %2467 = vmatpush1.bf16.msra.mxu0 %v1252_v0  ;;  %2631 = vmatpush1.bf16.msra.mxu1 %v1254_v1  ;;  %v518_v0 = vld [vmem:[#allocation5 + $0xb50] sm:$0xff]  ;;  %v1380_v1 = vunpack.c.l.s8.bf16 %v516_v63 }
 0x31e   :  { %2468 = vmatprep.subr.bf16.mxu0 %v1269_v2  ;;  %2632 = vmatprep.subr.bf16.mxu1 %v1271_v3  ;;  %v1382_v2 = vunpack.c.l.s8.bf16 %v518_v0  ;;  %v1397_v3 = vunpack.c.h.s8.bf16 %v517_v55 }
 0x321   :  { %2469 = vmatpush1.bf16.msra.mxu0 %v1268_v6  ;;  %2633 = vmatpush1.bf16.msra.mxu1 %v1270_v7  ;;  %v535_v6 = vld [vmem:[#allocation5 + $0xbd8] sm:$0xff]  ;;  %v1396_v7 = vunpack.c.h.s8.bf16 %v516_v63 }
 0x322   :  { %2470 = vmatprep.subr.bf16.mxu0 %v1285_v8  ;;  %2634 = vmatprep.subr.bf16.mxu1 %v1287_v10  ;;  %v1398_v8 = vunpack.c.h.s8.bf16 %v518_v0  ;;  %v1413_v10 = vunpack.c.l.s8.bf16 %v533_v5  ;;  %v1415_v11 = vunpack.c.l.s8.bf16 %v535_v6  ;;  %v1431_v25 = vunpack.c.h.s8.bf16 %v535_v6  ;;  %v580_v0 = vld [vmem:[#allocation5 + $0xd40] sm:$0xff] }
 0x323   :  { %v7647_v6 = vsub.s32 5, %v7594_v9 }
 0x325   :  { %2471 = vmatpush1.bf16.msra.mxu0 %v1284_v13  ;;  %2635 = vmatpush1.bf16.msra.mxu1 %v1286_v14  ;;  %v534_v13 = vld [vmem:[#allocation5 + $0xbd0] sm:$0xff]  ;;  %v1412_v14 = vunpack.c.l.s8.bf16 %v532_v12 }
 0x326   :  { %2472 = vmatprep.subr.bf16.mxu0 %v1301_v21  ;;  %2636 = vmatprep.subr.bf16.mxu1 %v1303_v22  ;;  %v1414_v21 = vunpack.c.l.s8.bf16 %v534_v13  ;;  %v1429_v22 = vunpack.c.h.s8.bf16 %v533_v5 }
 0x329   :  { %2473 = vmatpush1.bf16.msra.mxu0 %v1300_v29  ;;  %2637 = vmatpush1.bf16.msra.mxu1 %v1302_v31  ;;  %v551_v29 = vld [vmem:[#allocation5 + $0xc58] sm:$0xff]  ;;  %v1428_v31 = vunpack.c.h.s8.bf16 %v532_v12 }
 0x32a   :  { %2474 = vmatprep.subr.bf16.mxu0 %v1317_v32  ;;  %2638 = vmatprep.subr.bf16.mxu1 %v1319_v33  ;;  %v1430_v32 = vunpack.c.h.s8.bf16 %v534_v13  ;;  %v1445_v33 = vunpack.c.l.s8.bf16 %v549_v26  ;;  %v1447_v34 = vunpack.c.l.s8.bf16 %v551_v29  ;;  %v1463_v41 = vunpack.c.h.s8.bf16 %v551_v29  ;;  %v599_v12 = vld [vmem:[#allocation5 + $0xdd8] sm:$0xff]  ;;  %v7159_v13 = vld [vmem:[#allocation8] sm:$0xff]  ;;  %v7160_v29 = vld [vmem:[#allocation10] sm:$0xff] }
 0x32d   :  { %2475 = vmatpush1.bf16.msra.mxu0 %v1316_v37  ;;  %2639 = vmatpush1.bf16.msra.mxu1 %v1318_v38  ;;  %v550_v37 = vld [vmem:[#allocation5 + $0xc50] sm:$0xff]  ;;  %v1444_v38 = vunpack.c.l.s8.bf16 %v548_v36 }
 0x32e   :  { %2476 = vmatprep.subr.bf16.mxu0 %v1333_v39  ;;  %2640 = vmatprep.subr.bf16.mxu1 %v1335_v40  ;;  %v1446_v39 = vunpack.c.l.s8.bf16 %v550_v37  ;;  %v1461_v40 = vunpack.c.h.s8.bf16 %v549_v26  ;;  %v1524_v26 = vunpack.c.h.s8.bf16 %v580_v0 }
 0x331   :  { %2477 = vmatpush1.bf16.msra.mxu0 %v1332_v46  ;;  %2641 = vmatpush1.bf16.msra.mxu1 %v1334_v47  ;;  %v567_v46 = vld [vmem:[#allocation5 + $0xcd8] sm:$0xff]  ;;  %v1460_v47 = vunpack.c.h.s8.bf16 %v548_v36  ;;  %v596_v36 = vld [vmem:[#allocation5 + $0xdc0] sm:$0xff] }
 0x332   :  { %2478 = vmatprep.subr.bf16.mxu0 %v1349_v48  ;;  %2642 = vmatprep.subr.bf16.mxu1 %v1351_v49  ;;  %v1462_v48 = vunpack.c.h.s8.bf16 %v550_v37  ;;  %v1477_v49 = vunpack.c.l.s8.bf16 %v565_v45  ;;  %v1479_v30 = vunpack.c.l.s8.bf16 %v567_v46  ;;  %v1495_v55 = vunpack.c.h.s8.bf16 %v567_v46  ;;  %v598_v37 = vld [vmem:[#allocation5 + $0xdd0] sm:$0xff] }
 0x335   :  { %2479 = vmatpush1.bf16.msra.mxu0 %v1348_v52  ;;  %2643 = vmatpush1.bf16.msra.mxu1 %v1350_v61  ;;  %v566_v52 = vld [vmem:[#allocation5 + $0xcd0] sm:$0xff]  ;;  %v1476_v61 = vunpack.c.l.s8.bf16 %v564_v51 }
 0x336   :  { %2480 = vmatprep.subr.bf16.mxu0 %v1365_v53  ;;  %2644 = vmatprep.subr.bf16.mxu1 %v1367_v54  ;;  %v1478_v53 = vunpack.c.l.s8.bf16 %v566_v52  ;;  %v1493_v54 = vunpack.c.h.s8.bf16 %v565_v45 }
 0x339   :  { %2481 = vmatpush1.bf16.msra.mxu0 %v1364_v57  ;;  %2645 = vmatpush1.bf16.msra.mxu1 %v1366_v58  ;;  %v583_v57 = vld [vmem:[#allocation5 + $0xd58] sm:$0xff]  ;;  %v1492_v58 = vunpack.c.h.s8.bf16 %v564_v51 }
 0x33a   :  { %2482 = vmatprep.subr.bf16.mxu0 %v1381_v59  ;;  %2646 = vmatprep.subr.bf16.mxu1 %v1383_v62  ;;  %v1494_v59 = vunpack.c.h.s8.bf16 %v566_v52  ;;  %v1509_v62 = vunpack.c.l.s8.bf16 %v581_v56  ;;  %v1511_v63 = vunpack.c.l.s8.bf16 %v583_v57 }
 0x33d   :  { %2483 = vmatpush1.bf16.msra.mxu0 %v1380_v1  ;;  %2647 = vmatpush1.bf16.msra.mxu1 %v1382_v2  ;;  %v582_v1 = vld [vmem:[#allocation5 + $0xd50] sm:$0xff]  ;;  %v7641_v2 = vsub.s32 4, %v7594_v9 }
 0x33e   :  { %2484 = vmatprep.subr.bf16.mxu0 %v1397_v3  ;;  %2648 = vmatprep.subr.bf16.mxu1 %v1399_v17  ;;  %v7644_v3 = vsub.s32 6, %v7594_v9  ;;  %v1508_v17 = vunpack.c.l.s8.bf16 %v580_v0  ;;  %v1510_v5 = vunpack.c.l.s8.bf16 %v582_v1  ;;  %v613_v0 = vld [vmem:[#allocation5 + $0xe48] sm:$0xff] }
 0x341   :  { %2485 = vmatpush1.bf16.msra.mxu0 %v1396_v7  ;;  %2649 = vmatpush1.bf16.msra.mxu1 %v1398_v8  ;;  %v7650_v7 = vsub.s32 7, %v7594_v9  ;;  %v1525_v8 = vunpack.c.h.s8.bf16 %v581_v56  ;;  %v1526_v9 = vunpack.c.h.s8.bf16 %v582_v1  ;;  %v615_v1 = vld [vmem:[#allocation5 + $0xe58] sm:$0xff] }
 0x342   :  { %2486 = vmatprep.subr.bf16.mxu0 %v1413_v10  ;;  %2650 = vmatprep.subr.bf16.mxu1 %v1415_v11  ;;  %v1527_v10 = vunpack.c.h.s8.bf16 %v583_v57  ;;  %v597_v11 = vld [vmem:[#allocation5 + $0xdc8] sm:$0xff] }
 0x345   :  { %2487 = vmatpush1.bf16.msra.mxu0 %v1412_v14  ;;  %2651 = vmatpush1.bf16.msra.mxu1 %v1414_v21  ;;  %v3055_v14 = vrot.slane %v7159_v13, %v7641_v2  ;;  %v3063_v21 = vrot.slane %v7159_v13, %v7644_v3 }
 0x346   :  { %2488 = vmatprep.subr.bf16.mxu0 %v1429_v22  ;;  %2652 = vmatprep.subr.bf16.mxu1 %v1431_v25  ;;  %v3059_v22 = vrot.slane %v7159_v13, %v7647_v6  ;;  %v3067_v25 = vrot.slane %v7159_v13, %v7650_v7  ;;  %v1556_v13 = vunpack.c.h.s8.bf16 %v596_v36 }
 0x349   :  { %2489 = vmatpush1.bf16.msra.mxu0 %v1428_v31  ;;  %2653 = vmatpush1.bf16.msra.mxu1 %v1430_v32  ;;  %v3155_v31 = vrot.slane %v7160_v29, %v7641_v2  ;;  %v3163_v32 = vrot.slane %v7160_v29, %v7644_v3 }
 0x34a   :  { %2499 = vmatprep.subr.bf16.mxu0 %v1445_v33  ;;  %2663 = vmatprep.subr.bf16.mxu1 %v1447_v34  ;;  %v1541_v33 = vunpack.c.l.s8.bf16 %v597_v11  ;;  %v1543_v34 = vunpack.c.l.s8.bf16 %v599_v12 }
 0x34c   :  { %2491 = vmatmul.mubr.bf16.vlgmr.msra.gmra.mrb[8].mxu0 %v7559_v60  ;;  %2655 = vmatmul.mubr.bf16.vlgmr.msra.gmra.mrb[8].mxu1 %v7559_v60 }
 0x34d   :  { %2500 = vmatpush1.bf16.msra.mxu0 %v1444_v38  ;;  %2664 = vmatpush1.bf16.msra.mxu1 %v1446_v39 }
 0x34e   :  { %2501 = vmatprep.subr.bf16.mxu0 %v1461_v40  ;;  %2665 = vmatprep.subr.bf16.mxu1 %v1463_v41  ;;  %v3159_v40 = vrot.slane %v7160_v29, %v7647_v6  ;;  %v3167_v41 = vrot.slane %v7160_v29, %v7650_v7 }
 0x34f   :  { %2531 = vmatprep.mubr.bf16.mxu0 %v7568_v4  ;;  %2695 = vmatprep.mubr.bf16.mxu1 %v7568_v4 }
 0x351   :  { %2502 = vmatpush1.bf16.msra.mxu0 %v1460_v47  ;;  %2666 = vmatpush1.bf16.msra.mxu1 %v1462_v48 }
 0x352   :  { %2503 = vmatprep.subr.bf16.mxu0 %v1477_v49  ;;  %2667 = vmatprep.subr.bf16.mxu1 %v1479_v30 }
 0x355   :  { %2504 = vmatpush1.bf16.msra.mxu0 %v1476_v61  ;;  %2668 = vmatpush1.bf16.msra.mxu1 %v1478_v53  ;;  %v1540_v61 = vunpack.c.l.s8.bf16 %v596_v36  ;;  %v1542_v53 = vunpack.c.l.s8.bf16 %v598_v37  ;;  %v629_v36 = vld [vmem:[#allocation5 + $0xec8] sm:$0xff] }
 0x356   :  { %2505 = vmatprep.subr.bf16.mxu0 %v1493_v54  ;;  %2669 = vmatprep.subr.bf16.mxu1 %v1495_v55 }
 0x359   :  { %2506 = vmatpush1.bf16.msra.mxu0 %v1492_v58  ;;  %2670 = vmatpush1.bf16.msra.mxu1 %v1494_v59  ;;  %v1557_v58 = vunpack.c.h.s8.bf16 %v597_v11  ;;  %v1559_v59 = vunpack.c.h.s8.bf16 %v599_v12  ;;  %v1573_v11 = vunpack.c.l.s8.bf16 %v613_v0  ;;  %v1575_v12 = vunpack.c.l.s8.bf16 %v615_v1 }
 0x35a   :  { %2507 = vmatprep.subr.bf16.mxu0 %v1509_v62  ;;  %2671 = vmatprep.subr.bf16.mxu1 %v1511_v63 }
 0x35d   :  { %2508 = vmatpush1.bf16.msra.mxu0 %v1508_v17  ;;  %2672 = vmatpush1.bf16.msra.mxu1 %v1510_v5 }
 0x35e   :  { %2509 = vmatprep.subr.bf16.mxu0 %v1525_v8  ;;  %2673 = vmatprep.subr.bf16.mxu1 %v1527_v10 }
 0x35f   :  { %v2205_v38 = vpop.f32.mrb[4].mxu0  ;;  %v2369_v39 = vpop.f32.mrb[4].mxu1 }
 0x360   :  { %v3120_v45 = vmul.f32 %v3055_v14, %v2205_v38  ;;  %v3122_v46 = vmul.f32 %v3063_v21, %v2369_v39  ;;  %v2207_v47 = vpop.f32.mrb[5].mxu0  ;;  %v2371_v48 = vpop.f32.mrb[5].mxu1  ;;  %v1558_v14 = vunpack.c.h.s8.bf16 %v598_v37  ;;  %v631_v37 = vld [vmem:[#allocation5 + $0xed8] sm:$0xff] }
 0x361   :  { %v3121_v49 = vmul.f32 %v3059_v22, %v2207_v47  ;;  %v3123_v30 = vmul.f32 %v3067_v25, %v2371_v48  ;;  %v2209_v51 = vpop.f32.mrb[6].mxu0  ;;  %v2373_v52 = vpop.f32.mrb[6].mxu1  ;;  %2510 = vmatpush1.bf16.msra.mxu0 %v1524_v26  ;;  %2674 = vmatpush1.bf16.msra.mxu1 %v1526_v9  ;;  %v612_v25 = vld [vmem:[#allocation5 + $0xe40] sm:$0xff]  ;;  %v614_v26 = vld [vmem:[#allocation5 + $0xe50] sm:$0xff] }
 0x362   :  { %v3220_v54 = vadd.f32 %v3155_v31, %v3120_v45  ;;  %v3222_v55 = vadd.f32 %v3163_v32, %v3122_v46  ;;  %v2210_v56 = vpop.f32.mrb[7].mxu0  ;;  %v2374_v57 = vpop.f32.mrb[7].mxu1  ;;  %2511 = vmatprep.subr.bf16.mxu0 %v1541_v33  ;;  %2675 = vmatprep.subr.bf16.mxu1 %v1543_v34  ;;  %v1572_v31 = vunpack.c.l.s8.bf16 %v612_v25  ;;  %v1574_v32 = vunpack.c.l.s8.bf16 %v614_v26  ;;  %v628_v45 = vld [vmem:[#allocation5 + $0xec0] sm:$0xff]  ;;  %v630_v46 = vld [vmem:[#allocation5 + $0xed0] sm:$0xff]  ;;  %v645_v51 = vld [vmem:[#allocation5 + $0xf48] sm:$0xff] }
 0x363   :  { %v3221_v62 = vadd.f32 %v3159_v40, %v3121_v49  ;;  %v3223_v63 = vadd.f32 %v3167_v41, %v3123_v30  ;;  %v1589_v33 = vunpack.c.h.s8.bf16 %v613_v0  ;;  %v1591_v34 = vunpack.c.h.s8.bf16 %v615_v1  ;;  %v647_v52 = vld [vmem:[#allocation5 + $0xf58] sm:$0xff]  ;;  %v644_v56 = vld [vmem:[#allocation5 + $0xf40] sm:$0xff]  ;;  %v646_v57 = vld [vmem:[#allocation5 + $0xf50] sm:$0xff] }
 0x364   :  { %v3236_v17 = vmax.f32 %v3220_v54, 0.0  ;;  %v3238_v5 = vmax.f32 %v3222_v55, 0.0  ;;  %v1588_v38 = vunpack.c.h.s8.bf16 %v612_v25  ;;  %v1590_v39 = vunpack.c.h.s8.bf16 %v614_v26  ;;  %v661_v0 = vld [vmem:[#allocation5 + $0xfc8] sm:$0xff]  ;;  %v663_v1 = vld [vmem:[#allocation5 + $0xfd8] sm:$0xff] }
 0x365   :  { %v3237_v8 = vmax.f32 %v3221_v62, 0.0  ;;  %v3239_v10 = vmax.f32 %v3223_v63, 0.0  ;;  %2512 = vmatpush1.bf16.msra.mxu0 %v1540_v61  ;;  %2676 = vmatpush1.bf16.msra.mxu1 %v1542_v53  ;;  %v1605_v40 = vunpack.c.l.s8.bf16 %v629_v36  ;;  %v1607_v41 = vunpack.c.l.s8.bf16 %v631_v37 }
 0x366   :  { %v7660_v21 = vpack.c.bf16 %v3236_v17, %v3236_v17  ;;  %v7662_v22 = vpack.c.bf16 %v3238_v5, %v3238_v5  ;;  %2513 = vmatprep.subr.bf16.mxu0 %v1557_v58  ;;  %2677 = vmatprep.subr.bf16.mxu1 %v1559_v59  ;;  %v1604_v47 = vunpack.c.l.s8.bf16 %v628_v45  ;;  %v1606_v48 = vunpack.c.l.s8.bf16 %v630_v46 }
 0x367   :  { %v7664_v9 = vpack.c.bf16 %v3237_v8, %v3237_v8  ;;  %v7666_v29 = vpack.c.bf16 %v3239_v10, %v3239_v10  ;;  %v1621_v49 = vunpack.c.h.s8.bf16 %v629_v36  ;;  %v1623_v30 = vunpack.c.h.s8.bf16 %v631_v37 }
 0x368   :  { %v1620_v61 = vunpack.c.h.s8.bf16 %v628_v45  ;;  %v1622_v53 = vunpack.c.h.s8.bf16 %v630_v46  ;;  %v1637_v54 = vunpack.c.l.s8.bf16 %v645_v51  ;;  %v1639_v55 = vunpack.c.l.s8.bf16 %v647_v52 }
 0x369   :  { %2514 = vmatpush1.bf16.msra.mxu0 %v1556_v13  ;;  %2678 = vmatpush1.bf16.msra.mxu1 %v1558_v14  ;;  %v1636_v58 = vunpack.c.l.s8.bf16 %v644_v56  ;;  %v1638_v59 = vunpack.c.l.s8.bf16 %v646_v57  ;;  %v1653_v62 = vunpack.c.h.s8.bf16 %v645_v51  ;;  %v1655_v63 = vunpack.c.h.s8.bf16 %v647_v52  ;;  %v660_v13 = vld [vmem:[#allocation5 + $0xfc0] sm:$0xff]  ;;  %v662_v14 = vld [vmem:[#allocation5 + $0xfd0] sm:$0xff] }
 0x36a   :  { %2515 = vmatprep.subr.bf16.mxu0 %v1573_v11  ;;  %2679 = vmatprep.subr.bf16.mxu1 %v1575_v12  ;;  %v1652_v17 = vunpack.c.h.s8.bf16 %v644_v56  ;;  %v1654_v5 = vunpack.c.h.s8.bf16 %v646_v57  ;;  %v1669_v8 = vunpack.c.l.s8.bf16 %v661_v0  ;;  %v1671_v10 = vunpack.c.l.s8.bf16 %v663_v1 }
 0x36b   :  { %v1668_v11 = vunpack.c.l.s8.bf16 %v660_v13  ;;  %v1670_v12 = vunpack.c.l.s8.bf16 %v662_v14  ;;  %v1685_v25 = vunpack.c.h.s8.bf16 %v661_v0  ;;  %v1687_v26 = vunpack.c.h.s8.bf16 %v663_v1 }
 0x36d   :  { %2516 = vmatpush1.bf16.msra.mxu0 %v1572_v31  ;;  %2680 = vmatpush1.bf16.msra.mxu1 %v1574_v32  ;;  %v169_v31 = vld [vmem:[#allocation5 + $0x68] sm:$0xff]  ;;  %v171_v32 = vld [vmem:[#allocation5 + $0x78] sm:$0xff] }
 0x36e   :  { %2517 = vmatprep.subr.bf16.mxu0 %v1589_v33  ;;  %2681 = vmatprep.subr.bf16.mxu1 %v1591_v34  ;;  %v1684_v33 = vunpack.c.h.s8.bf16 %v660_v13  ;;  %v1686_v34 = vunpack.c.h.s8.bf16 %v662_v14  ;;  %v681_v36 = vunpack.c.l.s8.bf16 %v169_v31  ;;  %v683_v37 = vunpack.c.l.s8.bf16 %v171_v32  ;;  %v217_v14 = vld [vmem:[#allocation5 + $0x1e8] sm:$0xff] }
 0x36f   :  { %v697_v45 = vunpack.c.h.s8.bf16 %v169_v31  ;;  %v699_v46 = vunpack.c.h.s8.bf16 %v171_v32  ;;  %v216_v32 = vld [vmem:[#allocation5 + $0x1e0] sm:$0xff] }
 0x371   :  { %2518 = vmatpush1.bf16.msra.mxu0 %v1588_v38  ;;  %2682 = vmatpush1.bf16.msra.mxu1 %v1590_v39  ;;  %v168_v38 = vld [vmem:[#allocation5 + $0x60] sm:$0xff]  ;;  %v170_v39 = vld [vmem:[#allocation5 + $0x70] sm:$0xff] }
 0x372   :  { %2519 = vmatprep.subr.bf16.mxu0 %v1605_v40  ;;  %2683 = vmatprep.subr.bf16.mxu1 %v1607_v41  ;;  %v680_v40 = vunpack.c.l.s8.bf16 %v168_v38  ;;  %v682_v41 = vunpack.c.l.s8.bf16 %v170_v39 }
 0x375   :  { %2520 = vmatpush1.bf16.msra.mxu0 %v1604_v47  ;;  %2684 = vmatpush1.bf16.msra.mxu1 %v1606_v48  ;;  %v185_v47 = vld [vmem:[#allocation5 + $0xe8] sm:$0xff]  ;;  %v187_v48 = vld [vmem:[#allocation5 + $0xf8] sm:$0xff] }
 0x376   :  { %2521 = vmatprep.subr.bf16.mxu0 %v1621_v49  ;;  %2685 = vmatprep.subr.bf16.mxu1 %v1623_v30  ;;  %v696_v49 = vunpack.c.h.s8.bf16 %v168_v38  ;;  %v698_v30 = vunpack.c.h.s8.bf16 %v170_v39  ;;  %v713_v51 = vunpack.c.l.s8.bf16 %v185_v47  ;;  %v715_v52 = vunpack.c.l.s8.bf16 %v187_v48  ;;  %v233_v39 = vld [vmem:[#allocation5 + $0x268] sm:$0xff] }
 0x377   :  { %v729_v56 = vunpack.c.h.s8.bf16 %v185_v47  ;;  %v731_v57 = vunpack.c.h.s8.bf16 %v187_v48  ;;  %v232_v48 = vld [vmem:[#allocation5 + $0x260] sm:$0xff] }
 0x379   :  { %2522 = vmatpush1.bf16.msra.mxu0 %v1620_v61  ;;  %2686 = vmatpush1.bf16.msra.mxu1 %v1622_v53  ;;  %v184_v61 = vld [vmem:[#allocation5 + $0xe0] sm:$0xff]  ;;  %v186_v53 = vld [vmem:[#allocation5 + $0xf0] sm:$0xff] }
 0x37a   :  { %2523 = vmatprep.subr.bf16.mxu0 %v1637_v54  ;;  %2687 = vmatprep.subr.bf16.mxu1 %v1639_v55  ;;  %v712_v54 = vunpack.c.l.s8.bf16 %v184_v61  ;;  %v714_v55 = vunpack.c.l.s8.bf16 %v186_v53 }
 0x37d   :  { %2524 = vmatpush1.bf16.msra.mxu0 %v1636_v58  ;;  %2688 = vmatpush1.bf16.msra.mxu1 %v1638_v59  ;;  %v201_v58 = vld [vmem:[#allocation5 + $0x168] sm:$0xff]  ;;  %v203_v59 = vld [vmem:[#allocation5 + $0x178] sm:$0xff] }
 0x37e   :  { %2525 = vmatprep.subr.bf16.mxu0 %v1653_v62  ;;  %2689 = vmatprep.subr.bf16.mxu1 %v1655_v63  ;;  %v728_v62 = vunpack.c.h.s8.bf16 %v184_v61  ;;  %v730_v63 = vunpack.c.h.s8.bf16 %v186_v53  ;;  %v745_v0 = vunpack.c.l.s8.bf16 %v201_v58  ;;  %v747_v1 = vunpack.c.l.s8.bf16 %v203_v59  ;;  %v249_v53 = vld [vmem:[#allocation5 + $0x2e8] sm:$0xff] }
 0x37f   :  { %v763_v13 = vunpack.c.h.s8.bf16 %v203_v59  ;;  %v248_v59 = vld [vmem:[#allocation5 + $0x2e0] sm:$0xff] }
 0x381   :  { %2526 = vmatpush1.bf16.msra.mxu0 %v1652_v17  ;;  %2690 = vmatpush1.bf16.msra.mxu1 %v1654_v5  ;;  %v200_v17 = vld [vmem:[#allocation5 + $0x160] sm:$0xff] }
 0x382   :  { %2527 = vmatprep.subr.bf16.mxu0 %v1669_v8  ;;  %2691 = vmatprep.subr.bf16.mxu1 %v1671_v10  ;;  %v744_v5 = vunpack.c.l.s8.bf16 %v200_v17  ;;  %v761_v10 = vunpack.c.h.s8.bf16 %v201_v58 }
 0x385   :  { %2528 = vmatpush1.bf16.msra.mxu0 %v1668_v11  ;;  %2692 = vmatpush1.bf16.msra.mxu1 %v1670_v12  ;;  %v219_v11 = vld [vmem:[#allocation5 + $0x1f8] sm:$0xff]  ;;  %v760_v12 = vunpack.c.h.s8.bf16 %v200_v17 }
 0x386   :  { %2529 = vmatprep.subr.bf16.mxu0 %v1685_v25  ;;  %2693 = vmatprep.subr.bf16.mxu1 %v1687_v26  ;;  %v777_v26 = vunpack.c.l.s8.bf16 %v217_v14  ;;  %v779_v31 = vunpack.c.l.s8.bf16 %v219_v11  ;;  %v795_v38 = vunpack.c.h.s8.bf16 %v219_v11  ;;  %v264_v11 = vld [vmem:[#allocation5 + $0x360] sm:$0xff] }
 0x389   :  { %2530 = vmatpush1.bf16.msra.mxu0 %v1684_v33  ;;  %2694 = vmatpush1.bf16.msra.mxu1 %v1686_v34  ;;  %v218_v33 = vld [vmem:[#allocation5 + $0x1f0] sm:$0xff]  ;;  %v776_v34 = vunpack.c.l.s8.bf16 %v216_v32 }
 0x38a   :  { %2704 = vmatprep.subr.bf16.mxu0 %v681_v36  ;;  %2868 = vmatprep.subr.bf16.mxu1 %v683_v37  ;;  %v778_v36 = vunpack.c.l.s8.bf16 %v218_v33  ;;  %v793_v37 = vunpack.c.h.s8.bf16 %v217_v14 }
 0x38c   :  { %2532 = vmatmul.mubr.bf16.vlgmr.msra.gmra.mrb[8].mxu0 %v7576_v44  ;;  %2696 = vmatmul.mubr.bf16.vlgmr.msra.gmra.mrb[8].mxu1 %v7576_v44 }
 0x38d   :  { %2705 = vmatpush1.bf16.msra.mxu0 %v680_v40  ;;  %2869 = vmatpush1.bf16.msra.mxu1 %v682_v41  ;;  %v235_v40 = vld [vmem:[#allocation5 + $0x278] sm:$0xff]  ;;  %v792_v41 = vunpack.c.h.s8.bf16 %v216_v32 }
 0x38e   :  { %2706 = vmatprep.subr.bf16.mxu0 %v697_v45  ;;  %2870 = vmatprep.subr.bf16.mxu1 %v699_v46  ;;  %v794_v45 = vunpack.c.h.s8.bf16 %v218_v33  ;;  %v809_v46 = vunpack.c.l.s8.bf16 %v233_v39  ;;  %v811_v47 = vunpack.c.l.s8.bf16 %v235_v40  ;;  %v827_v61 = vunpack.c.h.s8.bf16 %v235_v40  ;;  %v281_v33 = vld [vmem:[#allocation5 + $0x3e8] sm:$0xff]  ;;  %v280_v40 = vld [vmem:[#allocation5 + $0x3e0] sm:$0xff] }
 0x38f   :  { %2736 = vmatprep.mubr.bf16.mxu0 %v7519_v35  ;;  %2900 = vmatprep.mubr.bf16.mxu1 %v7519_v35  ;;  %v202_v35 = vld [vmem:[#allocation5 + $0x170] sm:$0xff] }
 0x390   :  { %v746_v8 = vunpack.c.l.s8.bf16 %v202_v35  ;;  %v762_v25 = vunpack.c.h.s8.bf16 %v202_v35  ;;  %v265_v35 = vld [vmem:[#allocation5 + $0x368] sm:$0xff] }
 0x391   :  { %2707 = vmatpush1.bf16.msra.mxu0 %v696_v49  ;;  %2871 = vmatpush1.bf16.msra.mxu1 %v698_v30  ;;  %v234_v49 = vld [vmem:[#allocation5 + $0x270] sm:$0xff]  ;;  %v808_v30 = vunpack.c.l.s8.bf16 %v232_v48 }
 0x392   :  { %2708 = vmatprep.subr.bf16.mxu0 %v713_v51  ;;  %2872 = vmatprep.subr.bf16.mxu1 %v715_v52  ;;  %v810_v51 = vunpack.c.l.s8.bf16 %v234_v49  ;;  %v825_v52 = vunpack.c.h.s8.bf16 %v233_v39 }
 0x395   :  { %2709 = vmatpush1.bf16.msra.mxu0 %v712_v54  ;;  %2873 = vmatpush1.bf16.msra.mxu1 %v714_v55  ;;  %v251_v54 = vld [vmem:[#allocation5 + $0x2f8] sm:$0xff]  ;;  %v824_v55 = vunpack.c.h.s8.bf16 %v232_v48 }
 0x396   :  { %2710 = vmatprep.subr.bf16.mxu0 %v729_v56  ;;  %2874 = vmatprep.subr.bf16.mxu1 %v731_v57  ;;  %v826_v56 = vunpack.c.h.s8.bf16 %v234_v49  ;;  %v841_v57 = vunpack.c.l.s8.bf16 %v249_v53  ;;  %v843_v58 = vunpack.c.l.s8.bf16 %v251_v54  ;;  %v859_v17 = vunpack.c.h.s8.bf16 %v251_v54  ;;  %v297_v49 = vld [vmem:[#allocation5 + $0x468] sm:$0xff]  ;;  %v296_v54 = vld [vmem:[#allocation5 + $0x460] sm:$0xff] }
 0x399   :  { %2711 = vmatpush1.bf16.msra.mxu0 %v728_v62  ;;  %2875 = vmatpush1.bf16.msra.mxu1 %v730_v63  ;;  %v250_v62 = vld [vmem:[#allocation5 + $0x2f0] sm:$0xff]  ;;  %v840_v63 = vunpack.c.l.s8.bf16 %v248_v59 }
 0x39a   :  { %2712 = vmatprep.subr.bf16.mxu0 %v745_v0  ;;  %2876 = vmatprep.subr.bf16.mxu1 %v747_v1  ;;  %v842_v0 = vunpack.c.l.s8.bf16 %v250_v62  ;;  %v857_v1 = vunpack.c.h.s8.bf16 %v249_v53 }
 0x39d   :  { %2713 = vmatpush1.bf16.msra.mxu0 %v744_v5  ;;  %2877 = vmatpush1.bf16.msra.mxu1 %v746_v8  ;;  %v267_v5 = vld [vmem:[#allocation5 + $0x378] sm:$0xff]  ;;  %v856_v8 = vunpack.c.h.s8.bf16 %v248_v59 }
 0x39e   :  { %2714 = vmatprep.subr.bf16.mxu0 %v761_v10  ;;  %2878 = vmatprep.subr.bf16.mxu1 %v763_v13  ;;  %v858_v10 = vunpack.c.h.s8.bf16 %v250_v62  ;;  %v873_v13 = vunpack.c.l.s8.bf16 %v265_v35  ;;  %v875_v14 = vunpack.c.l.s8.bf16 %v267_v5  ;;  %v891_v32 = vunpack.c.h.s8.bf16 %v267_v5  ;;  %v313_v62 = vld [vmem:[#allocation5 + $0x4e8] sm:$0xff]  ;;  %v312_v5 = vld [vmem:[#allocation5 + $0x4e0] sm:$0xff] }
 0x3a1   :  { %2715 = vmatpush1.bf16.msra.mxu0 %v760_v12  ;;  %2879 = vmatpush1.bf16.msra.mxu1 %v762_v25  ;;  %v266_v12 = vld [vmem:[#allocation5 + $0x370] sm:$0xff]  ;;  %v872_v25 = vunpack.c.l.s8.bf16 %v264_v11 }
 0x3a2   :  { %2716 = vmatprep.subr.bf16.mxu0 %v777_v26  ;;  %2880 = vmatprep.subr.bf16.mxu1 %v779_v31  ;;  %v874_v26 = vunpack.c.l.s8.bf16 %v266_v12  ;;  %v889_v31 = vunpack.c.h.s8.bf16 %v265_v35 }
 0x3a5   :  { %2717 = vmatpush1.bf16.msra.mxu0 %v776_v34  ;;  %2881 = vmatpush1.bf16.msra.mxu1 %v778_v36  ;;  %v283_v34 = vld [vmem:[#allocation5 + $0x3f8] sm:$0xff]  ;;  %v888_v36 = vunpack.c.h.s8.bf16 %v264_v11  ;;  %v329_v11 = vld [vmem:[#allocation5 + $0x568] sm:$0xff] }
 0x3a6   :  { %2718 = vmatprep.subr.bf16.mxu0 %v793_v37  ;;  %2882 = vmatprep.subr.bf16.mxu1 %v795_v38  ;;  %v890_v37 = vunpack.c.h.s8.bf16 %v266_v12  ;;  %v905_v38 = vunpack.c.l.s8.bf16 %v281_v33  ;;  %v907_v39 = vunpack.c.l.s8.bf16 %v283_v34  ;;  %v923_v48 = vunpack.c.h.s8.bf16 %v283_v34  ;;  %v331_v12 = vld [vmem:[#allocation5 + $0x578] sm:$0xff] }
 0x3a9   :  { %2719 = vmatpush1.bf16.msra.mxu0 %v792_v41  ;;  %2883 = vmatpush1.bf16.msra.mxu1 %v794_v45  ;;  %v282_v41 = vld [vmem:[#allocation5 + $0x3f0] sm:$0xff]  ;;  %v904_v45 = vunpack.c.l.s8.bf16 %v280_v40 }
 0x3aa   :  { %2720 = vmatprep.subr.bf16.mxu0 %v809_v46  ;;  %2884 = vmatprep.subr.bf16.mxu1 %v811_v47  ;;  %v906_v46 = vunpack.c.l.s8.bf16 %v282_v41  ;;  %v921_v47 = vunpack.c.h.s8.bf16 %v281_v33  ;;  %v328_v33 = vld [vmem:[#allocation5 + $0x560] sm:$0xff] }
 0x3ab   :  { %v1000_v34 = vunpack.c.l.s8.bf16 %v328_v33 }
 0x3ad   :  { %2721 = vmatpush1.bf16.msra.mxu0 %v808_v30  ;;  %2885 = vmatpush1.bf16.msra.mxu1 %v810_v51  ;;  %v299_v30 = vld [vmem:[#allocation5 + $0x478] sm:$0xff]  ;;  %v920_v51 = vunpack.c.h.s8.bf16 %v280_v40 }
 0x3ae   :  { %2722 = vmatprep.subr.bf16.mxu0 %v825_v52  ;;  %2886 = vmatprep.subr.bf16.mxu1 %v827_v61  ;;  %v922_v52 = vunpack.c.h.s8.bf16 %v282_v41  ;;  %v937_v61 = vunpack.c.l.s8.bf16 %v297_v49  ;;  %v939_v53 = vunpack.c.l.s8.bf16 %v299_v30  ;;  %v955_v59 = vunpack.c.h.s8.bf16 %v299_v30  ;;  %v347_v40 = vld [vmem:[#allocation5 + $0x5f8] sm:$0xff] }
 0x3af   :  { %v1016_v41 = vunpack.c.h.s8.bf16 %v328_v33  ;;  %v395_v33 = vld [vmem:[#allocation5 + $0x778] sm:$0xff] }
 0x3b1   :  { %2723 = vmatpush1.bf16.msra.mxu0 %v824_v55  ;;  %2887 = vmatpush1.bf16.msra.mxu1 %v826_v56  ;;  %v298_v55 = vld [vmem:[#allocation5 + $0x470] sm:$0xff]  ;;  %v936_v56 = vunpack.c.l.s8.bf16 %v296_v54 }
 0x3b2   :  { %2724 = vmatprep.subr.bf16.mxu0 %v841_v57  ;;  %2888 = vmatprep.subr.bf16.mxu1 %v843_v58  ;;  %v938_v57 = vunpack.c.l.s8.bf16 %v298_v55  ;;  %v953_v58 = vunpack.c.h.s8.bf16 %v297_v49  ;;  %v346_v49 = vld [vmem:[#allocation5 + $0x5f0] sm:$0xff] }
 0x3b5   :  { %2725 = vmatpush1.bf16.msra.mxu0 %v840_v63  ;;  %2889 = vmatpush1.bf16.msra.mxu1 %v842_v0  ;;  %v315_v63 = vld [vmem:[#allocation5 + $0x4f8] sm:$0xff]  ;;  %v952_v0 = vunpack.c.h.s8.bf16 %v296_v54 }
 0x3b6   :  { %2726 = vmatprep.subr.bf16.mxu0 %v857_v1  ;;  %2890 = vmatprep.subr.bf16.mxu1 %v859_v17  ;;  %v954_v1 = vunpack.c.h.s8.bf16 %v298_v55  ;;  %v969_v17 = vunpack.c.l.s8.bf16 %v313_v62  ;;  %v971_v35 = vunpack.c.l.s8.bf16 %v315_v63  ;;  %v363_v54 = vld [vmem:[#allocation5 + $0x678] sm:$0xff] }
 0x3b9   :  { %2727 = vmatpush1.bf16.msra.mxu0 %v856_v8  ;;  %2891 = vmatpush1.bf16.msra.mxu1 %v858_v10  ;;  %v314_v8 = vld [vmem:[#allocation5 + $0x4f0] sm:$0xff]  ;;  %v968_v10 = vunpack.c.l.s8.bf16 %v312_v5 }
 0x3ba   :  { %2728 = vmatprep.subr.bf16.mxu0 %v873_v13  ;;  %2892 = vmatprep.subr.bf16.mxu1 %v875_v14  ;;  %v970_v13 = vunpack.c.l.s8.bf16 %v314_v8  ;;  %v987_v14 = vunpack.c.h.s8.bf16 %v315_v63 }
 0x3bd   :  { %2729 = vmatpush1.bf16.msra.mxu0 %v872_v25  ;;  %2893 = vmatpush1.bf16.msra.mxu1 %v874_v26  ;;  %v984_v25 = vunpack.c.h.s8.bf16 %v312_v5  ;;  %v986_v26 = vunpack.c.h.s8.bf16 %v314_v8  ;;  %v379_v5 = vld [vmem:[#allocation5 + $0x6f8] sm:$0xff] }
 0x3be   :  { %2730 = vmatprep.subr.bf16.mxu0 %v889_v31  ;;  %2894 = vmatprep.subr.bf16.mxu1 %v891_v32  ;;  %v1001_v31 = vunpack.c.l.s8.bf16 %v329_v11  ;;  %v1003_v32 = vunpack.c.l.s8.bf16 %v331_v12 }
 0x3c1   :  { %2731 = vmatpush1.bf16.msra.mxu0 %v888_v36  ;;  %2895 = vmatpush1.bf16.msra.mxu1 %v890_v37  ;;  %v1017_v37 = vunpack.c.h.s8.bf16 %v329_v11  ;;  %v378_v11 = vld [vmem:[#allocation5 + $0x6f0] sm:$0xff] }
 0x3c2   :  { %2732 = vmatprep.subr.bf16.mxu0 %v905_v38  ;;  %2896 = vmatprep.subr.bf16.mxu1 %v907_v39  ;;  %v1019_v38 = vunpack.c.h.s8.bf16 %v331_v12  ;;  %v345_v39 = vld [vmem:[#allocation5 + $0x5e8] sm:$0xff] }
 0x3c5   :  { %2733 = vmatpush1.bf16.msra.mxu0 %v904_v45  ;;  %2897 = vmatpush1.bf16.msra.mxu1 %v906_v46  ;;  %v1033_v46 = vunpack.c.l.s8.bf16 %v345_v39 }
 0x3c6   :  { %2734 = vmatprep.subr.bf16.mxu0 %v921_v47  ;;  %2898 = vmatprep.subr.bf16.mxu1 %v923_v48  ;;  %v1035_v47 = vunpack.c.l.s8.bf16 %v347_v40  ;;  %v344_v48 = vld [vmem:[#allocation5 + $0x5e0] sm:$0xff] }
 0x3c7   :  { %v1032_v30 = vunpack.c.l.s8.bf16 %v344_v48  ;;  %v1048_v55 = vunpack.c.h.s8.bf16 %v344_v48  ;;  %v411_v48 = vld [vmem:[#allocation5 + $0x7f8] sm:$0xff] }
 0x3c9   :  { %2735 = vmatpush1.bf16.msra.mxu0 %v920_v51  ;;  %2899 = vmatpush1.bf16.msra.mxu1 %v922_v52  ;;  %v1034_v51 = vunpack.c.l.s8.bf16 %v346_v49  ;;  %v1049_v52 = vunpack.c.h.s8.bf16 %v345_v39  ;;  %v394_v39 = vld [vmem:[#allocation5 + $0x770] sm:$0xff] }
 0x3ca   :  { %2745 = vmatprep.subr.bf16.mxu0 %v937_v61  ;;  %2909 = vmatprep.subr.bf16.mxu1 %v939_v53  ;;  %v1051_v61 = vunpack.c.h.s8.bf16 %v347_v40  ;;  %v361_v53 = vld [vmem:[#allocation5 + $0x668] sm:$0xff] }
 0x3cc   :  { %2737 = vmatmul.mubr.bf16.vlgmr.msra.gmra.mrb[12].mxu0 %v7525_v42  ;;  %2901 = vmatmul.mubr.bf16.vlgmr.msra.gmra.mrb[12].mxu1 %v7525_v42  ;;  %v985_v42 = vunpack.c.h.s8.bf16 %v313_v62  ;;  %v362_v62 = vld [vmem:[#allocation5 + $0x670] sm:$0xff] }
 0x3cd   :  { %2746 = vmatpush1.bf16.msra.mxu0 %v936_v56  ;;  %2910 = vmatpush1.bf16.msra.mxu1 %v938_v57  ;;  %v1050_v56 = vunpack.c.h.s8.bf16 %v346_v49  ;;  %v1065_v57 = vunpack.c.l.s8.bf16 %v361_v53 }
 0x3ce   :  { %2747 = vmatprep.subr.bf16.mxu0 %v953_v58  ;;  %2911 = vmatprep.subr.bf16.mxu1 %v955_v59  ;;  %v1067_v58 = vunpack.c.l.s8.bf16 %v363_v54  ;;  %v360_v59 = vld [vmem:[#allocation5 + $0x660] sm:$0xff] }
 0x3cf   :  { %2777 = vmatprep.mubr.bf16.mxu0 %v7534_v50  ;;  %2941 = vmatprep.mubr.bf16.mxu1 %v7534_v50  ;;  %v330_v50 = vld [vmem:[#allocation5 + $0x570] sm:$0xff]  ;;  %v1064_v63 = vunpack.c.l.s8.bf16 %v360_v59  ;;  %v1080_v8 = vunpack.c.h.s8.bf16 %v360_v59  ;;  %v427_v59 = vld [vmem:[#allocation5 + $0x878] sm:$0xff] }
 0x3d0   :  { %v1002_v36 = vunpack.c.l.s8.bf16 %v330_v50  ;;  %v1018_v45 = vunpack.c.h.s8.bf16 %v330_v50 }
 0x3d1   :  { %2748 = vmatpush1.bf16.msra.mxu0 %v952_v0  ;;  %2912 = vmatpush1.bf16.msra.mxu1 %v954_v1  ;;  %v1066_v0 = vunpack.c.l.s8.bf16 %v362_v62  ;;  %v1081_v1 = vunpack.c.h.s8.bf16 %v361_v53  ;;  %v410_v53 = vld [vmem:[#allocation5 + $0x7f0] sm:$0xff] }
 0x3d2   :  { %2749 = vmatprep.subr.bf16.mxu0 %v969_v17  ;;  %2913 = vmatprep.subr.bf16.mxu1 %v971_v35  ;;  %v1083_v17 = vunpack.c.h.s8.bf16 %v363_v54  ;;  %v377_v35 = vld [vmem:[#allocation5 + $0x6e8] sm:$0xff] }
 0x3d5   :  { %2750 = vmatpush1.bf16.msra.mxu0 %v968_v10  ;;  %2914 = vmatpush1.bf16.msra.mxu1 %v970_v13  ;;  %v1082_v10 = vunpack.c.h.s8.bf16 %v362_v62  ;;  %v1097_v13 = vunpack.c.l.s8.bf16 %v377_v35 }
 0x3d6   :  { %2751 = vmatprep.subr.bf16.mxu0 %v985_v42  ;;  %2915 = vmatprep.subr.bf16.mxu1 %v987_v14  ;;  %v1099_v42 = vunpack.c.l.s8.bf16 %v379_v5  ;;  %v376_v14 = vld [vmem:[#allocation5 + $0x6e0] sm:$0xff] }
 0x3d7   :  { %v1096_v12 = vunpack.c.l.s8.bf16 %v376_v14  ;;  %v1112_v50 = vunpack.c.h.s8.bf16 %v376_v14  ;;  %v443_v14 = vld [vmem:[#allocation5 + $0x8f8] sm:$0xff] }
 0x3d9   :  { %2752 = vmatpush1.bf16.msra.mxu0 %v984_v25  ;;  %2916 = vmatpush1.bf16.msra.mxu1 %v986_v26  ;;  %v1098_v25 = vunpack.c.l.s8.bf16 %v378_v11  ;;  %v1113_v26 = vunpack.c.h.s8.bf16 %v377_v35  ;;  %v426_v35 = vld [vmem:[#allocation5 + $0x870] sm:$0xff] }
 0x3da   :  { %2753 = vmatprep.subr.bf16.mxu0 %v1001_v31  ;;  %2917 = vmatprep.subr.bf16.mxu1 %v1003_v32  ;;  %v1115_v31 = vunpack.c.h.s8.bf16 %v379_v5  ;;  %v393_v32 = vld [vmem:[#allocation5 + $0x768] sm:$0xff] }
 0x3dd   :  { %2754 = vmatpush1.bf16.msra.mxu0 %v1000_v34  ;;  %2918 = vmatpush1.bf16.msra.mxu1 %v1002_v36  ;;  %v1114_v34 = vunpack.c.h.s8.bf16 %v378_v11  ;;  %v1129_v36 = vunpack.c.l.s8.bf16 %v393_v32 }
 0x3de   :  { %2755 = vmatprep.subr.bf16.mxu0 %v1017_v37  ;;  %2919 = vmatprep.subr.bf16.mxu1 %v1019_v38  ;;  %v1131_v37 = vunpack.c.l.s8.bf16 %v395_v33  ;;  %v392_v38 = vld [vmem:[#allocation5 + $0x760] sm:$0xff] }
 0x3df   :  { %v1128_v40 = vunpack.c.l.s8.bf16 %v392_v38  ;;  %v1144_v49 = vunpack.c.h.s8.bf16 %v392_v38 }
 0x3e1   :  { %2756 = vmatpush1.bf16.msra.mxu0 %v1016_v41  ;;  %2920 = vmatpush1.bf16.msra.mxu1 %v1018_v45  ;;  %v1130_v41 = vunpack.c.l.s8.bf16 %v394_v39  ;;  %v1145_v45 = vunpack.c.h.s8.bf16 %v393_v32  ;;  %v442_v32 = vld [vmem:[#allocation5 + $0x8f0] sm:$0xff] }
 0x3e2   :  { %2757 = vmatprep.subr.bf16.mxu0 %v1033_v46  ;;  %2921 = vmatprep.subr.bf16.mxu1 %v1035_v47  ;;  %v1147_v46 = vunpack.c.h.s8.bf16 %v395_v33  ;;  %v409_v47 = vld [vmem:[#allocation5 + $0x7e8] sm:$0xff] }
 0x3e5   :  { %2758 = vmatpush1.bf16.msra.mxu0 %v1032_v30  ;;  %2922 = vmatpush1.bf16.msra.mxu1 %v1034_v51  ;;  %v1146_v30 = vunpack.c.h.s8.bf16 %v394_v39  ;;  %v1161_v51 = vunpack.c.l.s8.bf16 %v409_v47  ;;  %v1242_v39 = vunpack.c.h.s8.bf16 %v442_v32 }
 0x3e6   :  { %2759 = vmatprep.subr.bf16.mxu0 %v1049_v52  ;;  %2923 = vmatprep.subr.bf16.mxu1 %v1051_v61  ;;  %v1163_v52 = vunpack.c.l.s8.bf16 %v411_v48  ;;  %v408_v61 = vld [vmem:[#allocation5 + $0x7e0] sm:$0xff] }
 0x3e7   :  { %v1160_v54 = vunpack.c.l.s8.bf16 %v408_v61  ;;  %v1176_v62 = vunpack.c.h.s8.bf16 %v408_v61 }
 0x3e9   :  { %2760 = vmatpush1.bf16.msra.mxu0 %v1048_v55  ;;  %2924 = vmatpush1.bf16.msra.mxu1 %v1050_v56  ;;  %v1162_v55 = vunpack.c.l.s8.bf16 %v410_v53  ;;  %v1177_v56 = vunpack.c.h.s8.bf16 %v409_v47 }
 0x3ea   :  { %2761 = vmatprep.subr.bf16.mxu0 %v1065_v57  ;;  %2925 = vmatprep.subr.bf16.mxu1 %v1067_v58  ;;  %v1179_v57 = vunpack.c.h.s8.bf16 %v411_v48  ;;  %v425_v58 = vld [vmem:[#allocation5 + $0x868] sm:$0xff] }
 0x3ed   :  { %2762 = vmatpush1.bf16.msra.mxu0 %v1064_v63  ;;  %2926 = vmatpush1.bf16.msra.mxu1 %v1066_v0  ;;  %v1178_v63 = vunpack.c.h.s8.bf16 %v410_v53  ;;  %v1193_v0 = vunpack.c.l.s8.bf16 %v425_v58 }
 0x3ee   :  { %2763 = vmatprep.subr.bf16.mxu0 %v1081_v1  ;;  %2927 = vmatprep.subr.bf16.mxu1 %v1083_v17  ;;  %v1195_v1 = vunpack.c.l.s8.bf16 %v427_v59  ;;  %v424_v17 = vld [vmem:[#allocation5 + $0x860] sm:$0xff] }
 0x3ef   :  { %v1192_v5 = vunpack.c.l.s8.bf16 %v424_v17  ;;  %v1208_v11 = vunpack.c.h.s8.bf16 %v424_v17 }
 0x3f1   :  { %2764 = vmatpush1.bf16.msra.mxu0 %v1080_v8  ;;  %2928 = vmatpush1.bf16.msra.mxu1 %v1082_v10  ;;  %v1194_v8 = vunpack.c.l.s8.bf16 %v426_v35  ;;  %v1209_v10 = vunpack.c.h.s8.bf16 %v425_v58 }
 0x3f2   :  { %2765 = vmatprep.subr.bf16.mxu0 %v1097_v13  ;;  %2929 = vmatprep.subr.bf16.mxu1 %v1099_v42  ;;  %v1211_v13 = vunpack.c.h.s8.bf16 %v427_v59  ;;  %v441_v42 = vld [vmem:[#allocation5 + $0x8e8] sm:$0xff] }
 0x3f5   :  { %2766 = vmatpush1.bf16.msra.mxu0 %v1096_v12  ;;  %2930 = vmatpush1.bf16.msra.mxu1 %v1098_v25  ;;  %v1210_v12 = vunpack.c.h.s8.bf16 %v426_v35  ;;  %v1225_v25 = vunpack.c.l.s8.bf16 %v441_v42 }
 0x3f6   :  { %2767 = vmatprep.subr.bf16.mxu0 %v1113_v26  ;;  %2931 = vmatprep.subr.bf16.mxu1 %v1115_v31  ;;  %v1227_v26 = vunpack.c.l.s8.bf16 %v443_v14  ;;  %v440_v31 = vld [vmem:[#allocation5 + $0x8e0] sm:$0xff] }
 0x3f7   :  { %v1224_v33 = vunpack.c.l.s8.bf16 %v440_v31  ;;  %v1240_v38 = vunpack.c.h.s8.bf16 %v440_v31 }
 0x3f9   :  { %2768 = vmatpush1.bf16.msra.mxu0 %v1112_v50  ;;  %2932 = vmatpush1.bf16.msra.mxu1 %v1114_v34  ;;  %v1226_v50 = vunpack.c.l.s8.bf16 %v442_v32  ;;  %v1243_v34 = vunpack.c.h.s8.bf16 %v443_v14 }
 0x3fa   :  { %2769 = vmatprep.subr.bf16.mxu0 %v1129_v36  ;;  %2933 = vmatprep.subr.bf16.mxu1 %v1131_v37  ;;  %v457_v36 = vld [vmem:[#allocation5 + $0x968] sm:$0xff]  ;;  %v459_v37 = vld [vmem:[#allocation5 + $0x978] sm:$0xff] }
 0x3fb   :  { %v1273_v48 = vunpack.c.h.s8.bf16 %v457_v36 }
 0x3fd   :  { %2770 = vmatpush1.bf16.msra.mxu0 %v1128_v40  ;;  %2934 = vmatpush1.bf16.msra.mxu1 %v1130_v41  ;;  %v1257_v40 = vunpack.c.l.s8.bf16 %v457_v36  ;;  %v1259_v41 = vunpack.c.l.s8.bf16 %v459_v37 }
 0x3fe   :  { %2771 = vmatprep.subr.bf16.mxu0 %v1145_v45  ;;  %2935 = vmatprep.subr.bf16.mxu1 %v1147_v46  ;;  %v456_v45 = vld [vmem:[#allocation5 + $0x960] sm:$0xff] }
 0x3ff   :  { %v1256_v46 = vunpack.c.l.s8.bf16 %v456_v45 }
 0x401   :  { %2772 = vmatpush1.bf16.msra.mxu0 %v1144_v49  ;;  %2936 = vmatpush1.bf16.msra.mxu1 %v1146_v30  ;;  %v1275_v49 = vunpack.c.h.s8.bf16 %v459_v37  ;;  %v473_v30 = vld [vmem:[#allocation5 + $0x9e8] sm:$0xff] }
 0x402   :  { %2773 = vmatprep.subr.bf16.mxu0 %v1161_v51  ;;  %2937 = vmatprep.subr.bf16.mxu1 %v1163_v52  ;;  %v475_v51 = vld [vmem:[#allocation5 + $0x9f8] sm:$0xff]  ;;  %v1272_v52 = vunpack.c.h.s8.bf16 %v456_v45  ;;  %v1289_v53 = vunpack.c.l.s8.bf16 %v473_v30  ;;  %v1305_v59 = vunpack.c.h.s8.bf16 %v473_v30 }
 0x405   :  { %2774 = vmatpush1.bf16.msra.mxu0 %v1160_v54  ;;  %2938 = vmatpush1.bf16.msra.mxu1 %v1162_v55  ;;  %v1291_v54 = vunpack.c.l.s8.bf16 %v475_v51  ;;  %v472_v55 = vld [vmem:[#allocation5 + $0x9e0] sm:$0xff] }
 0x406   :  { %2775 = vmatprep.subr.bf16.mxu0 %v1177_v56  ;;  %2939 = vmatprep.subr.bf16.mxu1 %v1179_v57  ;;  %v474_v56 = vld [vmem:[#allocation5 + $0x9f0] sm:$0xff]  ;;  %v1288_v57 = vunpack.c.l.s8.bf16 %v472_v55 }
 0x407   :  { %v1290_v58 = vunpack.c.l.s8.bf16 %v474_v56  ;;  %v1306_v17 = vunpack.c.h.s8.bf16 %v474_v56 }
 0x409   :  { %2776 = vmatpush1.bf16.msra.mxu0 %v1176_v62  ;;  %2940 = vmatpush1.bf16.msra.mxu1 %v1178_v63  ;;  %v1307_v62 = vunpack.c.h.s8.bf16 %v475_v51  ;;  %v489_v63 = vld [vmem:[#allocation5 + $0xa68] sm:$0xff] }
 0x40a   :  { %2786 = vmatprep.subr.bf16.mxu0 %v1193_v0  ;;  %2950 = vmatprep.subr.bf16.mxu1 %v1195_v1  ;;  %v491_v0 = vld [vmem:[#allocation5 + $0xa78] sm:$0xff]  ;;  %v1304_v1 = vunpack.c.h.s8.bf16 %v472_v55  ;;  %v1321_v35 = vunpack.c.l.s8.bf16 %v489_v63  ;;  %v1337_v14 = vunpack.c.h.s8.bf16 %v489_v63 }
 0x40c   :  { %2778 = vmatmul.mubr.bf16.vlgmr.msra.gmra.mrb[12].mxu0 %v7542_v16  ;;  %2942 = vmatmul.mubr.bf16.vlgmr.msra.gmra.mrb[12].mxu1 %v7542_v16  ;;  %v1241_v16 = vunpack.c.h.s8.bf16 %v441_v42 }
 0x40d   :  { %2787 = vmatpush1.bf16.msra.mxu0 %v1192_v5  ;;  %2951 = vmatpush1.bf16.msra.mxu1 %v1194_v8  ;;  %v1323_v5 = vunpack.c.l.s8.bf16 %v491_v0  ;;  %v488_v8 = vld [vmem:[#allocation5 + $0xa60] sm:$0xff] }
 0x40e   :  { %2788 = vmatprep.subr.bf16.mxu0 %v1209_v10  ;;  %2952 = vmatprep.subr.bf16.mxu1 %v1211_v13  ;;  %v490_v10 = vld [vmem:[#allocation5 + $0xa70] sm:$0xff]  ;;  %v1320_v13 = vunpack.c.l.s8.bf16 %v488_v8 }
 0x40f   :  { %2818 = vmatprep.mubr.bf16.mxu0 %v7551_v24  ;;  %2982 = vmatprep.mubr.bf16.mxu1 %v7551_v24  ;;  %v458_v24 = vld [vmem:[#allocation5 + $0x970] sm:$0xff]  ;;  %v1322_v42 = vunpack.c.l.s8.bf16 %v490_v10  ;;  %v1338_v31 = vunpack.c.h.s8.bf16 %v490_v10 }
 0x410   :  { %v1258_v47 = vunpack.c.l.s8.bf16 %v458_v24  ;;  %v1274_v61 = vunpack.c.h.s8.bf16 %v458_v24 }
 0x411   :  { %2789 = vmatpush1.bf16.msra.mxu0 %v1208_v11  ;;  %2953 = vmatpush1.bf16.msra.mxu1 %v1210_v12  ;;  %v1339_v11 = vunpack.c.h.s8.bf16 %v491_v0  ;;  %v505_v12 = vld [vmem:[#allocation5 + $0xae8] sm:$0xff] }
 0x412   :  { %2790 = vmatprep.subr.bf16.mxu0 %v1225_v25  ;;  %2954 = vmatprep.subr.bf16.mxu1 %v1227_v26  ;;  %v507_v25 = vld [vmem:[#allocation5 + $0xaf8] sm:$0xff]  ;;  %v1336_v26 = vunpack.c.h.s8.bf16 %v488_v8  ;;  %v1353_v32 = vunpack.c.l.s8.bf16 %v505_v12  ;;  %v1369_v37 = vunpack.c.h.s8.bf16 %v505_v12 }
 0x415   :  { %2791 = vmatpush1.bf16.msra.mxu0 %v1224_v33  ;;  %2955 = vmatpush1.bf16.msra.mxu1 %v1226_v50  ;;  %v1355_v33 = vunpack.c.l.s8.bf16 %v507_v25  ;;  %v504_v50 = vld [vmem:[#allocation5 + $0xae0] sm:$0xff] }
 0x416   :  { %2792 = vmatprep.subr.bf16.mxu0 %v1241_v16  ;;  %2956 = vmatprep.subr.bf16.mxu1 %v1243_v34  ;;  %v506_v16 = vld [vmem:[#allocation5 + $0xaf0] sm:$0xff]  ;;  %v1352_v34 = vunpack.c.l.s8.bf16 %v504_v50 }
 0x417   :  { %v1354_v36 = vunpack.c.l.s8.bf16 %v506_v16  ;;  %v1370_v45 = vunpack.c.h.s8.bf16 %v506_v16 }
 0x419   :  { %2793 = vmatpush1.bf16.msra.mxu0 %v1240_v38  ;;  %2957 = vmatpush1.bf16.msra.mxu1 %v1242_v39  ;;  %v1371_v38 = vunpack.c.h.s8.bf16 %v507_v25  ;;  %v521_v39 = vld [vmem:[#allocation5 + $0xb68] sm:$0xff] }
 0x41a   :  { %2794 = vmatprep.subr.bf16.mxu0 %v1257_v40  ;;  %2958 = vmatprep.subr.bf16.mxu1 %v1259_v41  ;;  %v523_v40 = vld [vmem:[#allocation5 + $0xb78] sm:$0xff]  ;;  %v1368_v41 = vunpack.c.h.s8.bf16 %v504_v50  ;;  %v1385_v24 = vunpack.c.l.s8.bf16 %v521_v39  ;;  %v1401_v51 = vunpack.c.h.s8.bf16 %v521_v39 }
 0x41d   :  { %2795 = vmatpush1.bf16.msra.mxu0 %v1256_v46  ;;  %2959 = vmatpush1.bf16.msra.mxu1 %v1258_v47  ;;  %v1387_v46 = vunpack.c.l.s8.bf16 %v523_v40  ;;  %v520_v47 = vld [vmem:[#allocation5 + $0xb60] sm:$0xff] }
 0x41e   :  { %2796 = vmatprep.subr.bf16.mxu0 %v1273_v48  ;;  %2960 = vmatprep.subr.bf16.mxu1 %v1275_v49  ;;  %v522_v48 = vld [vmem:[#allocation5 + $0xb70] sm:$0xff]  ;;  %v1384_v49 = vunpack.c.l.s8.bf16 %v520_v47 }
 0x41f   :  { %v1386_v30 = vunpack.c.l.s8.bf16 %v522_v48  ;;  %v1402_v55 = vunpack.c.h.s8.bf16 %v522_v48 }
 0x421   :  { %2797 = vmatpush1.bf16.msra.mxu0 %v1272_v52  ;;  %2961 = vmatpush1.bf16.msra.mxu1 %v1274_v61  ;;  %v1403_v52 = vunpack.c.h.s8.bf16 %v523_v40  ;;  %v537_v61 = vld [vmem:[#allocation5 + $0xbe8] sm:$0xff] }
 0x422   :  { %2798 = vmatprep.subr.bf16.mxu0 %v1289_v53  ;;  %2962 = vmatprep.subr.bf16.mxu1 %v1291_v54  ;;  %v539_v53 = vld [vmem:[#allocation5 + $0xbf8] sm:$0xff]  ;;  %v1400_v54 = vunpack.c.h.s8.bf16 %v520_v47  ;;  %v1417_v56 = vunpack.c.l.s8.bf16 %v537_v61  ;;  %v1433_v0 = vunpack.c.h.s8.bf16 %v537_v61 }
 0x425   :  { %2799 = vmatpush1.bf16.msra.mxu0 %v1288_v57  ;;  %2963 = vmatpush1.bf16.msra.mxu1 %v1290_v58  ;;  %v1419_v57 = vunpack.c.l.s8.bf16 %v539_v53  ;;  %v536_v58 = vld [vmem:[#allocation5 + $0xbe0] sm:$0xff] }
 0x426   :  { %2800 = vmatprep.subr.bf16.mxu0 %v1305_v59  ;;  %2964 = vmatprep.subr.bf16.mxu1 %v1307_v62  ;;  %v538_v59 = vld [vmem:[#allocation5 + $0xbf0] sm:$0xff]  ;;  %v1416_v62 = vunpack.c.l.s8.bf16 %v536_v58 }
 0x427   :  { %v1418_v63 = vunpack.c.l.s8.bf16 %v538_v59  ;;  %v1434_v8 = vunpack.c.h.s8.bf16 %v538_v59 }
 0x429   :  { %2801 = vmatpush1.bf16.msra.mxu0 %v1304_v1  ;;  %2965 = vmatpush1.bf16.msra.mxu1 %v1306_v17  ;;  %v1435_v1 = vunpack.c.h.s8.bf16 %v539_v53  ;;  %v553_v17 = vld [vmem:[#allocation5 + $0xc68] sm:$0xff] }
 0x42a   :  { %2802 = vmatprep.subr.bf16.mxu0 %v1321_v35  ;;  %2966 = vmatprep.subr.bf16.mxu1 %v1323_v5  ;;  %v555_v35 = vld [vmem:[#allocation5 + $0xc78] sm:$0xff]  ;;  %v1432_v5 = vunpack.c.h.s8.bf16 %v536_v58  ;;  %v1449_v10 = vunpack.c.l.s8.bf16 %v553_v17  ;;  %v1465_v25 = vunpack.c.h.s8.bf16 %v553_v17 }
 0x42d   :  { %2803 = vmatpush1.bf16.msra.mxu0 %v1320_v13  ;;  %2967 = vmatpush1.bf16.msra.mxu1 %v1322_v42  ;;  %v1451_v13 = vunpack.c.l.s8.bf16 %v555_v35  ;;  %v552_v42 = vld [vmem:[#allocation5 + $0xc60] sm:$0xff] }
 0x42e   :  { %2804 = vmatprep.subr.bf16.mxu0 %v1337_v14  ;;  %2968 = vmatprep.subr.bf16.mxu1 %v1339_v11  ;;  %v554_v14 = vld [vmem:[#allocation5 + $0xc70] sm:$0xff]  ;;  %v1448_v11 = vunpack.c.l.s8.bf16 %v552_v42 }
 0x42f   :  { %v1450_v12 = vunpack.c.l.s8.bf16 %v554_v14  ;;  %v1466_v50 = vunpack.c.h.s8.bf16 %v554_v14 }
 0x431   :  { %2805 = vmatpush1.bf16.msra.mxu0 %v1336_v26  ;;  %2969 = vmatpush1.bf16.msra.mxu1 %v1338_v31  ;;  %v1467_v26 = vunpack.c.h.s8.bf16 %v555_v35  ;;  %v569_v31 = vld [vmem:[#allocation5 + $0xce8] sm:$0xff] }
 0x432   :  { %2806 = vmatprep.subr.bf16.mxu0 %v1353_v32  ;;  %2970 = vmatprep.subr.bf16.mxu1 %v1355_v33  ;;  %v571_v32 = vld [vmem:[#allocation5 + $0xcf8] sm:$0xff]  ;;  %v1464_v33 = vunpack.c.h.s8.bf16 %v552_v42  ;;  %v1481_v16 = vunpack.c.l.s8.bf16 %v569_v31 }
 0x433   :  { %v1499_v40 = vunpack.c.h.s8.bf16 %v571_v32 }
 0x435   :  { %2807 = vmatpush1.bf16.msra.mxu0 %v1352_v34  ;;  %2971 = vmatpush1.bf16.msra.mxu1 %v1354_v36  ;;  %v1483_v34 = vunpack.c.l.s8.bf16 %v571_v32  ;;  %v568_v36 = vld [vmem:[#allocation5 + $0xce0] sm:$0xff] }
 0x436   :  { %2808 = vmatprep.subr.bf16.mxu0 %v1369_v37  ;;  %2972 = vmatprep.subr.bf16.mxu1 %v1371_v38  ;;  %v570_v37 = vld [vmem:[#allocation5 + $0xcf0] sm:$0xff]  ;;  %v1480_v38 = vunpack.c.l.s8.bf16 %v568_v36 }
 0x437   :  { %v1482_v39 = vunpack.c.l.s8.bf16 %v570_v37 }
 0x439   :  { %2809 = vmatpush1.bf16.msra.mxu0 %v1368_v41  ;;  %2973 = vmatpush1.bf16.msra.mxu1 %v1370_v45  ;;  %v585_v41 = vld [vmem:[#allocation5 + $0xd68] sm:$0xff]  ;;  %v587_v45 = vld [vmem:[#allocation5 + $0xd78] sm:$0xff] }
 0x43a   :  { %2810 = vmatprep.subr.bf16.mxu0 %v1385_v24  ;;  %2974 = vmatprep.subr.bf16.mxu1 %v1387_v46  ;;  %v1496_v24 = vunpack.c.h.s8.bf16 %v568_v36  ;;  %v1498_v46 = vunpack.c.h.s8.bf16 %v570_v37  ;;  %v1513_v47 = vunpack.c.l.s8.bf16 %v585_v41  ;;  %v1515_v48 = vunpack.c.l.s8.bf16 %v587_v45 }
 0x43b   :  { %v1529_v61 = vunpack.c.h.s8.bf16 %v585_v41  ;;  %v1531_v53 = vunpack.c.h.s8.bf16 %v587_v45 }
 0x43d   :  { %2811 = vmatpush1.bf16.msra.mxu0 %v1384_v49  ;;  %2975 = vmatpush1.bf16.msra.mxu1 %v1386_v30  ;;  %v584_v49 = vld [vmem:[#allocation5 + $0xd60] sm:$0xff] }
 0x43e   :  { %2812 = vmatprep.subr.bf16.mxu0 %v1401_v51  ;;  %2976 = vmatprep.subr.bf16.mxu1 %v1403_v52  ;;  %v1512_v30 = vunpack.c.l.s8.bf16 %v584_v49  ;;  %v7684_v52 = vld [vmem:[#allocation8 + $0x8] sm:$0xff] }
 0x43f   :  { %v3079_v58 = vrot.slane %v7684_v52, %v7600_v19  ;;  %v3075_v59 = vrot.slane %v7684_v52, %v7603_v23 }
 0x441   :  { %2813 = vmatpush1.bf16.msra.mxu0 %v1400_v54  ;;  %2977 = vmatpush1.bf16.msra.mxu1 %v1402_v55  ;;  %v7686_v54 = vld [vmem:[#allocation10 + $0x8] sm:$0xff]  ;;  %v601_v55 = vld [vmem:[#allocation5 + $0xde8] sm:$0xff] }
 0x442   :  { %2814 = vmatprep.subr.bf16.mxu0 %v1417_v56  ;;  %2978 = vmatprep.subr.bf16.mxu1 %v1419_v57  ;;  %v603_v56 = vld [vmem:[#allocation5 + $0xdf8] sm:$0xff]  ;;  %v3071_v57 = vrot.slane %v7684_v52, %v7597_v18  ;;  %v3179_v17 = vrot.slane %v7686_v54, %v7600_v19  ;;  %v1545_v35 = vunpack.c.l.s8.bf16 %v601_v55  ;;  %v3175_v14 = vrot.slane %v7686_v54, %v7603_v23 }
 0x443   :  { %v1563_v41 = vunpack.c.h.s8.bf16 %v603_v56 }
 0x445   :  { %2815 = vmatpush1.bf16.msra.mxu0 %v1416_v62  ;;  %2979 = vmatpush1.bf16.msra.mxu1 %v1418_v63  ;;  %v3083_v62 = vrot.slane %v7684_v52, %v7606_v43  ;;  %v1528_v63 = vunpack.c.h.s8.bf16 %v584_v49 }
 0x446   :  { %2816 = vmatprep.subr.bf16.mxu0 %v1433_v0  ;;  %2980 = vmatprep.subr.bf16.mxu1 %v1435_v1  ;;  %v3171_v1 = vrot.slane %v7686_v54, %v7597_v18 }
 0x449   :  { %2817 = vmatpush1.bf16.msra.mxu0 %v1432_v5  ;;  %2981 = vmatpush1.bf16.msra.mxu1 %v1434_v8  ;;  %v1547_v5 = vunpack.c.l.s8.bf16 %v603_v56  ;;  %v600_v8 = vld [vmem:[#allocation5 + $0xde0] sm:$0xff] }
 0x44a   :  { %2827 = vmatprep.subr.bf16.mxu0 %v1449_v10  ;;  %2991 = vmatprep.subr.bf16.mxu1 %v1451_v13  ;;  %v602_v10 = vld [vmem:[#allocation5 + $0xdf0] sm:$0xff] }
 0x44b   :  { %v1546_v36 = vunpack.c.l.s8.bf16 %v602_v10 }
 0x44c   :  { %2819 = vmatmul.mubr.bf16.vlgmr.msra.gmra.mrb[12].mxu0 %v7559_v60  ;;  %2983 = vmatmul.mubr.bf16.vlgmr.msra.gmra.mrb[12].mxu1 %v7559_v60  ;;  %v1497_v60 = vunpack.c.h.s8.bf16 %v569_v31 }
 0x44d   :  { %2828 = vmatpush1.bf16.msra.mxu0 %v1448_v11  ;;  %2992 = vmatpush1.bf16.msra.mxu1 %v1450_v12  ;;  %v3183_v11 = vrot.slane %v7686_v54, %v7606_v43 }
 0x44e   :  { %2829 = vmatprep.subr.bf16.mxu0 %v1465_v25  ;;  %2993 = vmatprep.subr.bf16.mxu1 %v1467_v26 }
 0x44f   :  { %2859 = vmatprep.mubr.bf16.mxu0 %v7568_v4  ;;  %3023 = vmatprep.mubr.bf16.mxu1 %v7568_v4  ;;  %v586_v4 = vld [vmem:[#allocation5 + $0xd70] sm:$0xff] }
 0x450   :  { %v1514_v51 = vunpack.c.l.s8.bf16 %v586_v4  ;;  %v1530_v0 = vunpack.c.h.s8.bf16 %v586_v4 }
 0x451   :  { %2830 = vmatpush1.bf16.msra.mxu0 %v1464_v33  ;;  %2994 = vmatpush1.bf16.msra.mxu1 %v1466_v50 }
 0x452   :  { %2831 = vmatprep.subr.bf16.mxu0 %v1481_v16  ;;  %2995 = vmatprep.subr.bf16.mxu1 %v1483_v34  ;;  %v1544_v34 = vunpack.c.l.s8.bf16 %v600_v8 }
 0x455   :  { %2832 = vmatpush1.bf16.msra.mxu0 %v1480_v38  ;;  %2996 = vmatpush1.bf16.msra.mxu1 %v1482_v39 }
 0x456   :  { %2833 = vmatprep.subr.bf16.mxu0 %v1497_v60  ;;  %2997 = vmatprep.subr.bf16.mxu1 %v1499_v40  ;;  %v1561_v40 = vunpack.c.h.s8.bf16 %v601_v55 }
 0x459   :  { %2834 = vmatpush1.bf16.msra.mxu0 %v1496_v24  ;;  %2998 = vmatpush1.bf16.msra.mxu1 %v1498_v46  ;;  %v617_v46 = vld [vmem:[#allocation5 + $0xe68] sm:$0xff] }
 0x45a   :  { %2835 = vmatprep.subr.bf16.mxu0 %v1513_v47  ;;  %2999 = vmatprep.subr.bf16.mxu1 %v1515_v48  ;;  %v619_v47 = vld [vmem:[#allocation5 + $0xe78] sm:$0xff]  ;;  %v1577_v55 = vunpack.c.l.s8.bf16 %v617_v46 }
 0x45b   :  { %v1579_v56 = vunpack.c.l.s8.bf16 %v619_v47 }
 0x45d   :  { %2836 = vmatpush1.bf16.msra.mxu0 %v1512_v30  ;;  %3000 = vmatpush1.bf16.msra.mxu1 %v1514_v51  ;;  %v1560_v51 = vunpack.c.h.s8.bf16 %v600_v8  ;;  %v635_v8 = vld [vmem:[#allocation5 + $0xef8] sm:$0xff] }
 0x45e   :  { %2837 = vmatprep.subr.bf16.mxu0 %v1529_v61  ;;  %3001 = vmatprep.subr.bf16.mxu1 %v1531_v53  ;;  %v1562_v61 = vunpack.c.h.s8.bf16 %v602_v10 }
 0x45f   :  { %v2533_v13 = vpop.f32.mrb[8].mxu0  ;;  %v2697_v42 = vpop.f32.mrb[8].mxu1 }
 0x460   :  { %v3124_v12 = vmul.f32 %v3071_v57, %v2533_v13  ;;  %v3126_v25 = vmul.f32 %v3079_v58, %v2697_v42  ;;  %v2535_v26 = vpop.f32.mrb[9].mxu0  ;;  %v2699_v31 = vpop.f32.mrb[9].mxu1  ;;  %v616_v58 = vld [vmem:[#allocation5 + $0xe60] sm:$0xff] }
 0x461   :  { %v3125_v32 = vmul.f32 %v3075_v59, %v2535_v26  ;;  %v3127_v33 = vmul.f32 %v3083_v62, %v2699_v31  ;;  %v2537_v50 = vpop.f32.mrb[10].mxu0  ;;  %v2701_v16 = vpop.f32.mrb[10].mxu1  ;;  %2838 = vmatpush1.bf16.msra.mxu0 %v1528_v63  ;;  %3002 = vmatpush1.bf16.msra.mxu1 %v1530_v0  ;;  %v618_v59 = vld [vmem:[#allocation5 + $0xe70] sm:$0xff]  ;;  %v1576_v0 = vunpack.c.l.s8.bf16 %v616_v58  ;;  %v1592_v10 = vunpack.c.h.s8.bf16 %v616_v58 }
 0x462   :  { %v3224_v37 = vadd.f32 %v3171_v1, %v3124_v12  ;;  %v3226_v38 = vadd.f32 %v3179_v17, %v3126_v25  ;;  %v2538_v39 = vpop.f32.mrb[11].mxu0  ;;  %v2702_v60 = vpop.f32.mrb[11].mxu1  ;;  %2839 = vmatprep.subr.bf16.mxu0 %v1545_v35  ;;  %3003 = vmatprep.subr.bf16.mxu1 %v1547_v5  ;;  %v1578_v1 = vunpack.c.l.s8.bf16 %v618_v59  ;;  %v1593_v17 = vunpack.c.h.s8.bf16 %v617_v46  ;;  %v633_v5 = vld [vmem:[#allocation5 + $0xee8] sm:$0xff]  ;;  %v634_v12 = vld [vmem:[#allocation5 + $0xef0] sm:$0xff]  ;;  %v651_v50 = vld [vmem:[#allocation5 + $0xf78] sm:$0xff] }
 0x463   :  { %v3225_v45 = vadd.f32 %v3175_v14, %v3125_v32  ;;  %v3227_v24 = vadd.f32 %v3183_v11, %v3127_v33  ;;  %v1595_v35 = vunpack.c.h.s8.bf16 %v619_v47  ;;  %v1594_v13 = vunpack.c.h.s8.bf16 %v618_v59  ;;  %v632_v11 = vld [vmem:[#allocation5 + $0xee0] sm:$0xff]  ;;  %v649_v33 = vld [vmem:[#allocation5 + $0xf68] sm:$0xff]  ;;  %v650_v39 = vld [vmem:[#allocation5 + $0xf70] sm:$0xff] }
 0x464   :  { %v3240_v48 = vmax.f32 %v3224_v37, 0.0  ;;  %v3242_v49 = vmax.f32 %v3226_v38, 0.0  ;;  %v1609_v42 = vunpack.c.l.s8.bf16 %v633_v5  ;;  %v1611_v14 = vunpack.c.l.s8.bf16 %v635_v8  ;;  %v648_v38 = vld [vmem:[#allocation5 + $0xf60] sm:$0xff]  ;;  %v667_v46 = vld [vmem:[#allocation5 + $0xff8] sm:$0xff] }
 0x465   :  { %v3241_v4 = vmax.f32 %v3225_v45, 0.0  ;;  %v3243_v30 = vmax.f32 %v3227_v24, 0.0  ;;  %2840 = vmatpush1.bf16.msra.mxu0 %v1544_v34  ;;  %3004 = vmatpush1.bf16.msra.mxu1 %v1546_v36  ;;  %v1608_v25 = vunpack.c.l.s8.bf16 %v632_v11  ;;  %v1610_v26 = vunpack.c.l.s8.bf16 %v634_v12  ;;  %v665_v24 = vld [vmem:[#allocation5 + $0xfe8] sm:$0xff] }
 0x466   :  { %v7704_v53 = vpack.c.bf16 %v3240_v48, %v3240_v48  ;;  %v7706_v57 = vpack.c.bf16 %v3242_v49, %v3242_v49  ;;  %2841 = vmatprep.subr.bf16.mxu0 %v1561_v40  ;;  %3005 = vmatprep.subr.bf16.mxu1 %v1563_v41  ;;  %v1625_v31 = vunpack.c.h.s8.bf16 %v633_v5  ;;  %v1627_v32 = vunpack.c.h.s8.bf16 %v635_v8 }
 0x467   :  { %v7708_v62 = vpack.c.bf16 %v3241_v4, %v3241_v4  ;;  %v7710_v63 = vpack.c.bf16 %v3243_v30, %v3243_v30  ;;  %v1624_v16 = vunpack.c.h.s8.bf16 %v632_v11  ;;  %v1626_v34 = vunpack.c.h.s8.bf16 %v634_v12  ;;  %v664_v30 = vld [vmem:[#allocation5 + $0xfe0] sm:$0xff] }
 0x468   :  { %v1641_v36 = vunpack.c.l.s8.bf16 %v649_v33  ;;  %v1643_v37 = vunpack.c.l.s8.bf16 %v651_v50  ;;  %v1640_v60 = vunpack.c.l.s8.bf16 %v648_v38  ;;  %v1642_v40 = vunpack.c.l.s8.bf16 %v650_v39 }
 0x469   :  { %2842 = vmatpush1.bf16.msra.mxu0 %v1560_v51  ;;  %3006 = vmatpush1.bf16.msra.mxu1 %v1562_v61  ;;  %v1657_v41 = vunpack.c.h.s8.bf16 %v649_v33  ;;  %v1659_v45 = vunpack.c.h.s8.bf16 %v651_v50  ;;  %v1656_v47 = vunpack.c.h.s8.bf16 %v648_v38  ;;  %v1658_v48 = vunpack.c.h.s8.bf16 %v650_v39  ;;  %v666_v51 = vld [vmem:[#allocation5 + $0xff0] sm:$0xff] }
 0x46a   :  { %2843 = vmatprep.subr.bf16.mxu0 %v1577_v55  ;;  %3007 = vmatprep.subr.bf16.mxu1 %v1579_v56  ;;  %v1673_v49 = vunpack.c.l.s8.bf16 %v665_v24  ;;  %v1675_v4 = vunpack.c.l.s8.bf16 %v667_v46  ;;  %v1672_v61 = vunpack.c.l.s8.bf16 %v664_v30  ;;  %v1674_v55 = vunpack.c.l.s8.bf16 %v666_v51 }
 0x46b   :  { %v1689_v56 = vunpack.c.h.s8.bf16 %v665_v24  ;;  %v1691_v58 = vunpack.c.h.s8.bf16 %v667_v46  ;;  %v1688_v59 = vunpack.c.h.s8.bf16 %v664_v30  ;;  %v3099_v5 = vrot.slane %v7684_v52, %v7650_v7 }
 0x46c   :  { %v3187_v8 = vrot.slane %v7686_v54, %v7641_v2 }
 0x46d   :  { %2844 = vmatpush1.bf16.msra.mxu0 %v1576_v0  ;;  %3008 = vmatpush1.bf16.msra.mxu1 %v1578_v1  ;;  %v1690_v0 = vunpack.c.h.s8.bf16 %v666_v51  ;;  %v3087_v1 = vrot.slane %v7684_v52, %v7641_v2 }
 0x46e   :  { %2845 = vmatprep.subr.bf16.mxu0 %v1593_v17  ;;  %3009 = vmatprep.subr.bf16.mxu1 %v1595_v35  ;;  %v3095_v17 = vrot.slane %v7684_v52, %v7644_v3  ;;  %v3091_v35 = vrot.slane %v7684_v52, %v7647_v6 }
 0x471   :  { %2846 = vmatpush1.bf16.msra.mxu0 %v1592_v10  ;;  %3010 = vmatpush1.bf16.msra.mxu1 %v1594_v13  ;;  %v3195_v10 = vrot.slane %v7686_v54, %v7644_v3 }
 0x472   :  { %2847 = vmatprep.subr.bf16.mxu0 %v1609_v42  ;;  %3011 = vmatprep.subr.bf16.mxu1 %v1611_v14  ;;  %v3191_v42 = vrot.slane %v7686_v54, %v7647_v6  ;;  %v3199_v14 = vrot.slane %v7686_v54, %v7650_v7 }
 0x475   :  { %2848 = vmatpush1.bf16.msra.mxu0 %v1608_v25  ;;  %3012 = vmatpush1.bf16.msra.mxu1 %v1610_v26 }
 0x476   :  { %2849 = vmatprep.subr.bf16.mxu0 %v1625_v31  ;;  %3013 = vmatprep.subr.bf16.mxu1 %v1627_v32 }
 0x479   :  { %2850 = vmatpush1.bf16.msra.mxu0 %v1624_v16  ;;  %3014 = vmatpush1.bf16.msra.mxu1 %v1626_v34 }
 0x47a   :  { %2851 = vmatprep.subr.bf16.mxu0 %v1641_v36  ;;  %3015 = vmatprep.subr.bf16.mxu1 %v1643_v37 }
 0x47d   :  { %2852 = vmatpush1.bf16.msra.mxu0 %v1640_v60  ;;  %3016 = vmatpush1.bf16.msra.mxu1 %v1642_v40 }
 0x47e   :  { %2853 = vmatprep.subr.bf16.mxu0 %v1657_v41  ;;  %3017 = vmatprep.subr.bf16.mxu1 %v1659_v45 }
 0x481   :  { %2854 = vmatpush1.bf16.msra.mxu0 %v1656_v47  ;;  %3018 = vmatpush1.bf16.msra.mxu1 %v1658_v48 }
 0x482   :  { %2855 = vmatprep.subr.bf16.mxu0 %v1673_v49  ;;  %3019 = vmatprep.subr.bf16.mxu1 %v1675_v4 }
 0x485   :  { %2856 = vmatpush1.bf16.msra.mxu0 %v1672_v61  ;;  %3020 = vmatpush1.bf16.msra.mxu1 %v1674_v55 }
 0x486   :  { %2857 = vmatprep.subr.bf16.mxu0 %v1689_v56  ;;  %3021 = vmatprep.subr.bf16.mxu1 %v1691_v58 }
 0x489   :  { %2858 = vmatpush1.bf16.msra.mxu0 %v1688_v59  ;;  %3022 = vmatpush1.bf16.msra.mxu1 %v1690_v0 }
 0x48c   :  { %2860 = vmatmul.mubr.bf16.vlgmr.msra.gmra.mrb[12].mxu0 %v7576_v44  ;;  %3024 = vmatmul.mubr.bf16.vlgmr.msra.gmra.mrb[12].mxu1 %v7576_v44 }
 0x55f   :  { %v2861_v13 = vpop.f32.mrb[12].mxu0  ;;  %v3025_v44 = vpop.f32.mrb[12].mxu1 }
 0x560   :  { %v3128_v11 = vmul.f32 %v3087_v1, %v2861_v13  ;;  %v3130_v12 = vmul.f32 %v3095_v17, %v3025_v44  ;;  %v2863_v25 = vpop.f32.mrb[13].mxu0  ;;  %v3027_v26 = vpop.f32.mrb[13].mxu1 }
 0x561   :  { %v3129_v31 = vmul.f32 %v3091_v35, %v2863_v25  ;;  %v3131_v52 = vmul.f32 %v3099_v5, %v3027_v26  ;;  %v2865_v32 = vpop.f32.mrb[14].mxu0  ;;  %v3029_v33 = vpop.f32.mrb[14].mxu1 }
 0x562   :  { %v3228_v50 = vadd.f32 %v3187_v8, %v3128_v11  ;;  %v3230_v16 = vadd.f32 %v3195_v10, %v3130_v12  ;;  %v2866_v34 = vpop.f32.mrb[15].mxu0  ;;  %v3030_v36 = vpop.f32.mrb[15].mxu1 }
 0x563   :  { %v3229_v37 = vadd.f32 %v3191_v42, %v3129_v31  ;;  %v3231_v38 = vadd.f32 %v3199_v14, %v3131_v52 }
 0x564   :  { %v3244_v39 = vmax.f32 %v3228_v50, 0.0  ;;  %v3246_v60 = vmax.f32 %v3230_v16, 0.0 }
 0x565   :  { %v3245_v40 = vmax.f32 %v3229_v37, 0.0  ;;  %v3247_v41 = vmax.f32 %v3231_v38, 0.0 }
 0x566   :  { %v7730_v45 = vpack.c.bf16 %v3244_v39, %v3244_v39  ;;  %v7732_v54 = vpack.c.bf16 %v3246_v60, %v3246_v60 }
 0x567   :  { %v7734_v24 = vpack.c.bf16 %v3245_v40, %v3245_v40  ;;  %v7736_v46 = vpack.c.bf16 %v3247_v41, %v3247_v41 }
 0x568   :  { %7347 = dma.done.wait [#allocation4], 65536 }
 0x569   :  { %7348 = vsyncadd [#allocation4], 4294901760  ;;  %4839 = vmatprep.mubr.bf16.mxu0 %v7620_v27  ;;  %5167 = vmatprep.mubr.bf16.mxu1 %v7620_v27  ;;  %v3272_v47 = vld [vmem:[#allocation2 + $0x8] sm:$0xff]  ;;  %v3274_v48 = vld [vmem:[#allocation2 + $0x18] sm:$0xff] }
 0x56a   :  { %v3271_v49 = vld [vmem:[#allocation2] sm:$0xff]  ;;  %v3784_v4 = vunpack.c.l.s8.bf16 %v3272_v47  ;;  %v3792_v30 = vunpack.c.h.s8.bf16 %v3272_v47  ;;  %v3786_v51 = vunpack.c.l.s8.bf16 %v3274_v48  ;;  %v3794_v61 = vunpack.c.h.s8.bf16 %v3274_v48  ;;  %v3273_v55 = vld [vmem:[#allocation2 + $0x10] sm:$0xff]  ;;  %v3280_v59 = vld [vmem:[#allocation2 + $0x48] sm:$0xff] }
 0x56b   :  { %v3783_v56 = vunpack.c.l.s8.bf16 %v3271_v49  ;;  %v3785_v58 = vunpack.c.l.s8.bf16 %v3273_v55  ;;  %v3282_v0 = vld [vmem:[#allocation2 + $0x58] sm:$0xff]  ;;  %v3791_v1 = vunpack.c.h.s8.bf16 %v3271_v49  ;;  %v3793_v17 = vunpack.c.h.s8.bf16 %v3273_v55  ;;  %v3279_v8 = vld [vmem:[#allocation2 + $0x40] sm:$0xff]  ;;  %v3281_v10 = vld [vmem:[#allocation2 + $0x50] sm:$0xff] }
 0x56c   :  { %4807 = vmatprep.subr.bf16.mxu0 %v3784_v4  ;;  %5135 = vmatprep.subr.bf16.mxu1 %v3786_v51  ;;  %v3800_v35 = vunpack.c.l.s8.bf16 %v3280_v59  ;;  %v3802_v5 = vunpack.c.l.s8.bf16 %v3282_v0  ;;  %v3799_v13 = vunpack.c.l.s8.bf16 %v3279_v8  ;;  %v3801_v44 = vunpack.c.l.s8.bf16 %v3281_v10  ;;  %v3288_v11 = vld [vmem:[#allocation2 + $0x88] sm:$0xff]  ;;  %v3290_v12 = vld [vmem:[#allocation2 + $0x98] sm:$0xff]  ;;  %v3287_v32 = vld [vmem:[#allocation2 + $0x80] sm:$0xff] }
 0x56d   :  { %4808 = vmatpush1.bf16.msra.mxu0 %v3783_v56  ;;  %5136 = vmatpush1.bf16.msra.mxu1 %v3785_v58  ;;  %v3808_v42 = vunpack.c.h.s8.bf16 %v3280_v59  ;;  %v3810_v14 = vunpack.c.h.s8.bf16 %v3282_v0  ;;  %v3807_v25 = vunpack.c.h.s8.bf16 %v3279_v8  ;;  %v3809_v26 = vunpack.c.h.s8.bf16 %v3281_v10  ;;  %v3289_v33 = vld [vmem:[#allocation2 + $0x90] sm:$0xff]  ;;  %v3296_v37 = vld [vmem:[#allocation2 + $0xc8] sm:$0xff]  ;;  %v3298_v38 = vld [vmem:[#allocation2 + $0xd8] sm:$0xff] }
 0x56e   :  { %4809 = vmatprep.subr.bf16.mxu0 %v3792_v30  ;;  %5137 = vmatprep.subr.bf16.mxu1 %v3794_v61  ;;  %v3816_v31 = vunpack.c.l.s8.bf16 %v3288_v11  ;;  %v3818_v52 = vunpack.c.l.s8.bf16 %v3290_v12  ;;  %v3815_v50 = vunpack.c.l.s8.bf16 %v3287_v32  ;;  %v3817_v16 = vunpack.c.l.s8.bf16 %v3289_v33  ;;  %v3295_v47 = vld [vmem:[#allocation2 + $0xc0] sm:$0xff]  ;;  %v3297_v48 = vld [vmem:[#allocation2 + $0xd0] sm:$0xff]  ;;  %v3304_v61 = vld [vmem:[#allocation2 + $0x108] sm:$0xff] }
 0x56f   :  { %v3824_v34 = vunpack.c.h.s8.bf16 %v3288_v11  ;;  %v3826_v36 = vunpack.c.h.s8.bf16 %v3290_v12  ;;  %v3823_v39 = vunpack.c.h.s8.bf16 %v3287_v32  ;;  %v3825_v60 = vunpack.c.h.s8.bf16 %v3289_v33  ;;  %v3306_v55 = vld [vmem:[#allocation2 + $0x118] sm:$0xff] }
 0x570   :  { %v3832_v40 = vunpack.c.l.s8.bf16 %v3296_v37  ;;  %v3834_v41 = vunpack.c.l.s8.bf16 %v3298_v38  ;;  %v3831_v49 = vunpack.c.l.s8.bf16 %v3295_v47  ;;  %v3833_v4 = vunpack.c.l.s8.bf16 %v3297_v48 }
 0x571   :  { %4810 = vmatpush1.bf16.msra.mxu0 %v3791_v1  ;;  %5138 = vmatpush1.bf16.msra.mxu1 %v3793_v17  ;;  %v3840_v30 = vunpack.c.h.s8.bf16 %v3296_v37  ;;  %v3842_v51 = vunpack.c.h.s8.bf16 %v3298_v38  ;;  %v3839_v56 = vunpack.c.h.s8.bf16 %v3295_v47  ;;  %v3841_v58 = vunpack.c.h.s8.bf16 %v3297_v48  ;;  %v3303_v1 = vld [vmem:[#allocation2 + $0x100] sm:$0xff]  ;;  %v3305_v17 = vld [vmem:[#allocation2 + $0x110] sm:$0xff] }
 0x572   :  { %4811 = vmatprep.subr.bf16.mxu0 %v3800_v35  ;;  %5139 = vmatprep.subr.bf16.mxu1 %v3802_v5  ;;  %v3848_v59 = vunpack.c.l.s8.bf16 %v3304_v61  ;;  %v3850_v0 = vunpack.c.l.s8.bf16 %v3306_v55  ;;  %v3847_v35 = vunpack.c.l.s8.bf16 %v3303_v1  ;;  %v3849_v5 = vunpack.c.l.s8.bf16 %v3305_v17 }
 0x573   :  { %v3856_v8 = vunpack.c.h.s8.bf16 %v3304_v61  ;;  %v3858_v10 = vunpack.c.h.s8.bf16 %v3306_v55 }
 0x575   :  { %4812 = vmatpush1.bf16.msra.mxu0 %v3799_v13  ;;  %5140 = vmatpush1.bf16.msra.mxu1 %v3801_v44  ;;  %v3312_v13 = vld [vmem:[#allocation2 + $0x148] sm:$0xff]  ;;  %v3314_v44 = vld [vmem:[#allocation2 + $0x158] sm:$0xff] }
 0x576   :  { %4813 = vmatprep.subr.bf16.mxu0 %v3808_v42  ;;  %5141 = vmatprep.subr.bf16.mxu1 %v3810_v14  ;;  %v3855_v42 = vunpack.c.h.s8.bf16 %v3303_v1  ;;  %v3857_v14 = vunpack.c.h.s8.bf16 %v3305_v17  ;;  %v3864_v11 = vunpack.c.l.s8.bf16 %v3312_v13  ;;  %v3866_v12 = vunpack.c.l.s8.bf16 %v3314_v44 }
 0x577   :  { %v3872_v32 = vunpack.c.h.s8.bf16 %v3312_v13  ;;  %v3874_v33 = vunpack.c.h.s8.bf16 %v3314_v44 }
 0x579   :  { %4814 = vmatpush1.bf16.msra.mxu0 %v3807_v25  ;;  %5142 = vmatpush1.bf16.msra.mxu1 %v3809_v26  ;;  %v3311_v25 = vld [vmem:[#allocation2 + $0x140] sm:$0xff]  ;;  %v3313_v26 = vld [vmem:[#allocation2 + $0x150] sm:$0xff] }
 0x57a   :  { %4815 = vmatprep.subr.bf16.mxu0 %v3816_v31  ;;  %5143 = vmatprep.subr.bf16.mxu1 %v3818_v52  ;;  %v3863_v31 = vunpack.c.l.s8.bf16 %v3311_v25  ;;  %v3865_v52 = vunpack.c.l.s8.bf16 %v3313_v26 }
 0x57d   :  { %4816 = vmatpush1.bf16.msra.mxu0 %v3815_v50  ;;  %5144 = vmatpush1.bf16.msra.mxu1 %v3817_v16  ;;  %v3320_v50 = vld [vmem:[#allocation2 + $0x188] sm:$0xff]  ;;  %v3322_v16 = vld [vmem:[#allocation2 + $0x198] sm:$0xff] }
 0x57e   :  { %4817 = vmatprep.subr.bf16.mxu0 %v3824_v34  ;;  %5145 = vmatprep.subr.bf16.mxu1 %v3826_v36  ;;  %v3871_v34 = vunpack.c.h.s8.bf16 %v3311_v25  ;;  %v3873_v36 = vunpack.c.h.s8.bf16 %v3313_v26  ;;  %v3880_v37 = vunpack.c.l.s8.bf16 %v3320_v50  ;;  %v3882_v38 = vunpack.c.l.s8.bf16 %v3322_v16 }
 0x57f   :  { %v3888_v47 = vunpack.c.h.s8.bf16 %v3320_v50  ;;  %v3890_v48 = vunpack.c.h.s8.bf16 %v3322_v16 }
 0x581   :  { %4818 = vmatpush1.bf16.msra.mxu0 %v3823_v39  ;;  %5146 = vmatpush1.bf16.msra.mxu1 %v3825_v60  ;;  %v3319_v39 = vld [vmem:[#allocation2 + $0x180] sm:$0xff]  ;;  %v3321_v60 = vld [vmem:[#allocation2 + $0x190] sm:$0xff] }
 0x582   :  { %4819 = vmatprep.subr.bf16.mxu0 %v3832_v40  ;;  %5147 = vmatprep.subr.bf16.mxu1 %v3834_v41  ;;  %v3879_v40 = vunpack.c.l.s8.bf16 %v3319_v39  ;;  %v3881_v41 = vunpack.c.l.s8.bf16 %v3321_v60 }
 0x585   :  { %4820 = vmatpush1.bf16.msra.mxu0 %v3831_v49  ;;  %5148 = vmatpush1.bf16.msra.mxu1 %v3833_v4  ;;  %v3328_v49 = vld [vmem:[#allocation2 + $0x1c8] sm:$0xff]  ;;  %v3330_v4 = vld [vmem:[#allocation2 + $0x1d8] sm:$0xff] }
 0x586   :  { %4821 = vmatprep.subr.bf16.mxu0 %v3840_v30  ;;  %5149 = vmatprep.subr.bf16.mxu1 %v3842_v51  ;;  %v3887_v30 = vunpack.c.h.s8.bf16 %v3319_v39  ;;  %v3889_v51 = vunpack.c.h.s8.bf16 %v3321_v60  ;;  %v3896_v61 = vunpack.c.l.s8.bf16 %v3328_v49  ;;  %v3898_v55 = vunpack.c.l.s8.bf16 %v3330_v4 }
 0x587   :  { %v3904_v1 = vunpack.c.h.s8.bf16 %v3328_v49  ;;  %v3906_v17 = vunpack.c.h.s8.bf16 %v3330_v4 }
 0x589   :  { %4822 = vmatpush1.bf16.msra.mxu0 %v3839_v56  ;;  %5150 = vmatpush1.bf16.msra.mxu1 %v3841_v58  ;;  %v3327_v56 = vld [vmem:[#allocation2 + $0x1c0] sm:$0xff]  ;;  %v3329_v58 = vld [vmem:[#allocation2 + $0x1d0] sm:$0xff] }
 0x58a   :  { %4823 = vmatprep.subr.bf16.mxu0 %v3848_v59  ;;  %5151 = vmatprep.subr.bf16.mxu1 %v3850_v0  ;;  %v3895_v59 = vunpack.c.l.s8.bf16 %v3327_v56  ;;  %v3897_v0 = vunpack.c.l.s8.bf16 %v3329_v58 }
 0x58d   :  { %4824 = vmatpush1.bf16.msra.mxu0 %v3847_v35  ;;  %5152 = vmatpush1.bf16.msra.mxu1 %v3849_v5  ;;  %v3336_v35 = vld [vmem:[#allocation2 + $0x208] sm:$0xff]  ;;  %v3338_v5 = vld [vmem:[#allocation2 + $0x218] sm:$0xff] }
 0x58e   :  { %4825 = vmatprep.subr.bf16.mxu0 %v3856_v8  ;;  %5153 = vmatprep.subr.bf16.mxu1 %v3858_v10  ;;  %v3903_v8 = vunpack.c.h.s8.bf16 %v3327_v56  ;;  %v3905_v10 = vunpack.c.h.s8.bf16 %v3329_v58  ;;  %v3912_v13 = vunpack.c.l.s8.bf16 %v3336_v35  ;;  %v3914_v44 = vunpack.c.l.s8.bf16 %v3338_v5 }
 0x58f   :  { %v3920_v25 = vunpack.c.h.s8.bf16 %v3336_v35  ;;  %v3922_v26 = vunpack.c.h.s8.bf16 %v3338_v5 }
 0x591   :  { %4826 = vmatpush1.bf16.msra.mxu0 %v3855_v42  ;;  %5154 = vmatpush1.bf16.msra.mxu1 %v3857_v14  ;;  %v3335_v42 = vld [vmem:[#allocation2 + $0x200] sm:$0xff]  ;;  %v3337_v14 = vld [vmem:[#allocation2 + $0x210] sm:$0xff] }
 0x592   :  { %4827 = vmatprep.subr.bf16.mxu0 %v3864_v11  ;;  %5155 = vmatprep.subr.bf16.mxu1 %v3866_v12  ;;  %v3911_v11 = vunpack.c.l.s8.bf16 %v3335_v42  ;;  %v3913_v12 = vunpack.c.l.s8.bf16 %v3337_v14 }
 0x595   :  { %4828 = vmatpush1.bf16.msra.mxu0 %v3863_v31  ;;  %5156 = vmatpush1.bf16.msra.mxu1 %v3865_v52  ;;  %v3344_v31 = vld [vmem:[#allocation2 + $0x248] sm:$0xff]  ;;  %v3346_v52 = vld [vmem:[#allocation2 + $0x258] sm:$0xff] }
 0x596   :  { %4829 = vmatprep.subr.bf16.mxu0 %v3872_v32  ;;  %5157 = vmatprep.subr.bf16.mxu1 %v3874_v33  ;;  %v3919_v32 = vunpack.c.h.s8.bf16 %v3335_v42  ;;  %v3921_v33 = vunpack.c.h.s8.bf16 %v3337_v14  ;;  %v3928_v50 = vunpack.c.l.s8.bf16 %v3344_v31  ;;  %v3930_v16 = vunpack.c.l.s8.bf16 %v3346_v52 }
 0x597   :  { %v3936_v39 = vunpack.c.h.s8.bf16 %v3344_v31  ;;  %v3938_v60 = vunpack.c.h.s8.bf16 %v3346_v52 }
 0x599   :  { %4830 = vmatpush1.bf16.msra.mxu0 %v3871_v34  ;;  %5158 = vmatpush1.bf16.msra.mxu1 %v3873_v36  ;;  %v3343_v34 = vld [vmem:[#allocation2 + $0x240] sm:$0xff]  ;;  %v3345_v36 = vld [vmem:[#allocation2 + $0x250] sm:$0xff] }
 0x59a   :  { %4831 = vmatprep.subr.bf16.mxu0 %v3880_v37  ;;  %5159 = vmatprep.subr.bf16.mxu1 %v3882_v38  ;;  %v3927_v37 = vunpack.c.l.s8.bf16 %v3343_v34  ;;  %v3929_v38 = vunpack.c.l.s8.bf16 %v3345_v36 }
 0x59d   :  { %4832 = vmatpush1.bf16.msra.mxu0 %v3879_v40  ;;  %5160 = vmatpush1.bf16.msra.mxu1 %v3881_v41  ;;  %v3352_v40 = vld [vmem:[#allocation2 + $0x288] sm:$0xff]  ;;  %v3354_v41 = vld [vmem:[#allocation2 + $0x298] sm:$0xff] }
 0x59e   :  { %4833 = vmatprep.subr.bf16.mxu0 %v3888_v47  ;;  %5161 = vmatprep.subr.bf16.mxu1 %v3890_v48  ;;  %v3935_v47 = vunpack.c.h.s8.bf16 %v3343_v34  ;;  %v3937_v48 = vunpack.c.h.s8.bf16 %v3345_v36  ;;  %v3944_v49 = vunpack.c.l.s8.bf16 %v3352_v40  ;;  %v3946_v4 = vunpack.c.l.s8.bf16 %v3354_v41 }
 0x59f   :  { %v3952_v56 = vunpack.c.h.s8.bf16 %v3352_v40  ;;  %v3954_v58 = vunpack.c.h.s8.bf16 %v3354_v41 }
 0x5a1   :  { %4834 = vmatpush1.bf16.msra.mxu0 %v3887_v30  ;;  %5162 = vmatpush1.bf16.msra.mxu1 %v3889_v51  ;;  %v3351_v30 = vld [vmem:[#allocation2 + $0x280] sm:$0xff]  ;;  %v3353_v51 = vld [vmem:[#allocation2 + $0x290] sm:$0xff] }
 0x5a2   :  { %4835 = vmatprep.subr.bf16.mxu0 %v3896_v61  ;;  %5163 = vmatprep.subr.bf16.mxu1 %v3898_v55  ;;  %v3943_v61 = vunpack.c.l.s8.bf16 %v3351_v30  ;;  %v3945_v55 = vunpack.c.l.s8.bf16 %v3353_v51 }
 0x5a5   :  { %4836 = vmatpush1.bf16.msra.mxu0 %v3895_v59  ;;  %5164 = vmatpush1.bf16.msra.mxu1 %v3897_v0  ;;  %v3360_v59 = vld [vmem:[#allocation2 + $0x2c8] sm:$0xff]  ;;  %v3362_v0 = vld [vmem:[#allocation2 + $0x2d8] sm:$0xff] }
 0x5a6   :  { %4837 = vmatprep.subr.bf16.mxu0 %v3904_v1  ;;  %5165 = vmatprep.subr.bf16.mxu1 %v3906_v17  ;;  %v3951_v1 = vunpack.c.h.s8.bf16 %v3351_v30  ;;  %v3953_v17 = vunpack.c.h.s8.bf16 %v3353_v51  ;;  %v3960_v35 = vunpack.c.l.s8.bf16 %v3360_v59  ;;  %v3962_v5 = vunpack.c.l.s8.bf16 %v3362_v0 }
 0x5a7   :  { %v3968_v42 = vunpack.c.h.s8.bf16 %v3360_v59  ;;  %v3970_v14 = vunpack.c.h.s8.bf16 %v3362_v0 }
 0x5a9   :  { %4838 = vmatpush1.bf16.msra.mxu0 %v3903_v8  ;;  %5166 = vmatpush1.bf16.msra.mxu1 %v3905_v10  ;;  %v3359_v8 = vld [vmem:[#allocation2 + $0x2c0] sm:$0xff]  ;;  %v3361_v10 = vld [vmem:[#allocation2 + $0x2d0] sm:$0xff] }
 0x5aa   :  { %4848 = vmatprep.subr.bf16.mxu0 %v3912_v13  ;;  %5176 = vmatprep.subr.bf16.mxu1 %v3914_v44  ;;  %v3959_v13 = vunpack.c.l.s8.bf16 %v3359_v8  ;;  %v3961_v44 = vunpack.c.l.s8.bf16 %v3361_v10 }
 0x5ac   :  { %4840 = vmatmul.mubr.bf16.vlgmr.msra.gmra.mrb[16].mxu0 %v7616_v15  ;;  %5168 = vmatmul.mubr.bf16.vlgmr.msra.gmra.mrb[16].mxu1 %v7616_v15 }
 0x5ad   :  { %4849 = vmatpush1.bf16.msra.mxu0 %v3911_v11  ;;  %5177 = vmatpush1.bf16.msra.mxu1 %v3913_v12  ;;  %v3368_v11 = vld [vmem:[#allocation2 + $0x308] sm:$0xff]  ;;  %v3370_v12 = vld [vmem:[#allocation2 + $0x318] sm:$0xff] }
 0x5ae   :  { %4850 = vmatprep.subr.bf16.mxu0 %v3920_v25  ;;  %5178 = vmatprep.subr.bf16.mxu1 %v3922_v26  ;;  %v3967_v25 = vunpack.c.h.s8.bf16 %v3359_v8  ;;  %v3969_v26 = vunpack.c.h.s8.bf16 %v3361_v10  ;;  %v3976_v31 = vunpack.c.l.s8.bf16 %v3368_v11  ;;  %v3978_v52 = vunpack.c.l.s8.bf16 %v3370_v12 }
 0x5af   :  { %4880 = vmatprep.mubr.bf16.mxu0 %v7622_v28  ;;  %5208 = vmatprep.mubr.bf16.mxu1 %v7622_v28  ;;  %v3984_v34 = vunpack.c.h.s8.bf16 %v3368_v11  ;;  %v3986_v36 = vunpack.c.h.s8.bf16 %v3370_v12 }
 0x5b1   :  { %4851 = vmatpush1.bf16.msra.mxu0 %v3919_v32  ;;  %5179 = vmatpush1.bf16.msra.mxu1 %v3921_v33  ;;  %v3367_v32 = vld [vmem:[#allocation2 + $0x300] sm:$0xff]  ;;  %v3369_v33 = vld [vmem:[#allocation2 + $0x310] sm:$0xff] }
 0x5b2   :  { %4852 = vmatprep.subr.bf16.mxu0 %v3928_v50  ;;  %5180 = vmatprep.subr.bf16.mxu1 %v3930_v16  ;;  %v3975_v50 = vunpack.c.l.s8.bf16 %v3367_v32  ;;  %v3977_v16 = vunpack.c.l.s8.bf16 %v3369_v33 }
 0x5b5   :  { %4853 = vmatpush1.bf16.msra.mxu0 %v3927_v37  ;;  %5181 = vmatpush1.bf16.msra.mxu1 %v3929_v38  ;;  %v3376_v37 = vld [vmem:[#allocation2 + $0x348] sm:$0xff]  ;;  %v3378_v38 = vld [vmem:[#allocation2 + $0x358] sm:$0xff] }
 0x5b6   :  { %4854 = vmatprep.subr.bf16.mxu0 %v3936_v39  ;;  %5182 = vmatprep.subr.bf16.mxu1 %v3938_v60  ;;  %v3983_v39 = vunpack.c.h.s8.bf16 %v3367_v32  ;;  %v3985_v60 = vunpack.c.h.s8.bf16 %v3369_v33  ;;  %v3992_v40 = vunpack.c.l.s8.bf16 %v3376_v37  ;;  %v3994_v41 = vunpack.c.l.s8.bf16 %v3378_v38 }
 0x5b7   :  { %v4000_v30 = vunpack.c.h.s8.bf16 %v3376_v37  ;;  %v4002_v51 = vunpack.c.h.s8.bf16 %v3378_v38 }
 0x5b9   :  { %4855 = vmatpush1.bf16.msra.mxu0 %v3935_v47  ;;  %5183 = vmatpush1.bf16.msra.mxu1 %v3937_v48  ;;  %v3375_v47 = vld [vmem:[#allocation2 + $0x340] sm:$0xff]  ;;  %v3377_v48 = vld [vmem:[#allocation2 + $0x350] sm:$0xff] }
 0x5ba   :  { %4856 = vmatprep.subr.bf16.mxu0 %v3944_v49  ;;  %5184 = vmatprep.subr.bf16.mxu1 %v3946_v4  ;;  %v3991_v49 = vunpack.c.l.s8.bf16 %v3375_v47  ;;  %v3993_v4 = vunpack.c.l.s8.bf16 %v3377_v48 }
 0x5bd   :  { %4857 = vmatpush1.bf16.msra.mxu0 %v3943_v61  ;;  %5185 = vmatpush1.bf16.msra.mxu1 %v3945_v55  ;;  %v3384_v61 = vld [vmem:[#allocation2 + $0x388] sm:$0xff]  ;;  %v3386_v55 = vld [vmem:[#allocation2 + $0x398] sm:$0xff] }
 0x5be   :  { %4858 = vmatprep.subr.bf16.mxu0 %v3952_v56  ;;  %5186 = vmatprep.subr.bf16.mxu1 %v3954_v58  ;;  %v3999_v56 = vunpack.c.h.s8.bf16 %v3375_v47  ;;  %v4001_v58 = vunpack.c.h.s8.bf16 %v3377_v48  ;;  %v4008_v59 = vunpack.c.l.s8.bf16 %v3384_v61  ;;  %v4010_v0 = vunpack.c.l.s8.bf16 %v3386_v55 }
 0x5bf   :  { %v4016_v8 = vunpack.c.h.s8.bf16 %v3384_v61  ;;  %v4018_v10 = vunpack.c.h.s8.bf16 %v3386_v55 }
 0x5c1   :  { %4859 = vmatpush1.bf16.msra.mxu0 %v3951_v1  ;;  %5187 = vmatpush1.bf16.msra.mxu1 %v3953_v17  ;;  %v3383_v1 = vld [vmem:[#allocation2 + $0x380] sm:$0xff]  ;;  %v3385_v17 = vld [vmem:[#allocation2 + $0x390] sm:$0xff] }
 0x5c2   :  { %4860 = vmatprep.subr.bf16.mxu0 %v3960_v35  ;;  %5188 = vmatprep.subr.bf16.mxu1 %v3962_v5  ;;  %v4007_v35 = vunpack.c.l.s8.bf16 %v3383_v1  ;;  %v4009_v5 = vunpack.c.l.s8.bf16 %v3385_v17 }
 0x5c5   :  { %4861 = vmatpush1.bf16.msra.mxu0 %v3959_v13  ;;  %5189 = vmatpush1.bf16.msra.mxu1 %v3961_v44  ;;  %v3392_v13 = vld [vmem:[#allocation2 + $0x3c8] sm:$0xff]  ;;  %v3394_v44 = vld [vmem:[#allocation2 + $0x3d8] sm:$0xff] }
 0x5c6   :  { %4862 = vmatprep.subr.bf16.mxu0 %v3968_v42  ;;  %5190 = vmatprep.subr.bf16.mxu1 %v3970_v14  ;;  %v4015_v42 = vunpack.c.h.s8.bf16 %v3383_v1  ;;  %v4017_v14 = vunpack.c.h.s8.bf16 %v3385_v17  ;;  %v4024_v11 = vunpack.c.l.s8.bf16 %v3392_v13  ;;  %v4026_v12 = vunpack.c.l.s8.bf16 %v3394_v44 }
 0x5c7   :  { %v4032_v32 = vunpack.c.h.s8.bf16 %v3392_v13  ;;  %v4034_v33 = vunpack.c.h.s8.bf16 %v3394_v44 }
 0x5c9   :  { %4863 = vmatpush1.bf16.msra.mxu0 %v3967_v25  ;;  %5191 = vmatpush1.bf16.msra.mxu1 %v3969_v26  ;;  %v3391_v25 = vld [vmem:[#allocation2 + $0x3c0] sm:$0xff]  ;;  %v3393_v26 = vld [vmem:[#allocation2 + $0x3d0] sm:$0xff] }
 0x5ca   :  { %4864 = vmatprep.subr.bf16.mxu0 %v3976_v31  ;;  %5192 = vmatprep.subr.bf16.mxu1 %v3978_v52  ;;  %v4023_v31 = vunpack.c.l.s8.bf16 %v3391_v25  ;;  %v4025_v52 = vunpack.c.l.s8.bf16 %v3393_v26 }
 0x5cd   :  { %4865 = vmatpush1.bf16.msra.mxu0 %v3975_v50  ;;  %5193 = vmatpush1.bf16.msra.mxu1 %v3977_v16  ;;  %v3400_v50 = vld [vmem:[#allocation2 + $0x408] sm:$0xff]  ;;  %v3402_v16 = vld [vmem:[#allocation2 + $0x418] sm:$0xff] }
 0x5ce   :  { %4866 = vmatprep.subr.bf16.mxu0 %v3984_v34  ;;  %5194 = vmatprep.subr.bf16.mxu1 %v3986_v36  ;;  %v4031_v34 = vunpack.c.h.s8.bf16 %v3391_v25  ;;  %v4033_v36 = vunpack.c.h.s8.bf16 %v3393_v26  ;;  %v4040_v37 = vunpack.c.l.s8.bf16 %v3400_v50  ;;  %v4042_v38 = vunpack.c.l.s8.bf16 %v3402_v16 }
 0x5cf   :  { %v4048_v47 = vunpack.c.h.s8.bf16 %v3400_v50  ;;  %v4050_v48 = vunpack.c.h.s8.bf16 %v3402_v16 }
 0x5d1   :  { %4867 = vmatpush1.bf16.msra.mxu0 %v3983_v39  ;;  %5195 = vmatpush1.bf16.msra.mxu1 %v3985_v60  ;;  %v3399_v39 = vld [vmem:[#allocation2 + $0x400] sm:$0xff]  ;;  %v3401_v60 = vld [vmem:[#allocation2 + $0x410] sm:$0xff] }
 0x5d2   :  { %4868 = vmatprep.subr.bf16.mxu0 %v3992_v40  ;;  %5196 = vmatprep.subr.bf16.mxu1 %v3994_v41  ;;  %v4039_v40 = vunpack.c.l.s8.bf16 %v3399_v39  ;;  %v4041_v41 = vunpack.c.l.s8.bf16 %v3401_v60 }
 0x5d5   :  { %4869 = vmatpush1.bf16.msra.mxu0 %v3991_v49  ;;  %5197 = vmatpush1.bf16.msra.mxu1 %v3993_v4  ;;  %v3408_v49 = vld [vmem:[#allocation2 + $0x448] sm:$0xff]  ;;  %v3410_v4 = vld [vmem:[#allocation2 + $0x458] sm:$0xff] }
 0x5d6   :  { %4870 = vmatprep.subr.bf16.mxu0 %v4000_v30  ;;  %5198 = vmatprep.subr.bf16.mxu1 %v4002_v51  ;;  %v4047_v30 = vunpack.c.h.s8.bf16 %v3399_v39  ;;  %v4049_v51 = vunpack.c.h.s8.bf16 %v3401_v60  ;;  %v4056_v61 = vunpack.c.l.s8.bf16 %v3408_v49  ;;  %v4058_v55 = vunpack.c.l.s8.bf16 %v3410_v4 }
 0x5d7   :  { %v4064_v1 = vunpack.c.h.s8.bf16 %v3408_v49  ;;  %v4066_v17 = vunpack.c.h.s8.bf16 %v3410_v4 }
 0x5d9   :  { %4871 = vmatpush1.bf16.msra.mxu0 %v3999_v56  ;;  %5199 = vmatpush1.bf16.msra.mxu1 %v4001_v58  ;;  %v3407_v56 = vld [vmem:[#allocation2 + $0x440] sm:$0xff]  ;;  %v3409_v58 = vld [vmem:[#allocation2 + $0x450] sm:$0xff] }
 0x5da   :  { %4872 = vmatprep.subr.bf16.mxu0 %v4008_v59  ;;  %5200 = vmatprep.subr.bf16.mxu1 %v4010_v0  ;;  %v4055_v59 = vunpack.c.l.s8.bf16 %v3407_v56  ;;  %v4057_v0 = vunpack.c.l.s8.bf16 %v3409_v58 }
 0x5dd   :  { %4873 = vmatpush1.bf16.msra.mxu0 %v4007_v35  ;;  %5201 = vmatpush1.bf16.msra.mxu1 %v4009_v5  ;;  %v3416_v35 = vld [vmem:[#allocation2 + $0x488] sm:$0xff]  ;;  %v3418_v5 = vld [vmem:[#allocation2 + $0x498] sm:$0xff] }
 0x5de   :  { %4874 = vmatprep.subr.bf16.mxu0 %v4016_v8  ;;  %5202 = vmatprep.subr.bf16.mxu1 %v4018_v10  ;;  %v4063_v8 = vunpack.c.h.s8.bf16 %v3407_v56  ;;  %v4065_v10 = vunpack.c.h.s8.bf16 %v3409_v58  ;;  %v4072_v13 = vunpack.c.l.s8.bf16 %v3416_v35  ;;  %v4074_v44 = vunpack.c.l.s8.bf16 %v3418_v5 }
 0x5df   :  { %v4080_v25 = vunpack.c.h.s8.bf16 %v3416_v35  ;;  %v4082_v26 = vunpack.c.h.s8.bf16 %v3418_v5 }
 0x5e1   :  { %4875 = vmatpush1.bf16.msra.mxu0 %v4015_v42  ;;  %5203 = vmatpush1.bf16.msra.mxu1 %v4017_v14  ;;  %v3415_v42 = vld [vmem:[#allocation2 + $0x480] sm:$0xff]  ;;  %v3417_v14 = vld [vmem:[#allocation2 + $0x490] sm:$0xff] }
 0x5e2   :  { %4876 = vmatprep.subr.bf16.mxu0 %v4024_v11  ;;  %5204 = vmatprep.subr.bf16.mxu1 %v4026_v12  ;;  %v4071_v11 = vunpack.c.l.s8.bf16 %v3415_v42  ;;  %v4073_v12 = vunpack.c.l.s8.bf16 %v3417_v14 }
 0x5e5   :  { %4877 = vmatpush1.bf16.msra.mxu0 %v4023_v31  ;;  %5205 = vmatpush1.bf16.msra.mxu1 %v4025_v52  ;;  %v3424_v31 = vld [vmem:[#allocation2 + $0x4c8] sm:$0xff]  ;;  %v3426_v52 = vld [vmem:[#allocation2 + $0x4d8] sm:$0xff] }
 0x5e6   :  { %4878 = vmatprep.subr.bf16.mxu0 %v4032_v32  ;;  %5206 = vmatprep.subr.bf16.mxu1 %v4034_v33  ;;  %v4079_v32 = vunpack.c.h.s8.bf16 %v3415_v42  ;;  %v4081_v33 = vunpack.c.h.s8.bf16 %v3417_v14  ;;  %v4088_v50 = vunpack.c.l.s8.bf16 %v3424_v31  ;;  %v4090_v16 = vunpack.c.l.s8.bf16 %v3426_v52 }
 0x5e7   :  { %v4096_v39 = vunpack.c.h.s8.bf16 %v3424_v31  ;;  %v4098_v60 = vunpack.c.h.s8.bf16 %v3426_v52 }
 0x5e9   :  { %4879 = vmatpush1.bf16.msra.mxu0 %v4031_v34  ;;  %5207 = vmatpush1.bf16.msra.mxu1 %v4033_v36  ;;  %v3423_v34 = vld [vmem:[#allocation2 + $0x4c0] sm:$0xff]  ;;  %v3425_v36 = vld [vmem:[#allocation2 + $0x4d0] sm:$0xff] }
 0x5ea   :  { %4889 = vmatprep.subr.bf16.mxu0 %v4040_v37  ;;  %5217 = vmatprep.subr.bf16.mxu1 %v4042_v38  ;;  %v4087_v37 = vunpack.c.l.s8.bf16 %v3423_v34  ;;  %v4089_v38 = vunpack.c.l.s8.bf16 %v3425_v36 }
 0x5ec   :  { %4881 = vmatmul.mubr.bf16.vlgmr.msra.gmra.mrb[16].mxu0 %v7618_v20  ;;  %5209 = vmatmul.mubr.bf16.vlgmr.msra.gmra.mrb[16].mxu1 %v7618_v20 }
 0x5ed   :  { %4890 = vmatpush1.bf16.msra.mxu0 %v4039_v40  ;;  %5218 = vmatpush1.bf16.msra.mxu1 %v4041_v41  ;;  %v3432_v40 = vld [vmem:[#allocation2 + $0x508] sm:$0xff]  ;;  %v3434_v41 = vld [vmem:[#allocation2 + $0x518] sm:$0xff] }
 0x5ee   :  { %4891 = vmatprep.subr.bf16.mxu0 %v4048_v47  ;;  %5219 = vmatprep.subr.bf16.mxu1 %v4050_v48  ;;  %v4095_v47 = vunpack.c.h.s8.bf16 %v3423_v34  ;;  %v4097_v48 = vunpack.c.h.s8.bf16 %v3425_v36  ;;  %v4104_v49 = vunpack.c.l.s8.bf16 %v3432_v40  ;;  %v4106_v4 = vunpack.c.l.s8.bf16 %v3434_v41 }
 0x5ef   :  { %4921 = vmatprep.mubr.bf16.mxu0 %v7664_v9  ;;  %5249 = vmatprep.mubr.bf16.mxu1 %v7664_v9  ;;  %v4112_v56 = vunpack.c.h.s8.bf16 %v3432_v40  ;;  %v4114_v58 = vunpack.c.h.s8.bf16 %v3434_v41 }
 0x5f1   :  { %4892 = vmatpush1.bf16.msra.mxu0 %v4047_v30  ;;  %5220 = vmatpush1.bf16.msra.mxu1 %v4049_v51  ;;  %v3431_v30 = vld [vmem:[#allocation2 + $0x500] sm:$0xff]  ;;  %v3433_v51 = vld [vmem:[#allocation2 + $0x510] sm:$0xff] }
 0x5f2   :  { %4893 = vmatprep.subr.bf16.mxu0 %v4056_v61  ;;  %5221 = vmatprep.subr.bf16.mxu1 %v4058_v55  ;;  %v4103_v61 = vunpack.c.l.s8.bf16 %v3431_v30  ;;  %v4105_v55 = vunpack.c.l.s8.bf16 %v3433_v51 }
 0x5f5   :  { %4894 = vmatpush1.bf16.msra.mxu0 %v4055_v59  ;;  %5222 = vmatpush1.bf16.msra.mxu1 %v4057_v0  ;;  %v3440_v59 = vld [vmem:[#allocation2 + $0x548] sm:$0xff]  ;;  %v3442_v0 = vld [vmem:[#allocation2 + $0x558] sm:$0xff] }
 0x5f6   :  { %4895 = vmatprep.subr.bf16.mxu0 %v4064_v1  ;;  %5223 = vmatprep.subr.bf16.mxu1 %v4066_v17  ;;  %v4111_v1 = vunpack.c.h.s8.bf16 %v3431_v30  ;;  %v4113_v17 = vunpack.c.h.s8.bf16 %v3433_v51  ;;  %v4120_v35 = vunpack.c.l.s8.bf16 %v3440_v59  ;;  %v4122_v5 = vunpack.c.l.s8.bf16 %v3442_v0 }
 0x5f7   :  { %v4128_v42 = vunpack.c.h.s8.bf16 %v3440_v59  ;;  %v4130_v14 = vunpack.c.h.s8.bf16 %v3442_v0 }
 0x5f9   :  { %4896 = vmatpush1.bf16.msra.mxu0 %v4063_v8  ;;  %5224 = vmatpush1.bf16.msra.mxu1 %v4065_v10  ;;  %v3439_v8 = vld [vmem:[#allocation2 + $0x540] sm:$0xff]  ;;  %v3441_v10 = vld [vmem:[#allocation2 + $0x550] sm:$0xff] }
 0x5fa   :  { %4897 = vmatprep.subr.bf16.mxu0 %v4072_v13  ;;  %5225 = vmatprep.subr.bf16.mxu1 %v4074_v44  ;;  %v4119_v13 = vunpack.c.l.s8.bf16 %v3439_v8  ;;  %v4121_v44 = vunpack.c.l.s8.bf16 %v3441_v10 }
 0x5fd   :  { %4898 = vmatpush1.bf16.msra.mxu0 %v4071_v11  ;;  %5226 = vmatpush1.bf16.msra.mxu1 %v4073_v12  ;;  %v3448_v11 = vld [vmem:[#allocation2 + $0x588] sm:$0xff]  ;;  %v3450_v12 = vld [vmem:[#allocation2 + $0x598] sm:$0xff] }
 0x5fe   :  { %4899 = vmatprep.subr.bf16.mxu0 %v4080_v25  ;;  %5227 = vmatprep.subr.bf16.mxu1 %v4082_v26  ;;  %v4127_v25 = vunpack.c.h.s8.bf16 %v3439_v8  ;;  %v4129_v26 = vunpack.c.h.s8.bf16 %v3441_v10  ;;  %v4136_v31 = vunpack.c.l.s8.bf16 %v3448_v11  ;;  %v4138_v52 = vunpack.c.l.s8.bf16 %v3450_v12 }
 0x5ff   :  { %v4144_v34 = vunpack.c.h.s8.bf16 %v3448_v11  ;;  %v4146_v36 = vunpack.c.h.s8.bf16 %v3450_v12 }
 0x601   :  { %4900 = vmatpush1.bf16.msra.mxu0 %v4079_v32  ;;  %5228 = vmatpush1.bf16.msra.mxu1 %v4081_v33  ;;  %v3447_v32 = vld [vmem:[#allocation2 + $0x580] sm:$0xff]  ;;  %v3449_v33 = vld [vmem:[#allocation2 + $0x590] sm:$0xff] }
 0x602   :  { %4901 = vmatprep.subr.bf16.mxu0 %v4088_v50  ;;  %5229 = vmatprep.subr.bf16.mxu1 %v4090_v16  ;;  %v4135_v50 = vunpack.c.l.s8.bf16 %v3447_v32  ;;  %v4137_v16 = vunpack.c.l.s8.bf16 %v3449_v33 }
 0x605   :  { %4902 = vmatpush1.bf16.msra.mxu0 %v4087_v37  ;;  %5230 = vmatpush1.bf16.msra.mxu1 %v4089_v38  ;;  %v3456_v37 = vld [vmem:[#allocation2 + $0x5c8] sm:$0xff]  ;;  %v3458_v38 = vld [vmem:[#allocation2 + $0x5d8] sm:$0xff] }
 0x606   :  { %4903 = vmatprep.subr.bf16.mxu0 %v4096_v39  ;;  %5231 = vmatprep.subr.bf16.mxu1 %v4098_v60  ;;  %v4143_v39 = vunpack.c.h.s8.bf16 %v3447_v32  ;;  %v4145_v60 = vunpack.c.h.s8.bf16 %v3449_v33  ;;  %v4152_v40 = vunpack.c.l.s8.bf16 %v3456_v37  ;;  %v4154_v41 = vunpack.c.l.s8.bf16 %v3458_v38 }
 0x607   :  { %v4160_v30 = vunpack.c.h.s8.bf16 %v3456_v37  ;;  %v4162_v51 = vunpack.c.h.s8.bf16 %v3458_v38 }
 0x609   :  { %4904 = vmatpush1.bf16.msra.mxu0 %v4095_v47  ;;  %5232 = vmatpush1.bf16.msra.mxu1 %v4097_v48  ;;  %v3455_v47 = vld [vmem:[#allocation2 + $0x5c0] sm:$0xff]  ;;  %v3457_v48 = vld [vmem:[#allocation2 + $0x5d0] sm:$0xff] }
 0x60a   :  { %4905 = vmatprep.subr.bf16.mxu0 %v4104_v49  ;;  %5233 = vmatprep.subr.bf16.mxu1 %v4106_v4  ;;  %v4151_v49 = vunpack.c.l.s8.bf16 %v3455_v47  ;;  %v4153_v4 = vunpack.c.l.s8.bf16 %v3457_v48 }
 0x60d   :  { %4906 = vmatpush1.bf16.msra.mxu0 %v4103_v61  ;;  %5234 = vmatpush1.bf16.msra.mxu1 %v4105_v55  ;;  %v3464_v61 = vld [vmem:[#allocation2 + $0x608] sm:$0xff]  ;;  %v3466_v55 = vld [vmem:[#allocation2 + $0x618] sm:$0xff] }
 0x60e   :  { %4907 = vmatprep.subr.bf16.mxu0 %v4112_v56  ;;  %5235 = vmatprep.subr.bf16.mxu1 %v4114_v58  ;;  %v4159_v56 = vunpack.c.h.s8.bf16 %v3455_v47  ;;  %v4161_v58 = vunpack.c.h.s8.bf16 %v3457_v48  ;;  %v4168_v59 = vunpack.c.l.s8.bf16 %v3464_v61  ;;  %v4170_v0 = vunpack.c.l.s8.bf16 %v3466_v55 }
 0x60f   :  { %v4176_v8 = vunpack.c.h.s8.bf16 %v3464_v61  ;;  %v4178_v10 = vunpack.c.h.s8.bf16 %v3466_v55 }
 0x611   :  { %4908 = vmatpush1.bf16.msra.mxu0 %v4111_v1  ;;  %5236 = vmatpush1.bf16.msra.mxu1 %v4113_v17  ;;  %v3463_v1 = vld [vmem:[#allocation2 + $0x600] sm:$0xff]  ;;  %v3465_v17 = vld [vmem:[#allocation2 + $0x610] sm:$0xff] }
 0x612   :  { %4909 = vmatprep.subr.bf16.mxu0 %v4120_v35  ;;  %5237 = vmatprep.subr.bf16.mxu1 %v4122_v5  ;;  %v4167_v35 = vunpack.c.l.s8.bf16 %v3463_v1  ;;  %v4169_v5 = vunpack.c.l.s8.bf16 %v3465_v17 }
 0x615   :  { %4910 = vmatpush1.bf16.msra.mxu0 %v4119_v13  ;;  %5238 = vmatpush1.bf16.msra.mxu1 %v4121_v44  ;;  %v3472_v13 = vld [vmem:[#allocation2 + $0x648] sm:$0xff]  ;;  %v3474_v44 = vld [vmem:[#allocation2 + $0x658] sm:$0xff] }
 0x616   :  { %4911 = vmatprep.subr.bf16.mxu0 %v4128_v42  ;;  %5239 = vmatprep.subr.bf16.mxu1 %v4130_v14  ;;  %v4175_v42 = vunpack.c.h.s8.bf16 %v3463_v1  ;;  %v4177_v14 = vunpack.c.h.s8.bf16 %v3465_v17  ;;  %v4184_v11 = vunpack.c.l.s8.bf16 %v3472_v13  ;;  %v4186_v12 = vunpack.c.l.s8.bf16 %v3474_v44 }
 0x617   :  { %v4192_v32 = vunpack.c.h.s8.bf16 %v3472_v13  ;;  %v4194_v33 = vunpack.c.h.s8.bf16 %v3474_v44 }
 0x619   :  { %4912 = vmatpush1.bf16.msra.mxu0 %v4127_v25  ;;  %5240 = vmatpush1.bf16.msra.mxu1 %v4129_v26  ;;  %v3471_v25 = vld [vmem:[#allocation2 + $0x640] sm:$0xff]  ;;  %v3473_v26 = vld [vmem:[#allocation2 + $0x650] sm:$0xff] }
 0x61a   :  { %4913 = vmatprep.subr.bf16.mxu0 %v4136_v31  ;;  %5241 = vmatprep.subr.bf16.mxu1 %v4138_v52  ;;  %v4183_v31 = vunpack.c.l.s8.bf16 %v3471_v25  ;;  %v4185_v52 = vunpack.c.l.s8.bf16 %v3473_v26 }
 0x61d   :  { %4914 = vmatpush1.bf16.msra.mxu0 %v4135_v50  ;;  %5242 = vmatpush1.bf16.msra.mxu1 %v4137_v16  ;;  %v3480_v50 = vld [vmem:[#allocation2 + $0x688] sm:$0xff]  ;;  %v3482_v16 = vld [vmem:[#allocation2 + $0x698] sm:$0xff] }
 0x61e   :  { %4915 = vmatprep.subr.bf16.mxu0 %v4144_v34  ;;  %5243 = vmatprep.subr.bf16.mxu1 %v4146_v36  ;;  %v4191_v34 = vunpack.c.h.s8.bf16 %v3471_v25  ;;  %v4193_v36 = vunpack.c.h.s8.bf16 %v3473_v26  ;;  %v4200_v37 = vunpack.c.l.s8.bf16 %v3480_v50  ;;  %v4202_v38 = vunpack.c.l.s8.bf16 %v3482_v16 }
 0x61f   :  { %v4208_v47 = vunpack.c.h.s8.bf16 %v3480_v50  ;;  %v4210_v48 = vunpack.c.h.s8.bf16 %v3482_v16 }
 0x621   :  { %4916 = vmatpush1.bf16.msra.mxu0 %v4143_v39  ;;  %5244 = vmatpush1.bf16.msra.mxu1 %v4145_v60  ;;  %v3479_v39 = vld [vmem:[#allocation2 + $0x680] sm:$0xff]  ;;  %v3481_v60 = vld [vmem:[#allocation2 + $0x690] sm:$0xff] }
 0x622   :  { %4917 = vmatprep.subr.bf16.mxu0 %v4152_v40  ;;  %5245 = vmatprep.subr.bf16.mxu1 %v4154_v41  ;;  %v4199_v40 = vunpack.c.l.s8.bf16 %v3479_v39  ;;  %v4201_v41 = vunpack.c.l.s8.bf16 %v3481_v60 }
 0x625   :  { %4918 = vmatpush1.bf16.msra.mxu0 %v4151_v49  ;;  %5246 = vmatpush1.bf16.msra.mxu1 %v4153_v4  ;;  %v3488_v49 = vld [vmem:[#allocation2 + $0x6c8] sm:$0xff]  ;;  %v3490_v4 = vld [vmem:[#allocation2 + $0x6d8] sm:$0xff] }
 0x626   :  { %4919 = vmatprep.subr.bf16.mxu0 %v4160_v30  ;;  %5247 = vmatprep.subr.bf16.mxu1 %v4162_v51  ;;  %v4207_v30 = vunpack.c.h.s8.bf16 %v3479_v39  ;;  %v4209_v51 = vunpack.c.h.s8.bf16 %v3481_v60  ;;  %v4216_v61 = vunpack.c.l.s8.bf16 %v3488_v49  ;;  %v4218_v55 = vunpack.c.l.s8.bf16 %v3490_v4 }
 0x627   :  { %v4224_v1 = vunpack.c.h.s8.bf16 %v3488_v49  ;;  %v4226_v17 = vunpack.c.h.s8.bf16 %v3490_v4 }
 0x629   :  { %4920 = vmatpush1.bf16.msra.mxu0 %v4159_v56  ;;  %5248 = vmatpush1.bf16.msra.mxu1 %v4161_v58  ;;  %v3487_v56 = vld [vmem:[#allocation2 + $0x6c0] sm:$0xff]  ;;  %v3489_v58 = vld [vmem:[#allocation2 + $0x6d0] sm:$0xff] }
 0x62a   :  { %4930 = vmatprep.subr.bf16.mxu0 %v4168_v59  ;;  %5258 = vmatprep.subr.bf16.mxu1 %v4170_v0  ;;  %v4215_v59 = vunpack.c.l.s8.bf16 %v3487_v56  ;;  %v4217_v0 = vunpack.c.l.s8.bf16 %v3489_v58 }
 0x62c   :  { %4922 = vmatmul.mubr.bf16.vlgmr.msra.gmra.mrb[16].mxu0 %v7660_v21  ;;  %5250 = vmatmul.mubr.bf16.vlgmr.msra.gmra.mrb[16].mxu1 %v7660_v21 }
 0x62d   :  { %4931 = vmatpush1.bf16.msra.mxu0 %v4167_v35  ;;  %5259 = vmatpush1.bf16.msra.mxu1 %v4169_v5  ;;  %v3496_v35 = vld [vmem:[#allocation2 + $0x708] sm:$0xff]  ;;  %v3498_v5 = vld [vmem:[#allocation2 + $0x718] sm:$0xff] }
 0x62e   :  { %4932 = vmatprep.subr.bf16.mxu0 %v4176_v8  ;;  %5260 = vmatprep.subr.bf16.mxu1 %v4178_v10  ;;  %v4223_v8 = vunpack.c.h.s8.bf16 %v3487_v56  ;;  %v4225_v10 = vunpack.c.h.s8.bf16 %v3489_v58  ;;  %v4232_v13 = vunpack.c.l.s8.bf16 %v3496_v35  ;;  %v4234_v44 = vunpack.c.l.s8.bf16 %v3498_v5 }
 0x62f   :  { %4962 = vmatprep.mubr.bf16.mxu0 %v7666_v29  ;;  %5290 = vmatprep.mubr.bf16.mxu1 %v7666_v29  ;;  %v4240_v25 = vunpack.c.h.s8.bf16 %v3496_v35  ;;  %v4242_v26 = vunpack.c.h.s8.bf16 %v3498_v5 }
 0x631   :  { %4933 = vmatpush1.bf16.msra.mxu0 %v4175_v42  ;;  %5261 = vmatpush1.bf16.msra.mxu1 %v4177_v14  ;;  %v3495_v42 = vld [vmem:[#allocation2 + $0x700] sm:$0xff]  ;;  %v3497_v14 = vld [vmem:[#allocation2 + $0x710] sm:$0xff] }
 0x632   :  { %4934 = vmatprep.subr.bf16.mxu0 %v4184_v11  ;;  %5262 = vmatprep.subr.bf16.mxu1 %v4186_v12  ;;  %v4231_v11 = vunpack.c.l.s8.bf16 %v3495_v42  ;;  %v4233_v12 = vunpack.c.l.s8.bf16 %v3497_v14 }
 0x635   :  { %4935 = vmatpush1.bf16.msra.mxu0 %v4183_v31  ;;  %5263 = vmatpush1.bf16.msra.mxu1 %v4185_v52  ;;  %v3504_v31 = vld [vmem:[#allocation2 + $0x748] sm:$0xff]  ;;  %v3506_v52 = vld [vmem:[#allocation2 + $0x758] sm:$0xff] }
 0x636   :  { %4936 = vmatprep.subr.bf16.mxu0 %v4192_v32  ;;  %5264 = vmatprep.subr.bf16.mxu1 %v4194_v33  ;;  %v4239_v32 = vunpack.c.h.s8.bf16 %v3495_v42  ;;  %v4241_v33 = vunpack.c.h.s8.bf16 %v3497_v14  ;;  %v4248_v50 = vunpack.c.l.s8.bf16 %v3504_v31  ;;  %v4250_v16 = vunpack.c.l.s8.bf16 %v3506_v52 }
 0x637   :  { %v4256_v39 = vunpack.c.h.s8.bf16 %v3504_v31  ;;  %v4258_v60 = vunpack.c.h.s8.bf16 %v3506_v52 }
 0x639   :  { %4937 = vmatpush1.bf16.msra.mxu0 %v4191_v34  ;;  %5265 = vmatpush1.bf16.msra.mxu1 %v4193_v36  ;;  %v3503_v34 = vld [vmem:[#allocation2 + $0x740] sm:$0xff]  ;;  %v3505_v36 = vld [vmem:[#allocation2 + $0x750] sm:$0xff] }
 0x63a   :  { %4938 = vmatprep.subr.bf16.mxu0 %v4200_v37  ;;  %5266 = vmatprep.subr.bf16.mxu1 %v4202_v38  ;;  %v4247_v37 = vunpack.c.l.s8.bf16 %v3503_v34  ;;  %v4249_v38 = vunpack.c.l.s8.bf16 %v3505_v36 }
 0x63d   :  { %4939 = vmatpush1.bf16.msra.mxu0 %v4199_v40  ;;  %5267 = vmatpush1.bf16.msra.mxu1 %v4201_v41  ;;  %v3512_v40 = vld [vmem:[#allocation2 + $0x788] sm:$0xff]  ;;  %v3514_v41 = vld [vmem:[#allocation2 + $0x798] sm:$0xff] }
 0x63e   :  { %4940 = vmatprep.subr.bf16.mxu0 %v4208_v47  ;;  %5268 = vmatprep.subr.bf16.mxu1 %v4210_v48  ;;  %v4255_v47 = vunpack.c.h.s8.bf16 %v3503_v34  ;;  %v4257_v48 = vunpack.c.h.s8.bf16 %v3505_v36  ;;  %v4264_v49 = vunpack.c.l.s8.bf16 %v3512_v40  ;;  %v4266_v4 = vunpack.c.l.s8.bf16 %v3514_v41 }
 0x63f   :  { %v4272_v56 = vunpack.c.h.s8.bf16 %v3512_v40  ;;  %v4274_v58 = vunpack.c.h.s8.bf16 %v3514_v41 }
 0x641   :  { %4941 = vmatpush1.bf16.msra.mxu0 %v4207_v30  ;;  %5269 = vmatpush1.bf16.msra.mxu1 %v4209_v51  ;;  %v3511_v30 = vld [vmem:[#allocation2 + $0x780] sm:$0xff]  ;;  %v3513_v51 = vld [vmem:[#allocation2 + $0x790] sm:$0xff] }
 0x642   :  { %4942 = vmatprep.subr.bf16.mxu0 %v4216_v61  ;;  %5270 = vmatprep.subr.bf16.mxu1 %v4218_v55  ;;  %v4263_v61 = vunpack.c.l.s8.bf16 %v3511_v30  ;;  %v4265_v55 = vunpack.c.l.s8.bf16 %v3513_v51 }
 0x645   :  { %4943 = vmatpush1.bf16.msra.mxu0 %v4215_v59  ;;  %5271 = vmatpush1.bf16.msra.mxu1 %v4217_v0  ;;  %v3520_v59 = vld [vmem:[#allocation2 + $0x7c8] sm:$0xff]  ;;  %v3522_v0 = vld [vmem:[#allocation2 + $0x7d8] sm:$0xff] }
 0x646   :  { %4944 = vmatprep.subr.bf16.mxu0 %v4224_v1  ;;  %5272 = vmatprep.subr.bf16.mxu1 %v4226_v17  ;;  %v4271_v1 = vunpack.c.h.s8.bf16 %v3511_v30  ;;  %v4273_v17 = vunpack.c.h.s8.bf16 %v3513_v51  ;;  %v4280_v35 = vunpack.c.l.s8.bf16 %v3520_v59  ;;  %v4282_v5 = vunpack.c.l.s8.bf16 %v3522_v0 }
 0x647   :  { %v4288_v42 = vunpack.c.h.s8.bf16 %v3520_v59  ;;  %v4290_v14 = vunpack.c.h.s8.bf16 %v3522_v0 }
 0x649   :  { %4945 = vmatpush1.bf16.msra.mxu0 %v4223_v8  ;;  %5273 = vmatpush1.bf16.msra.mxu1 %v4225_v10  ;;  %v3519_v8 = vld [vmem:[#allocation2 + $0x7c0] sm:$0xff]  ;;  %v3521_v10 = vld [vmem:[#allocation2 + $0x7d0] sm:$0xff] }
 0x64a   :  { %4946 = vmatprep.subr.bf16.mxu0 %v4232_v13  ;;  %5274 = vmatprep.subr.bf16.mxu1 %v4234_v44  ;;  %v4279_v13 = vunpack.c.l.s8.bf16 %v3519_v8  ;;  %v4281_v44 = vunpack.c.l.s8.bf16 %v3521_v10 }
 0x64d   :  { %4947 = vmatpush1.bf16.msra.mxu0 %v4231_v11  ;;  %5275 = vmatpush1.bf16.msra.mxu1 %v4233_v12  ;;  %v3528_v11 = vld [vmem:[#allocation2 + $0x808] sm:$0xff]  ;;  %v3530_v12 = vld [vmem:[#allocation2 + $0x818] sm:$0xff] }
 0x64e   :  { %4948 = vmatprep.subr.bf16.mxu0 %v4240_v25  ;;  %5276 = vmatprep.subr.bf16.mxu1 %v4242_v26  ;;  %v4287_v25 = vunpack.c.h.s8.bf16 %v3519_v8  ;;  %v4289_v26 = vunpack.c.h.s8.bf16 %v3521_v10  ;;  %v4296_v31 = vunpack.c.l.s8.bf16 %v3528_v11  ;;  %v4298_v52 = vunpack.c.l.s8.bf16 %v3530_v12 }
 0x64f   :  { %v4304_v34 = vunpack.c.h.s8.bf16 %v3528_v11  ;;  %v4306_v36 = vunpack.c.h.s8.bf16 %v3530_v12 }
 0x651   :  { %4949 = vmatpush1.bf16.msra.mxu0 %v4239_v32  ;;  %5277 = vmatpush1.bf16.msra.mxu1 %v4241_v33  ;;  %v3527_v32 = vld [vmem:[#allocation2 + $0x800] sm:$0xff]  ;;  %v3529_v33 = vld [vmem:[#allocation2 + $0x810] sm:$0xff] }
 0x652   :  { %4950 = vmatprep.subr.bf16.mxu0 %v4248_v50  ;;  %5278 = vmatprep.subr.bf16.mxu1 %v4250_v16  ;;  %v4295_v50 = vunpack.c.l.s8.bf16 %v3527_v32  ;;  %v4297_v16 = vunpack.c.l.s8.bf16 %v3529_v33 }
 0x655   :  { %4951 = vmatpush1.bf16.msra.mxu0 %v4247_v37  ;;  %5279 = vmatpush1.bf16.msra.mxu1 %v4249_v38  ;;  %v3536_v37 = vld [vmem:[#allocation2 + $0x848] sm:$0xff]  ;;  %v3538_v38 = vld [vmem:[#allocation2 + $0x858] sm:$0xff] }
 0x656   :  { %4952 = vmatprep.subr.bf16.mxu0 %v4256_v39  ;;  %5280 = vmatprep.subr.bf16.mxu1 %v4258_v60  ;;  %v4303_v39 = vunpack.c.h.s8.bf16 %v3527_v32  ;;  %v4305_v60 = vunpack.c.h.s8.bf16 %v3529_v33  ;;  %v4312_v40 = vunpack.c.l.s8.bf16 %v3536_v37  ;;  %v4314_v41 = vunpack.c.l.s8.bf16 %v3538_v38 }
 0x657   :  { %v4320_v30 = vunpack.c.h.s8.bf16 %v3536_v37  ;;  %v4322_v51 = vunpack.c.h.s8.bf16 %v3538_v38 }
 0x659   :  { %4953 = vmatpush1.bf16.msra.mxu0 %v4255_v47  ;;  %5281 = vmatpush1.bf16.msra.mxu1 %v4257_v48  ;;  %v3535_v47 = vld [vmem:[#allocation2 + $0x840] sm:$0xff]  ;;  %v3537_v48 = vld [vmem:[#allocation2 + $0x850] sm:$0xff] }
 0x65a   :  { %4954 = vmatprep.subr.bf16.mxu0 %v4264_v49  ;;  %5282 = vmatprep.subr.bf16.mxu1 %v4266_v4  ;;  %v4311_v49 = vunpack.c.l.s8.bf16 %v3535_v47  ;;  %v4313_v4 = vunpack.c.l.s8.bf16 %v3537_v48 }
 0x65d   :  { %4955 = vmatpush1.bf16.msra.mxu0 %v4263_v61  ;;  %5283 = vmatpush1.bf16.msra.mxu1 %v4265_v55  ;;  %v3544_v61 = vld [vmem:[#allocation2 + $0x888] sm:$0xff]  ;;  %v3546_v55 = vld [vmem:[#allocation2 + $0x898] sm:$0xff] }
 0x65e   :  { %4956 = vmatprep.subr.bf16.mxu0 %v4272_v56  ;;  %5284 = vmatprep.subr.bf16.mxu1 %v4274_v58  ;;  %v4319_v56 = vunpack.c.h.s8.bf16 %v3535_v47  ;;  %v4321_v58 = vunpack.c.h.s8.bf16 %v3537_v48  ;;  %v4328_v59 = vunpack.c.l.s8.bf16 %v3544_v61  ;;  %v4330_v0 = vunpack.c.l.s8.bf16 %v3546_v55 }
 0x65f   :  { %v4336_v8 = vunpack.c.h.s8.bf16 %v3544_v61  ;;  %v4338_v10 = vunpack.c.h.s8.bf16 %v3546_v55 }
 0x661   :  { %4957 = vmatpush1.bf16.msra.mxu0 %v4271_v1  ;;  %5285 = vmatpush1.bf16.msra.mxu1 %v4273_v17  ;;  %v3543_v1 = vld [vmem:[#allocation2 + $0x880] sm:$0xff]  ;;  %v3545_v17 = vld [vmem:[#allocation2 + $0x890] sm:$0xff] }
 0x662   :  { %4958 = vmatprep.subr.bf16.mxu0 %v4280_v35  ;;  %5286 = vmatprep.subr.bf16.mxu1 %v4282_v5  ;;  %v4327_v35 = vunpack.c.l.s8.bf16 %v3543_v1  ;;  %v4329_v5 = vunpack.c.l.s8.bf16 %v3545_v17 }
 0x665   :  { %4959 = vmatpush1.bf16.msra.mxu0 %v4279_v13  ;;  %5287 = vmatpush1.bf16.msra.mxu1 %v4281_v44  ;;  %v3552_v13 = vld [vmem:[#allocation2 + $0x8c8] sm:$0xff]  ;;  %v3554_v44 = vld [vmem:[#allocation2 + $0x8d8] sm:$0xff] }
 0x666   :  { %4960 = vmatprep.subr.bf16.mxu0 %v4288_v42  ;;  %5288 = vmatprep.subr.bf16.mxu1 %v4290_v14  ;;  %v4335_v42 = vunpack.c.h.s8.bf16 %v3543_v1  ;;  %v4337_v14 = vunpack.c.h.s8.bf16 %v3545_v17  ;;  %v4344_v11 = vunpack.c.l.s8.bf16 %v3552_v13  ;;  %v4346_v12 = vunpack.c.l.s8.bf16 %v3554_v44 }
 0x667   :  { %v4352_v32 = vunpack.c.h.s8.bf16 %v3552_v13  ;;  %v4354_v33 = vunpack.c.h.s8.bf16 %v3554_v44 }
 0x669   :  { %4961 = vmatpush1.bf16.msra.mxu0 %v4287_v25  ;;  %5289 = vmatpush1.bf16.msra.mxu1 %v4289_v26  ;;  %v3551_v25 = vld [vmem:[#allocation2 + $0x8c0] sm:$0xff]  ;;  %v3553_v26 = vld [vmem:[#allocation2 + $0x8d0] sm:$0xff] }
 0x66a   :  { %4971 = vmatprep.subr.bf16.mxu0 %v4296_v31  ;;  %5299 = vmatprep.subr.bf16.mxu1 %v4298_v52  ;;  %v4343_v31 = vunpack.c.l.s8.bf16 %v3551_v25  ;;  %v4345_v52 = vunpack.c.l.s8.bf16 %v3553_v26 }
 0x66c   :  { %4963 = vmatmul.mubr.bf16.vlgmr.msra.gmra.mrb[16].mxu0 %v7662_v22  ;;  %5291 = vmatmul.mubr.bf16.vlgmr.msra.gmra.mrb[16].mxu1 %v7662_v22 }
 0x66d   :  { %4972 = vmatpush1.bf16.msra.mxu0 %v4295_v50  ;;  %5300 = vmatpush1.bf16.msra.mxu1 %v4297_v16  ;;  %v3560_v50 = vld [vmem:[#allocation2 + $0x908] sm:$0xff]  ;;  %v3562_v16 = vld [vmem:[#allocation2 + $0x918] sm:$0xff] }
 0x66e   :  { %4973 = vmatprep.subr.bf16.mxu0 %v4304_v34  ;;  %5301 = vmatprep.subr.bf16.mxu1 %v4306_v36  ;;  %v4351_v34 = vunpack.c.h.s8.bf16 %v3551_v25  ;;  %v4353_v36 = vunpack.c.h.s8.bf16 %v3553_v26  ;;  %v4360_v37 = vunpack.c.l.s8.bf16 %v3560_v50  ;;  %v4362_v38 = vunpack.c.l.s8.bf16 %v3562_v16 }
 0x66f   :  { %5003 = vmatprep.mubr.bf16.mxu0 %v7708_v62  ;;  %5331 = vmatprep.mubr.bf16.mxu1 %v7708_v62  ;;  %v4368_v47 = vunpack.c.h.s8.bf16 %v3560_v50  ;;  %v4370_v48 = vunpack.c.h.s8.bf16 %v3562_v16 }
 0x671   :  { %4974 = vmatpush1.bf16.msra.mxu0 %v4303_v39  ;;  %5302 = vmatpush1.bf16.msra.mxu1 %v4305_v60  ;;  %v3559_v39 = vld [vmem:[#allocation2 + $0x900] sm:$0xff]  ;;  %v3561_v60 = vld [vmem:[#allocation2 + $0x910] sm:$0xff] }
 0x672   :  { %4975 = vmatprep.subr.bf16.mxu0 %v4312_v40  ;;  %5303 = vmatprep.subr.bf16.mxu1 %v4314_v41  ;;  %v4359_v40 = vunpack.c.l.s8.bf16 %v3559_v39  ;;  %v4361_v41 = vunpack.c.l.s8.bf16 %v3561_v60 }
 0x675   :  { %4976 = vmatpush1.bf16.msra.mxu0 %v4311_v49  ;;  %5304 = vmatpush1.bf16.msra.mxu1 %v4313_v4  ;;  %v3568_v49 = vld [vmem:[#allocation2 + $0x948] sm:$0xff]  ;;  %v3570_v4 = vld [vmem:[#allocation2 + $0x958] sm:$0xff] }
 0x676   :  { %4977 = vmatprep.subr.bf16.mxu0 %v4320_v30  ;;  %5305 = vmatprep.subr.bf16.mxu1 %v4322_v51  ;;  %v4367_v30 = vunpack.c.h.s8.bf16 %v3559_v39  ;;  %v4369_v51 = vunpack.c.h.s8.bf16 %v3561_v60  ;;  %v4376_v61 = vunpack.c.l.s8.bf16 %v3568_v49  ;;  %v4378_v55 = vunpack.c.l.s8.bf16 %v3570_v4 }
 0x677   :  { %v4384_v1 = vunpack.c.h.s8.bf16 %v3568_v49  ;;  %v4386_v17 = vunpack.c.h.s8.bf16 %v3570_v4 }
 0x679   :  { %4978 = vmatpush1.bf16.msra.mxu0 %v4319_v56  ;;  %5306 = vmatpush1.bf16.msra.mxu1 %v4321_v58  ;;  %v3567_v56 = vld [vmem:[#allocation2 + $0x940] sm:$0xff]  ;;  %v3569_v58 = vld [vmem:[#allocation2 + $0x950] sm:$0xff] }
 0x67a   :  { %4979 = vmatprep.subr.bf16.mxu0 %v4328_v59  ;;  %5307 = vmatprep.subr.bf16.mxu1 %v4330_v0  ;;  %v4375_v59 = vunpack.c.l.s8.bf16 %v3567_v56  ;;  %v4377_v0 = vunpack.c.l.s8.bf16 %v3569_v58 }
 0x67d   :  { %4980 = vmatpush1.bf16.msra.mxu0 %v4327_v35  ;;  %5308 = vmatpush1.bf16.msra.mxu1 %v4329_v5  ;;  %v3576_v35 = vld [vmem:[#allocation2 + $0x988] sm:$0xff]  ;;  %v3578_v5 = vld [vmem:[#allocation2 + $0x998] sm:$0xff] }
 0x67e   :  { %4981 = vmatprep.subr.bf16.mxu0 %v4336_v8  ;;  %5309 = vmatprep.subr.bf16.mxu1 %v4338_v10  ;;  %v4383_v8 = vunpack.c.h.s8.bf16 %v3567_v56  ;;  %v4385_v10 = vunpack.c.h.s8.bf16 %v3569_v58  ;;  %v4392_v13 = vunpack.c.l.s8.bf16 %v3576_v35  ;;  %v4394_v44 = vunpack.c.l.s8.bf16 %v3578_v5 }
 0x67f   :  { %v4400_v25 = vunpack.c.h.s8.bf16 %v3576_v35  ;;  %v4402_v26 = vunpack.c.h.s8.bf16 %v3578_v5 }
 0x681   :  { %4982 = vmatpush1.bf16.msra.mxu0 %v4335_v42  ;;  %5310 = vmatpush1.bf16.msra.mxu1 %v4337_v14  ;;  %v3575_v42 = vld [vmem:[#allocation2 + $0x980] sm:$0xff]  ;;  %v3577_v14 = vld [vmem:[#allocation2 + $0x990] sm:$0xff] }
 0x682   :  { %4983 = vmatprep.subr.bf16.mxu0 %v4344_v11  ;;  %5311 = vmatprep.subr.bf16.mxu1 %v4346_v12  ;;  %v4391_v11 = vunpack.c.l.s8.bf16 %v3575_v42  ;;  %v4393_v12 = vunpack.c.l.s8.bf16 %v3577_v14 }
 0x685   :  { %4984 = vmatpush1.bf16.msra.mxu0 %v4343_v31  ;;  %5312 = vmatpush1.bf16.msra.mxu1 %v4345_v52  ;;  %v3584_v31 = vld [vmem:[#allocation2 + $0x9c8] sm:$0xff]  ;;  %v3586_v52 = vld [vmem:[#allocation2 + $0x9d8] sm:$0xff] }
 0x686   :  { %4985 = vmatprep.subr.bf16.mxu0 %v4352_v32  ;;  %5313 = vmatprep.subr.bf16.mxu1 %v4354_v33  ;;  %v4399_v32 = vunpack.c.h.s8.bf16 %v3575_v42  ;;  %v4401_v33 = vunpack.c.h.s8.bf16 %v3577_v14  ;;  %v4408_v50 = vunpack.c.l.s8.bf16 %v3584_v31  ;;  %v4410_v16 = vunpack.c.l.s8.bf16 %v3586_v52 }
 0x687   :  { %v4416_v39 = vunpack.c.h.s8.bf16 %v3584_v31  ;;  %v4418_v60 = vunpack.c.h.s8.bf16 %v3586_v52 }
 0x689   :  { %4986 = vmatpush1.bf16.msra.mxu0 %v4351_v34  ;;  %5314 = vmatpush1.bf16.msra.mxu1 %v4353_v36  ;;  %v3583_v34 = vld [vmem:[#allocation2 + $0x9c0] sm:$0xff]  ;;  %v3585_v36 = vld [vmem:[#allocation2 + $0x9d0] sm:$0xff] }
 0x68a   :  { %4987 = vmatprep.subr.bf16.mxu0 %v4360_v37  ;;  %5315 = vmatprep.subr.bf16.mxu1 %v4362_v38  ;;  %v4407_v37 = vunpack.c.l.s8.bf16 %v3583_v34  ;;  %v4409_v38 = vunpack.c.l.s8.bf16 %v3585_v36 }
 0x68d   :  { %4988 = vmatpush1.bf16.msra.mxu0 %v4359_v40  ;;  %5316 = vmatpush1.bf16.msra.mxu1 %v4361_v41  ;;  %v3592_v40 = vld [vmem:[#allocation2 + $0xa08] sm:$0xff]  ;;  %v3594_v41 = vld [vmem:[#allocation2 + $0xa18] sm:$0xff] }
 0x68e   :  { %4989 = vmatprep.subr.bf16.mxu0 %v4368_v47  ;;  %5317 = vmatprep.subr.bf16.mxu1 %v4370_v48  ;;  %v4415_v47 = vunpack.c.h.s8.bf16 %v3583_v34  ;;  %v4417_v48 = vunpack.c.h.s8.bf16 %v3585_v36  ;;  %v4424_v49 = vunpack.c.l.s8.bf16 %v3592_v40  ;;  %v4426_v4 = vunpack.c.l.s8.bf16 %v3594_v41 }
 0x68f   :  { %v4432_v56 = vunpack.c.h.s8.bf16 %v3592_v40  ;;  %v4434_v58 = vunpack.c.h.s8.bf16 %v3594_v41 }
 0x691   :  { %4990 = vmatpush1.bf16.msra.mxu0 %v4367_v30  ;;  %5318 = vmatpush1.bf16.msra.mxu1 %v4369_v51  ;;  %v3591_v30 = vld [vmem:[#allocation2 + $0xa00] sm:$0xff]  ;;  %v3593_v51 = vld [vmem:[#allocation2 + $0xa10] sm:$0xff] }
 0x692   :  { %4991 = vmatprep.subr.bf16.mxu0 %v4376_v61  ;;  %5319 = vmatprep.subr.bf16.mxu1 %v4378_v55  ;;  %v4423_v61 = vunpack.c.l.s8.bf16 %v3591_v30  ;;  %v4425_v55 = vunpack.c.l.s8.bf16 %v3593_v51 }
 0x695   :  { %4992 = vmatpush1.bf16.msra.mxu0 %v4375_v59  ;;  %5320 = vmatpush1.bf16.msra.mxu1 %v4377_v0  ;;  %v3600_v59 = vld [vmem:[#allocation2 + $0xa48] sm:$0xff]  ;;  %v3602_v0 = vld [vmem:[#allocation2 + $0xa58] sm:$0xff] }
 0x696   :  { %4993 = vmatprep.subr.bf16.mxu0 %v4384_v1  ;;  %5321 = vmatprep.subr.bf16.mxu1 %v4386_v17  ;;  %v4431_v1 = vunpack.c.h.s8.bf16 %v3591_v30  ;;  %v4433_v17 = vunpack.c.h.s8.bf16 %v3593_v51  ;;  %v4440_v35 = vunpack.c.l.s8.bf16 %v3600_v59  ;;  %v4442_v5 = vunpack.c.l.s8.bf16 %v3602_v0 }
 0x697   :  { %v4448_v42 = vunpack.c.h.s8.bf16 %v3600_v59  ;;  %v4450_v14 = vunpack.c.h.s8.bf16 %v3602_v0 }
 0x699   :  { %4994 = vmatpush1.bf16.msra.mxu0 %v4383_v8  ;;  %5322 = vmatpush1.bf16.msra.mxu1 %v4385_v10  ;;  %v3599_v8 = vld [vmem:[#allocation2 + $0xa40] sm:$0xff]  ;;  %v3601_v10 = vld [vmem:[#allocation2 + $0xa50] sm:$0xff] }
 0x69a   :  { %4995 = vmatprep.subr.bf16.mxu0 %v4392_v13  ;;  %5323 = vmatprep.subr.bf16.mxu1 %v4394_v44  ;;  %v4439_v13 = vunpack.c.l.s8.bf16 %v3599_v8  ;;  %v4441_v44 = vunpack.c.l.s8.bf16 %v3601_v10 }
 0x69d   :  { %4996 = vmatpush1.bf16.msra.mxu0 %v4391_v11  ;;  %5324 = vmatpush1.bf16.msra.mxu1 %v4393_v12  ;;  %v3608_v11 = vld [vmem:[#allocation2 + $0xa88] sm:$0xff]  ;;  %v3610_v12 = vld [vmem:[#allocation2 + $0xa98] sm:$0xff] }
 0x69e   :  { %4997 = vmatprep.subr.bf16.mxu0 %v4400_v25  ;;  %5325 = vmatprep.subr.bf16.mxu1 %v4402_v26  ;;  %v4447_v25 = vunpack.c.h.s8.bf16 %v3599_v8  ;;  %v4449_v26 = vunpack.c.h.s8.bf16 %v3601_v10  ;;  %v4456_v31 = vunpack.c.l.s8.bf16 %v3608_v11  ;;  %v4458_v52 = vunpack.c.l.s8.bf16 %v3610_v12 }
 0x69f   :  { %v4464_v34 = vunpack.c.h.s8.bf16 %v3608_v11  ;;  %v4466_v36 = vunpack.c.h.s8.bf16 %v3610_v12 }
 0x6a1   :  { %4998 = vmatpush1.bf16.msra.mxu0 %v4399_v32  ;;  %5326 = vmatpush1.bf16.msra.mxu1 %v4401_v33  ;;  %v3607_v32 = vld [vmem:[#allocation2 + $0xa80] sm:$0xff]  ;;  %v3609_v33 = vld [vmem:[#allocation2 + $0xa90] sm:$0xff] }
 0x6a2   :  { %4999 = vmatprep.subr.bf16.mxu0 %v4408_v50  ;;  %5327 = vmatprep.subr.bf16.mxu1 %v4410_v16  ;;  %v4455_v50 = vunpack.c.l.s8.bf16 %v3607_v32  ;;  %v4457_v16 = vunpack.c.l.s8.bf16 %v3609_v33 }
 0x6a5   :  { %5000 = vmatpush1.bf16.msra.mxu0 %v4407_v37  ;;  %5328 = vmatpush1.bf16.msra.mxu1 %v4409_v38  ;;  %v3616_v37 = vld [vmem:[#allocation2 + $0xac8] sm:$0xff]  ;;  %v3618_v38 = vld [vmem:[#allocation2 + $0xad8] sm:$0xff] }
 0x6a6   :  { %5001 = vmatprep.subr.bf16.mxu0 %v4416_v39  ;;  %5329 = vmatprep.subr.bf16.mxu1 %v4418_v60  ;;  %v4463_v39 = vunpack.c.h.s8.bf16 %v3607_v32  ;;  %v4465_v60 = vunpack.c.h.s8.bf16 %v3609_v33  ;;  %v4472_v40 = vunpack.c.l.s8.bf16 %v3616_v37  ;;  %v4474_v41 = vunpack.c.l.s8.bf16 %v3618_v38 }
 0x6a7   :  { %v4480_v30 = vunpack.c.h.s8.bf16 %v3616_v37  ;;  %v4482_v51 = vunpack.c.h.s8.bf16 %v3618_v38 }
 0x6a9   :  { %5002 = vmatpush1.bf16.msra.mxu0 %v4415_v47  ;;  %5330 = vmatpush1.bf16.msra.mxu1 %v4417_v48  ;;  %v3615_v47 = vld [vmem:[#allocation2 + $0xac0] sm:$0xff]  ;;  %v3617_v48 = vld [vmem:[#allocation2 + $0xad0] sm:$0xff] }
 0x6aa   :  { %5012 = vmatprep.subr.bf16.mxu0 %v4424_v49  ;;  %5340 = vmatprep.subr.bf16.mxu1 %v4426_v4  ;;  %v4471_v49 = vunpack.c.l.s8.bf16 %v3615_v47  ;;  %v4473_v4 = vunpack.c.l.s8.bf16 %v3617_v48 }
 0x6ac   :  { %5004 = vmatmul.mubr.bf16.vlgmr.msra.gmra.mrb[16].mxu0 %v7704_v53  ;;  %5332 = vmatmul.mubr.bf16.vlgmr.msra.gmra.mrb[16].mxu1 %v7704_v53 }
 0x6ad   :  { %5013 = vmatpush1.bf16.msra.mxu0 %v4423_v61  ;;  %5341 = vmatpush1.bf16.msra.mxu1 %v4425_v55  ;;  %v3624_v61 = vld [vmem:[#allocation2 + $0xb08] sm:$0xff]  ;;  %v3626_v55 = vld [vmem:[#allocation2 + $0xb18] sm:$0xff] }
 0x6ae   :  { %5014 = vmatprep.subr.bf16.mxu0 %v4432_v56  ;;  %5342 = vmatprep.subr.bf16.mxu1 %v4434_v58  ;;  %v4479_v56 = vunpack.c.h.s8.bf16 %v3615_v47  ;;  %v4481_v58 = vunpack.c.h.s8.bf16 %v3617_v48  ;;  %v4488_v59 = vunpack.c.l.s8.bf16 %v3624_v61  ;;  %v4490_v0 = vunpack.c.l.s8.bf16 %v3626_v55 }
 0x6af   :  { %5044 = vmatprep.mubr.bf16.mxu0 %v7710_v63  ;;  %5372 = vmatprep.mubr.bf16.mxu1 %v7710_v63  ;;  %v4496_v8 = vunpack.c.h.s8.bf16 %v3624_v61  ;;  %v4498_v10 = vunpack.c.h.s8.bf16 %v3626_v55 }
 0x6b1   :  { %5015 = vmatpush1.bf16.msra.mxu0 %v4431_v1  ;;  %5343 = vmatpush1.bf16.msra.mxu1 %v4433_v17  ;;  %v3623_v1 = vld [vmem:[#allocation2 + $0xb00] sm:$0xff]  ;;  %v3625_v17 = vld [vmem:[#allocation2 + $0xb10] sm:$0xff] }
 0x6b2   :  { %5016 = vmatprep.subr.bf16.mxu0 %v4440_v35  ;;  %5344 = vmatprep.subr.bf16.mxu1 %v4442_v5  ;;  %v4487_v35 = vunpack.c.l.s8.bf16 %v3623_v1  ;;  %v4489_v5 = vunpack.c.l.s8.bf16 %v3625_v17 }
 0x6b5   :  { %5017 = vmatpush1.bf16.msra.mxu0 %v4439_v13  ;;  %5345 = vmatpush1.bf16.msra.mxu1 %v4441_v44  ;;  %v3632_v13 = vld [vmem:[#allocation2 + $0xb48] sm:$0xff]  ;;  %v3634_v44 = vld [vmem:[#allocation2 + $0xb58] sm:$0xff] }
 0x6b6   :  { %5018 = vmatprep.subr.bf16.mxu0 %v4448_v42  ;;  %5346 = vmatprep.subr.bf16.mxu1 %v4450_v14  ;;  %v4495_v42 = vunpack.c.h.s8.bf16 %v3623_v1  ;;  %v4497_v14 = vunpack.c.h.s8.bf16 %v3625_v17  ;;  %v4504_v11 = vunpack.c.l.s8.bf16 %v3632_v13  ;;  %v4506_v12 = vunpack.c.l.s8.bf16 %v3634_v44 }
 0x6b7   :  { %v4512_v32 = vunpack.c.h.s8.bf16 %v3632_v13  ;;  %v4514_v33 = vunpack.c.h.s8.bf16 %v3634_v44 }
 0x6b9   :  { %5019 = vmatpush1.bf16.msra.mxu0 %v4447_v25  ;;  %5347 = vmatpush1.bf16.msra.mxu1 %v4449_v26  ;;  %v3631_v25 = vld [vmem:[#allocation2 + $0xb40] sm:$0xff]  ;;  %v3633_v26 = vld [vmem:[#allocation2 + $0xb50] sm:$0xff] }
 0x6ba   :  { %5020 = vmatprep.subr.bf16.mxu0 %v4456_v31  ;;  %5348 = vmatprep.subr.bf16.mxu1 %v4458_v52  ;;  %v4503_v31 = vunpack.c.l.s8.bf16 %v3631_v25  ;;  %v4505_v52 = vunpack.c.l.s8.bf16 %v3633_v26 }
 0x6bd   :  { %5021 = vmatpush1.bf16.msra.mxu0 %v4455_v50  ;;  %5349 = vmatpush1.bf16.msra.mxu1 %v4457_v16  ;;  %v3640_v50 = vld [vmem:[#allocation2 + $0xb88] sm:$0xff]  ;;  %v3642_v16 = vld [vmem:[#allocation2 + $0xb98] sm:$0xff] }
 0x6be   :  { %5022 = vmatprep.subr.bf16.mxu0 %v4464_v34  ;;  %5350 = vmatprep.subr.bf16.mxu1 %v4466_v36  ;;  %v4511_v34 = vunpack.c.h.s8.bf16 %v3631_v25  ;;  %v4513_v36 = vunpack.c.h.s8.bf16 %v3633_v26  ;;  %v4520_v37 = vunpack.c.l.s8.bf16 %v3640_v50  ;;  %v4522_v38 = vunpack.c.l.s8.bf16 %v3642_v16 }
 0x6bf   :  { %v4528_v47 = vunpack.c.h.s8.bf16 %v3640_v50  ;;  %v4530_v48 = vunpack.c.h.s8.bf16 %v3642_v16 }
 0x6c1   :  { %5023 = vmatpush1.bf16.msra.mxu0 %v4463_v39  ;;  %5351 = vmatpush1.bf16.msra.mxu1 %v4465_v60  ;;  %v3639_v39 = vld [vmem:[#allocation2 + $0xb80] sm:$0xff]  ;;  %v3641_v60 = vld [vmem:[#allocation2 + $0xb90] sm:$0xff] }
 0x6c2   :  { %5024 = vmatprep.subr.bf16.mxu0 %v4472_v40  ;;  %5352 = vmatprep.subr.bf16.mxu1 %v4474_v41  ;;  %v4519_v40 = vunpack.c.l.s8.bf16 %v3639_v39  ;;  %v4521_v41 = vunpack.c.l.s8.bf16 %v3641_v60 }
 0x6c5   :  { %5025 = vmatpush1.bf16.msra.mxu0 %v4471_v49  ;;  %5353 = vmatpush1.bf16.msra.mxu1 %v4473_v4  ;;  %v3648_v49 = vld [vmem:[#allocation2 + $0xbc8] sm:$0xff]  ;;  %v3650_v4 = vld [vmem:[#allocation2 + $0xbd8] sm:$0xff] }
 0x6c6   :  { %5026 = vmatprep.subr.bf16.mxu0 %v4480_v30  ;;  %5354 = vmatprep.subr.bf16.mxu1 %v4482_v51  ;;  %v4527_v30 = vunpack.c.h.s8.bf16 %v3639_v39  ;;  %v4529_v51 = vunpack.c.h.s8.bf16 %v3641_v60  ;;  %v4536_v61 = vunpack.c.l.s8.bf16 %v3648_v49  ;;  %v4538_v55 = vunpack.c.l.s8.bf16 %v3650_v4 }
 0x6c7   :  { %v4544_v1 = vunpack.c.h.s8.bf16 %v3648_v49  ;;  %v4546_v17 = vunpack.c.h.s8.bf16 %v3650_v4 }
 0x6c9   :  { %5027 = vmatpush1.bf16.msra.mxu0 %v4479_v56  ;;  %5355 = vmatpush1.bf16.msra.mxu1 %v4481_v58  ;;  %v3647_v56 = vld [vmem:[#allocation2 + $0xbc0] sm:$0xff]  ;;  %v3649_v58 = vld [vmem:[#allocation2 + $0xbd0] sm:$0xff] }
 0x6ca   :  { %5028 = vmatprep.subr.bf16.mxu0 %v4488_v59  ;;  %5356 = vmatprep.subr.bf16.mxu1 %v4490_v0  ;;  %v4535_v59 = vunpack.c.l.s8.bf16 %v3647_v56  ;;  %v4537_v0 = vunpack.c.l.s8.bf16 %v3649_v58 }
 0x6cd   :  { %5029 = vmatpush1.bf16.msra.mxu0 %v4487_v35  ;;  %5357 = vmatpush1.bf16.msra.mxu1 %v4489_v5  ;;  %v3656_v35 = vld [vmem:[#allocation2 + $0xc08] sm:$0xff]  ;;  %v3658_v5 = vld [vmem:[#allocation2 + $0xc18] sm:$0xff] }
 0x6ce   :  { %5030 = vmatprep.subr.bf16.mxu0 %v4496_v8  ;;  %5358 = vmatprep.subr.bf16.mxu1 %v4498_v10  ;;  %v4543_v8 = vunpack.c.h.s8.bf16 %v3647_v56  ;;  %v4545_v10 = vunpack.c.h.s8.bf16 %v3649_v58  ;;  %v4552_v13 = vunpack.c.l.s8.bf16 %v3656_v35  ;;  %v4554_v44 = vunpack.c.l.s8.bf16 %v3658_v5 }
 0x6cf   :  { %v4560_v25 = vunpack.c.h.s8.bf16 %v3656_v35  ;;  %v4562_v26 = vunpack.c.h.s8.bf16 %v3658_v5 }
 0x6d1   :  { %5031 = vmatpush1.bf16.msra.mxu0 %v4495_v42  ;;  %5359 = vmatpush1.bf16.msra.mxu1 %v4497_v14  ;;  %v3655_v42 = vld [vmem:[#allocation2 + $0xc00] sm:$0xff]  ;;  %v3657_v14 = vld [vmem:[#allocation2 + $0xc10] sm:$0xff] }
 0x6d2   :  { %5032 = vmatprep.subr.bf16.mxu0 %v4504_v11  ;;  %5360 = vmatprep.subr.bf16.mxu1 %v4506_v12  ;;  %v4551_v11 = vunpack.c.l.s8.bf16 %v3655_v42  ;;  %v4553_v12 = vunpack.c.l.s8.bf16 %v3657_v14 }
 0x6d5   :  { %5033 = vmatpush1.bf16.msra.mxu0 %v4503_v31  ;;  %5361 = vmatpush1.bf16.msra.mxu1 %v4505_v52  ;;  %v3664_v31 = vld [vmem:[#allocation2 + $0xc48] sm:$0xff]  ;;  %v3666_v52 = vld [vmem:[#allocation2 + $0xc58] sm:$0xff] }
 0x6d6   :  { %5034 = vmatprep.subr.bf16.mxu0 %v4512_v32  ;;  %5362 = vmatprep.subr.bf16.mxu1 %v4514_v33  ;;  %v4559_v32 = vunpack.c.h.s8.bf16 %v3655_v42  ;;  %v4561_v33 = vunpack.c.h.s8.bf16 %v3657_v14  ;;  %v4568_v50 = vunpack.c.l.s8.bf16 %v3664_v31  ;;  %v4570_v16 = vunpack.c.l.s8.bf16 %v3666_v52 }
 0x6d7   :  { %v4576_v39 = vunpack.c.h.s8.bf16 %v3664_v31  ;;  %v4578_v60 = vunpack.c.h.s8.bf16 %v3666_v52 }
 0x6d9   :  { %5035 = vmatpush1.bf16.msra.mxu0 %v4511_v34  ;;  %5363 = vmatpush1.bf16.msra.mxu1 %v4513_v36  ;;  %v3663_v34 = vld [vmem:[#allocation2 + $0xc40] sm:$0xff]  ;;  %v3665_v36 = vld [vmem:[#allocation2 + $0xc50] sm:$0xff] }
 0x6da   :  { %5036 = vmatprep.subr.bf16.mxu0 %v4520_v37  ;;  %5364 = vmatprep.subr.bf16.mxu1 %v4522_v38  ;;  %v4567_v37 = vunpack.c.l.s8.bf16 %v3663_v34  ;;  %v4569_v38 = vunpack.c.l.s8.bf16 %v3665_v36 }
 0x6dd   :  { %5037 = vmatpush1.bf16.msra.mxu0 %v4519_v40  ;;  %5365 = vmatpush1.bf16.msra.mxu1 %v4521_v41  ;;  %v3672_v40 = vld [vmem:[#allocation2 + $0xc88] sm:$0xff]  ;;  %v3674_v41 = vld [vmem:[#allocation2 + $0xc98] sm:$0xff] }
 0x6de   :  { %5038 = vmatprep.subr.bf16.mxu0 %v4528_v47  ;;  %5366 = vmatprep.subr.bf16.mxu1 %v4530_v48  ;;  %v4575_v47 = vunpack.c.h.s8.bf16 %v3663_v34  ;;  %v4577_v48 = vunpack.c.h.s8.bf16 %v3665_v36  ;;  %v4584_v49 = vunpack.c.l.s8.bf16 %v3672_v40  ;;  %v4586_v4 = vunpack.c.l.s8.bf16 %v3674_v41 }
 0x6df   :  { %v4592_v56 = vunpack.c.h.s8.bf16 %v3672_v40  ;;  %v4594_v58 = vunpack.c.h.s8.bf16 %v3674_v41 }
 0x6e1   :  { %5039 = vmatpush1.bf16.msra.mxu0 %v4527_v30  ;;  %5367 = vmatpush1.bf16.msra.mxu1 %v4529_v51  ;;  %v3671_v30 = vld [vmem:[#allocation2 + $0xc80] sm:$0xff]  ;;  %v3673_v51 = vld [vmem:[#allocation2 + $0xc90] sm:$0xff] }
 0x6e2   :  { %5040 = vmatprep.subr.bf16.mxu0 %v4536_v61  ;;  %5368 = vmatprep.subr.bf16.mxu1 %v4538_v55  ;;  %v4583_v61 = vunpack.c.l.s8.bf16 %v3671_v30  ;;  %v4585_v55 = vunpack.c.l.s8.bf16 %v3673_v51 }
 0x6e5   :  { %5041 = vmatpush1.bf16.msra.mxu0 %v4535_v59  ;;  %5369 = vmatpush1.bf16.msra.mxu1 %v4537_v0  ;;  %v3680_v59 = vld [vmem:[#allocation2 + $0xcc8] sm:$0xff]  ;;  %v3682_v0 = vld [vmem:[#allocation2 + $0xcd8] sm:$0xff] }
 0x6e6   :  { %5042 = vmatprep.subr.bf16.mxu0 %v4544_v1  ;;  %5370 = vmatprep.subr.bf16.mxu1 %v4546_v17  ;;  %v4591_v1 = vunpack.c.h.s8.bf16 %v3671_v30  ;;  %v4593_v17 = vunpack.c.h.s8.bf16 %v3673_v51  ;;  %v4600_v35 = vunpack.c.l.s8.bf16 %v3680_v59  ;;  %v4602_v5 = vunpack.c.l.s8.bf16 %v3682_v0 }
 0x6e7   :  { %v4608_v42 = vunpack.c.h.s8.bf16 %v3680_v59  ;;  %v4610_v14 = vunpack.c.h.s8.bf16 %v3682_v0 }
 0x6e9   :  { %5043 = vmatpush1.bf16.msra.mxu0 %v4543_v8  ;;  %5371 = vmatpush1.bf16.msra.mxu1 %v4545_v10  ;;  %v3679_v8 = vld [vmem:[#allocation2 + $0xcc0] sm:$0xff]  ;;  %v3681_v10 = vld [vmem:[#allocation2 + $0xcd0] sm:$0xff] }
 0x6ea   :  { %5053 = vmatprep.subr.bf16.mxu0 %v4552_v13  ;;  %5381 = vmatprep.subr.bf16.mxu1 %v4554_v44  ;;  %v4599_v13 = vunpack.c.l.s8.bf16 %v3679_v8  ;;  %v4601_v44 = vunpack.c.l.s8.bf16 %v3681_v10 }
 0x6ec   :  { %5045 = vmatmul.mubr.bf16.vlgmr.msra.gmra.mrb[16].mxu0 %v7706_v57  ;;  %5373 = vmatmul.mubr.bf16.vlgmr.msra.gmra.mrb[16].mxu1 %v7706_v57 }
 0x6ed   :  { %5054 = vmatpush1.bf16.msra.mxu0 %v4551_v11  ;;  %5382 = vmatpush1.bf16.msra.mxu1 %v4553_v12  ;;  %v3688_v11 = vld [vmem:[#allocation2 + $0xd08] sm:$0xff]  ;;  %v3690_v12 = vld [vmem:[#allocation2 + $0xd18] sm:$0xff] }
 0x6ee   :  { %5055 = vmatprep.subr.bf16.mxu0 %v4560_v25  ;;  %5383 = vmatprep.subr.bf16.mxu1 %v4562_v26  ;;  %v4607_v25 = vunpack.c.h.s8.bf16 %v3679_v8  ;;  %v4609_v26 = vunpack.c.h.s8.bf16 %v3681_v10  ;;  %v4616_v31 = vunpack.c.l.s8.bf16 %v3688_v11  ;;  %v4618_v52 = vunpack.c.l.s8.bf16 %v3690_v12 }
 0x6ef   :  { %5085 = vmatprep.mubr.bf16.mxu0 %v7734_v24  ;;  %5413 = vmatprep.mubr.bf16.mxu1 %v7734_v24  ;;  %v4624_v34 = vunpack.c.h.s8.bf16 %v3688_v11  ;;  %v4626_v36 = vunpack.c.h.s8.bf16 %v3690_v12 }
 0x6f1   :  { %5056 = vmatpush1.bf16.msra.mxu0 %v4559_v32  ;;  %5384 = vmatpush1.bf16.msra.mxu1 %v4561_v33  ;;  %v3687_v32 = vld [vmem:[#allocation2 + $0xd00] sm:$0xff]  ;;  %v3689_v33 = vld [vmem:[#allocation2 + $0xd10] sm:$0xff] }
 0x6f2   :  { %5057 = vmatprep.subr.bf16.mxu0 %v4568_v50  ;;  %5385 = vmatprep.subr.bf16.mxu1 %v4570_v16  ;;  %v4615_v50 = vunpack.c.l.s8.bf16 %v3687_v32  ;;  %v4617_v16 = vunpack.c.l.s8.bf16 %v3689_v33 }
 0x6f5   :  { %5058 = vmatpush1.bf16.msra.mxu0 %v4567_v37  ;;  %5386 = vmatpush1.bf16.msra.mxu1 %v4569_v38  ;;  %v3696_v37 = vld [vmem:[#allocation2 + $0xd48] sm:$0xff]  ;;  %v3698_v38 = vld [vmem:[#allocation2 + $0xd58] sm:$0xff] }
 0x6f6   :  { %5059 = vmatprep.subr.bf16.mxu0 %v4576_v39  ;;  %5387 = vmatprep.subr.bf16.mxu1 %v4578_v60  ;;  %v4623_v39 = vunpack.c.h.s8.bf16 %v3687_v32  ;;  %v4625_v60 = vunpack.c.h.s8.bf16 %v3689_v33  ;;  %v4632_v40 = vunpack.c.l.s8.bf16 %v3696_v37  ;;  %v4634_v41 = vunpack.c.l.s8.bf16 %v3698_v38 }
 0x6f7   :  { %v4640_v30 = vunpack.c.h.s8.bf16 %v3696_v37  ;;  %v4642_v51 = vunpack.c.h.s8.bf16 %v3698_v38 }
 0x6f9   :  { %5060 = vmatpush1.bf16.msra.mxu0 %v4575_v47  ;;  %5388 = vmatpush1.bf16.msra.mxu1 %v4577_v48  ;;  %v3695_v47 = vld [vmem:[#allocation2 + $0xd40] sm:$0xff]  ;;  %v3697_v48 = vld [vmem:[#allocation2 + $0xd50] sm:$0xff] }
 0x6fa   :  { %5061 = vmatprep.subr.bf16.mxu0 %v4584_v49  ;;  %5389 = vmatprep.subr.bf16.mxu1 %v4586_v4  ;;  %v4631_v49 = vunpack.c.l.s8.bf16 %v3695_v47  ;;  %v4633_v4 = vunpack.c.l.s8.bf16 %v3697_v48 }
 0x6fd   :  { %5062 = vmatpush1.bf16.msra.mxu0 %v4583_v61  ;;  %5390 = vmatpush1.bf16.msra.mxu1 %v4585_v55  ;;  %v3704_v61 = vld [vmem:[#allocation2 + $0xd88] sm:$0xff]  ;;  %v3706_v55 = vld [vmem:[#allocation2 + $0xd98] sm:$0xff] }
 0x6fe   :  { %5063 = vmatprep.subr.bf16.mxu0 %v4592_v56  ;;  %5391 = vmatprep.subr.bf16.mxu1 %v4594_v58  ;;  %v4639_v56 = vunpack.c.h.s8.bf16 %v3695_v47  ;;  %v4641_v58 = vunpack.c.h.s8.bf16 %v3697_v48  ;;  %v4648_v59 = vunpack.c.l.s8.bf16 %v3704_v61  ;;  %v4650_v0 = vunpack.c.l.s8.bf16 %v3706_v55 }
 0x6ff   :  { %v4656_v8 = vunpack.c.h.s8.bf16 %v3704_v61  ;;  %v4658_v10 = vunpack.c.h.s8.bf16 %v3706_v55 }
 0x701   :  { %5064 = vmatpush1.bf16.msra.mxu0 %v4591_v1  ;;  %5392 = vmatpush1.bf16.msra.mxu1 %v4593_v17  ;;  %v3703_v1 = vld [vmem:[#allocation2 + $0xd80] sm:$0xff]  ;;  %v3705_v17 = vld [vmem:[#allocation2 + $0xd90] sm:$0xff] }
 0x702   :  { %5065 = vmatprep.subr.bf16.mxu0 %v4600_v35  ;;  %5393 = vmatprep.subr.bf16.mxu1 %v4602_v5  ;;  %v4647_v35 = vunpack.c.l.s8.bf16 %v3703_v1  ;;  %v4649_v5 = vunpack.c.l.s8.bf16 %v3705_v17 }
 0x705   :  { %5066 = vmatpush1.bf16.msra.mxu0 %v4599_v13  ;;  %5394 = vmatpush1.bf16.msra.mxu1 %v4601_v44  ;;  %v3712_v13 = vld [vmem:[#allocation2 + $0xdc8] sm:$0xff]  ;;  %v3714_v44 = vld [vmem:[#allocation2 + $0xdd8] sm:$0xff] }
 0x706   :  { %5067 = vmatprep.subr.bf16.mxu0 %v4608_v42  ;;  %5395 = vmatprep.subr.bf16.mxu1 %v4610_v14  ;;  %v4655_v42 = vunpack.c.h.s8.bf16 %v3703_v1  ;;  %v4657_v14 = vunpack.c.h.s8.bf16 %v3705_v17  ;;  %v4664_v11 = vunpack.c.l.s8.bf16 %v3712_v13  ;;  %v4666_v12 = vunpack.c.l.s8.bf16 %v3714_v44 }
 0x707   :  { %v4672_v32 = vunpack.c.h.s8.bf16 %v3712_v13  ;;  %v4674_v33 = vunpack.c.h.s8.bf16 %v3714_v44 }
 0x709   :  { %5068 = vmatpush1.bf16.msra.mxu0 %v4607_v25  ;;  %5396 = vmatpush1.bf16.msra.mxu1 %v4609_v26  ;;  %v3711_v25 = vld [vmem:[#allocation2 + $0xdc0] sm:$0xff]  ;;  %v3713_v26 = vld [vmem:[#allocation2 + $0xdd0] sm:$0xff] }
 0x70a   :  { %5069 = vmatprep.subr.bf16.mxu0 %v4616_v31  ;;  %5397 = vmatprep.subr.bf16.mxu1 %v4618_v52  ;;  %v4663_v31 = vunpack.c.l.s8.bf16 %v3711_v25  ;;  %v4665_v52 = vunpack.c.l.s8.bf16 %v3713_v26 }
 0x70d   :  { %5070 = vmatpush1.bf16.msra.mxu0 %v4615_v50  ;;  %5398 = vmatpush1.bf16.msra.mxu1 %v4617_v16  ;;  %v3720_v50 = vld [vmem:[#allocation2 + $0xe08] sm:$0xff]  ;;  %v3722_v16 = vld [vmem:[#allocation2 + $0xe18] sm:$0xff] }
 0x70e   :  { %5071 = vmatprep.subr.bf16.mxu0 %v4624_v34  ;;  %5399 = vmatprep.subr.bf16.mxu1 %v4626_v36  ;;  %v4671_v34 = vunpack.c.h.s8.bf16 %v3711_v25  ;;  %v4673_v36 = vunpack.c.h.s8.bf16 %v3713_v26  ;;  %v4680_v37 = vunpack.c.l.s8.bf16 %v3720_v50  ;;  %v4682_v38 = vunpack.c.l.s8.bf16 %v3722_v16 }
 0x70f   :  { %v4688_v47 = vunpack.c.h.s8.bf16 %v3720_v50  ;;  %v4690_v48 = vunpack.c.h.s8.bf16 %v3722_v16 }
 0x711   :  { %5072 = vmatpush1.bf16.msra.mxu0 %v4623_v39  ;;  %5400 = vmatpush1.bf16.msra.mxu1 %v4625_v60  ;;  %v3719_v39 = vld [vmem:[#allocation2 + $0xe00] sm:$0xff]  ;;  %v3721_v60 = vld [vmem:[#allocation2 + $0xe10] sm:$0xff] }
 0x712   :  { %5073 = vmatprep.subr.bf16.mxu0 %v4632_v40  ;;  %5401 = vmatprep.subr.bf16.mxu1 %v4634_v41  ;;  %v4679_v40 = vunpack.c.l.s8.bf16 %v3719_v39  ;;  %v4681_v41 = vunpack.c.l.s8.bf16 %v3721_v60 }
 0x715   :  { %5074 = vmatpush1.bf16.msra.mxu0 %v4631_v49  ;;  %5402 = vmatpush1.bf16.msra.mxu1 %v4633_v4  ;;  %v3728_v49 = vld [vmem:[#allocation2 + $0xe48] sm:$0xff]  ;;  %v3730_v4 = vld [vmem:[#allocation2 + $0xe58] sm:$0xff] }
 0x716   :  { %5075 = vmatprep.subr.bf16.mxu0 %v4640_v30  ;;  %5403 = vmatprep.subr.bf16.mxu1 %v4642_v51  ;;  %v4687_v30 = vunpack.c.h.s8.bf16 %v3719_v39  ;;  %v4689_v51 = vunpack.c.h.s8.bf16 %v3721_v60  ;;  %v4696_v61 = vunpack.c.l.s8.bf16 %v3728_v49  ;;  %v4698_v55 = vunpack.c.l.s8.bf16 %v3730_v4 }
 0x717   :  { %v4704_v1 = vunpack.c.h.s8.bf16 %v3728_v49  ;;  %v4706_v17 = vunpack.c.h.s8.bf16 %v3730_v4 }
 0x719   :  { %5076 = vmatpush1.bf16.msra.mxu0 %v4639_v56  ;;  %5404 = vmatpush1.bf16.msra.mxu1 %v4641_v58  ;;  %v3727_v56 = vld [vmem:[#allocation2 + $0xe40] sm:$0xff]  ;;  %v3729_v58 = vld [vmem:[#allocation2 + $0xe50] sm:$0xff] }
 0x71a   :  { %5077 = vmatprep.subr.bf16.mxu0 %v4648_v59  ;;  %5405 = vmatprep.subr.bf16.mxu1 %v4650_v0  ;;  %v4695_v59 = vunpack.c.l.s8.bf16 %v3727_v56  ;;  %v4697_v0 = vunpack.c.l.s8.bf16 %v3729_v58 }
 0x71d   :  { %5078 = vmatpush1.bf16.msra.mxu0 %v4647_v35  ;;  %5406 = vmatpush1.bf16.msra.mxu1 %v4649_v5  ;;  %v3736_v35 = vld [vmem:[#allocation2 + $0xe88] sm:$0xff]  ;;  %v3738_v5 = vld [vmem:[#allocation2 + $0xe98] sm:$0xff] }
 0x71e   :  { %5079 = vmatprep.subr.bf16.mxu0 %v4656_v8  ;;  %5407 = vmatprep.subr.bf16.mxu1 %v4658_v10  ;;  %v4703_v8 = vunpack.c.h.s8.bf16 %v3727_v56  ;;  %v4705_v10 = vunpack.c.h.s8.bf16 %v3729_v58  ;;  %v4712_v13 = vunpack.c.l.s8.bf16 %v3736_v35  ;;  %v4714_v44 = vunpack.c.l.s8.bf16 %v3738_v5 }
 0x71f   :  { %v4720_v25 = vunpack.c.h.s8.bf16 %v3736_v35  ;;  %v4722_v26 = vunpack.c.h.s8.bf16 %v3738_v5 }
 0x721   :  { %5080 = vmatpush1.bf16.msra.mxu0 %v4655_v42  ;;  %5408 = vmatpush1.bf16.msra.mxu1 %v4657_v14  ;;  %v3735_v42 = vld [vmem:[#allocation2 + $0xe80] sm:$0xff]  ;;  %v3737_v14 = vld [vmem:[#allocation2 + $0xe90] sm:$0xff] }
 0x722   :  { %5081 = vmatprep.subr.bf16.mxu0 %v4664_v11  ;;  %5409 = vmatprep.subr.bf16.mxu1 %v4666_v12  ;;  %v4711_v11 = vunpack.c.l.s8.bf16 %v3735_v42  ;;  %v4713_v12 = vunpack.c.l.s8.bf16 %v3737_v14 }
 0x725   :  { %5082 = vmatpush1.bf16.msra.mxu0 %v4663_v31  ;;  %5410 = vmatpush1.bf16.msra.mxu1 %v4665_v52  ;;  %v3744_v31 = vld [vmem:[#allocation2 + $0xec8] sm:$0xff]  ;;  %v3746_v52 = vld [vmem:[#allocation2 + $0xed8] sm:$0xff] }
 0x726   :  { %5083 = vmatprep.subr.bf16.mxu0 %v4672_v32  ;;  %5411 = vmatprep.subr.bf16.mxu1 %v4674_v33  ;;  %v4719_v32 = vunpack.c.h.s8.bf16 %v3735_v42  ;;  %v4721_v33 = vunpack.c.h.s8.bf16 %v3737_v14  ;;  %v4728_v50 = vunpack.c.l.s8.bf16 %v3744_v31  ;;  %v4730_v16 = vunpack.c.l.s8.bf16 %v3746_v52 }
 0x727   :  { %v4736_v39 = vunpack.c.h.s8.bf16 %v3744_v31  ;;  %v4738_v60 = vunpack.c.h.s8.bf16 %v3746_v52 }
 0x729   :  { %5084 = vmatpush1.bf16.msra.mxu0 %v4671_v34  ;;  %5412 = vmatpush1.bf16.msra.mxu1 %v4673_v36  ;;  %v3743_v34 = vld [vmem:[#allocation2 + $0xec0] sm:$0xff]  ;;  %v3745_v36 = vld [vmem:[#allocation2 + $0xed0] sm:$0xff] }
 0x72a   :  { %5094 = vmatprep.subr.bf16.mxu0 %v4680_v37  ;;  %5422 = vmatprep.subr.bf16.mxu1 %v4682_v38  ;;  %v4727_v37 = vunpack.c.l.s8.bf16 %v3743_v34  ;;  %v4729_v38 = vunpack.c.l.s8.bf16 %v3745_v36 }
 0x72c   :  { %5086 = vmatmul.mubr.bf16.vlgmr.msra.gmra.mrb[16].mxu0 %v7730_v45  ;;  %5414 = vmatmul.mubr.bf16.vlgmr.msra.gmra.mrb[16].mxu1 %v7730_v45 }
 0x72d   :  { %5095 = vmatpush1.bf16.msra.mxu0 %v4679_v40  ;;  %5423 = vmatpush1.bf16.msra.mxu1 %v4681_v41  ;;  %v3752_v40 = vld [vmem:[#allocation2 + $0xf08] sm:$0xff]  ;;  %v3754_v41 = vld [vmem:[#allocation2 + $0xf18] sm:$0xff] }
 0x72e   :  { %5096 = vmatprep.subr.bf16.mxu0 %v4688_v47  ;;  %5424 = vmatprep.subr.bf16.mxu1 %v4690_v48  ;;  %v4735_v47 = vunpack.c.h.s8.bf16 %v3743_v34  ;;  %v4737_v48 = vunpack.c.h.s8.bf16 %v3745_v36  ;;  %v4744_v49 = vunpack.c.l.s8.bf16 %v3752_v40  ;;  %v4746_v4 = vunpack.c.l.s8.bf16 %v3754_v41 }
 0x72f   :  { %5126 = vmatprep.mubr.bf16.mxu0 %v7736_v46  ;;  %5454 = vmatprep.mubr.bf16.mxu1 %v7736_v46  ;;  %v4752_v56 = vunpack.c.h.s8.bf16 %v3752_v40  ;;  %v4754_v58 = vunpack.c.h.s8.bf16 %v3754_v41 }
 0x731   :  { %5097 = vmatpush1.bf16.msra.mxu0 %v4687_v30  ;;  %5425 = vmatpush1.bf16.msra.mxu1 %v4689_v51  ;;  %v3751_v30 = vld [vmem:[#allocation2 + $0xf00] sm:$0xff]  ;;  %v3753_v51 = vld [vmem:[#allocation2 + $0xf10] sm:$0xff] }
 0x732   :  { %5098 = vmatprep.subr.bf16.mxu0 %v4696_v61  ;;  %5426 = vmatprep.subr.bf16.mxu1 %v4698_v55  ;;  %v4743_v61 = vunpack.c.l.s8.bf16 %v3751_v30  ;;  %v4745_v55 = vunpack.c.l.s8.bf16 %v3753_v51 }
 0x735   :  { %5099 = vmatpush1.bf16.msra.mxu0 %v4695_v59  ;;  %5427 = vmatpush1.bf16.msra.mxu1 %v4697_v0  ;;  %v3760_v59 = vld [vmem:[#allocation2 + $0xf48] sm:$0xff]  ;;  %v3762_v0 = vld [vmem:[#allocation2 + $0xf58] sm:$0xff] }
 0x736   :  { %5100 = vmatprep.subr.bf16.mxu0 %v4704_v1  ;;  %5428 = vmatprep.subr.bf16.mxu1 %v4706_v17  ;;  %v4751_v1 = vunpack.c.h.s8.bf16 %v3751_v30  ;;  %v4753_v17 = vunpack.c.h.s8.bf16 %v3753_v51  ;;  %v4760_v35 = vunpack.c.l.s8.bf16 %v3760_v59  ;;  %v4762_v5 = vunpack.c.l.s8.bf16 %v3762_v0 }
 0x737   :  { %v4768_v42 = vunpack.c.h.s8.bf16 %v3760_v59  ;;  %v4770_v14 = vunpack.c.h.s8.bf16 %v3762_v0 }
 0x739   :  { %5101 = vmatpush1.bf16.msra.mxu0 %v4703_v8  ;;  %5429 = vmatpush1.bf16.msra.mxu1 %v4705_v10  ;;  %v3759_v8 = vld [vmem:[#allocation2 + $0xf40] sm:$0xff]  ;;  %v3761_v10 = vld [vmem:[#allocation2 + $0xf50] sm:$0xff] }
 0x73a   :  { %5102 = vmatprep.subr.bf16.mxu0 %v4712_v13  ;;  %5430 = vmatprep.subr.bf16.mxu1 %v4714_v44  ;;  %v4759_v13 = vunpack.c.l.s8.bf16 %v3759_v8  ;;  %v4761_v44 = vunpack.c.l.s8.bf16 %v3761_v10 }
 0x73d   :  { %5103 = vmatpush1.bf16.msra.mxu0 %v4711_v11  ;;  %5431 = vmatpush1.bf16.msra.mxu1 %v4713_v12  ;;  %v3768_v11 = vld [vmem:[#allocation2 + $0xf88] sm:$0xff]  ;;  %v3770_v12 = vld [vmem:[#allocation2 + $0xf98] sm:$0xff] }
 0x73e   :  { %5104 = vmatprep.subr.bf16.mxu0 %v4720_v25  ;;  %5432 = vmatprep.subr.bf16.mxu1 %v4722_v26  ;;  %v4767_v25 = vunpack.c.h.s8.bf16 %v3759_v8  ;;  %v4769_v26 = vunpack.c.h.s8.bf16 %v3761_v10  ;;  %v4776_v31 = vunpack.c.l.s8.bf16 %v3768_v11  ;;  %v4778_v52 = vunpack.c.l.s8.bf16 %v3770_v12 }
 0x73f   :  { %v4784_v34 = vunpack.c.h.s8.bf16 %v3768_v11  ;;  %v4786_v36 = vunpack.c.h.s8.bf16 %v3770_v12 }
 0x741   :  { %5105 = vmatpush1.bf16.msra.mxu0 %v4719_v32  ;;  %5433 = vmatpush1.bf16.msra.mxu1 %v4721_v33  ;;  %v3767_v32 = vld [vmem:[#allocation2 + $0xf80] sm:$0xff]  ;;  %v3769_v33 = vld [vmem:[#allocation2 + $0xf90] sm:$0xff] }
 0x742   :  { %5106 = vmatprep.subr.bf16.mxu0 %v4728_v50  ;;  %5434 = vmatprep.subr.bf16.mxu1 %v4730_v16  ;;  %v4775_v50 = vunpack.c.l.s8.bf16 %v3767_v32  ;;  %v4777_v16 = vunpack.c.l.s8.bf16 %v3769_v33 }
 0x745   :  { %5107 = vmatpush1.bf16.msra.mxu0 %v4727_v37  ;;  %5435 = vmatpush1.bf16.msra.mxu1 %v4729_v38  ;;  %v3776_v37 = vld [vmem:[#allocation2 + $0xfc8] sm:$0xff]  ;;  %v3778_v38 = vld [vmem:[#allocation2 + $0xfd8] sm:$0xff] }
 0x746   :  { %5108 = vmatprep.subr.bf16.mxu0 %v4736_v39  ;;  %5436 = vmatprep.subr.bf16.mxu1 %v4738_v60  ;;  %v4783_v39 = vunpack.c.h.s8.bf16 %v3767_v32  ;;  %v4785_v60 = vunpack.c.h.s8.bf16 %v3769_v33  ;;  %v4792_v40 = vunpack.c.l.s8.bf16 %v3776_v37  ;;  %v4794_v41 = vunpack.c.l.s8.bf16 %v3778_v38 }
 0x747   :  { %v4800_v30 = vunpack.c.h.s8.bf16 %v3776_v37  ;;  %v4802_v51 = vunpack.c.h.s8.bf16 %v3778_v38 }
 0x749   :  { %5109 = vmatpush1.bf16.msra.mxu0 %v4735_v47  ;;  %5437 = vmatpush1.bf16.msra.mxu1 %v4737_v48  ;;  %v3775_v47 = vld [vmem:[#allocation2 + $0xfc0] sm:$0xff]  ;;  %v3777_v48 = vld [vmem:[#allocation2 + $0xfd0] sm:$0xff] }
 0x74a   :  { %5110 = vmatprep.subr.bf16.mxu0 %v4744_v49  ;;  %5438 = vmatprep.subr.bf16.mxu1 %v4746_v4  ;;  %v4791_v49 = vunpack.c.l.s8.bf16 %v3775_v47  ;;  %v4793_v4 = vunpack.c.l.s8.bf16 %v3777_v48 }
 0x74d   :  { %5111 = vmatpush1.bf16.msra.mxu0 %v4743_v61  ;;  %5439 = vmatpush1.bf16.msra.mxu1 %v4745_v55  ;;  %v3276_v61 = vld [vmem:[#allocation2 + $0x28] sm:$0xff]  ;;  %v3278_v55 = vld [vmem:[#allocation2 + $0x38] sm:$0xff] }
 0x74e   :  { %5112 = vmatprep.subr.bf16.mxu0 %v4752_v56  ;;  %5440 = vmatprep.subr.bf16.mxu1 %v4754_v58  ;;  %v4799_v56 = vunpack.c.h.s8.bf16 %v3775_v47  ;;  %v4801_v58 = vunpack.c.h.s8.bf16 %v3777_v48  ;;  %v3788_v59 = vunpack.c.l.s8.bf16 %v3276_v61  ;;  %v3790_v0 = vunpack.c.l.s8.bf16 %v3278_v55  ;;  %v3300_v48 = vld [vmem:[#allocation2 + $0xe8] sm:$0xff] }
 0x74f   :  { %v3796_v8 = vunpack.c.h.s8.bf16 %v3276_v61  ;;  %v3798_v10 = vunpack.c.h.s8.bf16 %v3278_v55  ;;  %v3299_v55 = vld [vmem:[#allocation2 + $0xe0] sm:$0xff] }
 0x751   :  { %5113 = vmatpush1.bf16.msra.mxu0 %v4751_v1  ;;  %5441 = vmatpush1.bf16.msra.mxu1 %v4753_v17  ;;  %v3275_v1 = vld [vmem:[#allocation2 + $0x20] sm:$0xff]  ;;  %v3277_v17 = vld [vmem:[#allocation2 + $0x30] sm:$0xff] }
 0x752   :  { %5114 = vmatprep.subr.bf16.mxu0 %v4760_v35  ;;  %5442 = vmatprep.subr.bf16.mxu1 %v4762_v5  ;;  %v3787_v35 = vunpack.c.l.s8.bf16 %v3275_v1  ;;  %v3789_v5 = vunpack.c.l.s8.bf16 %v3277_v17 }
 0x755   :  { %5115 = vmatpush1.bf16.msra.mxu0 %v4759_v13  ;;  %5443 = vmatpush1.bf16.msra.mxu1 %v4761_v44  ;;  %v3284_v13 = vld [vmem:[#allocation2 + $0x68] sm:$0xff]  ;;  %v3286_v44 = vld [vmem:[#allocation2 + $0x78] sm:$0xff] }
 0x756   :  { %5116 = vmatprep.subr.bf16.mxu0 %v4768_v42  ;;  %5444 = vmatprep.subr.bf16.mxu1 %v4770_v14  ;;  %v3795_v42 = vunpack.c.h.s8.bf16 %v3275_v1  ;;  %v3797_v14 = vunpack.c.h.s8.bf16 %v3277_v17  ;;  %v3804_v11 = vunpack.c.l.s8.bf16 %v3284_v13  ;;  %v3806_v12 = vunpack.c.l.s8.bf16 %v3286_v44  ;;  %v3308_v17 = vld [vmem:[#allocation2 + $0x128] sm:$0xff] }
 0x757   :  { %v3812_v32 = vunpack.c.h.s8.bf16 %v3284_v13  ;;  %v3814_v33 = vunpack.c.h.s8.bf16 %v3286_v44  ;;  %v3307_v44 = vld [vmem:[#allocation2 + $0x120] sm:$0xff] }
 0x759   :  { %5117 = vmatpush1.bf16.msra.mxu0 %v4767_v25  ;;  %5445 = vmatpush1.bf16.msra.mxu1 %v4769_v26  ;;  %v3283_v25 = vld [vmem:[#allocation2 + $0x60] sm:$0xff]  ;;  %v3285_v26 = vld [vmem:[#allocation2 + $0x70] sm:$0xff] }
 0x75a   :  { %5118 = vmatprep.subr.bf16.mxu0 %v4776_v31  ;;  %5446 = vmatprep.subr.bf16.mxu1 %v4778_v52  ;;  %v3803_v31 = vunpack.c.l.s8.bf16 %v3283_v25  ;;  %v3805_v52 = vunpack.c.l.s8.bf16 %v3285_v26 }
 0x75d   :  { %5119 = vmatpush1.bf16.msra.mxu0 %v4775_v50  ;;  %5447 = vmatpush1.bf16.msra.mxu1 %v4777_v16  ;;  %v3292_v50 = vld [vmem:[#allocation2 + $0xa8] sm:$0xff]  ;;  %v3294_v16 = vld [vmem:[#allocation2 + $0xb8] sm:$0xff] }
 0x75e   :  { %5120 = vmatprep.subr.bf16.mxu0 %v4784_v34  ;;  %5448 = vmatprep.subr.bf16.mxu1 %v4786_v36  ;;  %v3811_v34 = vunpack.c.h.s8.bf16 %v3283_v25  ;;  %v3813_v36 = vunpack.c.h.s8.bf16 %v3285_v26  ;;  %v3820_v37 = vunpack.c.l.s8.bf16 %v3292_v50  ;;  %v3822_v38 = vunpack.c.l.s8.bf16 %v3294_v16  ;;  %v3316_v26 = vld [vmem:[#allocation2 + $0x168] sm:$0xff] }
 0x75f   :  { %v3830_v47 = vunpack.c.h.s8.bf16 %v3294_v16  ;;  %v3315_v16 = vld [vmem:[#allocation2 + $0x160] sm:$0xff] }
 0x761   :  { %5121 = vmatpush1.bf16.msra.mxu0 %v4783_v39  ;;  %5449 = vmatpush1.bf16.msra.mxu1 %v4785_v60  ;;  %v3291_v39 = vld [vmem:[#allocation2 + $0xa0] sm:$0xff] }
 0x762   :  { %5122 = vmatprep.subr.bf16.mxu0 %v4792_v40  ;;  %5450 = vmatprep.subr.bf16.mxu1 %v4794_v41  ;;  %v3819_v60 = vunpack.c.l.s8.bf16 %v3291_v39  ;;  %v3828_v41 = vunpack.c.h.s8.bf16 %v3292_v50 }
 0x765   :  { %5123 = vmatpush1.bf16.msra.mxu0 %v4791_v49  ;;  %5451 = vmatpush1.bf16.msra.mxu1 %v4793_v4  ;;  %v3302_v49 = vld [vmem:[#allocation2 + $0xf8] sm:$0xff]  ;;  %v3827_v4 = vunpack.c.h.s8.bf16 %v3291_v39 }
 0x766   :  { %5124 = vmatprep.subr.bf16.mxu0 %v4800_v30  ;;  %5452 = vmatprep.subr.bf16.mxu1 %v4802_v51  ;;  %v3836_v51 = vunpack.c.l.s8.bf16 %v3300_v48  ;;  %v3838_v61 = vunpack.c.l.s8.bf16 %v3302_v49  ;;  %v3846_v1 = vunpack.c.h.s8.bf16 %v3302_v49  ;;  %v3323_v49 = vld [vmem:[#allocation2 + $0x1a0] sm:$0xff] }
 0x769   :  { %5125 = vmatpush1.bf16.msra.mxu0 %v4799_v56  ;;  %5453 = vmatpush1.bf16.msra.mxu1 %v4801_v58  ;;  %v3301_v56 = vld [vmem:[#allocation2 + $0xf0] sm:$0xff]  ;;  %v3835_v58 = vunpack.c.l.s8.bf16 %v3299_v55 }
 0x76a   :  { %5463 = vmatprep.subr.bf16.mxu0 %v3788_v59  ;;  %5791 = vmatprep.subr.bf16.mxu1 %v3790_v0  ;;  %v3837_v59 = vunpack.c.l.s8.bf16 %v3301_v56  ;;  %v3844_v0 = vunpack.c.h.s8.bf16 %v3300_v48 }
 0x76c   :  { %5127 = vmatmul.mubr.bf16.vlgmr.msra.gmra.mrb[16].mxu0 %v7732_v54  ;;  %5455 = vmatmul.mubr.bf16.vlgmr.msra.gmra.mrb[16].mxu1 %v7732_v54 }
 0x76d   :  { %5464 = vmatpush1.bf16.msra.mxu0 %v3787_v35  ;;  %5792 = vmatpush1.bf16.msra.mxu1 %v3789_v5  ;;  %v3310_v35 = vld [vmem:[#allocation2 + $0x138] sm:$0xff]  ;;  %v3843_v5 = vunpack.c.h.s8.bf16 %v3299_v55 }
 0x76e   :  { %5465 = vmatprep.subr.bf16.mxu0 %v3796_v8  ;;  %5793 = vmatprep.subr.bf16.mxu1 %v3798_v10  ;;  %v3845_v8 = vunpack.c.h.s8.bf16 %v3301_v56  ;;  %v3852_v10 = vunpack.c.l.s8.bf16 %v3308_v17  ;;  %v3854_v13 = vunpack.c.l.s8.bf16 %v3310_v35  ;;  %v3862_v25 = vunpack.c.h.s8.bf16 %v3310_v35  ;;  %v3332_v56 = vld [vmem:[#allocation2 + $0x1e8] sm:$0xff]  ;;  %v3331_v35 = vld [vmem:[#allocation2 + $0x1e0] sm:$0xff] }
 0x76f   :  { %5495 = vmatprep.mubr.bf16.mxu0 %v7620_v27  ;;  %5823 = vmatprep.mubr.bf16.mxu1 %v7620_v27  ;;  %v3293_v27 = vld [vmem:[#allocation2 + $0xb0] sm:$0xff] }
 0x770   :  { %v3821_v40 = vunpack.c.l.s8.bf16 %v3293_v27  ;;  %v3829_v30 = vunpack.c.h.s8.bf16 %v3293_v27  ;;  %v3324_v27 = vld [vmem:[#allocation2 + $0x1a8] sm:$0xff] }
 0x771   :  { %5466 = vmatpush1.bf16.msra.mxu0 %v3795_v42  ;;  %5794 = vmatpush1.bf16.msra.mxu1 %v3797_v14  ;;  %v3309_v42 = vld [vmem:[#allocation2 + $0x130] sm:$0xff]  ;;  %v3851_v14 = vunpack.c.l.s8.bf16 %v3307_v44 }
 0x772   :  { %5467 = vmatprep.subr.bf16.mxu0 %v3804_v11  ;;  %5795 = vmatprep.subr.bf16.mxu1 %v3806_v12  ;;  %v3853_v11 = vunpack.c.l.s8.bf16 %v3309_v42  ;;  %v3860_v12 = vunpack.c.h.s8.bf16 %v3308_v17 }
 0x775   :  { %5468 = vmatpush1.bf16.msra.mxu0 %v3803_v31  ;;  %5796 = vmatpush1.bf16.msra.mxu1 %v3805_v52  ;;  %v3318_v31 = vld [vmem:[#allocation2 + $0x178] sm:$0xff]  ;;  %v3859_v52 = vunpack.c.h.s8.bf16 %v3307_v44 }
 0x776   :  { %5469 = vmatprep.subr.bf16.mxu0 %v3812_v32  ;;  %5797 = vmatprep.subr.bf16.mxu1 %v3814_v33  ;;  %v3861_v32 = vunpack.c.h.s8.bf16 %v3309_v42  ;;  %v3868_v33 = vunpack.c.l.s8.bf16 %v3316_v26  ;;  %v3870_v50 = vunpack.c.l.s8.bf16 %v3318_v31  ;;  %v3878_v39 = vunpack.c.h.s8.bf16 %v3318_v31  ;;  %v3340_v42 = vld [vmem:[#allocation2 + $0x228] sm:$0xff]  ;;  %v3339_v31 = vld [vmem:[#allocation2 + $0x220] sm:$0xff] }
 0x779   :  { %5470 = vmatpush1.bf16.msra.mxu0 %v3811_v34  ;;  %5798 = vmatpush1.bf16.msra.mxu1 %v3813_v36  ;;  %v3317_v34 = vld [vmem:[#allocation2 + $0x170] sm:$0xff]  ;;  %v3867_v36 = vunpack.c.l.s8.bf16 %v3315_v16 }
 0x77a   :  { %5471 = vmatprep.subr.bf16.mxu0 %v3820_v37  ;;  %5799 = vmatprep.subr.bf16.mxu1 %v3822_v38  ;;  %v3869_v37 = vunpack.c.l.s8.bf16 %v3317_v34  ;;  %v3876_v38 = vunpack.c.h.s8.bf16 %v3316_v26 }
 0x77d   :  { %5472 = vmatpush1.bf16.msra.mxu0 %v3819_v60  ;;  %5800 = vmatpush1.bf16.msra.mxu1 %v3821_v40  ;;  %v3326_v60 = vld [vmem:[#allocation2 + $0x1b8] sm:$0xff]  ;;  %v3875_v40 = vunpack.c.h.s8.bf16 %v3315_v16 }
 0x77e   :  { %5473 = vmatprep.subr.bf16.mxu0 %v3828_v41  ;;  %5801 = vmatprep.subr.bf16.mxu1 %v3830_v47  ;;  %v3877_v41 = vunpack.c.h.s8.bf16 %v3317_v34  ;;  %v3884_v47 = vunpack.c.l.s8.bf16 %v3324_v27  ;;  %v3886_v48 = vunpack.c.l.s8.bf16 %v3326_v60  ;;  %v3894_v55 = vunpack.c.h.s8.bf16 %v3326_v60  ;;  %v3348_v34 = vld [vmem:[#allocation2 + $0x268] sm:$0xff]  ;;  %v3347_v60 = vld [vmem:[#allocation2 + $0x260] sm:$0xff] }
 0x781   :  { %5474 = vmatpush1.bf16.msra.mxu0 %v3827_v4  ;;  %5802 = vmatpush1.bf16.msra.mxu1 %v3829_v30  ;;  %v3325_v4 = vld [vmem:[#allocation2 + $0x1b0] sm:$0xff]  ;;  %v3883_v30 = vunpack.c.l.s8.bf16 %v3323_v49 }
 0x782   :  { %5475 = vmatprep.subr.bf16.mxu0 %v3836_v51  ;;  %5803 = vmatprep.subr.bf16.mxu1 %v3838_v61  ;;  %v3885_v51 = vunpack.c.l.s8.bf16 %v3325_v4  ;;  %v3892_v61 = vunpack.c.h.s8.bf16 %v3324_v27 }
 0x785   :  { %5476 = vmatpush1.bf16.msra.mxu0 %v3835_v58  ;;  %5804 = vmatpush1.bf16.msra.mxu1 %v3837_v59  ;;  %v3334_v58 = vld [vmem:[#allocation2 + $0x1f8] sm:$0xff]  ;;  %v3891_v59 = vunpack.c.h.s8.bf16 %v3323_v49  ;;  %v3356_v49 = vld [vmem:[#allocation2 + $0x2a8] sm:$0xff] }
 0x786   :  { %5477 = vmatprep.subr.bf16.mxu0 %v3844_v0  ;;  %5805 = vmatprep.subr.bf16.mxu1 %v3846_v1  ;;  %v3893_v0 = vunpack.c.h.s8.bf16 %v3325_v4  ;;  %v3900_v1 = vunpack.c.l.s8.bf16 %v3332_v56  ;;  %v3902_v17 = vunpack.c.l.s8.bf16 %v3334_v58  ;;  %v3910_v44 = vunpack.c.h.s8.bf16 %v3334_v58  ;;  %v3358_v4 = vld [vmem:[#allocation2 + $0x2b8] sm:$0xff] }
 0x789   :  { %5478 = vmatpush1.bf16.msra.mxu0 %v3843_v5  ;;  %5806 = vmatpush1.bf16.msra.mxu1 %v3845_v8  ;;  %v3333_v5 = vld [vmem:[#allocation2 + $0x1f0] sm:$0xff]  ;;  %v3899_v8 = vunpack.c.l.s8.bf16 %v3331_v35 }
 0x78a   :  { %5479 = vmatprep.subr.bf16.mxu0 %v3852_v10  ;;  %5807 = vmatprep.subr.bf16.mxu1 %v3854_v13  ;;  %v3901_v10 = vunpack.c.l.s8.bf16 %v3333_v5  ;;  %v3908_v13 = vunpack.c.h.s8.bf16 %v3332_v56  ;;  %v3355_v56 = vld [vmem:[#allocation2 + $0x2a0] sm:$0xff] }
 0x78b   :  { %v3947_v58 = vunpack.c.l.s8.bf16 %v3355_v56 }
 0x78d   :  { %5480 = vmatpush1.bf16.msra.mxu0 %v3851_v14  ;;  %5808 = vmatpush1.bf16.msra.mxu1 %v3853_v11  ;;  %v3342_v14 = vld [vmem:[#allocation2 + $0x238] sm:$0xff]  ;;  %v3907_v11 = vunpack.c.h.s8.bf16 %v3331_v35 }
 0x78e   :  { %5481 = vmatprep.subr.bf16.mxu0 %v3860_v12  ;;  %5809 = vmatprep.subr.bf16.mxu1 %v3862_v25  ;;  %v3909_v12 = vunpack.c.h.s8.bf16 %v3333_v5  ;;  %v3916_v25 = vunpack.c.l.s8.bf16 %v3340_v42  ;;  %v3918_v26 = vunpack.c.l.s8.bf16 %v3342_v14  ;;  %v3926_v16 = vunpack.c.h.s8.bf16 %v3342_v14  ;;  %v3366_v35 = vld [vmem:[#allocation2 + $0x2f8] sm:$0xff] }
 0x78f   :  { %v3955_v5 = vunpack.c.h.s8.bf16 %v3355_v56  ;;  %v3390_v56 = vld [vmem:[#allocation2 + $0x3b8] sm:$0xff] }
 0x791   :  { %5482 = vmatpush1.bf16.msra.mxu0 %v3859_v52  ;;  %5810 = vmatpush1.bf16.msra.mxu1 %v3861_v32  ;;  %v3341_v52 = vld [vmem:[#allocation2 + $0x230] sm:$0xff]  ;;  %v3915_v32 = vunpack.c.l.s8.bf16 %v3339_v31 }
 0x792   :  { %5483 = vmatprep.subr.bf16.mxu0 %v3868_v33  ;;  %5811 = vmatprep.subr.bf16.mxu1 %v3870_v50  ;;  %v3917_v33 = vunpack.c.l.s8.bf16 %v3341_v52  ;;  %v3924_v50 = vunpack.c.h.s8.bf16 %v3340_v42  ;;  %v3365_v42 = vld [vmem:[#allocation2 + $0x2f0] sm:$0xff] }
 0x795   :  { %5484 = vmatpush1.bf16.msra.mxu0 %v3867_v36  ;;  %5812 = vmatpush1.bf16.msra.mxu1 %v3869_v37  ;;  %v3350_v36 = vld [vmem:[#allocation2 + $0x278] sm:$0xff]  ;;  %v3923_v37 = vunpack.c.h.s8.bf16 %v3339_v31 }
 0x796   :  { %5485 = vmatprep.subr.bf16.mxu0 %v3876_v38  ;;  %5813 = vmatprep.subr.bf16.mxu1 %v3878_v39  ;;  %v3925_v38 = vunpack.c.h.s8.bf16 %v3341_v52  ;;  %v3932_v39 = vunpack.c.l.s8.bf16 %v3348_v34  ;;  %v3934_v27 = vunpack.c.l.s8.bf16 %v3350_v36  ;;  %v3374_v31 = vld [vmem:[#allocation2 + $0x338] sm:$0xff] }
 0x799   :  { %5486 = vmatpush1.bf16.msra.mxu0 %v3875_v40  ;;  %5814 = vmatpush1.bf16.msra.mxu1 %v3877_v41  ;;  %v3349_v40 = vld [vmem:[#allocation2 + $0x270] sm:$0xff]  ;;  %v3931_v41 = vunpack.c.l.s8.bf16 %v3347_v60 }
 0x79a   :  { %5487 = vmatprep.subr.bf16.mxu0 %v3884_v47  ;;  %5815 = vmatprep.subr.bf16.mxu1 %v3886_v48  ;;  %v3933_v47 = vunpack.c.l.s8.bf16 %v3349_v40  ;;  %v3942_v48 = vunpack.c.h.s8.bf16 %v3350_v36 }
 0x79d   :  { %5488 = vmatpush1.bf16.msra.mxu0 %v3883_v30  ;;  %5816 = vmatpush1.bf16.msra.mxu1 %v3885_v51  ;;  %v3939_v30 = vunpack.c.h.s8.bf16 %v3347_v60  ;;  %v3941_v51 = vunpack.c.h.s8.bf16 %v3349_v40  ;;  %v3382_v60 = vld [vmem:[#allocation2 + $0x378] sm:$0xff] }
 0x79e   :  { %5489 = vmatprep.subr.bf16.mxu0 %v3892_v61  ;;  %5817 = vmatprep.subr.bf16.mxu1 %v3894_v55  ;;  %v3948_v61 = vunpack.c.l.s8.bf16 %v3356_v49  ;;  %v3950_v55 = vunpack.c.l.s8.bf16 %v3358_v4 }
 0x7a1   :  { %5490 = vmatpush1.bf16.msra.mxu0 %v3891_v59  ;;  %5818 = vmatpush1.bf16.msra.mxu1 %v3893_v0  ;;  %v3956_v0 = vunpack.c.h.s8.bf16 %v3356_v49  ;;  %v3381_v49 = vld [vmem:[#allocation2 + $0x370] sm:$0xff] }
 0x7a2   :  { %5491 = vmatprep.subr.bf16.mxu0 %v3900_v1  ;;  %5819 = vmatprep.subr.bf16.mxu1 %v3902_v17  ;;  %v3958_v1 = vunpack.c.h.s8.bf16 %v3358_v4  ;;  %v3364_v17 = vld [vmem:[#allocation2 + $0x2e8] sm:$0xff] }
 0x7a5   :  { %5492 = vmatpush1.bf16.msra.mxu0 %v3899_v8  ;;  %5820 = vmatpush1.bf16.msra.mxu1 %v3901_v10  ;;  %v3964_v10 = vunpack.c.l.s8.bf16 %v3364_v17 }
 0x7a6   :  { %5493 = vmatprep.subr.bf16.mxu0 %v3908_v13  ;;  %5821 = vmatprep.subr.bf16.mxu1 %v3910_v44  ;;  %v3966_v13 = vunpack.c.l.s8.bf16 %v3366_v35  ;;  %v3363_v44 = vld [vmem:[#allocation2 + $0x2e0] sm:$0xff] }
 0x7a7   :  { %v3963_v14 = vunpack.c.l.s8.bf16 %v3363_v44  ;;  %v3971_v52 = vunpack.c.h.s8.bf16 %v3363_v44  ;;  %v3398_v44 = vld [vmem:[#allocation2 + $0x3f8] sm:$0xff] }
 0x7a9   :  { %5494 = vmatpush1.bf16.msra.mxu0 %v3907_v11  ;;  %5822 = vmatpush1.bf16.msra.mxu1 %v3909_v12  ;;  %v3965_v11 = vunpack.c.l.s8.bf16 %v3365_v42  ;;  %v3972_v12 = vunpack.c.h.s8.bf16 %v3364_v17  ;;  %v3389_v17 = vld [vmem:[#allocation2 + $0x3b0] sm:$0xff] }
 0x7aa   :  { %5504 = vmatprep.subr.bf16.mxu0 %v3916_v25  ;;  %5832 = vmatprep.subr.bf16.mxu1 %v3918_v26  ;;  %v3974_v25 = vunpack.c.h.s8.bf16 %v3366_v35  ;;  %v3372_v26 = vld [vmem:[#allocation2 + $0x328] sm:$0xff] }
 0x7ac   :  { %5496 = vmatmul.mubr.bf16.vlgmr.msra.gmra.mrb[20].mxu0 %v7616_v15  ;;  %5824 = vmatmul.mubr.bf16.vlgmr.msra.gmra.mrb[20].mxu1 %v7616_v15  ;;  %v3940_v15 = vunpack.c.h.s8.bf16 %v3348_v34  ;;  %v3373_v34 = vld [vmem:[#allocation2 + $0x330] sm:$0xff] }
 0x7ad   :  { %5505 = vmatpush1.bf16.msra.mxu0 %v3915_v32  ;;  %5833 = vmatpush1.bf16.msra.mxu1 %v3917_v33  ;;  %v3973_v32 = vunpack.c.h.s8.bf16 %v3365_v42  ;;  %v3980_v33 = vunpack.c.l.s8.bf16 %v3372_v26 }
 0x7ae   :  { %5506 = vmatprep.subr.bf16.mxu0 %v3924_v50  ;;  %5834 = vmatprep.subr.bf16.mxu1 %v3926_v16  ;;  %v3982_v50 = vunpack.c.l.s8.bf16 %v3374_v31  ;;  %v3371_v16 = vld [vmem:[#allocation2 + $0x320] sm:$0xff] }
 0x7af   :  { %5536 = vmatprep.mubr.bf16.mxu0 %v7622_v28  ;;  %5864 = vmatprep.mubr.bf16.mxu1 %v7622_v28  ;;  %v3357_v28 = vld [vmem:[#allocation2 + $0x2b0] sm:$0xff]  ;;  %v3979_v36 = vunpack.c.l.s8.bf16 %v3371_v16  ;;  %v3987_v40 = vunpack.c.h.s8.bf16 %v3371_v16  ;;  %v3406_v16 = vld [vmem:[#allocation2 + $0x438] sm:$0xff] }
 0x7b0   :  { %v3949_v59 = vunpack.c.l.s8.bf16 %v3357_v28  ;;  %v3957_v8 = vunpack.c.h.s8.bf16 %v3357_v28 }
 0x7b1   :  { %5507 = vmatpush1.bf16.msra.mxu0 %v3923_v37  ;;  %5835 = vmatpush1.bf16.msra.mxu1 %v3925_v38  ;;  %v3981_v37 = vunpack.c.l.s8.bf16 %v3373_v34  ;;  %v3988_v38 = vunpack.c.h.s8.bf16 %v3372_v26  ;;  %v3397_v26 = vld [vmem:[#allocation2 + $0x3f0] sm:$0xff] }
 0x7b2   :  { %5508 = vmatprep.subr.bf16.mxu0 %v3932_v39  ;;  %5836 = vmatprep.subr.bf16.mxu1 %v3934_v27  ;;  %v3990_v39 = vunpack.c.h.s8.bf16 %v3374_v31  ;;  %v3380_v27 = vld [vmem:[#allocation2 + $0x368] sm:$0xff] }
 0x7b5   :  { %5509 = vmatpush1.bf16.msra.mxu0 %v3931_v41  ;;  %5837 = vmatpush1.bf16.msra.mxu1 %v3933_v47  ;;  %v3989_v41 = vunpack.c.h.s8.bf16 %v3373_v34  ;;  %v3996_v47 = vunpack.c.l.s8.bf16 %v3380_v27 }
 0x7b6   :  { %5510 = vmatprep.subr.bf16.mxu0 %v3940_v15  ;;  %5838 = vmatprep.subr.bf16.mxu1 %v3942_v48  ;;  %v3998_v15 = vunpack.c.l.s8.bf16 %v3382_v60  ;;  %v3379_v48 = vld [vmem:[#allocation2 + $0x360] sm:$0xff] }
 0x7b7   :  { %v3995_v4 = vunpack.c.l.s8.bf16 %v3379_v48  ;;  %v4003_v28 = vunpack.c.h.s8.bf16 %v3379_v48  ;;  %v3414_v48 = vld [vmem:[#allocation2 + $0x478] sm:$0xff] }
 0x7b9   :  { %5511 = vmatpush1.bf16.msra.mxu0 %v3939_v30  ;;  %5839 = vmatpush1.bf16.msra.mxu1 %v3941_v51  ;;  %v3997_v30 = vunpack.c.l.s8.bf16 %v3381_v49  ;;  %v4004_v51 = vunpack.c.h.s8.bf16 %v3380_v27  ;;  %v3405_v27 = vld [vmem:[#allocation2 + $0x430] sm:$0xff] }
 0x7ba   :  { %5512 = vmatprep.subr.bf16.mxu0 %v3948_v61  ;;  %5840 = vmatprep.subr.bf16.mxu1 %v3950_v55  ;;  %v4006_v61 = vunpack.c.h.s8.bf16 %v3382_v60  ;;  %v3388_v55 = vld [vmem:[#allocation2 + $0x3a8] sm:$0xff] }
 0x7bd   :  { %5513 = vmatpush1.bf16.msra.mxu0 %v3947_v58  ;;  %5841 = vmatpush1.bf16.msra.mxu1 %v3949_v59  ;;  %v4005_v58 = vunpack.c.h.s8.bf16 %v3381_v49  ;;  %v4012_v59 = vunpack.c.l.s8.bf16 %v3388_v55 }
 0x7be   :  { %5514 = vmatprep.subr.bf16.mxu0 %v3956_v0  ;;  %5842 = vmatprep.subr.bf16.mxu1 %v3958_v1  ;;  %v4014_v0 = vunpack.c.l.s8.bf16 %v3390_v56  ;;  %v3387_v1 = vld [vmem:[#allocation2 + $0x3a0] sm:$0xff] }
 0x7bf   :  { %v4011_v35 = vunpack.c.l.s8.bf16 %v3387_v1  ;;  %v4019_v42 = vunpack.c.h.s8.bf16 %v3387_v1 }
 0x7c1   :  { %5515 = vmatpush1.bf16.msra.mxu0 %v3955_v5  ;;  %5843 = vmatpush1.bf16.msra.mxu1 %v3957_v8  ;;  %v4013_v5 = vunpack.c.l.s8.bf16 %v3389_v17  ;;  %v4020_v8 = vunpack.c.h.s8.bf16 %v3388_v55  ;;  %v3413_v55 = vld [vmem:[#allocation2 + $0x470] sm:$0xff] }
 0x7c2   :  { %5516 = vmatprep.subr.bf16.mxu0 %v3964_v10  ;;  %5844 = vmatprep.subr.bf16.mxu1 %v3966_v13  ;;  %v4022_v10 = vunpack.c.h.s8.bf16 %v3390_v56  ;;  %v3396_v13 = vld [vmem:[#allocation2 + $0x3e8] sm:$0xff] }
 0x7c5   :  { %5517 = vmatpush1.bf16.msra.mxu0 %v3963_v14  ;;  %5845 = vmatpush1.bf16.msra.mxu1 %v3965_v11  ;;  %v4021_v14 = vunpack.c.h.s8.bf16 %v3389_v17  ;;  %v4028_v11 = vunpack.c.l.s8.bf16 %v3396_v13  ;;  %v4069_v17 = vunpack.c.h.s8.bf16 %v3413_v55 }
 0x7c6   :  { %5518 = vmatprep.subr.bf16.mxu0 %v3972_v12  ;;  %5846 = vmatprep.subr.bf16.mxu1 %v3974_v25  ;;  %v4030_v12 = vunpack.c.l.s8.bf16 %v3398_v44  ;;  %v3395_v25 = vld [vmem:[#allocation2 + $0x3e0] sm:$0xff] }
 0x7c7   :  { %v4027_v31 = vunpack.c.l.s8.bf16 %v3395_v25  ;;  %v4035_v34 = vunpack.c.h.s8.bf16 %v3395_v25 }
 0x7c9   :  { %5519 = vmatpush1.bf16.msra.mxu0 %v3971_v52  ;;  %5847 = vmatpush1.bf16.msra.mxu1 %v3973_v32  ;;  %v4029_v52 = vunpack.c.l.s8.bf16 %v3397_v26  ;;  %v4036_v32 = vunpack.c.h.s8.bf16 %v3396_v13 }
 0x7ca   :  { %5520 = vmatprep.subr.bf16.mxu0 %v3980_v33  ;;  %5848 = vmatprep.subr.bf16.mxu1 %v3982_v50  ;;  %v4038_v33 = vunpack.c.h.s8.bf16 %v3398_v44  ;;  %v3404_v50 = vld [vmem:[#allocation2 + $0x428] sm:$0xff] }
 0x7cd   :  { %5521 = vmatpush1.bf16.msra.mxu0 %v3979_v36  ;;  %5849 = vmatpush1.bf16.msra.mxu1 %v3981_v37  ;;  %v4037_v36 = vunpack.c.h.s8.bf16 %v3397_v26  ;;  %v4044_v37 = vunpack.c.l.s8.bf16 %v3404_v50 }
 0x7ce   :  { %5522 = vmatprep.subr.bf16.mxu0 %v3988_v38  ;;  %5850 = vmatprep.subr.bf16.mxu1 %v3990_v39  ;;  %v4046_v38 = vunpack.c.l.s8.bf16 %v3406_v16  ;;  %v3403_v39 = vld [vmem:[#allocation2 + $0x420] sm:$0xff] }
 0x7cf   :  { %v4043_v60 = vunpack.c.l.s8.bf16 %v3403_v39  ;;  %v4051_v49 = vunpack.c.h.s8.bf16 %v3403_v39 }
 0x7d1   :  { %5523 = vmatpush1.bf16.msra.mxu0 %v3987_v40  ;;  %5851 = vmatpush1.bf16.msra.mxu1 %v3989_v41  ;;  %v4045_v40 = vunpack.c.l.s8.bf16 %v3405_v27  ;;  %v4052_v41 = vunpack.c.h.s8.bf16 %v3404_v50 }
 0x7d2   :  { %5524 = vmatprep.subr.bf16.mxu0 %v3996_v47  ;;  %5852 = vmatprep.subr.bf16.mxu1 %v3998_v15  ;;  %v4054_v47 = vunpack.c.h.s8.bf16 %v3406_v16  ;;  %v3412_v15 = vld [vmem:[#allocation2 + $0x468] sm:$0xff] }
 0x7d5   :  { %5525 = vmatpush1.bf16.msra.mxu0 %v3995_v4  ;;  %5853 = vmatpush1.bf16.msra.mxu1 %v3997_v30  ;;  %v4053_v4 = vunpack.c.h.s8.bf16 %v3405_v27  ;;  %v4060_v30 = vunpack.c.l.s8.bf16 %v3412_v15 }
 0x7d6   :  { %5526 = vmatprep.subr.bf16.mxu0 %v4004_v51  ;;  %5854 = vmatprep.subr.bf16.mxu1 %v4006_v61  ;;  %v4062_v51 = vunpack.c.l.s8.bf16 %v3414_v48  ;;  %v3411_v61 = vld [vmem:[#allocation2 + $0x460] sm:$0xff] }
 0x7d7   :  { %v4059_v56 = vunpack.c.l.s8.bf16 %v3411_v61  ;;  %v4067_v1 = vunpack.c.h.s8.bf16 %v3411_v61 }
 0x7d9   :  { %5527 = vmatpush1.bf16.msra.mxu0 %v4003_v28  ;;  %5855 = vmatpush1.bf16.msra.mxu1 %v4005_v58  ;;  %v4061_v28 = vunpack.c.l.s8.bf16 %v3413_v55  ;;  %v4070_v58 = vunpack.c.h.s8.bf16 %v3414_v48 }
 0x7da   :  { %5528 = vmatprep.subr.bf16.mxu0 %v4012_v59  ;;  %5856 = vmatprep.subr.bf16.mxu1 %v4014_v0  ;;  %v3420_v59 = vld [vmem:[#allocation2 + $0x4a8] sm:$0xff]  ;;  %v3422_v0 = vld [vmem:[#allocation2 + $0x4b8] sm:$0xff] }
 0x7db   :  { %v4084_v44 = vunpack.c.h.s8.bf16 %v3420_v59 }
 0x7dd   :  { %5529 = vmatpush1.bf16.msra.mxu0 %v4011_v35  ;;  %5857 = vmatpush1.bf16.msra.mxu1 %v4013_v5  ;;  %v4076_v35 = vunpack.c.l.s8.bf16 %v3420_v59  ;;  %v4078_v5 = vunpack.c.l.s8.bf16 %v3422_v0 }
 0x7de   :  { %5530 = vmatprep.subr.bf16.mxu0 %v4020_v8  ;;  %5858 = vmatprep.subr.bf16.mxu1 %v4022_v10  ;;  %v3419_v8 = vld [vmem:[#allocation2 + $0x4a0] sm:$0xff] }
 0x7df   :  { %v4075_v10 = vunpack.c.l.s8.bf16 %v3419_v8 }
 0x7e1   :  { %5531 = vmatpush1.bf16.msra.mxu0 %v4019_v42  ;;  %5859 = vmatpush1.bf16.msra.mxu1 %v4021_v14  ;;  %v4086_v42 = vunpack.c.h.s8.bf16 %v3422_v0  ;;  %v3428_v14 = vld [vmem:[#allocation2 + $0x4e8] sm:$0xff] }
 0x7e2   :  { %5532 = vmatprep.subr.bf16.mxu0 %v4028_v11  ;;  %5860 = vmatprep.subr.bf16.mxu1 %v4030_v12  ;;  %v3430_v11 = vld [vmem:[#allocation2 + $0x4f8] sm:$0xff]  ;;  %v4083_v12 = vunpack.c.h.s8.bf16 %v3419_v8  ;;  %v4092_v26 = vunpack.c.l.s8.bf16 %v3428_v14  ;;  %v4100_v16 = vunpack.c.h.s8.bf16 %v3428_v14 }
 0x7e5   :  { %5533 = vmatpush1.bf16.msra.mxu0 %v4027_v31  ;;  %5861 = vmatpush1.bf16.msra.mxu1 %v4029_v52  ;;  %v4094_v31 = vunpack.c.l.s8.bf16 %v3430_v11  ;;  %v3427_v52 = vld [vmem:[#allocation2 + $0x4e0] sm:$0xff] }
 0x7e6   :  { %5534 = vmatprep.subr.bf16.mxu0 %v4036_v32  ;;  %5862 = vmatprep.subr.bf16.mxu1 %v4038_v33  ;;  %v3429_v32 = vld [vmem:[#allocation2 + $0x4f0] sm:$0xff]  ;;  %v4091_v33 = vunpack.c.l.s8.bf16 %v3427_v52 }
 0x7e7   :  { %v4093_v50 = vunpack.c.l.s8.bf16 %v3429_v32  ;;  %v4101_v39 = vunpack.c.h.s8.bf16 %v3429_v32 }
 0x7e9   :  { %5535 = vmatpush1.bf16.msra.mxu0 %v4035_v34  ;;  %5863 = vmatpush1.bf16.msra.mxu1 %v4037_v36  ;;  %v4102_v34 = vunpack.c.h.s8.bf16 %v3430_v11  ;;  %v3436_v36 = vld [vmem:[#allocation2 + $0x528] sm:$0xff] }
 0x7ea   :  { %5545 = vmatprep.subr.bf16.mxu0 %v4044_v37  ;;  %5873 = vmatprep.subr.bf16.mxu1 %v4046_v38  ;;  %v3438_v37 = vld [vmem:[#allocation2 + $0x538] sm:$0xff]  ;;  %v4099_v38 = vunpack.c.h.s8.bf16 %v3427_v52  ;;  %v4108_v27 = vunpack.c.l.s8.bf16 %v3436_v36  ;;  %v4116_v48 = vunpack.c.h.s8.bf16 %v3436_v36 }
 0x7ec   :  { %5537 = vmatmul.mubr.bf16.vlgmr.msra.gmra.mrb[20].mxu0 %v7618_v20  ;;  %5865 = vmatmul.mubr.bf16.vlgmr.msra.gmra.mrb[20].mxu1 %v7618_v20  ;;  %v4068_v20 = vunpack.c.h.s8.bf16 %v3412_v15 }
 0x7ed   :  { %5546 = vmatpush1.bf16.msra.mxu0 %v4043_v60  ;;  %5874 = vmatpush1.bf16.msra.mxu1 %v4045_v40  ;;  %v4110_v60 = vunpack.c.l.s8.bf16 %v3438_v37  ;;  %v3435_v40 = vld [vmem:[#allocation2 + $0x520] sm:$0xff] }
 0x7ee   :  { %5547 = vmatprep.subr.bf16.mxu0 %v4052_v41  ;;  %5875 = vmatprep.subr.bf16.mxu1 %v4054_v47  ;;  %v3437_v41 = vld [vmem:[#allocation2 + $0x530] sm:$0xff]  ;;  %v4107_v47 = vunpack.c.l.s8.bf16 %v3435_v40 }
 0x7ef   :  { %5577 = vmatprep.mubr.bf16.mxu0 %v7664_v9  ;;  %5905 = vmatprep.mubr.bf16.mxu1 %v7664_v9  ;;  %v3421_v9 = vld [vmem:[#allocation2 + $0x4b0] sm:$0xff]  ;;  %v4109_v15 = vunpack.c.l.s8.bf16 %v3437_v41  ;;  %v4117_v61 = vunpack.c.h.s8.bf16 %v3437_v41 }
 0x7f0   :  { %v4077_v13 = vunpack.c.l.s8.bf16 %v3421_v9  ;;  %v4085_v25 = vunpack.c.h.s8.bf16 %v3421_v9 }
 0x7f1   :  { %5548 = vmatpush1.bf16.msra.mxu0 %v4051_v49  ;;  %5876 = vmatpush1.bf16.msra.mxu1 %v4053_v4  ;;  %v4118_v49 = vunpack.c.h.s8.bf16 %v3438_v37  ;;  %v3444_v4 = vld [vmem:[#allocation2 + $0x568] sm:$0xff] }
 0x7f2   :  { %5549 = vmatprep.subr.bf16.mxu0 %v4060_v30  ;;  %5877 = vmatprep.subr.bf16.mxu1 %v4062_v51  ;;  %v3446_v30 = vld [vmem:[#allocation2 + $0x578] sm:$0xff]  ;;  %v4115_v51 = vunpack.c.h.s8.bf16 %v3435_v40  ;;  %v4124_v55 = vunpack.c.l.s8.bf16 %v3444_v4  ;;  %v4132_v0 = vunpack.c.h.s8.bf16 %v3444_v4 }
 0x7f5   :  { %5550 = vmatpush1.bf16.msra.mxu0 %v4059_v56  ;;  %5878 = vmatpush1.bf16.msra.mxu1 %v4061_v28  ;;  %v4126_v56 = vunpack.c.l.s8.bf16 %v3446_v30  ;;  %v3443_v28 = vld [vmem:[#allocation2 + $0x560] sm:$0xff] }
 0x7f6   :  { %5551 = vmatprep.subr.bf16.mxu0 %v4068_v20  ;;  %5879 = vmatprep.subr.bf16.mxu1 %v4070_v58  ;;  %v3445_v20 = vld [vmem:[#allocation2 + $0x570] sm:$0xff]  ;;  %v4123_v58 = vunpack.c.l.s8.bf16 %v3443_v28 }
 0x7f7   :  { %v4125_v59 = vunpack.c.l.s8.bf16 %v3445_v20  ;;  %v4133_v8 = vunpack.c.h.s8.bf16 %v3445_v20 }
 0x7f9   :  { %5552 = vmatpush1.bf16.msra.mxu0 %v4067_v1  ;;  %5880 = vmatpush1.bf16.msra.mxu1 %v4069_v17  ;;  %v4134_v1 = vunpack.c.h.s8.bf16 %v3446_v30  ;;  %v3452_v17 = vld [vmem:[#allocation2 + $0x5a8] sm:$0xff] }
 0x7fa   :  { %5553 = vmatprep.subr.bf16.mxu0 %v4076_v35  ;;  %5881 = vmatprep.subr.bf16.mxu1 %v4078_v5  ;;  %v3454_v35 = vld [vmem:[#allocation2 + $0x5b8] sm:$0xff]  ;;  %v4131_v5 = vunpack.c.h.s8.bf16 %v3443_v28  ;;  %v4140_v9 = vunpack.c.l.s8.bf16 %v3452_v17  ;;  %v4148_v11 = vunpack.c.h.s8.bf16 %v3452_v17 }
 0x7fd   :  { %5554 = vmatpush1.bf16.msra.mxu0 %v4075_v10  ;;  %5882 = vmatpush1.bf16.msra.mxu1 %v4077_v13  ;;  %v4142_v10 = vunpack.c.l.s8.bf16 %v3454_v35  ;;  %v3451_v13 = vld [vmem:[#allocation2 + $0x5a0] sm:$0xff] }
 0x7fe   :  { %5555 = vmatprep.subr.bf16.mxu0 %v4084_v44  ;;  %5883 = vmatprep.subr.bf16.mxu1 %v4086_v42  ;;  %v3453_v44 = vld [vmem:[#allocation2 + $0x5b0] sm:$0xff]  ;;  %v4139_v42 = vunpack.c.l.s8.bf16 %v3451_v13 }
 0x7ff   :  { %v4141_v14 = vunpack.c.l.s8.bf16 %v3453_v44  ;;  %v4149_v52 = vunpack.c.h.s8.bf16 %v3453_v44 }
 0x801   :  { %5556 = vmatpush1.bf16.msra.mxu0 %v4083_v12  ;;  %5884 = vmatpush1.bf16.msra.mxu1 %v4085_v25  ;;  %v4150_v12 = vunpack.c.h.s8.bf16 %v3454_v35  ;;  %v3460_v25 = vld [vmem:[#allocation2 + $0x5e8] sm:$0xff] }
 0x802   :  { %5557 = vmatprep.subr.bf16.mxu0 %v4092_v26  ;;  %5885 = vmatprep.subr.bf16.mxu1 %v4094_v31  ;;  %v3462_v26 = vld [vmem:[#allocation2 + $0x5f8] sm:$0xff]  ;;  %v4147_v31 = vunpack.c.h.s8.bf16 %v3451_v13  ;;  %v4156_v32 = vunpack.c.l.s8.bf16 %v3460_v25  ;;  %v4164_v37 = vunpack.c.h.s8.bf16 %v3460_v25 }
 0x805   :  { %5558 = vmatpush1.bf16.msra.mxu0 %v4091_v33  ;;  %5886 = vmatpush1.bf16.msra.mxu1 %v4093_v50  ;;  %v4158_v33 = vunpack.c.l.s8.bf16 %v3462_v26  ;;  %v3459_v50 = vld [vmem:[#allocation2 + $0x5e0] sm:$0xff] }
 0x806   :  { %5559 = vmatprep.subr.bf16.mxu0 %v4100_v16  ;;  %5887 = vmatprep.subr.bf16.mxu1 %v4102_v34  ;;  %v3461_v16 = vld [vmem:[#allocation2 + $0x5f0] sm:$0xff]  ;;  %v4155_v34 = vunpack.c.l.s8.bf16 %v3459_v50 }
 0x807   :  { %v4157_v36 = vunpack.c.l.s8.bf16 %v3461_v16  ;;  %v4165_v40 = vunpack.c.h.s8.bf16 %v3461_v16 }
 0x809   :  { %5560 = vmatpush1.bf16.msra.mxu0 %v4099_v38  ;;  %5888 = vmatpush1.bf16.msra.mxu1 %v4101_v39  ;;  %v4166_v38 = vunpack.c.h.s8.bf16 %v3462_v26  ;;  %v3468_v39 = vld [vmem:[#allocation2 + $0x628] sm:$0xff] }
 0x80a   :  { %5561 = vmatprep.subr.bf16.mxu0 %v4108_v27  ;;  %5889 = vmatprep.subr.bf16.mxu1 %v4110_v60  ;;  %v3470_v27 = vld [vmem:[#allocation2 + $0x638] sm:$0xff]  ;;  %v4163_v60 = vunpack.c.h.s8.bf16 %v3459_v50  ;;  %v4172_v41 = vunpack.c.l.s8.bf16 %v3468_v39  ;;  %v4180_v30 = vunpack.c.h.s8.bf16 %v3468_v39 }
 0x80d   :  { %5562 = vmatpush1.bf16.msra.mxu0 %v4107_v47  ;;  %5890 = vmatpush1.bf16.msra.mxu1 %v4109_v15  ;;  %v4174_v47 = vunpack.c.l.s8.bf16 %v3470_v27  ;;  %v3467_v15 = vld [vmem:[#allocation2 + $0x620] sm:$0xff] }
 0x80e   :  { %5563 = vmatprep.subr.bf16.mxu0 %v4116_v48  ;;  %5891 = vmatprep.subr.bf16.mxu1 %v4118_v49  ;;  %v3469_v48 = vld [vmem:[#allocation2 + $0x630] sm:$0xff]  ;;  %v4171_v49 = vunpack.c.l.s8.bf16 %v3467_v15 }
 0x80f   :  { %v4173_v4 = vunpack.c.l.s8.bf16 %v3469_v48  ;;  %v4181_v28 = vunpack.c.h.s8.bf16 %v3469_v48 }
 0x811   :  { %5564 = vmatpush1.bf16.msra.mxu0 %v4115_v51  ;;  %5892 = vmatpush1.bf16.msra.mxu1 %v4117_v61  ;;  %v4182_v51 = vunpack.c.h.s8.bf16 %v3470_v27  ;;  %v3476_v61 = vld [vmem:[#allocation2 + $0x668] sm:$0xff] }
 0x812   :  { %5565 = vmatprep.subr.bf16.mxu0 %v4124_v55  ;;  %5893 = vmatprep.subr.bf16.mxu1 %v4126_v56  ;;  %v3478_v55 = vld [vmem:[#allocation2 + $0x678] sm:$0xff]  ;;  %v4179_v56 = vunpack.c.h.s8.bf16 %v3467_v15  ;;  %v4188_v20 = vunpack.c.l.s8.bf16 %v3476_v61 }
 0x813   :  { %v4198_v35 = vunpack.c.h.s8.bf16 %v3478_v55 }
 0x815   :  { %5566 = vmatpush1.bf16.msra.mxu0 %v4123_v58  ;;  %5894 = vmatpush1.bf16.msra.mxu1 %v4125_v59  ;;  %v4190_v58 = vunpack.c.l.s8.bf16 %v3478_v55  ;;  %v3475_v59 = vld [vmem:[#allocation2 + $0x660] sm:$0xff] }
 0x816   :  { %5567 = vmatprep.subr.bf16.mxu0 %v4132_v0  ;;  %5895 = vmatprep.subr.bf16.mxu1 %v4134_v1  ;;  %v3477_v0 = vld [vmem:[#allocation2 + $0x670] sm:$0xff]  ;;  %v4187_v1 = vunpack.c.l.s8.bf16 %v3475_v59 }
 0x817   :  { %v4189_v17 = vunpack.c.l.s8.bf16 %v3477_v0 }
 0x819   :  { %5568 = vmatpush1.bf16.msra.mxu0 %v4131_v5  ;;  %5896 = vmatpush1.bf16.msra.mxu1 %v4133_v8  ;;  %v3484_v5 = vld [vmem:[#allocation2 + $0x6a8] sm:$0xff]  ;;  %v3486_v8 = vld [vmem:[#allocation2 + $0x6b8] sm:$0xff] }
 0x81a   :  { %5569 = vmatprep.subr.bf16.mxu0 %v4140_v9  ;;  %5897 = vmatprep.subr.bf16.mxu1 %v4142_v10  ;;  %v4195_v9 = vunpack.c.h.s8.bf16 %v3475_v59  ;;  %v4197_v10 = vunpack.c.h.s8.bf16 %v3477_v0  ;;  %v4204_v13 = vunpack.c.l.s8.bf16 %v3484_v5  ;;  %v4206_v44 = vunpack.c.l.s8.bf16 %v3486_v8 }
 0x81b   :  { %v4212_v25 = vunpack.c.h.s8.bf16 %v3484_v5  ;;  %v4214_v26 = vunpack.c.h.s8.bf16 %v3486_v8 }
 0x81d   :  { %5570 = vmatpush1.bf16.msra.mxu0 %v4139_v42  ;;  %5898 = vmatpush1.bf16.msra.mxu1 %v4141_v14  ;;  %v3483_v42 = vld [vmem:[#allocation2 + $0x6a0] sm:$0xff] }
 0x81e   :  { %5571 = vmatprep.subr.bf16.mxu0 %v4148_v11  ;;  %5899 = vmatprep.subr.bf16.mxu1 %v4150_v12  ;;  %v4203_v14 = vunpack.c.l.s8.bf16 %v3483_v42  ;;  %v6119_v12 = vld [vmem:[#allocation11] sm:$0xff] }
 0x81f   :  { %v6132_v50 = vrot.slane %v6119_v12, %v7600_v19  ;;  %v6128_v16 = vrot.slane %v6119_v12, %v7603_v23 }
 0x821   :  { %5572 = vmatpush1.bf16.msra.mxu0 %v4147_v31  ;;  %5900 = vmatpush1.bf16.msra.mxu1 %v4149_v52  ;;  %v6169_v31 = vld [vmem:[#allocation13] sm:$0xff] }
 0x822   :  { %5573 = vmatprep.subr.bf16.mxu0 %v4156_v32  ;;  %5901 = vmatprep.subr.bf16.mxu1 %v4158_v33  ;;  %v3492_v52 = vld [vmem:[#allocation2 + $0x6e8] sm:$0xff]  ;;  %v3494_v32 = vld [vmem:[#allocation2 + $0x6f8] sm:$0xff]  ;;  %v6124_v33 = vrot.slane %v6119_v12, %v7597_v18  ;;  %v6182_v39 = vrot.slane %v6169_v31, %v7600_v19  ;;  %v6178_v48 = vrot.slane %v6169_v31, %v7603_v23 }
 0x823   :  { %v4220_v27 = vunpack.c.l.s8.bf16 %v3492_v52  ;;  %v4230_v5 = vunpack.c.h.s8.bf16 %v3494_v32 }
 0x825   :  { %5574 = vmatpush1.bf16.msra.mxu0 %v4155_v34  ;;  %5902 = vmatpush1.bf16.msra.mxu1 %v4157_v36  ;;  %v6136_v34 = vrot.slane %v6119_v12, %v7606_v43  ;;  %v4211_v36 = vunpack.c.h.s8.bf16 %v3483_v42 }
 0x826   :  { %5575 = vmatprep.subr.bf16.mxu0 %v4164_v37  ;;  %5903 = vmatprep.subr.bf16.mxu1 %v4166_v38  ;;  %v6174_v38 = vrot.slane %v6169_v31, %v7597_v18 }
 0x829   :  { %5576 = vmatpush1.bf16.msra.mxu0 %v4163_v60  ;;  %5904 = vmatpush1.bf16.msra.mxu1 %v4165_v40  ;;  %v4222_v60 = vunpack.c.l.s8.bf16 %v3494_v32  ;;  %v3491_v40 = vld [vmem:[#allocation2 + $0x6e0] sm:$0xff] }
 0x82a   :  { %5586 = vmatprep.subr.bf16.mxu0 %v4172_v41  ;;  %5914 = vmatprep.subr.bf16.mxu1 %v4174_v47  ;;  %v3493_v41 = vld [vmem:[#allocation2 + $0x6f0] sm:$0xff]  ;;  %v3499_v32 = vld [vmem:[#allocation2 + $0x720] sm:$0xff] }
 0x82b   :  { %v4221_v59 = vunpack.c.l.s8.bf16 %v3493_v41  ;;  %v4229_v12 = vunpack.c.h.s8.bf16 %v3493_v41 }
 0x82c   :  { %5578 = vmatmul.mubr.bf16.vlgmr.msra.gmra.mrb[20].mxu0 %v7660_v21  ;;  %5906 = vmatmul.mubr.bf16.vlgmr.msra.gmra.mrb[20].mxu1 %v7660_v21  ;;  %v4196_v21 = vunpack.c.h.s8.bf16 %v3476_v61 }
 0x82d   :  { %5587 = vmatpush1.bf16.msra.mxu0 %v4171_v49  ;;  %5915 = vmatpush1.bf16.msra.mxu1 %v4173_v4  ;;  %v6186_v49 = vrot.slane %v6169_v31, %v7606_v43 }
 0x82e   :  { %5588 = vmatprep.subr.bf16.mxu0 %v4180_v30  ;;  %5916 = vmatprep.subr.bf16.mxu1 %v4182_v51 }
 0x82f   :  { %5618 = vmatprep.mubr.bf16.mxu0 %v7666_v29  ;;  %5946 = vmatprep.mubr.bf16.mxu1 %v7666_v29  ;;  %v3485_v29 = vld [vmem:[#allocation2 + $0x6b0] sm:$0xff] }
 0x830   :  { %v4205_v11 = vunpack.c.l.s8.bf16 %v3485_v29  ;;  %v4213_v37 = vunpack.c.h.s8.bf16 %v3485_v29 }
 0x831   :  { %5589 = vmatpush1.bf16.msra.mxu0 %v4179_v56  ;;  %5917 = vmatpush1.bf16.msra.mxu1 %v4181_v28 }
 0x832   :  { %5590 = vmatprep.subr.bf16.mxu0 %v4188_v20  ;;  %5918 = vmatprep.subr.bf16.mxu1 %v4190_v58  ;;  %v4219_v58 = vunpack.c.l.s8.bf16 %v3491_v40 }
 0x835   :  { %5591 = vmatpush1.bf16.msra.mxu0 %v4187_v1  ;;  %5919 = vmatpush1.bf16.msra.mxu1 %v4189_v17 }
 0x836   :  { %5592 = vmatprep.subr.bf16.mxu0 %v4196_v21  ;;  %5920 = vmatprep.subr.bf16.mxu1 %v4198_v35  ;;  %v4228_v35 = vunpack.c.h.s8.bf16 %v3492_v52 }
 0x839   :  { %5593 = vmatpush1.bf16.msra.mxu0 %v4195_v9  ;;  %5921 = vmatpush1.bf16.msra.mxu1 %v4197_v10  ;;  %v3500_v10 = vld [vmem:[#allocation2 + $0x728] sm:$0xff] }
 0x83a   :  { %5594 = vmatprep.subr.bf16.mxu0 %v4204_v13  ;;  %5922 = vmatprep.subr.bf16.mxu1 %v4206_v44  ;;  %v3502_v13 = vld [vmem:[#allocation2 + $0x738] sm:$0xff]  ;;  %v4236_v31 = vunpack.c.l.s8.bf16 %v3500_v10 }
 0x83b   :  { %v4238_v52 = vunpack.c.l.s8.bf16 %v3502_v13 }
 0x83d   :  { %5595 = vmatpush1.bf16.msra.mxu0 %v4203_v14  ;;  %5923 = vmatpush1.bf16.msra.mxu1 %v4205_v11  ;;  %v4227_v11 = vunpack.c.h.s8.bf16 %v3491_v40 }
 0x83e   :  { %5596 = vmatprep.subr.bf16.mxu0 %v4212_v25  ;;  %5924 = vmatprep.subr.bf16.mxu1 %v4214_v26 }
 0x83f   :  { %v5128_v47 = vpop.f32.mrb[16].mxu0  ;;  %v5456_v15 = vpop.f32.mrb[16].mxu1 }
 0x840   :  { %v6161_v4 = vmul.f32 %v6124_v33, %v5128_v47  ;;  %v6163_v30 = vmul.f32 %v6132_v50, %v5456_v15  ;;  %v5130_v51 = vpop.f32.mrb[17].mxu0  ;;  %v5458_v61 = vpop.f32.mrb[17].mxu1  ;;  %v3501_v33 = vld [vmem:[#allocation2 + $0x730] sm:$0xff]  ;;  %v3507_v15 = vld [vmem:[#allocation2 + $0x760] sm:$0xff] }
 0x841   :  { %v6162_v55 = vmul.f32 %v6128_v16, %v5130_v51  ;;  %v6164_v56 = vmul.f32 %v6136_v34, %v5458_v61  ;;  %v5132_v28 = vpop.f32.mrb[18].mxu0  ;;  %v5460_v20 = vpop.f32.mrb[18].mxu1  ;;  %5597 = vmatpush1.bf16.msra.mxu0 %v4211_v36  ;;  %5925 = vmatpush1.bf16.msra.mxu1 %v4213_v37  ;;  %v4235_v34 = vunpack.c.l.s8.bf16 %v3499_v32  ;;  %v4237_v36 = vunpack.c.l.s8.bf16 %v3501_v33  ;;  %v3516_v61 = vld [vmem:[#allocation2 + $0x7a8] sm:$0xff] }
 0x842   :  { %v6211_v0 = vadd.f32 %v6174_v38, %v6161_v4  ;;  %v6213_v1 = vadd.f32 %v6182_v39, %v6163_v30  ;;  %v5133_v17 = vpop.f32.mrb[19].mxu0  ;;  %v5461_v21 = vpop.f32.mrb[19].mxu1  ;;  %5598 = vmatprep.subr.bf16.mxu0 %v4220_v27  ;;  %5926 = vmatprep.subr.bf16.mxu1 %v4222_v60  ;;  %v4244_v37 = vunpack.c.h.s8.bf16 %v3500_v10  ;;  %v4246_v38 = vunpack.c.h.s8.bf16 %v3502_v13  ;;  %v3508_v39 = vld [vmem:[#allocation2 + $0x768] sm:$0xff]  ;;  %v3510_v27 = vld [vmem:[#allocation2 + $0x778] sm:$0xff] }
 0x843   :  { %v6212_v8 = vadd.f32 %v6178_v48, %v6162_v55  ;;  %v6214_v9 = vadd.f32 %v6186_v49, %v6164_v56  ;;  %v4243_v60 = vunpack.c.h.s8.bf16 %v3499_v32  ;;  %v4245_v40 = vunpack.c.h.s8.bf16 %v3501_v33  ;;  %v3509_v48 = vld [vmem:[#allocation2 + $0x770] sm:$0xff]  ;;  %v3518_v55 = vld [vmem:[#allocation2 + $0x7b8] sm:$0xff] }
 0x844   :  { %v6219_v44 = vmax.f32 %v6211_v0, 0.0  ;;  %v6221_v42 = vmax.f32 %v6213_v1, 0.0  ;;  %v4252_v41 = vunpack.c.l.s8.bf16 %v3508_v39  ;;  %v4254_v47 = vunpack.c.l.s8.bf16 %v3510_v27  ;;  %v3517_v0 = vld [vmem:[#allocation2 + $0x7b0] sm:$0xff]  ;;  %v3534_v32 = vld [vmem:[#allocation2 + $0x838] sm:$0xff] }
 0x845   :  { %v6220_v29 = vmax.f32 %v6212_v8, 0.0  ;;  %v6222_v14 = vmax.f32 %v6214_v9, 0.0  ;;  %5599 = vmatpush1.bf16.msra.mxu0 %v4219_v58  ;;  %5927 = vmatpush1.bf16.msra.mxu1 %v4221_v59  ;;  %v4251_v49 = vunpack.c.l.s8.bf16 %v3507_v15  ;;  %v4253_v4 = vunpack.c.l.s8.bf16 %v3509_v48  ;;  %v3515_v59 = vld [vmem:[#allocation2 + $0x7a0] sm:$0xff]  ;;  %v3526_v8 = vld [vmem:[#allocation2 + $0x7f8] sm:$0xff] }
 0x846   :  { %v7792_v25 = vpack.c.bf16 %v6219_v44, %v6219_v44  ;;  %v7794_v26 = vpack.c.bf16 %v6221_v42, %v6221_v42  ;;  %5600 = vmatprep.subr.bf16.mxu0 %v4228_v35  ;;  %5928 = vmatprep.subr.bf16.mxu1 %v4230_v5  ;;  %v4260_v30 = vunpack.c.h.s8.bf16 %v3508_v39  ;;  %v4262_v51 = vunpack.c.h.s8.bf16 %v3510_v27  ;;  %v3524_v5 = vld [vmem:[#allocation2 + $0x7e8] sm:$0xff]  ;;  %v3523_v42 = vld [vmem:[#allocation2 + $0x7e0] sm:$0xff]  ;;  %v3533_v39 = vld [vmem:[#allocation2 + $0x830] sm:$0xff] }
 0x847   :  { %v7796_v50 = vpack.c.bf16 %v6220_v29, %v6220_v29  ;;  %v7798_v16 = vpack.c.bf16 %v6222_v14, %v6222_v14  ;;  %v4259_v56 = vunpack.c.h.s8.bf16 %v3507_v15  ;;  %v4261_v28 = vunpack.c.h.s8.bf16 %v3509_v48  ;;  %v3525_v29 = vld [vmem:[#allocation2 + $0x7f0] sm:$0xff]  ;;  %v3542_v15 = vld [vmem:[#allocation2 + $0x878] sm:$0xff] }
 0x848   :  { %v4268_v20 = vunpack.c.l.s8.bf16 %v3516_v61  ;;  %v4270_v58 = vunpack.c.l.s8.bf16 %v3518_v55  ;;  %v4267_v1 = vunpack.c.l.s8.bf16 %v3515_v59  ;;  %v4269_v17 = vunpack.c.l.s8.bf16 %v3517_v0 }
 0x849   :  { %5601 = vmatpush1.bf16.msra.mxu0 %v4227_v11  ;;  %5929 = vmatpush1.bf16.msra.mxu1 %v4229_v12  ;;  %v4276_v21 = vunpack.c.h.s8.bf16 %v3516_v61  ;;  %v4278_v35 = vunpack.c.h.s8.bf16 %v3518_v55  ;;  %v4275_v9 = vunpack.c.h.s8.bf16 %v3515_v59  ;;  %v4277_v10 = vunpack.c.h.s8.bf16 %v3517_v0  ;;  %v3541_v61 = vld [vmem:[#allocation2 + $0x870] sm:$0xff] }
 0x84a   :  { %5602 = vmatprep.subr.bf16.mxu0 %v4236_v31  ;;  %5930 = vmatprep.subr.bf16.mxu1 %v4238_v52  ;;  %v4284_v13 = vunpack.c.l.s8.bf16 %v3524_v5  ;;  %v4286_v44 = vunpack.c.l.s8.bf16 %v3526_v8  ;;  %v4283_v14 = vunpack.c.l.s8.bf16 %v3523_v42  ;;  %v4285_v11 = vunpack.c.l.s8.bf16 %v3525_v29  ;;  %v3532_v52 = vld [vmem:[#allocation2 + $0x828] sm:$0xff] }
 0x84b   :  { %v4292_v12 = vunpack.c.h.s8.bf16 %v3524_v5  ;;  %v4294_v31 = vunpack.c.h.s8.bf16 %v3526_v8  ;;  %v4291_v33 = vunpack.c.h.s8.bf16 %v3523_v42  ;;  %v4325_v0 = vunpack.c.h.s8.bf16 %v3541_v61 }
 0x84d   :  { %5603 = vmatpush1.bf16.msra.mxu0 %v4235_v34  ;;  %5931 = vmatpush1.bf16.msra.mxu1 %v4237_v36  ;;  %v4293_v34 = vunpack.c.h.s8.bf16 %v3525_v29  ;;  %v4300_v36 = vunpack.c.l.s8.bf16 %v3532_v52 }
 0x84e   :  { %5604 = vmatprep.subr.bf16.mxu0 %v4244_v37  ;;  %5932 = vmatprep.subr.bf16.mxu1 %v4246_v38  ;;  %v4302_v37 = vunpack.c.l.s8.bf16 %v3534_v32  ;;  %v3531_v38 = vld [vmem:[#allocation2 + $0x820] sm:$0xff] }
 0x84f   :  { %v4299_v27 = vunpack.c.l.s8.bf16 %v3531_v38  ;;  %v4307_v48 = vunpack.c.h.s8.bf16 %v3531_v38 }
 0x851   :  { %5605 = vmatpush1.bf16.msra.mxu0 %v4243_v60  ;;  %5933 = vmatpush1.bf16.msra.mxu1 %v4245_v40  ;;  %v4301_v60 = vunpack.c.l.s8.bf16 %v3533_v39  ;;  %v4308_v40 = vunpack.c.h.s8.bf16 %v3532_v52 }
 0x852   :  { %5606 = vmatprep.subr.bf16.mxu0 %v4252_v41  ;;  %5934 = vmatprep.subr.bf16.mxu1 %v4254_v47  ;;  %v4310_v41 = vunpack.c.h.s8.bf16 %v3534_v32  ;;  %v3540_v47 = vld [vmem:[#allocation2 + $0x868] sm:$0xff] }
 0x855   :  { %5607 = vmatpush1.bf16.msra.mxu0 %v4251_v49  ;;  %5935 = vmatpush1.bf16.msra.mxu1 %v4253_v4  ;;  %v4309_v49 = vunpack.c.h.s8.bf16 %v3533_v39  ;;  %v4316_v4 = vunpack.c.l.s8.bf16 %v3540_v47 }
 0x856   :  { %5608 = vmatprep.subr.bf16.mxu0 %v4260_v30  ;;  %5936 = vmatprep.subr.bf16.mxu1 %v4262_v51  ;;  %v4318_v30 = vunpack.c.l.s8.bf16 %v3542_v15  ;;  %v3539_v51 = vld [vmem:[#allocation2 + $0x860] sm:$0xff] }
 0x857   :  { %v4315_v55 = vunpack.c.l.s8.bf16 %v3539_v51  ;;  %v4323_v59 = vunpack.c.h.s8.bf16 %v3539_v51 }
 0x859   :  { %5609 = vmatpush1.bf16.msra.mxu0 %v4259_v56  ;;  %5937 = vmatpush1.bf16.msra.mxu1 %v4261_v28  ;;  %v4317_v56 = vunpack.c.l.s8.bf16 %v3541_v61  ;;  %v4326_v28 = vunpack.c.h.s8.bf16 %v3542_v15 }
 0x85a   :  { %5610 = vmatprep.subr.bf16.mxu0 %v4268_v20  ;;  %5938 = vmatprep.subr.bf16.mxu1 %v4270_v58  ;;  %v3548_v20 = vld [vmem:[#allocation2 + $0x8a8] sm:$0xff]  ;;  %v3550_v58 = vld [vmem:[#allocation2 + $0x8b8] sm:$0xff] }
 0x85b   :  { %v4340_v8 = vunpack.c.h.s8.bf16 %v3548_v20 }
 0x85d   :  { %5611 = vmatpush1.bf16.msra.mxu0 %v4267_v1  ;;  %5939 = vmatpush1.bf16.msra.mxu1 %v4269_v17  ;;  %v4332_v1 = vunpack.c.l.s8.bf16 %v3548_v20  ;;  %v4334_v17 = vunpack.c.l.s8.bf16 %v3550_v58 }
 0x85e   :  { %5612 = vmatprep.subr.bf16.mxu0 %v4276_v21  ;;  %5940 = vmatprep.subr.bf16.mxu1 %v4278_v35  ;;  %v3547_v21 = vld [vmem:[#allocation2 + $0x8a0] sm:$0xff] }
 0x85f   :  { %v4331_v35 = vunpack.c.l.s8.bf16 %v3547_v21 }
 0x861   :  { %5613 = vmatpush1.bf16.msra.mxu0 %v4275_v9  ;;  %5941 = vmatpush1.bf16.msra.mxu1 %v4277_v10  ;;  %v4342_v9 = vunpack.c.h.s8.bf16 %v3550_v58  ;;  %v3556_v10 = vld [vmem:[#allocation2 + $0x8e8] sm:$0xff] }
 0x862   :  { %5614 = vmatprep.subr.bf16.mxu0 %v4284_v13  ;;  %5942 = vmatprep.subr.bf16.mxu1 %v4286_v44  ;;  %v3558_v13 = vld [vmem:[#allocation2 + $0x8f8] sm:$0xff]  ;;  %v4339_v44 = vunpack.c.h.s8.bf16 %v3547_v21  ;;  %v4348_v29 = vunpack.c.l.s8.bf16 %v3556_v10  ;;  %v4356_v32 = vunpack.c.h.s8.bf16 %v3556_v10 }
 0x865   :  { %5615 = vmatpush1.bf16.msra.mxu0 %v4283_v14  ;;  %5943 = vmatpush1.bf16.msra.mxu1 %v4285_v11  ;;  %v4350_v14 = vunpack.c.l.s8.bf16 %v3558_v13  ;;  %v3555_v11 = vld [vmem:[#allocation2 + $0x8e0] sm:$0xff] }
 0x866   :  { %5616 = vmatprep.subr.bf16.mxu0 %v4292_v12  ;;  %5944 = vmatprep.subr.bf16.mxu1 %v4294_v31  ;;  %v3557_v12 = vld [vmem:[#allocation2 + $0x8f0] sm:$0xff]  ;;  %v4347_v31 = vunpack.c.l.s8.bf16 %v3555_v11 }
 0x867   :  { %v4349_v52 = vunpack.c.l.s8.bf16 %v3557_v12  ;;  %v4357_v38 = vunpack.c.h.s8.bf16 %v3557_v12 }
 0x869   :  { %5617 = vmatpush1.bf16.msra.mxu0 %v4291_v33  ;;  %5945 = vmatpush1.bf16.msra.mxu1 %v4293_v34  ;;  %v4358_v33 = vunpack.c.h.s8.bf16 %v3558_v13  ;;  %v3564_v34 = vld [vmem:[#allocation2 + $0x928] sm:$0xff] }
 0x86a   :  { %5627 = vmatprep.subr.bf16.mxu0 %v4300_v36  ;;  %5955 = vmatprep.subr.bf16.mxu1 %v4302_v37  ;;  %v3566_v36 = vld [vmem:[#allocation2 + $0x938] sm:$0xff]  ;;  %v4355_v37 = vunpack.c.h.s8.bf16 %v3555_v11  ;;  %v4364_v39 = vunpack.c.l.s8.bf16 %v3564_v34  ;;  %v4372_v15 = vunpack.c.h.s8.bf16 %v3564_v34 }
 0x86c   :  { %5619 = vmatmul.mubr.bf16.vlgmr.msra.gmra.mrb[20].mxu0 %v7662_v22  ;;  %5947 = vmatmul.mubr.bf16.vlgmr.msra.gmra.mrb[20].mxu1 %v7662_v22  ;;  %v4324_v22 = vunpack.c.h.s8.bf16 %v3540_v47 }
 0x86d   :  { %5628 = vmatpush1.bf16.msra.mxu0 %v4299_v27  ;;  %5956 = vmatpush1.bf16.msra.mxu1 %v4301_v60  ;;  %v4366_v27 = vunpack.c.l.s8.bf16 %v3566_v36  ;;  %v3563_v60 = vld [vmem:[#allocation2 + $0x920] sm:$0xff] }
 0x86e   :  { %5629 = vmatprep.subr.bf16.mxu0 %v4308_v40  ;;  %5957 = vmatprep.subr.bf16.mxu1 %v4310_v41  ;;  %v3565_v40 = vld [vmem:[#allocation2 + $0x930] sm:$0xff]  ;;  %v4363_v41 = vunpack.c.l.s8.bf16 %v3563_v60 }
 0x86f   :  { %5659 = vmatprep.mubr.bf16.mxu0 %v7708_v62  ;;  %5987 = vmatprep.mubr.bf16.mxu1 %v7708_v62  ;;  %v3549_v62 = vld [vmem:[#allocation2 + $0x8b0] sm:$0xff]  ;;  %v4365_v47 = vunpack.c.l.s8.bf16 %v3565_v40  ;;  %v4373_v51 = vunpack.c.h.s8.bf16 %v3565_v40 }
 0x870   :  { %v4333_v5 = vunpack.c.l.s8.bf16 %v3549_v62  ;;  %v4341_v42 = vunpack.c.h.s8.bf16 %v3549_v62 }
 0x871   :  { %5630 = vmatpush1.bf16.msra.mxu0 %v4307_v48  ;;  %5958 = vmatpush1.bf16.msra.mxu1 %v4309_v49  ;;  %v4374_v48 = vunpack.c.h.s8.bf16 %v3566_v36  ;;  %v3572_v49 = vld [vmem:[#allocation2 + $0x968] sm:$0xff] }
 0x872   :  { %5631 = vmatprep.subr.bf16.mxu0 %v4316_v4  ;;  %5959 = vmatprep.subr.bf16.mxu1 %v4318_v30  ;;  %v3574_v4 = vld [vmem:[#allocation2 + $0x978] sm:$0xff]  ;;  %v4371_v30 = vunpack.c.h.s8.bf16 %v3563_v60  ;;  %v4380_v61 = vunpack.c.l.s8.bf16 %v3572_v49  ;;  %v4388_v58 = vunpack.c.h.s8.bf16 %v3572_v49 }
 0x875   :  { %5632 = vmatpush1.bf16.msra.mxu0 %v4315_v55  ;;  %5960 = vmatpush1.bf16.msra.mxu1 %v4317_v56  ;;  %v4382_v55 = vunpack.c.l.s8.bf16 %v3574_v4  ;;  %v3571_v56 = vld [vmem:[#allocation2 + $0x960] sm:$0xff] }
 0x876   :  { %5633 = vmatprep.subr.bf16.mxu0 %v4324_v22  ;;  %5961 = vmatprep.subr.bf16.mxu1 %v4326_v28  ;;  %v3573_v22 = vld [vmem:[#allocation2 + $0x970] sm:$0xff]  ;;  %v4379_v28 = vunpack.c.l.s8.bf16 %v3571_v56 }
 0x877   :  { %v4381_v20 = vunpack.c.l.s8.bf16 %v3573_v22  ;;  %v4389_v21 = vunpack.c.h.s8.bf16 %v3573_v22 }
 0x879   :  { %5634 = vmatpush1.bf16.msra.mxu0 %v4323_v59  ;;  %5962 = vmatpush1.bf16.msra.mxu1 %v4325_v0  ;;  %v4390_v59 = vunpack.c.h.s8.bf16 %v3574_v4  ;;  %v3580_v0 = vld [vmem:[#allocation2 + $0x9a8] sm:$0xff] }
 0x87a   :  { %5635 = vmatprep.subr.bf16.mxu0 %v4332_v1  ;;  %5963 = vmatprep.subr.bf16.mxu1 %v4334_v17  ;;  %v3582_v1 = vld [vmem:[#allocation2 + $0x9b8] sm:$0xff]  ;;  %v4387_v17 = vunpack.c.h.s8.bf16 %v3571_v56  ;;  %v4396_v62 = vunpack.c.l.s8.bf16 %v3580_v0  ;;  %v4404_v13 = vunpack.c.h.s8.bf16 %v3580_v0 }
 0x87d   :  { %5636 = vmatpush1.bf16.msra.mxu0 %v4331_v35  ;;  %5964 = vmatpush1.bf16.msra.mxu1 %v4333_v5  ;;  %v4398_v35 = vunpack.c.l.s8.bf16 %v3582_v1  ;;  %v3579_v5 = vld [vmem:[#allocation2 + $0x9a0] sm:$0xff] }
 0x87e   :  { %5637 = vmatprep.subr.bf16.mxu0 %v4340_v8  ;;  %5965 = vmatprep.subr.bf16.mxu1 %v4342_v9  ;;  %v3581_v8 = vld [vmem:[#allocation2 + $0x9b0] sm:$0xff]  ;;  %v4395_v9 = vunpack.c.l.s8.bf16 %v3579_v5 }
 0x87f   :  { %v4397_v10 = vunpack.c.l.s8.bf16 %v3581_v8  ;;  %v4405_v11 = vunpack.c.h.s8.bf16 %v3581_v8 }
 0x881   :  { %5638 = vmatpush1.bf16.msra.mxu0 %v4339_v44  ;;  %5966 = vmatpush1.bf16.msra.mxu1 %v4341_v42  ;;  %v4406_v44 = vunpack.c.h.s8.bf16 %v3582_v1  ;;  %v3588_v42 = vld [vmem:[#allocation2 + $0x9e8] sm:$0xff] }
 0x882   :  { %5639 = vmatprep.subr.bf16.mxu0 %v4348_v29  ;;  %5967 = vmatprep.subr.bf16.mxu1 %v4350_v14  ;;  %v3590_v29 = vld [vmem:[#allocation2 + $0x9f8] sm:$0xff]  ;;  %v4403_v14 = vunpack.c.h.s8.bf16 %v3579_v5  ;;  %v4412_v12 = vunpack.c.l.s8.bf16 %v3588_v42  ;;  %v4420_v36 = vunpack.c.h.s8.bf16 %v3588_v42 }
 0x885   :  { %5640 = vmatpush1.bf16.msra.mxu0 %v4347_v31  ;;  %5968 = vmatpush1.bf16.msra.mxu1 %v4349_v52  ;;  %v4414_v31 = vunpack.c.l.s8.bf16 %v3590_v29  ;;  %v3587_v52 = vld [vmem:[#allocation2 + $0x9e0] sm:$0xff] }
 0x886   :  { %5641 = vmatprep.subr.bf16.mxu0 %v4356_v32  ;;  %5969 = vmatprep.subr.bf16.mxu1 %v4358_v33  ;;  %v3589_v32 = vld [vmem:[#allocation2 + $0x9f0] sm:$0xff]  ;;  %v4411_v33 = vunpack.c.l.s8.bf16 %v3587_v52 }
 0x887   :  { %v4413_v34 = vunpack.c.l.s8.bf16 %v3589_v32  ;;  %v4421_v60 = vunpack.c.h.s8.bf16 %v3589_v32  ;;  %v3619_v32 = vld [vmem:[#allocation2 + $0xae0] sm:$0xff] }
 0x889   :  { %5642 = vmatpush1.bf16.msra.mxu0 %v4355_v37  ;;  %5970 = vmatpush1.bf16.msra.mxu1 %v4357_v38  ;;  %v4422_v37 = vunpack.c.h.s8.bf16 %v3590_v29  ;;  %v3596_v38 = vld [vmem:[#allocation2 + $0xa28] sm:$0xff] }
 0x88a   :  { %5643 = vmatprep.subr.bf16.mxu0 %v4364_v39  ;;  %5971 = vmatprep.subr.bf16.mxu1 %v4366_v27  ;;  %v3598_v39 = vld [vmem:[#allocation2 + $0xa38] sm:$0xff]  ;;  %v4419_v27 = vunpack.c.h.s8.bf16 %v3587_v52  ;;  %v4428_v40 = vunpack.c.l.s8.bf16 %v3596_v38  ;;  %v4436_v4 = vunpack.c.h.s8.bf16 %v3596_v38  ;;  %v3620_v29 = vld [vmem:[#allocation2 + $0xae8] sm:$0xff] }
 0x88d   :  { %5644 = vmatpush1.bf16.msra.mxu0 %v4363_v41  ;;  %5972 = vmatpush1.bf16.msra.mxu1 %v4365_v47  ;;  %v4430_v41 = vunpack.c.l.s8.bf16 %v3598_v39  ;;  %v3595_v47 = vld [vmem:[#allocation2 + $0xa20] sm:$0xff] }
 0x88e   :  { %5645 = vmatprep.subr.bf16.mxu0 %v4372_v15  ;;  %5973 = vmatprep.subr.bf16.mxu1 %v4374_v48  ;;  %v3597_v15 = vld [vmem:[#allocation2 + $0xa30] sm:$0xff]  ;;  %v4427_v48 = vunpack.c.l.s8.bf16 %v3595_v47 }
 0x88f   :  { %v4429_v49 = vunpack.c.l.s8.bf16 %v3597_v15  ;;  %v4437_v56 = vunpack.c.h.s8.bf16 %v3597_v15  ;;  %v3627_v15 = vld [vmem:[#allocation2 + $0xb20] sm:$0xff] }
 0x891   :  { %5646 = vmatpush1.bf16.msra.mxu0 %v4371_v30  ;;  %5974 = vmatpush1.bf16.msra.mxu1 %v4373_v51  ;;  %v4438_v30 = vunpack.c.h.s8.bf16 %v3598_v39  ;;  %v3604_v51 = vld [vmem:[#allocation2 + $0xa68] sm:$0xff] }
 0x892   :  { %5647 = vmatprep.subr.bf16.mxu0 %v4380_v61  ;;  %5975 = vmatprep.subr.bf16.mxu1 %v4382_v55  ;;  %v3606_v61 = vld [vmem:[#allocation2 + $0xa78] sm:$0xff]  ;;  %v4435_v55 = vunpack.c.h.s8.bf16 %v3595_v47  ;;  %v4444_v22 = vunpack.c.l.s8.bf16 %v3604_v51  ;;  %v3628_v39 = vld [vmem:[#allocation2 + $0xb28] sm:$0xff] }
 0x893   :  { %v4454_v1 = vunpack.c.h.s8.bf16 %v3606_v61 }
 0x895   :  { %5648 = vmatpush1.bf16.msra.mxu0 %v4379_v28  ;;  %5976 = vmatpush1.bf16.msra.mxu1 %v4381_v20  ;;  %v4446_v28 = vunpack.c.l.s8.bf16 %v3606_v61  ;;  %v3603_v20 = vld [vmem:[#allocation2 + $0xa60] sm:$0xff]  ;;  %v3636_v61 = vld [vmem:[#allocation2 + $0xb68] sm:$0xff] }
 0x896   :  { %5649 = vmatprep.subr.bf16.mxu0 %v4388_v58  ;;  %5977 = vmatprep.subr.bf16.mxu1 %v4390_v59  ;;  %v3605_v58 = vld [vmem:[#allocation2 + $0xa70] sm:$0xff]  ;;  %v4443_v59 = vunpack.c.l.s8.bf16 %v3603_v20 }
 0x897   :  { %v4445_v0 = vunpack.c.l.s8.bf16 %v3605_v58 }
 0x899   :  { %5650 = vmatpush1.bf16.msra.mxu0 %v4387_v17  ;;  %5978 = vmatpush1.bf16.msra.mxu1 %v4389_v21  ;;  %v3612_v17 = vld [vmem:[#allocation2 + $0xaa8] sm:$0xff]  ;;  %v3614_v21 = vld [vmem:[#allocation2 + $0xab8] sm:$0xff] }
 0x89a   :  { %5651 = vmatprep.subr.bf16.mxu0 %v4396_v62  ;;  %5979 = vmatprep.subr.bf16.mxu1 %v4398_v35  ;;  %v4451_v62 = vunpack.c.h.s8.bf16 %v3603_v20  ;;  %v4453_v35 = vunpack.c.h.s8.bf16 %v3605_v58  ;;  %v4460_v5 = vunpack.c.l.s8.bf16 %v3612_v17  ;;  %v4462_v8 = vunpack.c.l.s8.bf16 %v3614_v21  ;;  %v3635_v58 = vld [vmem:[#allocation2 + $0xb60] sm:$0xff] }
 0x89b   :  { %v4470_v42 = vunpack.c.h.s8.bf16 %v3614_v21  ;;  %v3644_v21 = vld [vmem:[#allocation2 + $0xba8] sm:$0xff] }
 0x89d   :  { %5652 = vmatpush1.bf16.msra.mxu0 %v4395_v9  ;;  %5980 = vmatpush1.bf16.msra.mxu1 %v4397_v10  ;;  %v3611_v9 = vld [vmem:[#allocation2 + $0xaa0] sm:$0xff] }
 0x89e   :  { %5653 = vmatprep.subr.bf16.mxu0 %v4404_v13  ;;  %5981 = vmatprep.subr.bf16.mxu1 %v4406_v44  ;;  %v4459_v10 = vunpack.c.l.s8.bf16 %v3611_v9  ;;  %v4468_v44 = vunpack.c.h.s8.bf16 %v3612_v17 }
 0x8a1   :  { %5654 = vmatpush1.bf16.msra.mxu0 %v4403_v14  ;;  %5982 = vmatpush1.bf16.msra.mxu1 %v4405_v11  ;;  %v3622_v14 = vld [vmem:[#allocation2 + $0xaf8] sm:$0xff]  ;;  %v4467_v11 = vunpack.c.h.s8.bf16 %v3611_v9 }
 0x8a2   :  { %5655 = vmatprep.subr.bf16.mxu0 %v4412_v12  ;;  %5983 = vmatprep.subr.bf16.mxu1 %v4414_v31  ;;  %v4476_v31 = vunpack.c.l.s8.bf16 %v3620_v29  ;;  %v4478_v52 = vunpack.c.l.s8.bf16 %v3622_v14  ;;  %v4486_v38 = vunpack.c.h.s8.bf16 %v3622_v14  ;;  %v3652_v14 = vld [vmem:[#allocation2 + $0xbe8] sm:$0xff] }
 0x8a5   :  { %5656 = vmatpush1.bf16.msra.mxu0 %v4411_v33  ;;  %5984 = vmatpush1.bf16.msra.mxu1 %v4413_v34  ;;  %v3621_v33 = vld [vmem:[#allocation2 + $0xaf0] sm:$0xff]  ;;  %v4475_v34 = vunpack.c.l.s8.bf16 %v3619_v32 }
 0x8a6   :  { %5657 = vmatprep.subr.bf16.mxu0 %v4420_v36  ;;  %5985 = vmatprep.subr.bf16.mxu1 %v4422_v37  ;;  %v4477_v36 = vunpack.c.l.s8.bf16 %v3621_v33  ;;  %v4484_v37 = vunpack.c.h.s8.bf16 %v3620_v29 }
 0x8a9   :  { %5658 = vmatpush1.bf16.msra.mxu0 %v4419_v27  ;;  %5986 = vmatpush1.bf16.msra.mxu1 %v4421_v60  ;;  %v3630_v27 = vld [vmem:[#allocation2 + $0xb38] sm:$0xff]  ;;  %v4483_v60 = vunpack.c.h.s8.bf16 %v3619_v32 }
 0x8aa   :  { %5668 = vmatprep.subr.bf16.mxu0 %v4428_v40  ;;  %5996 = vmatprep.subr.bf16.mxu1 %v4430_v41  ;;  %v4485_v40 = vunpack.c.h.s8.bf16 %v3621_v33  ;;  %v4492_v41 = vunpack.c.l.s8.bf16 %v3628_v39  ;;  %v4494_v47 = vunpack.c.l.s8.bf16 %v3630_v27  ;;  %v3651_v33 = vld [vmem:[#allocation2 + $0xbe0] sm:$0xff] }
 0x8ac   :  { %5660 = vmatmul.mubr.bf16.vlgmr.msra.gmra.mrb[20].mxu0 %v7704_v53  ;;  %5988 = vmatmul.mubr.bf16.vlgmr.msra.gmra.mrb[20].mxu1 %v7704_v53  ;;  %v4452_v53 = vunpack.c.h.s8.bf16 %v3604_v51  ;;  %v4502_v51 = vunpack.c.h.s8.bf16 %v3630_v27  ;;  %v3660_v27 = vld [vmem:[#allocation2 + $0xc28] sm:$0xff] }
 0x8ad   :  { %5669 = vmatpush1.bf16.msra.mxu0 %v4427_v48  ;;  %5997 = vmatpush1.bf16.msra.mxu1 %v4429_v49  ;;  %v3629_v48 = vld [vmem:[#allocation2 + $0xb30] sm:$0xff]  ;;  %v4491_v49 = vunpack.c.l.s8.bf16 %v3627_v15 }
 0x8ae   :  { %5670 = vmatprep.subr.bf16.mxu0 %v4436_v4  ;;  %5998 = vmatprep.subr.bf16.mxu1 %v4438_v30  ;;  %v4493_v4 = vunpack.c.l.s8.bf16 %v3629_v48  ;;  %v4500_v30 = vunpack.c.h.s8.bf16 %v3628_v39 }
 0x8af   :  { %5700 = vmatprep.mubr.bf16.mxu0 %v7710_v63  ;;  %6028 = vmatprep.mubr.bf16.mxu1 %v7710_v63  ;;  %v3613_v63 = vld [vmem:[#allocation2 + $0xab0] sm:$0xff] }
 0x8b0   :  { %v4461_v13 = vunpack.c.l.s8.bf16 %v3613_v63  ;;  %v4469_v12 = vunpack.c.h.s8.bf16 %v3613_v63  ;;  %v3643_v63 = vld [vmem:[#allocation2 + $0xba0] sm:$0xff] }
 0x8b1   :  { %5671 = vmatpush1.bf16.msra.mxu0 %v4435_v55  ;;  %5999 = vmatpush1.bf16.msra.mxu1 %v4437_v56  ;;  %v3638_v55 = vld [vmem:[#allocation2 + $0xb78] sm:$0xff]  ;;  %v4499_v56 = vunpack.c.h.s8.bf16 %v3627_v15 }
 0x8b2   :  { %5672 = vmatprep.subr.bf16.mxu0 %v4444_v22  ;;  %6000 = vmatprep.subr.bf16.mxu1 %v4446_v28  ;;  %v4501_v22 = vunpack.c.h.s8.bf16 %v3629_v48  ;;  %v4508_v28 = vunpack.c.l.s8.bf16 %v3636_v61  ;;  %v4510_v20 = vunpack.c.l.s8.bf16 %v3638_v55  ;;  %v4518_v17 = vunpack.c.h.s8.bf16 %v3638_v55  ;;  %v3659_v48 = vld [vmem:[#allocation2 + $0xc20] sm:$0xff]  ;;  %v3668_v55 = vld [vmem:[#allocation2 + $0xc68] sm:$0xff] }
 0x8b5   :  { %5673 = vmatpush1.bf16.msra.mxu0 %v4443_v59  ;;  %6001 = vmatpush1.bf16.msra.mxu1 %v4445_v0  ;;  %v3637_v59 = vld [vmem:[#allocation2 + $0xb70] sm:$0xff]  ;;  %v4507_v0 = vunpack.c.l.s8.bf16 %v3635_v58 }
 0x8b6   :  { %5674 = vmatprep.subr.bf16.mxu0 %v4452_v53  ;;  %6002 = vmatprep.subr.bf16.mxu1 %v4454_v1  ;;  %v4509_v53 = vunpack.c.l.s8.bf16 %v3637_v59  ;;  %v4516_v1 = vunpack.c.h.s8.bf16 %v3636_v61 }
 0x8b9   :  { %5675 = vmatpush1.bf16.msra.mxu0 %v4451_v62  ;;  %6003 = vmatpush1.bf16.msra.mxu1 %v4453_v35  ;;  %v3646_v62 = vld [vmem:[#allocation2 + $0xbb8] sm:$0xff]  ;;  %v4515_v35 = vunpack.c.h.s8.bf16 %v3635_v58 }
 0x8ba   :  { %5676 = vmatprep.subr.bf16.mxu0 %v4460_v5  ;;  %6004 = vmatprep.subr.bf16.mxu1 %v4462_v8  ;;  %v4517_v5 = vunpack.c.h.s8.bf16 %v3637_v59  ;;  %v4524_v8 = vunpack.c.l.s8.bf16 %v3644_v21  ;;  %v4526_v9 = vunpack.c.l.s8.bf16 %v3646_v62  ;;  %v4534_v29 = vunpack.c.h.s8.bf16 %v3646_v62  ;;  %v3667_v59 = vld [vmem:[#allocation2 + $0xc60] sm:$0xff]  ;;  %v3678_v62 = vld [vmem:[#allocation2 + $0xcb8] sm:$0xff] }
 0x8bd   :  { %5677 = vmatpush1.bf16.msra.mxu0 %v4459_v10  ;;  %6005 = vmatpush1.bf16.msra.mxu1 %v4461_v13  ;;  %v3645_v10 = vld [vmem:[#allocation2 + $0xbb0] sm:$0xff]  ;;  %v4523_v13 = vunpack.c.l.s8.bf16 %v3643_v63 }
 0x8be   :  { %5678 = vmatprep.subr.bf16.mxu0 %v4468_v44  ;;  %6006 = vmatprep.subr.bf16.mxu1 %v4470_v42  ;;  %v4525_v44 = vunpack.c.l.s8.bf16 %v3645_v10  ;;  %v4532_v42 = vunpack.c.h.s8.bf16 %v3644_v21  ;;  %v3676_v21 = vld [vmem:[#allocation2 + $0xca8] sm:$0xff] }
 0x8c1   :  { %5679 = vmatpush1.bf16.msra.mxu0 %v4467_v11  ;;  %6007 = vmatpush1.bf16.msra.mxu1 %v4469_v12  ;;  %v3654_v11 = vld [vmem:[#allocation2 + $0xbf8] sm:$0xff]  ;;  %v4531_v12 = vunpack.c.h.s8.bf16 %v3643_v63  ;;  %v3675_v63 = vld [vmem:[#allocation2 + $0xca0] sm:$0xff] }
 0x8c2   :  { %5680 = vmatprep.subr.bf16.mxu0 %v4476_v31  ;;  %6008 = vmatprep.subr.bf16.mxu1 %v4478_v52  ;;  %v4533_v31 = vunpack.c.h.s8.bf16 %v3645_v10  ;;  %v4540_v52 = vunpack.c.l.s8.bf16 %v3652_v14  ;;  %v4542_v32 = vunpack.c.l.s8.bf16 %v3654_v11  ;;  %v4550_v39 = vunpack.c.h.s8.bf16 %v3654_v11 }
 0x8c3   :  { %v4587_v10 = vunpack.c.l.s8.bf16 %v3675_v63  ;;  %v4595_v11 = vunpack.c.h.s8.bf16 %v3675_v63  ;;  %v3709_v63 = vld [vmem:[#allocation2 + $0xdb0] sm:$0xff] }
 0x8c5   :  { %5681 = vmatpush1.bf16.msra.mxu0 %v4475_v34  ;;  %6009 = vmatpush1.bf16.msra.mxu1 %v4477_v36  ;;  %v3653_v34 = vld [vmem:[#allocation2 + $0xbf0] sm:$0xff]  ;;  %v4539_v36 = vunpack.c.l.s8.bf16 %v3651_v33 }
 0x8c6   :  { %5682 = vmatprep.subr.bf16.mxu0 %v4484_v37  ;;  %6010 = vmatprep.subr.bf16.mxu1 %v4486_v38  ;;  %v4541_v37 = vunpack.c.l.s8.bf16 %v3653_v34  ;;  %v4548_v38 = vunpack.c.h.s8.bf16 %v3652_v14  ;;  %v3686_v14 = vld [vmem:[#allocation2 + $0xcf8] sm:$0xff] }
 0x8c9   :  { %5683 = vmatpush1.bf16.msra.mxu0 %v4483_v60  ;;  %6011 = vmatpush1.bf16.msra.mxu1 %v4485_v40  ;;  %v3662_v60 = vld [vmem:[#allocation2 + $0xc38] sm:$0xff]  ;;  %v4547_v40 = vunpack.c.h.s8.bf16 %v3651_v33  ;;  %v3685_v33 = vld [vmem:[#allocation2 + $0xcf0] sm:$0xff] }
 0x8ca   :  { %5684 = vmatprep.subr.bf16.mxu0 %v4492_v41  ;;  %6012 = vmatprep.subr.bf16.mxu1 %v4494_v47  ;;  %v4549_v41 = vunpack.c.h.s8.bf16 %v3653_v34  ;;  %v4556_v47 = vunpack.c.l.s8.bf16 %v3660_v27  ;;  %v4558_v15 = vunpack.c.l.s8.bf16 %v3662_v60  ;;  %v4566_v61 = vunpack.c.h.s8.bf16 %v3662_v60 }
 0x8cd   :  { %5685 = vmatpush1.bf16.msra.mxu0 %v4491_v49  ;;  %6013 = vmatpush1.bf16.msra.mxu1 %v4493_v4  ;;  %v3661_v49 = vld [vmem:[#allocation2 + $0xc30] sm:$0xff]  ;;  %v4555_v4 = vunpack.c.l.s8.bf16 %v3659_v48 }
 0x8ce   :  { %5686 = vmatprep.subr.bf16.mxu0 %v4500_v30  ;;  %6014 = vmatprep.subr.bf16.mxu1 %v4502_v51  ;;  %v4557_v30 = vunpack.c.l.s8.bf16 %v3661_v49  ;;  %v4564_v51 = vunpack.c.h.s8.bf16 %v3660_v27  ;;  %v3694_v27 = vld [vmem:[#allocation2 + $0xd38] sm:$0xff] }
 0x8d1   :  { %5687 = vmatpush1.bf16.msra.mxu0 %v4499_v56  ;;  %6015 = vmatpush1.bf16.msra.mxu1 %v4501_v22  ;;  %v3670_v56 = vld [vmem:[#allocation2 + $0xc78] sm:$0xff]  ;;  %v4563_v22 = vunpack.c.h.s8.bf16 %v3659_v48  ;;  %v3693_v48 = vld [vmem:[#allocation2 + $0xd30] sm:$0xff] }
 0x8d2   :  { %5688 = vmatprep.subr.bf16.mxu0 %v4508_v28  ;;  %6016 = vmatprep.subr.bf16.mxu1 %v4510_v20  ;;  %v4565_v28 = vunpack.c.h.s8.bf16 %v3661_v49  ;;  %v4572_v20 = vunpack.c.l.s8.bf16 %v3668_v55  ;;  %v4574_v58 = vunpack.c.l.s8.bf16 %v3670_v56 }
 0x8d5   :  { %5689 = vmatpush1.bf16.msra.mxu0 %v4507_v0  ;;  %6017 = vmatpush1.bf16.msra.mxu1 %v4509_v53  ;;  %v3669_v0 = vld [vmem:[#allocation2 + $0xc70] sm:$0xff]  ;;  %v4571_v53 = vunpack.c.l.s8.bf16 %v3667_v59 }
 0x8d6   :  { %5690 = vmatprep.subr.bf16.mxu0 %v4516_v1  ;;  %6018 = vmatprep.subr.bf16.mxu1 %v4518_v17  ;;  %v4573_v1 = vunpack.c.l.s8.bf16 %v3669_v0  ;;  %v4582_v17 = vunpack.c.h.s8.bf16 %v3670_v56 }
 0x8d9   :  { %5691 = vmatpush1.bf16.msra.mxu0 %v4515_v35  ;;  %6019 = vmatpush1.bf16.msra.mxu1 %v4517_v5  ;;  %v4579_v35 = vunpack.c.h.s8.bf16 %v3667_v59  ;;  %v4581_v5 = vunpack.c.h.s8.bf16 %v3669_v0  ;;  %v3701_v59 = vld [vmem:[#allocation2 + $0xd70] sm:$0xff] }
 0x8da   :  { %5692 = vmatprep.subr.bf16.mxu0 %v4524_v8  ;;  %6020 = vmatprep.subr.bf16.mxu1 %v4526_v9  ;;  %v4588_v8 = vunpack.c.l.s8.bf16 %v3676_v21  ;;  %v4590_v9 = vunpack.c.l.s8.bf16 %v3678_v62 }
 0x8dd   :  { %5693 = vmatpush1.bf16.msra.mxu0 %v4523_v13  ;;  %6021 = vmatpush1.bf16.msra.mxu1 %v4525_v44  ;;  %v4596_v44 = vunpack.c.h.s8.bf16 %v3676_v21  ;;  %v3710_v21 = vld [vmem:[#allocation2 + $0xdb8] sm:$0xff] }
 0x8de   :  { %5694 = vmatprep.subr.bf16.mxu0 %v4532_v42  ;;  %6022 = vmatprep.subr.bf16.mxu1 %v4534_v29  ;;  %v4598_v42 = vunpack.c.h.s8.bf16 %v3678_v62  ;;  %v3684_v29 = vld [vmem:[#allocation2 + $0xce8] sm:$0xff] }
 0x8e1   :  { %5695 = vmatpush1.bf16.msra.mxu0 %v4531_v12  ;;  %6023 = vmatpush1.bf16.msra.mxu1 %v4533_v31  ;;  %v4604_v31 = vunpack.c.l.s8.bf16 %v3684_v29 }
 0x8e2   :  { %5696 = vmatprep.subr.bf16.mxu0 %v4540_v52  ;;  %6024 = vmatprep.subr.bf16.mxu1 %v4542_v32  ;;  %v4606_v52 = vunpack.c.l.s8.bf16 %v3686_v14  ;;  %v3683_v32 = vld [vmem:[#allocation2 + $0xce0] sm:$0xff] }
 0x8e3   :  { %v4603_v34 = vunpack.c.l.s8.bf16 %v3683_v32  ;;  %v4611_v60 = vunpack.c.h.s8.bf16 %v3683_v32  ;;  %v3717_v32 = vld [vmem:[#allocation2 + $0xdf0] sm:$0xff] }
 0x8e5   :  { %5697 = vmatpush1.bf16.msra.mxu0 %v4539_v36  ;;  %6025 = vmatpush1.bf16.msra.mxu1 %v4541_v37  ;;  %v4605_v36 = vunpack.c.l.s8.bf16 %v3685_v33  ;;  %v4612_v37 = vunpack.c.h.s8.bf16 %v3684_v29  ;;  %v3718_v29 = vld [vmem:[#allocation2 + $0xdf8] sm:$0xff] }
 0x8e6   :  { %5698 = vmatprep.subr.bf16.mxu0 %v4548_v38  ;;  %6026 = vmatprep.subr.bf16.mxu1 %v4550_v39  ;;  %v4614_v38 = vunpack.c.h.s8.bf16 %v3686_v14  ;;  %v3692_v39 = vld [vmem:[#allocation2 + $0xd28] sm:$0xff] }
 0x8e9   :  { %5699 = vmatpush1.bf16.msra.mxu0 %v4547_v40  ;;  %6027 = vmatpush1.bf16.msra.mxu1 %v4549_v41  ;;  %v4613_v40 = vunpack.c.h.s8.bf16 %v3685_v33  ;;  %v4620_v41 = vunpack.c.l.s8.bf16 %v3692_v39 }
 0x8ea   :  { %5709 = vmatprep.subr.bf16.mxu0 %v4556_v47  ;;  %6037 = vmatprep.subr.bf16.mxu1 %v4558_v15  ;;  %v4622_v47 = vunpack.c.l.s8.bf16 %v3694_v27  ;;  %v3691_v15 = vld [vmem:[#allocation2 + $0xd20] sm:$0xff] }
 0x8eb   :  { %v4619_v49 = vunpack.c.l.s8.bf16 %v3691_v15  ;;  %v4627_v56 = vunpack.c.h.s8.bf16 %v3691_v15  ;;  %v3725_v15 = vld [vmem:[#allocation2 + $0xe30] sm:$0xff] }
 0x8ec   :  { %5701 = vmatmul.mubr.bf16.vlgmr.msra.gmra.mrb[20].mxu0 %v7706_v57  ;;  %6029 = vmatmul.mubr.bf16.vlgmr.msra.gmra.mrb[20].mxu1 %v7706_v57  ;;  %v4580_v57 = vunpack.c.h.s8.bf16 %v3668_v55  ;;  %v3702_v55 = vld [vmem:[#allocation2 + $0xd78] sm:$0xff] }
 0x8ed   :  { %5710 = vmatpush1.bf16.msra.mxu0 %v4555_v4  ;;  %6038 = vmatpush1.bf16.msra.mxu1 %v4557_v30  ;;  %v4621_v4 = vunpack.c.l.s8.bf16 %v3693_v48  ;;  %v4628_v30 = vunpack.c.h.s8.bf16 %v3692_v39  ;;  %v3726_v39 = vld [vmem:[#allocation2 + $0xe38] sm:$0xff] }
 0x8ee   :  { %5711 = vmatprep.subr.bf16.mxu0 %v4564_v51  ;;  %6039 = vmatprep.subr.bf16.mxu1 %v4566_v61  ;;  %v4630_v51 = vunpack.c.h.s8.bf16 %v3694_v27  ;;  %v3700_v61 = vld [vmem:[#allocation2 + $0xd68] sm:$0xff] }
 0x8ef   :  { %5741 = vmatprep.mubr.bf16.mxu0 %v7734_v24  ;;  %6069 = vmatprep.mubr.bf16.mxu1 %v7734_v24  ;;  %v3677_v24 = vld [vmem:[#allocation2 + $0xcb0] sm:$0xff] }
 0x8f0   :  { %v4589_v13 = vunpack.c.l.s8.bf16 %v3677_v24  ;;  %v4597_v12 = vunpack.c.h.s8.bf16 %v3677_v24 }
 0x8f1   :  { %5712 = vmatpush1.bf16.msra.mxu0 %v4563_v22  ;;  %6040 = vmatpush1.bf16.msra.mxu1 %v4565_v28  ;;  %v4629_v22 = vunpack.c.h.s8.bf16 %v3693_v48  ;;  %v4636_v28 = vunpack.c.l.s8.bf16 %v3700_v61 }
 0x8f2   :  { %5713 = vmatprep.subr.bf16.mxu0 %v4572_v20  ;;  %6041 = vmatprep.subr.bf16.mxu1 %v4574_v58  ;;  %v4638_v20 = vunpack.c.l.s8.bf16 %v3702_v55  ;;  %v3699_v58 = vld [vmem:[#allocation2 + $0xd60] sm:$0xff] }
 0x8f3   :  { %v4635_v0 = vunpack.c.l.s8.bf16 %v3699_v58  ;;  %v4643_v62 = vunpack.c.h.s8.bf16 %v3699_v58  ;;  %v3733_v58 = vld [vmem:[#allocation2 + $0xe70] sm:$0xff] }
 0x8f5   :  { %5714 = vmatpush1.bf16.msra.mxu0 %v4571_v53  ;;  %6042 = vmatpush1.bf16.msra.mxu1 %v4573_v1  ;;  %v4637_v53 = vunpack.c.l.s8.bf16 %v3701_v59  ;;  %v4644_v1 = vunpack.c.h.s8.bf16 %v3700_v61  ;;  %v3734_v61 = vld [vmem:[#allocation2 + $0xe78] sm:$0xff] }
 0x8f6   :  { %5715 = vmatprep.subr.bf16.mxu0 %v4580_v57  ;;  %6043 = vmatprep.subr.bf16.mxu1 %v4582_v17  ;;  %v4646_v57 = vunpack.c.h.s8.bf16 %v3702_v55  ;;  %v3708_v17 = vld [vmem:[#allocation2 + $0xda8] sm:$0xff] }
 0x8f9   :  { %5716 = vmatpush1.bf16.msra.mxu0 %v4579_v35  ;;  %6044 = vmatpush1.bf16.msra.mxu1 %v4581_v5  ;;  %v4645_v35 = vunpack.c.h.s8.bf16 %v3701_v59  ;;  %v4652_v5 = vunpack.c.l.s8.bf16 %v3708_v17 }
 0x8fa   :  { %5717 = vmatprep.subr.bf16.mxu0 %v4588_v8  ;;  %6045 = vmatprep.subr.bf16.mxu1 %v4590_v9  ;;  %v4654_v8 = vunpack.c.l.s8.bf16 %v3710_v21  ;;  %v3707_v9 = vld [vmem:[#allocation2 + $0xda0] sm:$0xff] }
 0x8fb   :  { %v4651_v24 = vunpack.c.l.s8.bf16 %v3707_v9  ;;  %v4659_v14 = vunpack.c.h.s8.bf16 %v3707_v9 }
 0x8fd   :  { %5718 = vmatpush1.bf16.msra.mxu0 %v4587_v10  ;;  %6046 = vmatpush1.bf16.msra.mxu1 %v4589_v13  ;;  %v4653_v10 = vunpack.c.l.s8.bf16 %v3709_v63  ;;  %v4660_v13 = vunpack.c.h.s8.bf16 %v3708_v17 }
 0x8fe   :  { %5719 = vmatprep.subr.bf16.mxu0 %v4596_v44  ;;  %6047 = vmatprep.subr.bf16.mxu1 %v4598_v42  ;;  %v4662_v44 = vunpack.c.h.s8.bf16 %v3710_v21  ;;  %v3716_v42 = vld [vmem:[#allocation2 + $0xde8] sm:$0xff]  ;;  %v4709_v21 = vunpack.c.h.s8.bf16 %v3733_v58 }
 0x901   :  { %5720 = vmatpush1.bf16.msra.mxu0 %v4595_v11  ;;  %6048 = vmatpush1.bf16.msra.mxu1 %v4597_v12  ;;  %v4661_v11 = vunpack.c.h.s8.bf16 %v3709_v63  ;;  %v4668_v12 = vunpack.c.l.s8.bf16 %v3716_v42 }
 0x902   :  { %5721 = vmatprep.subr.bf16.mxu0 %v4604_v31  ;;  %6049 = vmatprep.subr.bf16.mxu1 %v4606_v52  ;;  %v4670_v31 = vunpack.c.l.s8.bf16 %v3718_v29  ;;  %v3715_v52 = vld [vmem:[#allocation2 + $0xde0] sm:$0xff] }
 0x903   :  { %v4667_v33 = vunpack.c.l.s8.bf16 %v3715_v52  ;;  %v4675_v27 = vunpack.c.h.s8.bf16 %v3715_v52 }
 0x905   :  { %5722 = vmatpush1.bf16.msra.mxu0 %v4603_v34  ;;  %6050 = vmatpush1.bf16.msra.mxu1 %v4605_v36  ;;  %v4669_v34 = vunpack.c.l.s8.bf16 %v3717_v32  ;;  %v4676_v36 = vunpack.c.h.s8.bf16 %v3716_v42 }
 0x906   :  { %5723 = vmatprep.subr.bf16.mxu0 %v4612_v37  ;;  %6051 = vmatprep.subr.bf16.mxu1 %v4614_v38  ;;  %v4678_v37 = vunpack.c.h.s8.bf16 %v3718_v29  ;;  %v3724_v38 = vld [vmem:[#allocation2 + $0xe28] sm:$0xff] }
 0x909   :  { %5724 = vmatpush1.bf16.msra.mxu0 %v4611_v60  ;;  %6052 = vmatpush1.bf16.msra.mxu1 %v4613_v40  ;;  %v4677_v60 = vunpack.c.h.s8.bf16 %v3717_v32  ;;  %v4684_v40 = vunpack.c.l.s8.bf16 %v3724_v38 }
 0x90a   :  { %5725 = vmatprep.subr.bf16.mxu0 %v4620_v41  ;;  %6053 = vmatprep.subr.bf16.mxu1 %v4622_v47  ;;  %v4686_v41 = vunpack.c.l.s8.bf16 %v3726_v39  ;;  %v3723_v47 = vld [vmem:[#allocation2 + $0xe20] sm:$0xff] }
 0x90b   :  { %v4683_v48 = vunpack.c.l.s8.bf16 %v3723_v47  ;;  %v4691_v55 = vunpack.c.h.s8.bf16 %v3723_v47 }
 0x90d   :  { %5726 = vmatpush1.bf16.msra.mxu0 %v4619_v49  ;;  %6054 = vmatpush1.bf16.msra.mxu1 %v4621_v4  ;;  %v4685_v49 = vunpack.c.l.s8.bf16 %v3725_v15  ;;  %v4692_v4 = vunpack.c.h.s8.bf16 %v3724_v38 }
 0x90e   :  { %5727 = vmatprep.subr.bf16.mxu0 %v4628_v30  ;;  %6055 = vmatprep.subr.bf16.mxu1 %v4630_v51  ;;  %v4694_v30 = vunpack.c.h.s8.bf16 %v3726_v39  ;;  %v3732_v51 = vld [vmem:[#allocation2 + $0xe68] sm:$0xff] }
 0x911   :  { %5728 = vmatpush1.bf16.msra.mxu0 %v4627_v56  ;;  %6056 = vmatpush1.bf16.msra.mxu1 %v4629_v22  ;;  %v4693_v56 = vunpack.c.h.s8.bf16 %v3725_v15  ;;  %v4700_v22 = vunpack.c.l.s8.bf16 %v3732_v51 }
 0x912   :  { %5729 = vmatprep.subr.bf16.mxu0 %v4636_v28  ;;  %6057 = vmatprep.subr.bf16.mxu1 %v4638_v20  ;;  %v4702_v28 = vunpack.c.l.s8.bf16 %v3734_v61  ;;  %v3731_v20 = vld [vmem:[#allocation2 + $0xe60] sm:$0xff] }
 0x913   :  { %v4699_v59 = vunpack.c.l.s8.bf16 %v3731_v20  ;;  %v4707_v17 = vunpack.c.h.s8.bf16 %v3731_v20 }
 0x915   :  { %5730 = vmatpush1.bf16.msra.mxu0 %v4635_v0  ;;  %6058 = vmatpush1.bf16.msra.mxu1 %v4637_v53  ;;  %v4701_v0 = vunpack.c.l.s8.bf16 %v3733_v58  ;;  %v4710_v53 = vunpack.c.h.s8.bf16 %v3734_v61 }
 0x916   :  { %5731 = vmatprep.subr.bf16.mxu0 %v4644_v1  ;;  %6059 = vmatprep.subr.bf16.mxu1 %v4646_v57  ;;  %v3740_v1 = vld [vmem:[#allocation2 + $0xea8] sm:$0xff]  ;;  %v3742_v57 = vld [vmem:[#allocation2 + $0xeb8] sm:$0xff] }
 0x917   :  { %v4724_v63 = vunpack.c.h.s8.bf16 %v3740_v1 }
 0x919   :  { %5732 = vmatpush1.bf16.msra.mxu0 %v4643_v62  ;;  %6060 = vmatpush1.bf16.msra.mxu1 %v4645_v35  ;;  %v4716_v62 = vunpack.c.l.s8.bf16 %v3740_v1  ;;  %v4718_v35 = vunpack.c.l.s8.bf16 %v3742_v57 }
 0x91a   :  { %5733 = vmatprep.subr.bf16.mxu0 %v4652_v5  ;;  %6061 = vmatprep.subr.bf16.mxu1 %v4654_v8  ;;  %v3739_v5 = vld [vmem:[#allocation2 + $0xea0] sm:$0xff] }
 0x91b   :  { %v4715_v8 = vunpack.c.l.s8.bf16 %v3739_v5 }
 0x91d   :  { %5734 = vmatpush1.bf16.msra.mxu0 %v4651_v24  ;;  %6062 = vmatpush1.bf16.msra.mxu1 %v4653_v10  ;;  %v4726_v24 = vunpack.c.h.s8.bf16 %v3742_v57  ;;  %v3748_v10 = vld [vmem:[#allocation2 + $0xee8] sm:$0xff] }
 0x91e   :  { %5735 = vmatprep.subr.bf16.mxu0 %v4660_v13  ;;  %6063 = vmatprep.subr.bf16.mxu1 %v4662_v44  ;;  %v3750_v13 = vld [vmem:[#allocation2 + $0xef8] sm:$0xff]  ;;  %v4723_v44 = vunpack.c.h.s8.bf16 %v3739_v5  ;;  %v4732_v29 = vunpack.c.l.s8.bf16 %v3748_v10  ;;  %v4740_v32 = vunpack.c.h.s8.bf16 %v3748_v10 }
 0x921   :  { %5736 = vmatpush1.bf16.msra.mxu0 %v4659_v14  ;;  %6064 = vmatpush1.bf16.msra.mxu1 %v4661_v11  ;;  %v4734_v14 = vunpack.c.l.s8.bf16 %v3750_v13  ;;  %v3747_v11 = vld [vmem:[#allocation2 + $0xee0] sm:$0xff] }
 0x922   :  { %5737 = vmatprep.subr.bf16.mxu0 %v4668_v12  ;;  %6065 = vmatprep.subr.bf16.mxu1 %v4670_v31  ;;  %v3749_v12 = vld [vmem:[#allocation2 + $0xef0] sm:$0xff]  ;;  %v4731_v31 = vunpack.c.l.s8.bf16 %v3747_v11 }
 0x923   :  { %v4733_v52 = vunpack.c.l.s8.bf16 %v3749_v12  ;;  %v4741_v38 = vunpack.c.h.s8.bf16 %v3749_v12 }
 0x925   :  { %5738 = vmatpush1.bf16.msra.mxu0 %v4667_v33  ;;  %6066 = vmatpush1.bf16.msra.mxu1 %v4669_v34  ;;  %v4742_v33 = vunpack.c.h.s8.bf16 %v3750_v13  ;;  %v3756_v34 = vld [vmem:[#allocation2 + $0xf28] sm:$0xff] }
 0x926   :  { %5739 = vmatprep.subr.bf16.mxu0 %v4676_v36  ;;  %6067 = vmatprep.subr.bf16.mxu1 %v4678_v37  ;;  %v3758_v36 = vld [vmem:[#allocation2 + $0xf38] sm:$0xff]  ;;  %v4739_v37 = vunpack.c.h.s8.bf16 %v3747_v11  ;;  %v4748_v39 = vunpack.c.l.s8.bf16 %v3756_v34  ;;  %v4756_v15 = vunpack.c.h.s8.bf16 %v3756_v34 }
 0x929   :  { %5740 = vmatpush1.bf16.msra.mxu0 %v4675_v27  ;;  %6068 = vmatpush1.bf16.msra.mxu1 %v4677_v60  ;;  %v4750_v27 = vunpack.c.l.s8.bf16 %v3758_v36  ;;  %v3755_v60 = vld [vmem:[#allocation2 + $0xf20] sm:$0xff] }
 0x92a   :  { %5750 = vmatprep.subr.bf16.mxu0 %v4684_v40  ;;  %6078 = vmatprep.subr.bf16.mxu1 %v4686_v41  ;;  %v3757_v40 = vld [vmem:[#allocation2 + $0xf30] sm:$0xff]  ;;  %v4747_v41 = vunpack.c.l.s8.bf16 %v3755_v60 }
 0x92b   :  { %v4749_v47 = vunpack.c.l.s8.bf16 %v3757_v40 }
 0x92c   :  { %5742 = vmatmul.mubr.bf16.vlgmr.msra.gmra.mrb[20].mxu0 %v7730_v45  ;;  %6070 = vmatmul.mubr.bf16.vlgmr.msra.gmra.mrb[20].mxu1 %v7730_v45  ;;  %v4708_v45 = vunpack.c.h.s8.bf16 %v3732_v51  ;;  %v4757_v51 = vunpack.c.h.s8.bf16 %v3757_v40 }
 0x92d   :  { %5751 = vmatpush1.bf16.msra.mxu0 %v4683_v48  ;;  %6079 = vmatpush1.bf16.msra.mxu1 %v4685_v49  ;;  %v4758_v48 = vunpack.c.h.s8.bf16 %v3758_v36  ;;  %v3764_v49 = vld [vmem:[#allocation2 + $0xf68] sm:$0xff] }
 0x92e   :  { %5752 = vmatprep.subr.bf16.mxu0 %v4692_v4  ;;  %6080 = vmatprep.subr.bf16.mxu1 %v4694_v30  ;;  %v3766_v4 = vld [vmem:[#allocation2 + $0xf78] sm:$0xff]  ;;  %v4755_v30 = vunpack.c.h.s8.bf16 %v3755_v60  ;;  %v4764_v61 = vunpack.c.l.s8.bf16 %v3764_v49  ;;  %v4772_v58 = vunpack.c.h.s8.bf16 %v3764_v49 }
 0x92f   :  { %5782 = vmatprep.mubr.bf16.mxu0 %v7736_v46  ;;  %6110 = vmatprep.mubr.bf16.mxu1 %v7736_v46  ;;  %v3741_v46 = vld [vmem:[#allocation2 + $0xeb0] sm:$0xff] }
 0x930   :  { %v4717_v9 = vunpack.c.l.s8.bf16 %v3741_v46  ;;  %v4725_v42 = vunpack.c.h.s8.bf16 %v3741_v46 }
 0x931   :  { %5753 = vmatpush1.bf16.msra.mxu0 %v4691_v55  ;;  %6081 = vmatpush1.bf16.msra.mxu1 %v4693_v56  ;;  %v4766_v55 = vunpack.c.l.s8.bf16 %v3766_v4  ;;  %v3763_v56 = vld [vmem:[#allocation2 + $0xf60] sm:$0xff] }
 0x932   :  { %5754 = vmatprep.subr.bf16.mxu0 %v4700_v22  ;;  %6082 = vmatprep.subr.bf16.mxu1 %v4702_v28  ;;  %v3765_v22 = vld [vmem:[#allocation2 + $0xf70] sm:$0xff]  ;;  %v4763_v28 = vunpack.c.l.s8.bf16 %v3763_v56 }
 0x933   :  { %v4765_v20 = vunpack.c.l.s8.bf16 %v3765_v22  ;;  %v4773_v1 = vunpack.c.h.s8.bf16 %v3765_v22 }
 0x935   :  { %5755 = vmatpush1.bf16.msra.mxu0 %v4699_v59  ;;  %6083 = vmatpush1.bf16.msra.mxu1 %v4701_v0  ;;  %v4774_v59 = vunpack.c.h.s8.bf16 %v3766_v4  ;;  %v3772_v0 = vld [vmem:[#allocation2 + $0xfa8] sm:$0xff] }
 0x936   :  { %5756 = vmatprep.subr.bf16.mxu0 %v4708_v45  ;;  %6084 = vmatprep.subr.bf16.mxu1 %v4710_v53  ;;  %v3774_v45 = vld [vmem:[#allocation2 + $0xfb8] sm:$0xff]  ;;  %v4771_v53 = vunpack.c.h.s8.bf16 %v3763_v56  ;;  %v4780_v57 = vunpack.c.l.s8.bf16 %v3772_v0  ;;  %v4788_v46 = vunpack.c.h.s8.bf16 %v3772_v0 }
 0x939   :  { %5757 = vmatpush1.bf16.msra.mxu0 %v4707_v17  ;;  %6085 = vmatpush1.bf16.msra.mxu1 %v4709_v21  ;;  %v4782_v17 = vunpack.c.l.s8.bf16 %v3774_v45  ;;  %v3771_v21 = vld [vmem:[#allocation2 + $0xfa0] sm:$0xff] }
 0x93a   :  { %5758 = vmatprep.subr.bf16.mxu0 %v4716_v62  ;;  %6086 = vmatprep.subr.bf16.mxu1 %v4718_v35  ;;  %v3773_v62 = vld [vmem:[#allocation2 + $0xfb0] sm:$0xff]  ;;  %v4779_v35 = vunpack.c.l.s8.bf16 %v3771_v21 }
 0x93b   :  { %v4781_v5 = vunpack.c.l.s8.bf16 %v3773_v62  ;;  %v4789_v10 = vunpack.c.h.s8.bf16 %v3773_v62 }
 0x93d   :  { %5759 = vmatpush1.bf16.msra.mxu0 %v4715_v8  ;;  %6087 = vmatpush1.bf16.msra.mxu1 %v4717_v9  ;;  %v4790_v8 = vunpack.c.h.s8.bf16 %v3774_v45  ;;  %v3780_v9 = vld [vmem:[#allocation2 + $0xfe8] sm:$0xff] }
 0x93e   :  { %5760 = vmatprep.subr.bf16.mxu0 %v4724_v63  ;;  %6088 = vmatprep.subr.bf16.mxu1 %v4726_v24  ;;  %v3782_v63 = vld [vmem:[#allocation2 + $0xff8] sm:$0xff]  ;;  %v4787_v24 = vunpack.c.h.s8.bf16 %v3771_v21  ;;  %v4796_v13 = vunpack.c.l.s8.bf16 %v3780_v9  ;;  %v4804_v12 = vunpack.c.h.s8.bf16 %v3780_v9 }
 0x941   :  { %5761 = vmatpush1.bf16.msra.mxu0 %v4723_v44  ;;  %6089 = vmatpush1.bf16.msra.mxu1 %v4725_v42  ;;  %v4798_v44 = vunpack.c.l.s8.bf16 %v3782_v63  ;;  %v3779_v42 = vld [vmem:[#allocation2 + $0xfe0] sm:$0xff] }
 0x942   :  { %5762 = vmatprep.subr.bf16.mxu0 %v4732_v29  ;;  %6090 = vmatprep.subr.bf16.mxu1 %v4734_v14  ;;  %v3781_v29 = vld [vmem:[#allocation2 + $0xff0] sm:$0xff]  ;;  %v4795_v14 = vunpack.c.l.s8.bf16 %v3779_v42 }
 0x943   :  { %v4797_v11 = vunpack.c.l.s8.bf16 %v3781_v29 }
 0x945   :  { %5763 = vmatpush1.bf16.msra.mxu0 %v4731_v31  ;;  %6091 = vmatpush1.bf16.msra.mxu1 %v4733_v52  ;;  %v4806_v31 = vunpack.c.h.s8.bf16 %v3782_v63  ;;  %v4803_v52 = vunpack.c.h.s8.bf16 %v3779_v42 }
 0x946   :  { %5764 = vmatprep.subr.bf16.mxu0 %v4740_v32  ;;  %6092 = vmatprep.subr.bf16.mxu1 %v4742_v33  ;;  %v4805_v32 = vunpack.c.h.s8.bf16 %v3781_v29  ;;  %v7161_v33 = vld [vmem:[#allocation11] sm:$0xff] }
 0x947   :  { %v6140_v34 = vrot.slane %v7161_v33, %v7641_v2  ;;  %v6148_v36 = vrot.slane %v7161_v33, %v7644_v3 }
 0x949   :  { %5765 = vmatpush1.bf16.msra.mxu0 %v4739_v37  ;;  %6093 = vmatpush1.bf16.msra.mxu1 %v4741_v38  ;;  %v6144_v37 = vrot.slane %v7161_v33, %v7647_v6  ;;  %v6152_v38 = vrot.slane %v7161_v33, %v7650_v7 }
 0x94a   :  { %5766 = vmatprep.subr.bf16.mxu0 %v4748_v39  ;;  %6094 = vmatprep.subr.bf16.mxu1 %v4750_v27  ;;  %v7162_v39 = vld [vmem:[#allocation13] sm:$0xff] }
 0x94b   :  { %v6190_v27 = vrot.slane %v7162_v39, %v7641_v2  ;;  %v6198_v60 = vrot.slane %v7162_v39, %v7644_v3 }
 0x94d   :  { %5767 = vmatpush1.bf16.msra.mxu0 %v4747_v41  ;;  %6095 = vmatpush1.bf16.msra.mxu1 %v4749_v47  ;;  %v6194_v47 = vrot.slane %v7162_v39, %v7647_v6 }
 0x94e   :  { %5768 = vmatprep.subr.bf16.mxu0 %v4756_v15  ;;  %6096 = vmatprep.subr.bf16.mxu1 %v4758_v48 }
 0x951   :  { %5769 = vmatpush1.bf16.msra.mxu0 %v4755_v30  ;;  %6097 = vmatpush1.bf16.msra.mxu1 %v4757_v51 }
 0x952   :  { %5770 = vmatprep.subr.bf16.mxu0 %v4764_v61  ;;  %6098 = vmatprep.subr.bf16.mxu1 %v4766_v55 }
 0x955   :  { %5771 = vmatpush1.bf16.msra.mxu0 %v4763_v28  ;;  %6099 = vmatpush1.bf16.msra.mxu1 %v4765_v20 }
 0x956   :  { %5772 = vmatprep.subr.bf16.mxu0 %v4772_v58  ;;  %6100 = vmatprep.subr.bf16.mxu1 %v4774_v59 }
 0x959   :  { %5773 = vmatpush1.bf16.msra.mxu0 %v4771_v53  ;;  %6101 = vmatpush1.bf16.msra.mxu1 %v4773_v1 }
 0x95a   :  { %5774 = vmatprep.subr.bf16.mxu0 %v4780_v57  ;;  %6102 = vmatprep.subr.bf16.mxu1 %v4782_v17 }
 0x95d   :  { %5775 = vmatpush1.bf16.msra.mxu0 %v4779_v35  ;;  %6103 = vmatpush1.bf16.msra.mxu1 %v4781_v5 }
 0x95e   :  { %5776 = vmatprep.subr.bf16.mxu0 %v4788_v46  ;;  %6104 = vmatprep.subr.bf16.mxu1 %v4790_v8 }
 0x961   :  { %5777 = vmatpush1.bf16.msra.mxu0 %v4787_v24  ;;  %6105 = vmatpush1.bf16.msra.mxu1 %v4789_v10 }
 0x962   :  { %5778 = vmatprep.subr.bf16.mxu0 %v4796_v13  ;;  %6106 = vmatprep.subr.bf16.mxu1 %v4798_v44 }
 0x965   :  { %5779 = vmatpush1.bf16.msra.mxu0 %v4795_v14  ;;  %6107 = vmatpush1.bf16.msra.mxu1 %v4797_v11 }
 0x966   :  { %5780 = vmatprep.subr.bf16.mxu0 %v4804_v12  ;;  %6108 = vmatprep.subr.bf16.mxu1 %v4806_v31 }
 0x969   :  { %5781 = vmatpush1.bf16.msra.mxu0 %v4803_v52  ;;  %6109 = vmatpush1.bf16.msra.mxu1 %v4805_v32 }
 0x96c   :  { %5783 = vmatmul.mubr.bf16.vlgmr.msra.gmra.mrb[20].mxu0 %v7732_v54  ;;  %6111 = vmatmul.mubr.bf16.vlgmr.msra.gmra.mrb[20].mxu1 %v7732_v54  ;;  %v6202_v54 = vrot.slane %v7162_v39, %v7650_v7 }
 0xa3f   :  { %v5784_v40 = vpop.f32.mrb[20].mxu0  ;;  %v6112_v41 = vpop.f32.mrb[20].mxu1 }
 0xa40   :  { %v6165_v15 = vmul.f32 %v6140_v34, %v5784_v40  ;;  %v6167_v48 = vmul.f32 %v6148_v36, %v6112_v41  ;;  %v5786_v49 = vpop.f32.mrb[21].mxu0  ;;  %v6114_v4 = vpop.f32.mrb[21].mxu1 }
 0xa41   :  { %v6166_v30 = vmul.f32 %v6144_v37, %v5786_v49  ;;  %v6168_v51 = vmul.f32 %v6152_v38, %v6114_v4  ;;  %v5788_v61 = vpop.f32.mrb[22].mxu0  ;;  %v6116_v55 = vpop.f32.mrb[22].mxu1 }
 0xa42   :  { %v6215_v56 = vadd.f32 %v6190_v27, %v6165_v15  ;;  %v6217_v22 = vadd.f32 %v6198_v60, %v6167_v48  ;;  %v5789_v28 = vpop.f32.mrb[23].mxu0  ;;  %v6117_v2 = vpop.f32.mrb[23].mxu1 }
 0xa43   :  { %v6216_v20 = vadd.f32 %v6194_v47, %v6166_v30  ;;  %v6218_v3 = vadd.f32 %v6202_v54, %v6168_v51 }
 0xa44   :  { %v6223_v58 = vmax.f32 %v6215_v56, 0.0  ;;  %v6225_v59 = vmax.f32 %v6217_v22, 0.0 }
 0xa45   :  { %v6224_v0 = vmax.f32 %v6216_v20, 0.0  ;;  %v6226_v6 = vmax.f32 %v6218_v3, 0.0 }
 0xa46   :  { %v7826_v45 = vpack.c.bf16 %v6223_v58, %v6223_v58  ;;  %v7828_v7 = vpack.c.bf16 %v6225_v59, %v6225_v59 }
 0xa47   :  { %v7830_v53 = vpack.c.bf16 %v6224_v0, %v6224_v0  ;;  %v7832_v1 = vpack.c.bf16 %v6226_v6, %v6226_v6 }
 0xa48   :  { %7349 = dma.done.wait [#allocation4 + $0x1], 32768 }
 0xa49   :  { %7350 = vsyncadd [#allocation4 + $0x1], 4294934528  ;;  %6553 = vmatprep.mubr.bf16.mxu0 %v7796_v50  ;;  %6717 = vmatprep.mubr.bf16.mxu1 %v7796_v50  ;;  %v6244_v57 = vld [vmem:[#allocation3 + $0x8] sm:$0xff]  ;;  %v6246_v17 = vld [vmem:[#allocation3 + $0x18] sm:$0xff]  ;;  %s7371_s0 = smov [#allocation16]  }
 0xa4a   :  { %v6243_v21 = vld [vmem:[#allocation3] sm:$0xff]  ;;  %6521 = vmatprep.subr.bf16.mxu0 %v6244_v57  ;;  %6685 = vmatprep.subr.bf16.mxu1 %v6246_v17  ;;  %v6245_v62 = vld [vmem:[#allocation3 + $0x10] sm:$0xff]  ;;  %v6248_v35 = vld [vmem:[#allocation3 + $0x28] sm:$0xff]  ;;  %s6859_s18 = sshll.u32 %s7371_s0, 4  ;;  %s6860_s18 = int_to_ptr.vmem [resolvable:$true] %s6859_s18 }
 0xa4b   :  { %v6250_v5 = vld [vmem:[#allocation3 + $0x38] sm:$0xff]  ;;  %6522 = vmatpush1.bf16.msra.mxu0 %v6243_v21  ;;  %6686 = vmatpush1.bf16.msra.mxu1 %v6245_v62  ;;  %v6247_v46 = vld [vmem:[#allocation3 + $0x20] sm:$0xff]  ;;  %v6249_v8 = vld [vmem:[#allocation3 + $0x30] sm:$0xff]  ;;  %s7317_s19 = scalar_lea.vmem %s6860_s18, 512  ;;  %p7322_p1 = scmp.lt.s32.totalorder %s6860_s18, %s6860_s18 }
 0xa4c   :  { %6523 = vmatprep.subr.bf16.mxu0 %v6248_v35  ;;  %6687 = vmatprep.subr.bf16.mxu1 %v6250_v5  ;;  %v6252_v9 = vld [vmem:[#allocation3 + $0x48] sm:$0xff]  ;;  %v6254_v63 = vld [vmem:[#allocation3 + $0x58] sm:$0xff]  ;;  %v6251_v50 = vld [vmem:[#allocation3 + $0x40] sm:$0xff]  ;;  %p7318_p0 = scmp.ne.s32.totalorder %s6860_s18, %s7317_s19  ;;  %p7323_p2 = scmp.lt.s32.totalorder %s7317_s19, %s7317_s19 }
 0xa4d   :  { %v6253_v24 = vld [vmem:[#allocation3 + $0x50] sm:$0xff]  ;;  %v6256_v10 = vld [vmem:[#allocation3 + $0x68] sm:$0xff]  ;;  %v6258_v13 = vld [vmem:[#allocation3 + $0x78] sm:$0xff] }
 0xa4e   :  { %v6255_v44 = vld [vmem:[#allocation3 + $0x60] sm:$0xff]  ;;  %v6257_v42 = vld [vmem:[#allocation3 + $0x70] sm:$0xff]  ;;  %v6260_v29 = vld [vmem:[#allocation3 + $0x88] sm:$0xff]  ;;  %p7324_p3 = por %p7323_p2, %p7322_p1 }
 0xa4f   :  { %6524 = vmatpush1.bf16.msra.mxu0 %v6247_v46  ;;  %6688 = vmatpush1.bf16.msra.mxu1 %v6249_v8  ;;  %v6262_v14 = vld [vmem:[#allocation3 + $0x98] sm:$0xff]  ;;  %v6259_v11 = vld [vmem:[#allocation3 + $0x80] sm:$0xff]  ;;  %v6261_v12 = vld [vmem:[#allocation3 + $0x90] sm:$0xff] }
 0xa50   :  { %6525 = vmatprep.subr.bf16.mxu0 %v6252_v9  ;;  %6689 = vmatprep.subr.bf16.mxu1 %v6254_v63  ;;  %v6264_v31 = vld [vmem:[#allocation3 + $0xa8] sm:$0xff]  ;;  %v6266_v52 = vld [vmem:[#allocation3 + $0xb8] sm:$0xff]  ;;  %v6263_v32 = vld [vmem:[#allocation3 + $0xa0] sm:$0xff]  ;;  %p7325_p4 = pnand %p7324_p3, %p7318_p0 }
 0xa51   :  { %v6265_v33 = vld [vmem:[#allocation3 + $0xb0] sm:$0xff]  ;;  %v6268_v34 = vld [vmem:[#allocation3 + $0xc8] sm:$0xff]  ;;  %v6270_v36 = vld [vmem:[#allocation3 + $0xd8] sm:$0xff] }
 0xa52   :  { %v6267_v37 = vld [vmem:[#allocation3 + $0xc0] sm:$0xff]  ;;  %v6269_v38 = vld [vmem:[#allocation3 + $0xd0] sm:$0xff]  ;;  %v6272_v39 = vld [vmem:[#allocation3 + $0xe8] sm:$0xff] }
 0xa53   :  { %6526 = vmatpush1.bf16.msra.mxu0 %v6251_v50  ;;  %6690 = vmatpush1.bf16.msra.mxu1 %v6253_v24  ;;  %v6274_v27 = vld [vmem:[#allocation3 + $0xf8] sm:$0xff]  ;;  %v6271_v60 = vld [vmem:[#allocation3 + $0xe0] sm:$0xff]  ;;  %v6273_v40 = vld [vmem:[#allocation3 + $0xf0] sm:$0xff] }
 0xa54   :  { %6527 = vmatprep.subr.bf16.mxu0 %v6256_v10  ;;  %6691 = vmatprep.subr.bf16.mxu1 %v6258_v13  ;;  %v6276_v41 = vld [vmem:[#allocation3 + $0x108] sm:$0xff]  ;;  %v6278_v47 = vld [vmem:[#allocation3 + $0x118] sm:$0xff]  ;;  %v6275_v54 = vld [vmem:[#allocation3 + $0x100] sm:$0xff] }
 0xa55   :  { %v6277_v15 = vld [vmem:[#allocation3 + $0x110] sm:$0xff]  ;;  %v6280_v48 = vld [vmem:[#allocation3 + $0x128] sm:$0xff]  ;;  %v6282_v49 = vld [vmem:[#allocation3 + $0x138] sm:$0xff] }
 0xa56   :  { %v6279_v4 = vld [vmem:[#allocation3 + $0x120] sm:$0xff]  ;;  %v6281_v30 = vld [vmem:[#allocation3 + $0x130] sm:$0xff]  ;;  %v6284_v51 = vld [vmem:[#allocation3 + $0x148] sm:$0xff] }
 0xa57   :  { %6528 = vmatpush1.bf16.msra.mxu0 %v6255_v44  ;;  %6692 = vmatpush1.bf16.msra.mxu1 %v6257_v42  ;;  %v6286_v61 = vld [vmem:[#allocation3 + $0x158] sm:$0xff]  ;;  %v6283_v55 = vld [vmem:[#allocation3 + $0x140] sm:$0xff]  ;;  %v6285_v56 = vld [vmem:[#allocation3 + $0x150] sm:$0xff] }
 0xa58   :  { %6529 = vmatprep.subr.bf16.mxu0 %v6260_v29  ;;  %6693 = vmatprep.subr.bf16.mxu1 %v6262_v14  ;;  %v6288_v22 = vld [vmem:[#allocation3 + $0x168] sm:$0xff]  ;;  %v6290_v28 = vld [vmem:[#allocation3 + $0x178] sm:$0xff]  ;;  %v6287_v2 = vld [vmem:[#allocation3 + $0x160] sm:$0xff] }
 0xa59   :  { %v6289_v20 = vld [vmem:[#allocation3 + $0x170] sm:$0xff]  ;;  %v6292_v3 = vld [vmem:[#allocation3 + $0x188] sm:$0xff]  ;;  %v6294_v58 = vld [vmem:[#allocation3 + $0x198] sm:$0xff] }
 0xa5a   :  { %v6291_v59 = vld [vmem:[#allocation3 + $0x180] sm:$0xff]  ;;  %v6293_v0 = vld [vmem:[#allocation3 + $0x190] sm:$0xff]  ;;  %v6296_v6 = vld [vmem:[#allocation3 + $0x1a8] sm:$0xff] }
 0xa5b   :  { %6530 = vmatpush1.bf16.msra.mxu0 %v6259_v11  ;;  %6694 = vmatpush1.bf16.msra.mxu1 %v6261_v12  ;;  %v6298_v57 = vld [vmem:[#allocation3 + $0x1b8] sm:$0xff]  ;;  %v6295_v17 = vld [vmem:[#allocation3 + $0x1a0] sm:$0xff]  ;;  %v6297_v21 = vld [vmem:[#allocation3 + $0x1b0] sm:$0xff] }
 0xa5c   :  { %6531 = vmatprep.subr.bf16.mxu0 %v6264_v31  ;;  %6695 = vmatprep.subr.bf16.mxu1 %v6266_v52  ;;  %v6300_v62 = vld [vmem:[#allocation3 + $0x1c8] sm:$0xff]  ;;  %v6302_v35 = vld [vmem:[#allocation3 + $0x1d8] sm:$0xff]  ;;  %v6299_v5 = vld [vmem:[#allocation3 + $0x1c0] sm:$0xff] }
 0xa5d   :  { %v6301_v46 = vld [vmem:[#allocation3 + $0x1d0] sm:$0xff]  ;;  %v6304_v8 = vld [vmem:[#allocation3 + $0x1e8] sm:$0xff]  ;;  %v6306_v9 = vld [vmem:[#allocation3 + $0x1f8] sm:$0xff] }
 0xa5e   :  { %v6303_v63 = vld [vmem:[#allocation3 + $0x1e0] sm:$0xff]  ;;  %v6305_v50 = vld [vmem:[#allocation3 + $0x1f0] sm:$0xff]  ;;  %v6308_v24 = vld [vmem:[#allocation3 + $0x208] sm:$0xff] }
 0xa5f   :  { %6532 = vmatpush1.bf16.msra.mxu0 %v6263_v32  ;;  %6696 = vmatpush1.bf16.msra.mxu1 %v6265_v33  ;;  %v6310_v10 = vld [vmem:[#allocation3 + $0x218] sm:$0xff]  ;;  %v6307_v13 = vld [vmem:[#allocation3 + $0x200] sm:$0xff]  ;;  %v6309_v44 = vld [vmem:[#allocation3 + $0x210] sm:$0xff] }
 0xa60   :  { %6533 = vmatprep.subr.bf16.mxu0 %v6268_v34  ;;  %6697 = vmatprep.subr.bf16.mxu1 %v6270_v36  ;;  %v6312_v42 = vld [vmem:[#allocation3 + $0x228] sm:$0xff]  ;;  %v6314_v29 = vld [vmem:[#allocation3 + $0x238] sm:$0xff]  ;;  %v6311_v14 = vld [vmem:[#allocation3 + $0x220] sm:$0xff] }
 0xa61   :  { %v6313_v11 = vld [vmem:[#allocation3 + $0x230] sm:$0xff]  ;;  %v6316_v12 = vld [vmem:[#allocation3 + $0x248] sm:$0xff]  ;;  %v6318_v31 = vld [vmem:[#allocation3 + $0x258] sm:$0xff] }
 0xa62   :  { %v6315_v52 = vld [vmem:[#allocation3 + $0x240] sm:$0xff]  ;;  %v6317_v32 = vld [vmem:[#allocation3 + $0x250] sm:$0xff]  ;;  %v6320_v33 = vld [vmem:[#allocation3 + $0x268] sm:$0xff] }
 0xa63   :  { %6534 = vmatpush1.bf16.msra.mxu0 %v6267_v37  ;;  %6698 = vmatpush1.bf16.msra.mxu1 %v6269_v38  ;;  %v6319_v34 = vld [vmem:[#allocation3 + $0x260] sm:$0xff]  ;;  %v6321_v36 = vld [vmem:[#allocation3 + $0x270] sm:$0xff]  ;;  %v6324_v37 = vld [vmem:[#allocation3 + $0x288] sm:$0xff] }
 0xa64   :  { %6535 = vmatprep.subr.bf16.mxu0 %v6272_v39  ;;  %6699 = vmatprep.subr.bf16.mxu1 %v6274_v27  ;;  %v6326_v38 = vld [vmem:[#allocation3 + $0x298] sm:$0xff]  ;;  %v6325_v39 = vld [vmem:[#allocation3 + $0x290] sm:$0xff]  ;;  %v6328_v27 = vld [vmem:[#allocation3 + $0x2a8] sm:$0xff] }
 0xa67   :  { %6536 = vmatpush1.bf16.msra.mxu0 %v6271_v60  ;;  %6700 = vmatpush1.bf16.msra.mxu1 %v6273_v40  ;;  %v6330_v60 = vld [vmem:[#allocation3 + $0x2b8] sm:$0xff]  ;;  %v6327_v40 = vld [vmem:[#allocation3 + $0x2a0] sm:$0xff] }
 0xa68   :  { %6537 = vmatprep.subr.bf16.mxu0 %v6276_v41  ;;  %6701 = vmatprep.subr.bf16.mxu1 %v6278_v47  ;;  %v6329_v41 = vld [vmem:[#allocation3 + $0x2b0] sm:$0xff]  ;;  %v6332_v47 = vld [vmem:[#allocation3 + $0x2c8] sm:$0xff] }
 0xa6b   :  { %6538 = vmatpush1.bf16.msra.mxu0 %v6275_v54  ;;  %6702 = vmatpush1.bf16.msra.mxu1 %v6277_v15  ;;  %v6334_v54 = vld [vmem:[#allocation3 + $0x2d8] sm:$0xff]  ;;  %v6331_v15 = vld [vmem:[#allocation3 + $0x2c0] sm:$0xff] }
 0xa6c   :  { %6539 = vmatprep.subr.bf16.mxu0 %v6280_v48  ;;  %6703 = vmatprep.subr.bf16.mxu1 %v6282_v49  ;;  %v6333_v48 = vld [vmem:[#allocation3 + $0x2d0] sm:$0xff]  ;;  %v6336_v49 = vld [vmem:[#allocation3 + $0x2e8] sm:$0xff] }
 0xa6f   :  { %6540 = vmatpush1.bf16.msra.mxu0 %v6279_v4  ;;  %6704 = vmatpush1.bf16.msra.mxu1 %v6281_v30  ;;  %v6338_v4 = vld [vmem:[#allocation3 + $0x2f8] sm:$0xff]  ;;  %v6335_v30 = vld [vmem:[#allocation3 + $0x2e0] sm:$0xff] }
 0xa70   :  { %6541 = vmatprep.subr.bf16.mxu0 %v6284_v51  ;;  %6705 = vmatprep.subr.bf16.mxu1 %v6286_v61  ;;  %v6337_v51 = vld [vmem:[#allocation3 + $0x2f0] sm:$0xff]  ;;  %v6340_v61 = vld [vmem:[#allocation3 + $0x308] sm:$0xff] }
 0xa73   :  { %6542 = vmatpush1.bf16.msra.mxu0 %v6283_v55  ;;  %6706 = vmatpush1.bf16.msra.mxu1 %v6285_v56  ;;  %v6342_v55 = vld [vmem:[#allocation3 + $0x318] sm:$0xff]  ;;  %v6339_v56 = vld [vmem:[#allocation3 + $0x300] sm:$0xff] }
 0xa74   :  { %6543 = vmatprep.subr.bf16.mxu0 %v6288_v22  ;;  %6707 = vmatprep.subr.bf16.mxu1 %v6290_v28  ;;  %v6341_v22 = vld [vmem:[#allocation3 + $0x310] sm:$0xff]  ;;  %v6344_v28 = vld [vmem:[#allocation3 + $0x328] sm:$0xff] }
 0xa77   :  { %6544 = vmatpush1.bf16.msra.mxu0 %v6287_v2  ;;  %6708 = vmatpush1.bf16.msra.mxu1 %v6289_v20  ;;  %v6346_v2 = vld [vmem:[#allocation3 + $0x338] sm:$0xff]  ;;  %v6343_v20 = vld [vmem:[#allocation3 + $0x320] sm:$0xff] }
 0xa78   :  { %6545 = vmatprep.subr.bf16.mxu0 %v6292_v3  ;;  %6709 = vmatprep.subr.bf16.mxu1 %v6294_v58  ;;  %v6345_v3 = vld [vmem:[#allocation3 + $0x330] sm:$0xff]  ;;  %v6348_v58 = vld [vmem:[#allocation3 + $0x348] sm:$0xff] }
 0xa7b   :  { %6546 = vmatpush1.bf16.msra.mxu0 %v6291_v59  ;;  %6710 = vmatpush1.bf16.msra.mxu1 %v6293_v0  ;;  %v6350_v59 = vld [vmem:[#allocation3 + $0x358] sm:$0xff]  ;;  %v6347_v0 = vld [vmem:[#allocation3 + $0x340] sm:$0xff] }
 0xa7c   :  { %6547 = vmatprep.subr.bf16.mxu0 %v6296_v6  ;;  %6711 = vmatprep.subr.bf16.mxu1 %v6298_v57  ;;  %v6349_v6 = vld [vmem:[#allocation3 + $0x350] sm:$0xff]  ;;  %v6352_v57 = vld [vmem:[#allocation3 + $0x368] sm:$0xff] }
 0xa7f   :  { %6548 = vmatpush1.bf16.msra.mxu0 %v6295_v17  ;;  %6712 = vmatpush1.bf16.msra.mxu1 %v6297_v21  ;;  %v6354_v17 = vld [vmem:[#allocation3 + $0x378] sm:$0xff]  ;;  %v6351_v21 = vld [vmem:[#allocation3 + $0x360] sm:$0xff] }
 0xa80   :  { %6549 = vmatprep.subr.bf16.mxu0 %v6300_v62  ;;  %6713 = vmatprep.subr.bf16.mxu1 %v6302_v35  ;;  %v6353_v62 = vld [vmem:[#allocation3 + $0x370] sm:$0xff]  ;;  %v6356_v35 = vld [vmem:[#allocation3 + $0x388] sm:$0xff] }
 0xa83   :  { %6550 = vmatpush1.bf16.msra.mxu0 %v6299_v5  ;;  %6714 = vmatpush1.bf16.msra.mxu1 %v6301_v46  ;;  %v6358_v5 = vld [vmem:[#allocation3 + $0x398] sm:$0xff]  ;;  %v6355_v46 = vld [vmem:[#allocation3 + $0x380] sm:$0xff] }
 0xa84   :  { %6551 = vmatprep.subr.bf16.mxu0 %v6304_v8  ;;  %6715 = vmatprep.subr.bf16.mxu1 %v6306_v9  ;;  %v6357_v8 = vld [vmem:[#allocation3 + $0x390] sm:$0xff]  ;;  %v6360_v9 = vld [vmem:[#allocation3 + $0x3a8] sm:$0xff] }
 0xa87   :  { %6552 = vmatpush1.bf16.msra.mxu0 %v6303_v63  ;;  %6716 = vmatpush1.bf16.msra.mxu1 %v6305_v50  ;;  %v6362_v63 = vld [vmem:[#allocation3 + $0x3b8] sm:$0xff]  ;;  %v6359_v50 = vld [vmem:[#allocation3 + $0x3a0] sm:$0xff] }
 0xa88   :  { %6562 = vmatprep.subr.bf16.mxu0 %v6308_v24  ;;  %6726 = vmatprep.subr.bf16.mxu1 %v6310_v10  ;;  %v6361_v24 = vld [vmem:[#allocation3 + $0x3b0] sm:$0xff]  ;;  %v6364_v10 = vld [vmem:[#allocation3 + $0x3c8] sm:$0xff] }
 0xa8a   :  { %6554 = vmatmul.mubr.bf16.vlgmr.msra.gmra.mrb[24].mxu0 %v7792_v25  ;;  %6718 = vmatmul.mubr.bf16.vlgmr.msra.gmra.mrb[24].mxu1 %v7792_v25  ;;  %v6322_v25 = vld [vmem:[#allocation3 + $0x278] sm:$0xff] }
 0xa8b   :  { %6563 = vmatpush1.bf16.msra.mxu0 %v6307_v13  ;;  %6727 = vmatpush1.bf16.msra.mxu1 %v6309_v44  ;;  %v6366_v13 = vld [vmem:[#allocation3 + $0x3d8] sm:$0xff]  ;;  %v6363_v44 = vld [vmem:[#allocation3 + $0x3c0] sm:$0xff] }
 0xa8c   :  { %6564 = vmatprep.subr.bf16.mxu0 %v6312_v42  ;;  %6728 = vmatprep.subr.bf16.mxu1 %v6314_v29  ;;  %v6365_v42 = vld [vmem:[#allocation3 + $0x3d0] sm:$0xff]  ;;  %v6368_v29 = vld [vmem:[#allocation3 + $0x3e8] sm:$0xff] }
 0xa8d   :  { %6594 = vmatprep.mubr.bf16.mxu0 %v7798_v16  ;;  %6758 = vmatprep.mubr.bf16.mxu1 %v7798_v16  ;;  %v6323_v16 = vld [vmem:[#allocation3 + $0x280] sm:$0xff] }
 0xa8f   :  { %6565 = vmatpush1.bf16.msra.mxu0 %v6311_v14  ;;  %6729 = vmatpush1.bf16.msra.mxu1 %v6313_v11  ;;  %v6370_v14 = vld [vmem:[#allocation3 + $0x3f8] sm:$0xff]  ;;  %v6367_v11 = vld [vmem:[#allocation3 + $0x3e0] sm:$0xff] }
 0xa90   :  { %6566 = vmatprep.subr.bf16.mxu0 %v6316_v12  ;;  %6730 = vmatprep.subr.bf16.mxu1 %v6318_v31  ;;  %v6369_v12 = vld [vmem:[#allocation3 + $0x3f0] sm:$0xff]  ;;  %v6372_v31 = vld [vmem:[#allocation3 + $0x408] sm:$0xff] }
 0xa93   :  { %6567 = vmatpush1.bf16.msra.mxu0 %v6315_v52  ;;  %6731 = vmatpush1.bf16.msra.mxu1 %v6317_v32  ;;  %v6374_v52 = vld [vmem:[#allocation3 + $0x418] sm:$0xff]  ;;  %v6371_v32 = vld [vmem:[#allocation3 + $0x400] sm:$0xff] }
 0xa94   :  { %6568 = vmatprep.subr.bf16.mxu0 %v6320_v33  ;;  %6732 = vmatprep.subr.bf16.mxu1 %v6322_v25  ;;  %v6373_v33 = vld [vmem:[#allocation3 + $0x410] sm:$0xff]  ;;  %v6376_v25 = vld [vmem:[#allocation3 + $0x428] sm:$0xff] }
 0xa97   :  { %6569 = vmatpush1.bf16.msra.mxu0 %v6319_v34  ;;  %6733 = vmatpush1.bf16.msra.mxu1 %v6321_v36  ;;  %v6378_v34 = vld [vmem:[#allocation3 + $0x438] sm:$0xff]  ;;  %v6375_v36 = vld [vmem:[#allocation3 + $0x420] sm:$0xff] }
 0xa98   :  { %6570 = vmatprep.subr.bf16.mxu0 %v6324_v37  ;;  %6734 = vmatprep.subr.bf16.mxu1 %v6326_v38  ;;  %v6377_v37 = vld [vmem:[#allocation3 + $0x430] sm:$0xff]  ;;  %v6380_v38 = vld [vmem:[#allocation3 + $0x448] sm:$0xff] }
 0xa9b   :  { %6571 = vmatpush1.bf16.msra.mxu0 %v6323_v16  ;;  %6735 = vmatpush1.bf16.msra.mxu1 %v6325_v39  ;;  %v6382_v16 = vld [vmem:[#allocation3 + $0x458] sm:$0xff]  ;;  %v6379_v39 = vld [vmem:[#allocation3 + $0x440] sm:$0xff] }
 0xa9c   :  { %6572 = vmatprep.subr.bf16.mxu0 %v6328_v27  ;;  %6736 = vmatprep.subr.bf16.mxu1 %v6330_v60  ;;  %v6381_v27 = vld [vmem:[#allocation3 + $0x450] sm:$0xff]  ;;  %v6384_v60 = vld [vmem:[#allocation3 + $0x468] sm:$0xff] }
 0xa9f   :  { %6573 = vmatpush1.bf16.msra.mxu0 %v6327_v40  ;;  %6737 = vmatpush1.bf16.msra.mxu1 %v6329_v41  ;;  %v6383_v40 = vld [vmem:[#allocation3 + $0x460] sm:$0xff]  ;;  %v6385_v41 = vld [vmem:[#allocation3 + $0x470] sm:$0xff] }
 0xaa0   :  { %6574 = vmatprep.subr.bf16.mxu0 %v6332_v47  ;;  %6738 = vmatprep.subr.bf16.mxu1 %v6334_v54  ;;  %v6388_v47 = vld [vmem:[#allocation3 + $0x488] sm:$0xff]  ;;  %v6390_v54 = vld [vmem:[#allocation3 + $0x498] sm:$0xff] }
 0xaa3   :  { %6575 = vmatpush1.bf16.msra.mxu0 %v6331_v15  ;;  %6739 = vmatpush1.bf16.msra.mxu1 %v6333_v48  ;;  %v6389_v15 = vld [vmem:[#allocation3 + $0x490] sm:$0xff]  ;;  %v6392_v48 = vld [vmem:[#allocation3 + $0x4a8] sm:$0xff] }
 0xaa4   :  { %6576 = vmatprep.subr.bf16.mxu0 %v6336_v49  ;;  %6740 = vmatprep.subr.bf16.mxu1 %v6338_v4  ;;  %v6394_v49 = vld [vmem:[#allocation3 + $0x4b8] sm:$0xff]  ;;  %v6391_v4 = vld [vmem:[#allocation3 + $0x4a0] sm:$0xff] }
 0xaa7   :  { %6577 = vmatpush1.bf16.msra.mxu0 %v6335_v30  ;;  %6741 = vmatpush1.bf16.msra.mxu1 %v6337_v51  ;;  %v6393_v30 = vld [vmem:[#allocation3 + $0x4b0] sm:$0xff]  ;;  %v6396_v51 = vld [vmem:[#allocation3 + $0x4c8] sm:$0xff] }
 0xaa8   :  { %6578 = vmatprep.subr.bf16.mxu0 %v6340_v61  ;;  %6742 = vmatprep.subr.bf16.mxu1 %v6342_v55  ;;  %v6398_v61 = vld [vmem:[#allocation3 + $0x4d8] sm:$0xff]  ;;  %v6395_v55 = vld [vmem:[#allocation3 + $0x4c0] sm:$0xff] }
 0xaab   :  { %6579 = vmatpush1.bf16.msra.mxu0 %v6339_v56  ;;  %6743 = vmatpush1.bf16.msra.mxu1 %v6341_v22  ;;  %v6397_v56 = vld [vmem:[#allocation3 + $0x4d0] sm:$0xff]  ;;  %v6400_v22 = vld [vmem:[#allocation3 + $0x4e8] sm:$0xff] }
 0xaac   :  { %6580 = vmatprep.subr.bf16.mxu0 %v6344_v28  ;;  %6744 = vmatprep.subr.bf16.mxu1 %v6346_v2  ;;  %v6402_v28 = vld [vmem:[#allocation3 + $0x4f8] sm:$0xff]  ;;  %v6399_v2 = vld [vmem:[#allocation3 + $0x4e0] sm:$0xff] }
 0xaaf   :  { %6581 = vmatpush1.bf16.msra.mxu0 %v6343_v20  ;;  %6745 = vmatpush1.bf16.msra.mxu1 %v6345_v3  ;;  %v6401_v20 = vld [vmem:[#allocation3 + $0x4f0] sm:$0xff]  ;;  %v6404_v3 = vld [vmem:[#allocation3 + $0x508] sm:$0xff] }
 0xab0   :  { %6582 = vmatprep.subr.bf16.mxu0 %v6348_v58  ;;  %6746 = vmatprep.subr.bf16.mxu1 %v6350_v59  ;;  %v6406_v58 = vld [vmem:[#allocation3 + $0x518] sm:$0xff]  ;;  %v6403_v59 = vld [vmem:[#allocation3 + $0x500] sm:$0xff] }
 0xab3   :  { %6583 = vmatpush1.bf16.msra.mxu0 %v6347_v0  ;;  %6747 = vmatpush1.bf16.msra.mxu1 %v6349_v6  ;;  %v6405_v0 = vld [vmem:[#allocation3 + $0x510] sm:$0xff]  ;;  %v6408_v6 = vld [vmem:[#allocation3 + $0x528] sm:$0xff] }
 0xab4   :  { %6584 = vmatprep.subr.bf16.mxu0 %v6352_v57  ;;  %6748 = vmatprep.subr.bf16.mxu1 %v6354_v17  ;;  %v6410_v57 = vld [vmem:[#allocation3 + $0x538] sm:$0xff]  ;;  %v6407_v17 = vld [vmem:[#allocation3 + $0x520] sm:$0xff] }
 0xab7   :  { %6585 = vmatpush1.bf16.msra.mxu0 %v6351_v21  ;;  %6749 = vmatpush1.bf16.msra.mxu1 %v6353_v62  ;;  %v6409_v21 = vld [vmem:[#allocation3 + $0x530] sm:$0xff]  ;;  %v6412_v62 = vld [vmem:[#allocation3 + $0x548] sm:$0xff] }
 0xab8   :  { %6586 = vmatprep.subr.bf16.mxu0 %v6356_v35  ;;  %6750 = vmatprep.subr.bf16.mxu1 %v6358_v5  ;;  %v6414_v35 = vld [vmem:[#allocation3 + $0x558] sm:$0xff]  ;;  %v6411_v5 = vld [vmem:[#allocation3 + $0x540] sm:$0xff] }
 0xabb   :  { %6587 = vmatpush1.bf16.msra.mxu0 %v6355_v46  ;;  %6751 = vmatpush1.bf16.msra.mxu1 %v6357_v8  ;;  %v6413_v46 = vld [vmem:[#allocation3 + $0x550] sm:$0xff]  ;;  %v6416_v8 = vld [vmem:[#allocation3 + $0x568] sm:$0xff] }
 0xabc   :  { %6588 = vmatprep.subr.bf16.mxu0 %v6360_v9  ;;  %6752 = vmatprep.subr.bf16.mxu1 %v6362_v63  ;;  %v6418_v9 = vld [vmem:[#allocation3 + $0x578] sm:$0xff]  ;;  %v6415_v63 = vld [vmem:[#allocation3 + $0x560] sm:$0xff] }
 0xabf   :  { %6589 = vmatpush1.bf16.msra.mxu0 %v6359_v50  ;;  %6753 = vmatpush1.bf16.msra.mxu1 %v6361_v24  ;;  %v6417_v50 = vld [vmem:[#allocation3 + $0x570] sm:$0xff]  ;;  %v6420_v24 = vld [vmem:[#allocation3 + $0x588] sm:$0xff] }
 0xac0   :  { %6590 = vmatprep.subr.bf16.mxu0 %v6364_v10  ;;  %6754 = vmatprep.subr.bf16.mxu1 %v6366_v13  ;;  %v6422_v10 = vld [vmem:[#allocation3 + $0x598] sm:$0xff]  ;;  %v6419_v13 = vld [vmem:[#allocation3 + $0x580] sm:$0xff] }
 0xac3   :  { %6591 = vmatpush1.bf16.msra.mxu0 %v6363_v44  ;;  %6755 = vmatpush1.bf16.msra.mxu1 %v6365_v42  ;;  %v6421_v44 = vld [vmem:[#allocation3 + $0x590] sm:$0xff]  ;;  %v6424_v42 = vld [vmem:[#allocation3 + $0x5a8] sm:$0xff] }
 0xac4   :  { %6592 = vmatprep.subr.bf16.mxu0 %v6368_v29  ;;  %6756 = vmatprep.subr.bf16.mxu1 %v6370_v14  ;;  %v6426_v29 = vld [vmem:[#allocation3 + $0x5b8] sm:$0xff]  ;;  %v6423_v14 = vld [vmem:[#allocation3 + $0x5a0] sm:$0xff] }
 0xac7   :  { %6593 = vmatpush1.bf16.msra.mxu0 %v6367_v11  ;;  %6757 = vmatpush1.bf16.msra.mxu1 %v6369_v12  ;;  %v6425_v11 = vld [vmem:[#allocation3 + $0x5b0] sm:$0xff]  ;;  %v6428_v12 = vld [vmem:[#allocation3 + $0x5c8] sm:$0xff] }
 0xac8   :  { %6603 = vmatprep.subr.bf16.mxu0 %v6372_v31  ;;  %6767 = vmatprep.subr.bf16.mxu1 %v6374_v52  ;;  %v6430_v31 = vld [vmem:[#allocation3 + $0x5d8] sm:$0xff]  ;;  %v6427_v52 = vld [vmem:[#allocation3 + $0x5c0] sm:$0xff] }
 0xaca   :  { %6595 = vmatmul.mubr.bf16.vlgmr.msra.gmra.mrb[24].mxu0 %v7794_v26  ;;  %6759 = vmatmul.mubr.bf16.vlgmr.msra.gmra.mrb[24].mxu1 %v7794_v26  ;;  %v6386_v26 = vld [vmem:[#allocation3 + $0x478] sm:$0xff] }
 0xacb   :  { %6604 = vmatpush1.bf16.msra.mxu0 %v6371_v32  ;;  %6768 = vmatpush1.bf16.msra.mxu1 %v6373_v33  ;;  %v6429_v32 = vld [vmem:[#allocation3 + $0x5d0] sm:$0xff]  ;;  %v6432_v33 = vld [vmem:[#allocation3 + $0x5e8] sm:$0xff] }
 0xacc   :  { %6605 = vmatprep.subr.bf16.mxu0 %v6376_v25  ;;  %6769 = vmatprep.subr.bf16.mxu1 %v6378_v34  ;;  %v6434_v25 = vld [vmem:[#allocation3 + $0x5f8] sm:$0xff]  ;;  %v6431_v34 = vld [vmem:[#allocation3 + $0x5e0] sm:$0xff] }
 0xacd   :  { %6635 = vmatprep.mubr.bf16.mxu0 %v7830_v53  ;;  %6799 = vmatprep.mubr.bf16.mxu1 %v7830_v53  ;;  %v6387_v53 = vld [vmem:[#allocation3 + $0x480] sm:$0xff] }
 0xacf   :  { %6606 = vmatpush1.bf16.msra.mxu0 %v6375_v36  ;;  %6770 = vmatpush1.bf16.msra.mxu1 %v6377_v37  ;;  %v6433_v36 = vld [vmem:[#allocation3 + $0x5f0] sm:$0xff]  ;;  %v6436_v37 = vld [vmem:[#allocation3 + $0x608] sm:$0xff] }
 0xad0   :  { %6607 = vmatprep.subr.bf16.mxu0 %v6380_v38  ;;  %6771 = vmatprep.subr.bf16.mxu1 %v6382_v16  ;;  %v6438_v38 = vld [vmem:[#allocation3 + $0x618] sm:$0xff]  ;;  %v6435_v16 = vld [vmem:[#allocation3 + $0x600] sm:$0xff] }
 0xad3   :  { %6608 = vmatpush1.bf16.msra.mxu0 %v6379_v39  ;;  %6772 = vmatpush1.bf16.msra.mxu1 %v6381_v27  ;;  %v6437_v39 = vld [vmem:[#allocation3 + $0x610] sm:$0xff]  ;;  %v6440_v27 = vld [vmem:[#allocation3 + $0x628] sm:$0xff] }
 0xad4   :  { %6609 = vmatprep.subr.bf16.mxu0 %v6384_v60  ;;  %6773 = vmatprep.subr.bf16.mxu1 %v6386_v26  ;;  %v6442_v60 = vld [vmem:[#allocation3 + $0x638] sm:$0xff]  ;;  %v6439_v26 = vld [vmem:[#allocation3 + $0x620] sm:$0xff] }
 0xad7   :  { %6610 = vmatpush1.bf16.msra.mxu0 %v6383_v40  ;;  %6774 = vmatpush1.bf16.msra.mxu1 %v6385_v41  ;;  %v6441_v40 = vld [vmem:[#allocation3 + $0x630] sm:$0xff]  ;;  %v6444_v41 = vld [vmem:[#allocation3 + $0x648] sm:$0xff] }
 0xad8   :  { %6611 = vmatprep.subr.bf16.mxu0 %v6388_v47  ;;  %6775 = vmatprep.subr.bf16.mxu1 %v6390_v54  ;;  %v6446_v47 = vld [vmem:[#allocation3 + $0x658] sm:$0xff]  ;;  %v6443_v54 = vld [vmem:[#allocation3 + $0x640] sm:$0xff] }
 0xadb   :  { %6612 = vmatpush1.bf16.msra.mxu0 %v6387_v53  ;;  %6776 = vmatpush1.bf16.msra.mxu1 %v6389_v15  ;;  %v6445_v53 = vld [vmem:[#allocation3 + $0x650] sm:$0xff]  ;;  %v6448_v15 = vld [vmem:[#allocation3 + $0x668] sm:$0xff] }
 0xadc   :  { %6613 = vmatprep.subr.bf16.mxu0 %v6392_v48  ;;  %6777 = vmatprep.subr.bf16.mxu1 %v6394_v49  ;;  %v6447_v48 = vld [vmem:[#allocation3 + $0x660] sm:$0xff]  ;;  %v6449_v49 = vld [vmem:[#allocation3 + $0x670] sm:$0xff] }
 0xadf   :  { %6614 = vmatpush1.bf16.msra.mxu0 %v6391_v4  ;;  %6778 = vmatpush1.bf16.msra.mxu1 %v6393_v30  ;;  %v6452_v4 = vld [vmem:[#allocation3 + $0x688] sm:$0xff]  ;;  %v6454_v30 = vld [vmem:[#allocation3 + $0x698] sm:$0xff] }
 0xae0   :  { %6615 = vmatprep.subr.bf16.mxu0 %v6396_v51  ;;  %6779 = vmatprep.subr.bf16.mxu1 %v6398_v61  ;;  %v6453_v51 = vld [vmem:[#allocation3 + $0x690] sm:$0xff]  ;;  %v6456_v61 = vld [vmem:[#allocation3 + $0x6a8] sm:$0xff] }
 0xae3   :  { %6616 = vmatpush1.bf16.msra.mxu0 %v6395_v55  ;;  %6780 = vmatpush1.bf16.msra.mxu1 %v6397_v56  ;;  %v6458_v55 = vld [vmem:[#allocation3 + $0x6b8] sm:$0xff]  ;;  %v6455_v56 = vld [vmem:[#allocation3 + $0x6a0] sm:$0xff] }
 0xae4   :  { %6617 = vmatprep.subr.bf16.mxu0 %v6400_v22  ;;  %6781 = vmatprep.subr.bf16.mxu1 %v6402_v28  ;;  %v6457_v22 = vld [vmem:[#allocation3 + $0x6b0] sm:$0xff]  ;;  %v6460_v28 = vld [vmem:[#allocation3 + $0x6c8] sm:$0xff] }
 0xae7   :  { %6618 = vmatpush1.bf16.msra.mxu0 %v6399_v2  ;;  %6782 = vmatpush1.bf16.msra.mxu1 %v6401_v20  ;;  %v6462_v2 = vld [vmem:[#allocation3 + $0x6d8] sm:$0xff]  ;;  %v6459_v20 = vld [vmem:[#allocation3 + $0x6c0] sm:$0xff] }
 0xae8   :  { %6619 = vmatprep.subr.bf16.mxu0 %v6404_v3  ;;  %6783 = vmatprep.subr.bf16.mxu1 %v6406_v58  ;;  %v6461_v3 = vld [vmem:[#allocation3 + $0x6d0] sm:$0xff]  ;;  %v6464_v58 = vld [vmem:[#allocation3 + $0x6e8] sm:$0xff] }
 0xaeb   :  { %6620 = vmatpush1.bf16.msra.mxu0 %v6403_v59  ;;  %6784 = vmatpush1.bf16.msra.mxu1 %v6405_v0  ;;  %v6466_v59 = vld [vmem:[#allocation3 + $0x6f8] sm:$0xff]  ;;  %v6463_v0 = vld [vmem:[#allocation3 + $0x6e0] sm:$0xff] }
 0xaec   :  { %6621 = vmatprep.subr.bf16.mxu0 %v6408_v6  ;;  %6785 = vmatprep.subr.bf16.mxu1 %v6410_v57  ;;  %v6465_v6 = vld [vmem:[#allocation3 + $0x6f0] sm:$0xff]  ;;  %v6468_v57 = vld [vmem:[#allocation3 + $0x708] sm:$0xff] }
 0xaef   :  { %6622 = vmatpush1.bf16.msra.mxu0 %v6407_v17  ;;  %6786 = vmatpush1.bf16.msra.mxu1 %v6409_v21  ;;  %v6470_v17 = vld [vmem:[#allocation3 + $0x718] sm:$0xff]  ;;  %v6467_v21 = vld [vmem:[#allocation3 + $0x700] sm:$0xff] }
 0xaf0   :  { %6623 = vmatprep.subr.bf16.mxu0 %v6412_v62  ;;  %6787 = vmatprep.subr.bf16.mxu1 %v6414_v35  ;;  %v6469_v62 = vld [vmem:[#allocation3 + $0x710] sm:$0xff]  ;;  %v6472_v35 = vld [vmem:[#allocation3 + $0x728] sm:$0xff] }
 0xaf3   :  { %6624 = vmatpush1.bf16.msra.mxu0 %v6411_v5  ;;  %6788 = vmatpush1.bf16.msra.mxu1 %v6413_v46  ;;  %v6474_v5 = vld [vmem:[#allocation3 + $0x738] sm:$0xff]  ;;  %v6471_v46 = vld [vmem:[#allocation3 + $0x720] sm:$0xff] }
 0xaf4   :  { %6625 = vmatprep.subr.bf16.mxu0 %v6416_v8  ;;  %6789 = vmatprep.subr.bf16.mxu1 %v6418_v9  ;;  %v6473_v8 = vld [vmem:[#allocation3 + $0x730] sm:$0xff]  ;;  %v6476_v9 = vld [vmem:[#allocation3 + $0x748] sm:$0xff] }
 0xaf7   :  { %6626 = vmatpush1.bf16.msra.mxu0 %v6415_v63  ;;  %6790 = vmatpush1.bf16.msra.mxu1 %v6417_v50  ;;  %v6478_v63 = vld [vmem:[#allocation3 + $0x758] sm:$0xff]  ;;  %v6475_v50 = vld [vmem:[#allocation3 + $0x740] sm:$0xff] }
 0xaf8   :  { %6627 = vmatprep.subr.bf16.mxu0 %v6420_v24  ;;  %6791 = vmatprep.subr.bf16.mxu1 %v6422_v10  ;;  %v6477_v24 = vld [vmem:[#allocation3 + $0x750] sm:$0xff]  ;;  %v6480_v10 = vld [vmem:[#allocation3 + $0x768] sm:$0xff] }
 0xafb   :  { %6628 = vmatpush1.bf16.msra.mxu0 %v6419_v13  ;;  %6792 = vmatpush1.bf16.msra.mxu1 %v6421_v44  ;;  %v6482_v13 = vld [vmem:[#allocation3 + $0x778] sm:$0xff]  ;;  %v6479_v44 = vld [vmem:[#allocation3 + $0x760] sm:$0xff] }
 0xafc   :  { %6629 = vmatprep.subr.bf16.mxu0 %v6424_v42  ;;  %6793 = vmatprep.subr.bf16.mxu1 %v6426_v29  ;;  %v6481_v42 = vld [vmem:[#allocation3 + $0x770] sm:$0xff]  ;;  %v6484_v29 = vld [vmem:[#allocation3 + $0x788] sm:$0xff] }
 0xaff   :  { %6630 = vmatpush1.bf16.msra.mxu0 %v6423_v14  ;;  %6794 = vmatpush1.bf16.msra.mxu1 %v6425_v11  ;;  %v6486_v14 = vld [vmem:[#allocation3 + $0x798] sm:$0xff]  ;;  %v6483_v11 = vld [vmem:[#allocation3 + $0x780] sm:$0xff] }
 0xb00   :  { %6631 = vmatprep.subr.bf16.mxu0 %v6428_v12  ;;  %6795 = vmatprep.subr.bf16.mxu1 %v6430_v31  ;;  %v6485_v12 = vld [vmem:[#allocation3 + $0x790] sm:$0xff]  ;;  %v6488_v31 = vld [vmem:[#allocation3 + $0x7a8] sm:$0xff] }
 0xb03   :  { %6632 = vmatpush1.bf16.msra.mxu0 %v6427_v52  ;;  %6796 = vmatpush1.bf16.msra.mxu1 %v6429_v32  ;;  %v6490_v52 = vld [vmem:[#allocation3 + $0x7b8] sm:$0xff]  ;;  %v6487_v32 = vld [vmem:[#allocation3 + $0x7a0] sm:$0xff] }
 0xb04   :  { %6633 = vmatprep.subr.bf16.mxu0 %v6432_v33  ;;  %6797 = vmatprep.subr.bf16.mxu1 %v6434_v25  ;;  %v6489_v33 = vld [vmem:[#allocation3 + $0x7b0] sm:$0xff]  ;;  %v6492_v25 = vld [vmem:[#allocation3 + $0x7c8] sm:$0xff] }
 0xb07   :  { %6634 = vmatpush1.bf16.msra.mxu0 %v6431_v34  ;;  %6798 = vmatpush1.bf16.msra.mxu1 %v6433_v36  ;;  %v6494_v34 = vld [vmem:[#allocation3 + $0x7d8] sm:$0xff]  ;;  %v6491_v36 = vld [vmem:[#allocation3 + $0x7c0] sm:$0xff] }
 0xb08   :  { %6644 = vmatprep.subr.bf16.mxu0 %v6436_v37  ;;  %6808 = vmatprep.subr.bf16.mxu1 %v6438_v38  ;;  %v6493_v37 = vld [vmem:[#allocation3 + $0x7d0] sm:$0xff]  ;;  %v6496_v38 = vld [vmem:[#allocation3 + $0x7e8] sm:$0xff] }
 0xb0a   :  { %6636 = vmatmul.mubr.bf16.vlgmr.msra.gmra.mrb[24].mxu0 %v7826_v45  ;;  %6800 = vmatmul.mubr.bf16.vlgmr.msra.gmra.mrb[24].mxu1 %v7826_v45  ;;  %v6450_v45 = vld [vmem:[#allocation3 + $0x678] sm:$0xff] }
 0xb0b   :  { %6645 = vmatpush1.bf16.msra.mxu0 %v6435_v16  ;;  %6809 = vmatpush1.bf16.msra.mxu1 %v6437_v39  ;;  %v6498_v16 = vld [vmem:[#allocation3 + $0x7f8] sm:$0xff]  ;;  %v6495_v39 = vld [vmem:[#allocation3 + $0x7e0] sm:$0xff] }
 0xb0c   :  { %6646 = vmatprep.subr.bf16.mxu0 %v6440_v27  ;;  %6810 = vmatprep.subr.bf16.mxu1 %v6442_v60  ;;  %v6497_v27 = vld [vmem:[#allocation3 + $0x7f0] sm:$0xff] }
 0xb0d   :  { %6676 = vmatprep.mubr.bf16.mxu0 %v7832_v1  ;;  %6840 = vmatprep.mubr.bf16.mxu1 %v7832_v1  ;;  %v6451_v1 = vld [vmem:[#allocation3 + $0x680] sm:$0xff]  ;;  %v6499_v60 = vld [vmem:[#allocation14] sm:$0xf] }
 0xb0f   :  { %6647 = vmatpush1.bf16.msra.mxu0 %v6439_v26  ;;  %6811 = vmatpush1.bf16.msra.mxu1 %v6441_v40  ;;  %v6504_v26 = vrot.slane %v6499_v60, %v7597_v18  ;;  %v6512_v40 = vrot.slane %v6499_v60, %v7600_v19 }
 0xb10   :  { %6648 = vmatprep.subr.bf16.mxu0 %v6444_v41  ;;  %6812 = vmatprep.subr.bf16.mxu1 %v6446_v47  ;;  %v6508_v41 = vrot.slane %v6499_v60, %v7603_v23  ;;  %v6516_v47 = vrot.slane %v6499_v60, %v7606_v43 }
 0xb13   :  { %6649 = vmatpush1.bf16.msra.mxu0 %v6443_v54  ;;  %6813 = vmatpush1.bf16.msra.mxu1 %v6445_v53 }
 0xb14   :  { %6650 = vmatprep.subr.bf16.mxu0 %v6448_v15  ;;  %6814 = vmatprep.subr.bf16.mxu1 %v6450_v45 }
 0xb17   :  { %6651 = vmatpush1.bf16.msra.mxu0 %v6447_v48  ;;  %6815 = vmatpush1.bf16.msra.mxu1 %v6449_v49 }
 0xb18   :  { %6652 = vmatprep.subr.bf16.mxu0 %v6452_v4  ;;  %6816 = vmatprep.subr.bf16.mxu1 %v6454_v30 }
 0xb1b   :  { %6653 = vmatpush1.bf16.msra.mxu0 %v6451_v1  ;;  %6817 = vmatpush1.bf16.msra.mxu1 %v6453_v51 }
 0xb1c   :  { %6654 = vmatprep.subr.bf16.mxu0 %v6456_v61  ;;  %6818 = vmatprep.subr.bf16.mxu1 %v6458_v55 }
 0xb1f   :  { %6655 = vmatpush1.bf16.msra.mxu0 %v6455_v56  ;;  %6819 = vmatpush1.bf16.msra.mxu1 %v6457_v22 }
 0xb20   :  { %6656 = vmatprep.subr.bf16.mxu0 %v6460_v28  ;;  %6820 = vmatprep.subr.bf16.mxu1 %v6462_v2 }
 0xb23   :  { %6657 = vmatpush1.bf16.msra.mxu0 %v6459_v20  ;;  %6821 = vmatpush1.bf16.msra.mxu1 %v6461_v3 }
 0xb24   :  { %6658 = vmatprep.subr.bf16.mxu0 %v6464_v58  ;;  %6822 = vmatprep.subr.bf16.mxu1 %v6466_v59 }
 0xb27   :  { %6659 = vmatpush1.bf16.msra.mxu0 %v6463_v0  ;;  %6823 = vmatpush1.bf16.msra.mxu1 %v6465_v6 }
 0xb28   :  { %6660 = vmatprep.subr.bf16.mxu0 %v6468_v57  ;;  %6824 = vmatprep.subr.bf16.mxu1 %v6470_v17 }
 0xb2b   :  { %6661 = vmatpush1.bf16.msra.mxu0 %v6467_v21  ;;  %6825 = vmatpush1.bf16.msra.mxu1 %v6469_v62 }
 0xb2c   :  { %6662 = vmatprep.subr.bf16.mxu0 %v6472_v35  ;;  %6826 = vmatprep.subr.bf16.mxu1 %v6474_v5 }
 0xb2f   :  { %6663 = vmatpush1.bf16.msra.mxu0 %v6471_v46  ;;  %6827 = vmatpush1.bf16.msra.mxu1 %v6473_v8 }
 0xb30   :  { %6664 = vmatprep.subr.bf16.mxu0 %v6476_v9  ;;  %6828 = vmatprep.subr.bf16.mxu1 %v6478_v63 }
 0xb33   :  { %6665 = vmatpush1.bf16.msra.mxu0 %v6475_v50  ;;  %6829 = vmatpush1.bf16.msra.mxu1 %v6477_v24 }
 0xb34   :  { %6666 = vmatprep.subr.bf16.mxu0 %v6480_v10  ;;  %6830 = vmatprep.subr.bf16.mxu1 %v6482_v13 }
 0xb37   :  { %6667 = vmatpush1.bf16.msra.mxu0 %v6479_v44  ;;  %6831 = vmatpush1.bf16.msra.mxu1 %v6481_v42 }
 0xb38   :  { %6668 = vmatprep.subr.bf16.mxu0 %v6484_v29  ;;  %6832 = vmatprep.subr.bf16.mxu1 %v6486_v14 }
 0xb3b   :  { %6669 = vmatpush1.bf16.msra.mxu0 %v6483_v11  ;;  %6833 = vmatpush1.bf16.msra.mxu1 %v6485_v12 }
 0xb3c   :  { %6670 = vmatprep.subr.bf16.mxu0 %v6488_v31  ;;  %6834 = vmatprep.subr.bf16.mxu1 %v6490_v52 }
 0xb3f   :  { %6671 = vmatpush1.bf16.msra.mxu0 %v6487_v32  ;;  %6835 = vmatpush1.bf16.msra.mxu1 %v6489_v33 }
 0xb40   :  { %6672 = vmatprep.subr.bf16.mxu0 %v6492_v25  ;;  %6836 = vmatprep.subr.bf16.mxu1 %v6494_v34 }
 0xb43   :  { %6673 = vmatpush1.bf16.msra.mxu0 %v6491_v36  ;;  %6837 = vmatpush1.bf16.msra.mxu1 %v6493_v37 }
 0xb44   :  { %6674 = vmatprep.subr.bf16.mxu0 %v6496_v38  ;;  %6838 = vmatprep.subr.bf16.mxu1 %v6498_v16 }
 0xb47   :  { %6675 = vmatpush1.bf16.msra.mxu0 %v6495_v39  ;;  %6839 = vmatpush1.bf16.msra.mxu1 %v6497_v27 }
 0xb4a   :  { %6677 = vmatmul.mubr.bf16.vlgmr.msra.gmra.mrb[24].mxu0 %v7828_v7  ;;  %6841 = vmatmul.mubr.bf16.vlgmr.msra.gmra.mrb[24].mxu1 %v7828_v7 }
 0xc1d   :  { %v6678_v54 = vpop.f32.mrb[24].mxu0  ;;  %v6842_v53 = vpop.f32.mrb[24].mxu1 }
 0xc1e   :  { %v6896_v15 = vadd.f32 %v6678_v54, %v6504_v26  ;;  %v6898_v45 = vadd.f32 %v6842_v53, %v6512_v40  ;;  %v6680_v48 = vpop.f32.mrb[25].mxu0  ;;  %v6844_v49 = vpop.f32.mrb[25].mxu1 }
 0xc1f   :  { %v6897_v4 = vadd.f32 %v6680_v48, %v6508_v41  ;;  %v6899_v30 = vadd.f32 %v6844_v49, %v6516_v47  ;;  %v6682_v7 = vpop.f32.mrb[26].mxu0  ;;  %v6846_v1 = vpop.f32.mrb[26].mxu1 }
 0xc20   :  { %6849 = vst [vmem:[#allocation16] sm:$0xff] %v6896_v15  ;;  %6851 = vst [vmem:[#allocation16 + $0x10] sm:$0xff] %v6898_v45  ;;  %v6683_v18 = vpop.f32.mrb[27].mxu0  ;;  %v6847_v19 = vpop.f32.mrb[27].mxu1 }
 0xc21   :  { %6850 = vst [vmem:[#allocation16 + $0x8] sm:$0xff] %v6897_v4  ;;  %6852 = vst [vmem:[#allocation16 + $0x18] sm:$0xff] %v6899_v30 }
 0xc22   :  { %7328 = shalt.err (!%p7325_p4)
}
 0xc23   :  { %s7329_s21 = scalar_lea.hbm %s7875_s9, 512 }
 0xc24   :  { %p7330_p5 = scmp.ne.s32.totalorder %s7875_s9, %s7329_s21  ;;  %p7333_p6 = scmp.lt.u32.totalorder %s7329_s21, %s7875_s9 }
 0xc26   :  { %p7335_p7 = pnand %p7333_p6, %p7330_p5 }
 0xc28   :  { %7338 = shalt.err (!%p7335_p7)
}
 0xc29   :  { %6862 = dma.vmem_to_hbm [thread:$0]  %s6860_s18, 512, %s7875_s9, [#allocation7]  }
 0xc2a   :  { %7351 = dma.done.wait [#allocation7], 512  }
 0xc2b   :  { %7352 = vsyncadd [#allocation7], 4294966784 }
 0xc2c   :  { %6866 = vsyncpa [#allocation6], 1 }
 0xc2d   :  { %6867 = vsyncpa [#allocation9], 1 }
 0xc2e   :  { %6868 = vsyncpa [#allocation12], 1 }
 0xc2f   :  { %6869 = vsyncpa [#allocation15], 1 }
 0xc30   :  { %6870 = vsyncpa [#allocation7], 1 }
 0xc31   :  { %6871 = vsyncmov [#allocation4] }
 0xc34   :  { %s6872_s25 = vpop.sfrf %6871 }
 0xc35   :  { %p6894_p8 = scmp.ne.s32.totalorder %s6872_s25, 0 }
 0xc37   :  { %6876 = shalt.err (%p6894_p8)  }
 0xc38   :  { %6878 = vsyncmov [#allocation4 + $0x1] }
 0xc3b   :  { %s6879_s26 = vpop.sfrf %6878 }
 0xc3c   :  { %p6895_p9 = scmp.ne.s32.totalorder %s6879_s26, 0 }
 0xc3e   :  { %6883 = shalt.err (%p6895_p9)  }

</bundles_post_ra>
